<compile_context>
chip_gen: v7x
topology: tpu7x:2x2x1
jax: 0.10.0
libtpu: 0.0.40
codegen_flags: <defaults>
</compile_context>

<pallas_src>
import functools

import jax
import jax.numpy as jnp
from jax import lax
from jax.experimental import pallas as pl
from jax.experimental.pallas import tpu as pltpu

CP = 128  # padded channel count == lane width


def resblock_kernel(xext_ref, w1_ref, b1_ref, w2_ref, ws_ref, bf_ref, mask_ref,
                    out_ref, acc_ref, h1e_ref, *, Wp, E):
    """Fused ResBlock for one batch element (flat-shift conv formulation).

    xext_ref : (1, Pext, CP) bf16  zero-padded, channel-padded, flattened input,
                                   zero-extended by E rows on both ends
    w1_ref   : (9, CP, CP)  bf16   conv1 taps (BN1 scale folded in)
    w2_ref   : (9, CP, CP)  bf16   conv2 taps (BN2 scale folded in)
    ws_ref   : (CP, CP)     bf16   1x1 shortcut conv (shortcut-BN scale folded in)
    b1_ref   : (1, CP)      f32    BN1 bias
    bf_ref   : (1, CP)      f32    BN2 bias + shortcut-BN bias (pre-summed)
    mask_ref : (P, 1)       f32    1.0 at interior flat positions, 0.0 at halo
    out_ref  : (1, P, CP)   f32    output in the padded-flat frame (halo rows/cols
                                   and padded channels discarded by the wrapper)
    acc_ref  : (P, CP)      f32    VMEM accumulator scratch (reused by both convs)
    h1e_ref  : (Pext, CP)   bf16   VMEM scratch for the padded intermediate
    """
    P = acc_ref.shape[0]
    Cp = acc_ref.shape[1]
    Pext = h1e_ref.shape[0]
    off0 = E - Wp - 1  # >= 0 by construction of E

    def conv3x3(load_slab, w_ref):
        # 9 taps == 9 contiguous slab slices, each one MXU matmul, f32 accumulate.
        for t in range(9):
            ky, kx = divmod(t, 3)
            off = off0 + ky * Wp + kx
            contrib = jnp.dot(load_slab(off), w_ref[t],
                              preferred_element_type=jnp.float32)
            if t == 0:
                acc_ref[...] = contrib
            else:
                acc_ref[...] += contrib

    # ---- conv1 (3x3, pad=1, stride=1), BN1 scale already folded; bias+ReLU+halo mask
    conv3x3(lambda off: xext_ref[0, off:off + P, :], w1_ref)
    h1 = jnp.maximum(acc_ref[...] + b1_ref[...], 0.0) * mask_ref[...]

    # stage padded intermediate (same flat frame) in VMEM for conv2; only the small
    # sublane-aligned extension regions are zeroed, not the whole buffer
    h1e_ref[0:E, :] = jnp.zeros((E, Cp), h1e_ref.dtype)
    h1e_ref[E:E + P, :] = h1.astype(h1e_ref.dtype)
    h1e_ref[E + P:Pext, :] = jnp.zeros((Pext - E - P, Cp), h1e_ref.dtype)

    # ---- conv2 (3x3), BN2 scale folded ----
    conv3x3(lambda off: h1e_ref[off:off + P, :], w2_ref)

    # ---- shortcut 1x1 conv (scale folded), accumulated into the same accumulator ----
    acc_ref[...] += jnp.dot(xext_ref[0, E:E + P, :], ws_ref[...],
                            preferred_element_type=jnp.float32)

    # ---- combined biases + residual ReLU ----
    out_ref[0] = jnp.maximum(acc_ref[...] + bf_ref[...], 0.0).astype(out_ref.dtype)


def _fold_bn(gamma, beta, mean, var, eps=1e-5):
    scale = gamma / jnp.sqrt(var + eps)
    bias = beta - mean * scale
    return scale, bias


@jax.jit
def resblock_pallas(x_nchw, params):
    """x_nchw: [N, Cin, H, W] float32 -> [N, Cout, H, W] float32 (eval-mode BN)."""
    N, Cin, H, W = x_nchw.shape
    Cout = params["w1"].shape[0]
    assert Cin <= CP and Cout <= CP
    Hp, Wp = H + 2, W + 2
    P = Hp * Wp
    E = ((Wp + 1 + 7) // 8) * 8          # sublane-aligned flat extension (>= Wp+1)
    Pext = P + 2 * E

    s1, b1 = _fold_bn(*params["bn1"])
    s2, b2 = _fold_bn(*params["bn2"])
    ss, bs = _fold_bn(*params["bns"])

    # ---- glue: NCHW -> padded, channel-padded, flattened, zero-extended bf16 slab ----
    x_nhwc = jnp.transpose(x_nchw, (0, 2, 3, 1))
    xp = jnp.pad(x_nhwc, ((0, 0), (1, 1), (1, 1), (0, CP - Cin)))
    xext = jnp.pad(xp.reshape(N, P, CP),
                   ((0, 0), (E, E), (0, 0))).astype(jnp.bfloat16)

    # ---- glue: OIHW weights -> per-tap (CP, CP) matrices, BN scale folded, bf16 ----
    def prep3x3(w_oihw, scale):
        w = jnp.transpose(w_oihw, (2, 3, 1, 0)) * scale[None, None, None, :]
        w = jnp.pad(w, ((0, 0), (0, 0),
                        (0, CP - w.shape[2]), (0, CP - w.shape[3])))
        return w.reshape(9, CP, CP).astype(jnp.bfloat16)

    w1p = prep3x3(params["w1"], s1)
    w2p = prep3x3(params["w2"], s2)
    wsp = jnp.pad(params["ws"][:, :, 0, 0].T * ss[None, :],
                  ((0, CP - Cin), (0, CP - Cout))).astype(jnp.bfloat16)

    b1p = jnp.pad(b1, (0, CP - Cout)).reshape(1, CP).astype(jnp.float32)
    bfp = jnp.pad(b2 + bs, (0, CP - Cout)).reshape(1, CP).astype(jnp.float32)

    # interior mask over the padded-flat frame
    flat = jnp.arange(P)
    row, col = flat // Wp, flat % Wp
    mask = (((row >= 1) & (row <= H) & (col >= 1) & (col <= W))
            .astype(jnp.float32).reshape(P, 1))

    kernel = functools.partial(resblock_kernel, Wp=Wp, E=E)

    out_flat = pl.pallas_call(
        kernel,
        out_shape=jax.ShapeDtypeStruct((N, P, CP), jnp.float32),
        grid=(N,),
        in_specs=[
            pl.BlockSpec((1, Pext, CP), lambda n: (n, 0, 0)),
            pl.BlockSpec((9, CP, CP), lambda n: (0, 0, 0)),
            pl.BlockSpec((1, CP), lambda n: (0, 0)),
            pl.BlockSpec((9, CP, CP), lambda n: (0, 0, 0)),
            pl.BlockSpec((CP, CP), lambda n: (0, 0)),
            pl.BlockSpec((1, CP), lambda n: (0, 0)),
            pl.BlockSpec((P, 1), lambda n: (0, 0)),
        ],
        out_specs=pl.BlockSpec((1, P, CP), lambda n: (n, 0, 0)),
        scratch_shapes=[pltpu.VMEM((P, CP), jnp.float32),
                        pltpu.VMEM((Pext, CP), jnp.bfloat16)],
        compiler_params=pltpu.CompilerParams(
            dimension_semantics=("parallel",)),
    )(xext, w1p, b1p, w2p, wsp, bfp, mask)

    # glue: drop halo rows/cols and padded channels, back to NCHW
    out = out_flat.reshape(N, Hp, Wp, CP)[:, 1:H + 1, 1:W + 1, :Cout]
    return jnp.transpose(out, (0, 3, 1, 2))


# ---------------- pure-JAX reference (NCHW, like PyTorch, f32) ----------------
def _bn_eval_nchw(x, gamma, beta, mean, var, eps=1e-5):
    s = gamma / jnp.sqrt(var + eps)
    b = beta - mean * s
    return x * s[None, :, None, None] + b[None, :, None, None]


def resblock_ref(x, p):
    dn = ("NCHW", "OIHW", "NCHW")
    y = lax.conv_general_dilated(x, p["w1"], (1, 1), ((1, 1), (1, 1)),
                                 dimension_numbers=dn)
    y = jnp.maximum(_bn_eval_nchw(y, *p["bn1"]), 0.0)
    y = lax.conv_general_dilated(y, p["w2"], (1, 1), ((1, 1), (1, 1)),
                                 dimension_numbers=dn)
    y = _bn_eval_nchw(y, *p["bn2"])
    sc = lax.conv_general_dilated(x, p["ws"], (1, 1), ((0, 0), (0, 0)),
                                  dimension_numbers=dn)
    sc = _bn_eval_nchw(sc, *p["bns"])
    return jnp.maximum(y + sc, 0.0)


def make_params(key, cin, cout):
    ks = jax.random.split(key, 10)
    p = {
        "w1": 0.1 * jax.random.normal(ks[0], (cout, cin, 3, 3), jnp.float32),
        "w2": 0.1 * jax.random.normal(ks[1], (cout, cout, 3, 3), jnp.float32),
        "ws": 0.1 * jax.random.normal(ks[2], (cout, cin, 1, 1), jnp.float32),
    }

    def bn_params(k):
        k1, k2, k3, k4 = jax.random.split(k, 4)
        gamma = 1.0 + 0.1 * jax.random.normal(k1, (cout,), jnp.float32)
        beta = 0.1 * jax.random.normal(k2, (cout,), jnp.float32)
        mean = 0.1 * jax.random.normal(k3, (cout,), jnp.float32)
        var = jax.random.uniform(k4, (cout,), jnp.float32, 0.5, 1.5)
        return (gamma, beta, mean, var)

    p["bn1"] = bn_params(ks[3])
    p["bn2"] = bn_params(ks[4])
    p["bns"] = bn_params(ks[5])
    return p


if __name__ == "__main__":
    N, Cin, Cout, H, W = 2, 4, 8, 16, 16
    key = jax.random.PRNGKey(0)
    kx, kp = jax.random.split(key)
    x = jax.random.normal(kx, (N, Cin, H, W), jnp.float32)
    params = make_params(kp, Cin, Cout)

    out = resblock_pallas(x, params)
    out = jax.block_until_ready(out)

    ref = jax.block_until_ready(resblock_ref(x, params))
    assert out.shape == (N, Cout, H, W)
    # bf16 MXU operands (f32 accumulation) -> loosened tolerance vs f32 reference
    assert jnp.allclose(out, ref, atol=5e-2, rtol=5e-2), (
        float(jnp.max(jnp.abs(out - ref))))

    print("KERNEL_OK")
</pallas_src>

<mosaic_0001>
module attributes {stable_mosaic.version = 11 : i64} {
  func.func @resblock_kernel(%arg0: i32, %arg1: memref<1x372x128xbf16, #tpu.memory_space<vmem>>, %arg2: memref<9x128x128xbf16, #tpu.memory_space<vmem>>, %arg3: memref<1x128xf32, #tpu.memory_space<vmem>>, %arg4: memref<9x128x128xbf16, #tpu.memory_space<vmem>>, %arg5: memref<128x128xbf16, #tpu.memory_space<vmem>>, %arg6: memref<1x128xf32, #tpu.memory_space<vmem>>, %arg7: memref<324x1xf32, #tpu.memory_space<vmem>>, %arg8: memref<1x324x128xf32, #tpu.memory_space<vmem>>, %arg9: memref<324x128xf32, #tpu.memory_space<vmem>>, %arg10: memref<372x128xbf16, #tpu.memory_space<vmem>>) attributes {dimension_semantics = [#tpu.dimension_semantics<parallel>], iteration_bounds = array<i64: 2>, scalar_prefetch = 0 : i64, scratch_operands = 2 : i64, tpu.core_type = #tpu.core_type<tc>, window_params = [{transform_indices = @transform_0, window_bounds = array<i64: 1, 372, 128>}, {pipeline_mode = #tpu.pipeline_mode<synchronous>, transform_indices = @transform_1, window_bounds = array<i64: 9, 128, 128>}, {pipeline_mode = #tpu.pipeline_mode<synchronous>, transform_indices = @transform_2, window_bounds = array<i64: 1, 128>}, {pipeline_mode = #tpu.pipeline_mode<synchronous>, transform_indices = @transform_3, window_bounds = array<i64: 9, 128, 128>}, {pipeline_mode = #tpu.pipeline_mode<synchronous>, transform_indices = @transform_4, window_bounds = array<i64: 128, 128>}, {pipeline_mode = #tpu.pipeline_mode<synchronous>, transform_indices = @transform_5, window_bounds = array<i64: 1, 128>}, {pipeline_mode = #tpu.pipeline_mode<synchronous>, transform_indices = @transform_6, window_bounds = array<i64: 324, 1>}, {transform_indices = @transform_7, window_bounds = array<i64: 1, 324, 128>}]} {
    %c0 = arith.constant 0 : index
    %c5 = arith.constant 5 : index
    %c0_0 = arith.constant 0 : index
    %0 = vector.load %arg1[%c0, %c5, %c0_0] : memref<1x372x128xbf16, #tpu.memory_space<vmem>>, vector<1x324x128xbf16>
    %1 = vector.shape_cast %0 : vector<1x324x128xbf16> to vector<324x128xbf16>
    %c0_1 = arith.constant 0 : index
    %c0_2 = arith.constant 0 : index
    %c0_3 = arith.constant 0 : index
    %2 = vector.load %arg2[%c0_1, %c0_2, %c0_3] : memref<9x128x128xbf16, #tpu.memory_space<vmem>>, vector<1x128x128xbf16>
    %3 = vector.shape_cast %2 : vector<1x128x128xbf16> to vector<128x128xbf16>
    %cst = arith.constant dense<0.000000e+00> : vector<324x128xf32>
    %4 = tpu.matmul %1, %3, %cst {dimension_numbers = #tpu.dot_dimension_numbers<[1], [0], [0], [1], [0, 0, 1, 1], [], []>} : vector<324x128xbf16>, vector<128x128xbf16>, vector<324x128xf32> -> vector<324x128xf32>
    %c0_4 = arith.constant 0 : index
    %c0_5 = arith.constant 0 : index
    %5 = vector.load %arg9[%c0_4, %c0_5] : memref<324x128xf32, #tpu.memory_space<vmem>>, vector<324x128xf32>
    tpu.vector_store %arg9[%c0_4, %c0_5], %4 {strides = array<i32>} : memref<324x128xf32, #tpu.memory_space<vmem>>, vector<324x128xf32>,
    %c0_6 = arith.constant 0 : index
    %c6 = arith.constant 6 : index
    %c0_7 = arith.constant 0 : index
    %6 = vector.load %arg1[%c0_6, %c6, %c0_7] : memref<1x372x128xbf16, #tpu.memory_space<vmem>>, vector<1x324x128xbf16>
    %7 = vector.shape_cast %6 : vector<1x324x128xbf16> to vector<324x128xbf16>
    %c1 = arith.constant 1 : index
    %c0_8 = arith.constant 0 : index
    %c0_9 = arith.constant 0 : index
    %8 = vector.load %arg2[%c1, %c0_8, %c0_9] : memref<9x128x128xbf16, #tpu.memory_space<vmem>>, vector<1x128x128xbf16>
    %9 = vector.shape_cast %8 : vector<1x128x128xbf16> to vector<128x128xbf16>
    %cst_10 = arith.constant dense<0.000000e+00> : vector<324x128xf32>
    %10 = tpu.matmul %7, %9, %cst_10 {dimension_numbers = #tpu.dot_dimension_numbers<[1], [0], [0], [1], [0, 0, 1, 1], [], []>} : vector<324x128xbf16>, vector<128x128xbf16>, vector<324x128xf32> -> vector<324x128xf32>
    %c0_11 = arith.constant 0 : index
    %c0_12 = arith.constant 0 : index
    %11 = vector.load %arg9[%c0_11, %c0_12] : memref<324x128xf32, #tpu.memory_space<vmem>>, vector<324x128xf32>
    %12 = arith.addf %11, %10 : vector<324x128xf32>
    %c0_13 = arith.constant 0 : index
    %c0_14 = arith.constant 0 : index
    %13 = vector.load %arg9[%c0_13, %c0_14] : memref<324x128xf32, #tpu.memory_space<vmem>>, vector<324x128xf32>
    tpu.vector_store %arg9[%c0_13, %c0_14], %12 {strides = array<i32>} : memref<324x128xf32, #tpu.memory_space<vmem>>, vector<324x128xf32>,
    %c0_15 = arith.constant 0 : index
    %c7 = arith.constant 7 : index
    %c0_16 = arith.constant 0 : index
    %14 = vector.load %arg1[%c0_15, %c7, %c0_16] : memref<1x372x128xbf16, #tpu.memory_space<vmem>>, vector<1x324x128xbf16>
    %15 = vector.shape_cast %14 : vector<1x324x128xbf16> to vector<324x128xbf16>
    %c2 = arith.constant 2 : index
    %c0_17 = arith.constant 0 : index
    %c0_18 = arith.constant 0 : index
    %16 = vector.load %arg2[%c2, %c0_17, %c0_18] : memref<9x128x128xbf16, #tpu.memory_space<vmem>>, vector<1x128x128xbf16>
    %17 = vector.shape_cast %16 : vector<1x128x128xbf16> to vector<128x128xbf16>
    %cst_19 = arith.constant dense<0.000000e+00> : vector<324x128xf32>
    %18 = tpu.matmul %15, %17, %cst_19 {dimension_numbers = #tpu.dot_dimension_numbers<[1], [0], [0], [1], [0, 0, 1, 1], [], []>} : vector<324x128xbf16>, vector<128x128xbf16>, vector<324x128xf32> -> vector<324x128xf32>
    %c0_20 = arith.constant 0 : index
    %c0_21 = arith.constant 0 : index
    %19 = vector.load %arg9[%c0_20, %c0_21] : memref<324x128xf32, #tpu.memory_space<vmem>>, vector<324x128xf32>
    %20 = arith.addf %19, %18 : vector<324x128xf32>
    %c0_22 = arith.constant 0 : index
    %c0_23 = arith.constant 0 : index
    %21 = vector.load %arg9[%c0_22, %c0_23] : memref<324x128xf32, #tpu.memory_space<vmem>>, vector<324x128xf32>
    tpu.vector_store %arg9[%c0_22, %c0_23], %20 {strides = array<i32>} : memref<324x128xf32, #tpu.memory_space<vmem>>, vector<324x128xf32>,
    %c0_24 = arith.constant 0 : index
    %c23 = arith.constant 23 : index
    %c0_25 = arith.constant 0 : index
    %22 = vector.load %arg1[%c0_24, %c23, %c0_25] : memref<1x372x128xbf16, #tpu.memory_space<vmem>>, vector<1x324x128xbf16>
    %23 = vector.shape_cast %22 : vector<1x324x128xbf16> to vector<324x128xbf16>
    %c3 = arith.constant 3 : index
    %c0_26 = arith.constant 0 : index
    %c0_27 = arith.constant 0 : index
    %24 = vector.load %arg2[%c3, %c0_26, %c0_27] : memref<9x128x128xbf16, #tpu.memory_space<vmem>>, vector<1x128x128xbf16>
    %25 = vector.shape_cast %24 : vector<1x128x128xbf16> to vector<128x128xbf16>
    %cst_28 = arith.constant dense<0.000000e+00> : vector<324x128xf32>
    %26 = tpu.matmul %23, %25, %cst_28 {dimension_numbers = #tpu.dot_dimension_numbers<[1], [0], [0], [1], [0, 0, 1, 1], [], []>} : vector<324x128xbf16>, vector<128x128xbf16>, vector<324x128xf32> -> vector<324x128xf32>
    %c0_29 = arith.constant 0 : index
    %c0_30 = arith.constant 0 : index
    %27 = vector.load %arg9[%c0_29, %c0_30] : memref<324x128xf32, #tpu.memory_space<vmem>>, vector<324x128xf32>
    %28 = arith.addf %27, %26 : vector<324x128xf32>
    %c0_31 = arith.constant 0 : index
    %c0_32 = arith.constant 0 : index
    %29 = vector.load %arg9[%c0_31, %c0_32] : memref<324x128xf32, #tpu.memory_space<vmem>>, vector<324x128xf32>
    tpu.vector_store %arg9[%c0_31, %c0_32], %28 {strides = array<i32>} : memref<324x128xf32, #tpu.memory_space<vmem>>, vector<324x128xf32>,
    %c0_33 = arith.constant 0 : index
    %c24 = arith.constant 24 : index
    %c0_34 = arith.constant 0 : index
    %30 = vector.load %arg1[%c0_33, %c24, %c0_34] : memref<1x372x128xbf16, #tpu.memory_space<vmem>>, vector<1x324x128xbf16>
    %31 = vector.shape_cast %30 : vector<1x324x128xbf16> to vector<324x128xbf16>
    %c4 = arith.constant 4 : index
    %c0_35 = arith.constant 0 : index
    %c0_36 = arith.constant 0 : index
    %32 = vector.load %arg2[%c4, %c0_35, %c0_36] : memref<9x128x128xbf16, #tpu.memory_space<vmem>>, vector<1x128x128xbf16>
    %33 = vector.shape_cast %32 : vector<1x128x128xbf16> to vector<128x128xbf16>
    %cst_37 = arith.constant dense<0.000000e+00> : vector<324x128xf32>
    %34 = tpu.matmul %31, %33, %cst_37 {dimension_numbers = #tpu.dot_dimension_numbers<[1], [0], [0], [1], [0, 0, 1, 1], [], []>} : vector<324x128xbf16>, vector<128x128xbf16>, vector<324x128xf32> -> vector<324x128xf32>
    %c0_38 = arith.constant 0 : index
    %c0_39 = arith.constant 0 : index
    %35 = vector.load %arg9[%c0_38, %c0_39] : memref<324x128xf32, #tpu.memory_space<vmem>>, vector<324x128xf32>
    %36 = arith.addf %35, %34 : vector<324x128xf32>
    %c0_40 = arith.constant 0 : index
    %c0_41 = arith.constant 0 : index
    %37 = vector.load %arg9[%c0_40, %c0_41] : memref<324x128xf32, #tpu.memory_space<vmem>>, vector<324x128xf32>
    tpu.vector_store %arg9[%c0_40, %c0_41], %36 {strides = array<i32>} : memref<324x128xf32, #tpu.memory_space<vmem>>, vector<324x128xf32>,
    %c0_42 = arith.constant 0 : index
    %c25 = arith.constant 25 : index
    %c0_43 = arith.constant 0 : index
    %38 = vector.load %arg1[%c0_42, %c25, %c0_43] : memref<1x372x128xbf16, #tpu.memory_space<vmem>>, vector<1x324x128xbf16>
    %39 = vector.shape_cast %38 : vector<1x324x128xbf16> to vector<324x128xbf16>
    %c5_44 = arith.constant 5 : index
    %c0_45 = arith.constant 0 : index
    %c0_46 = arith.constant 0 : index
    %40 = vector.load %arg2[%c5_44, %c0_45, %c0_46] : memref<9x128x128xbf16, #tpu.memory_space<vmem>>, vector<1x128x128xbf16>
    %41 = vector.shape_cast %40 : vector<1x128x128xbf16> to vector<128x128xbf16>
    %cst_47 = arith.constant dense<0.000000e+00> : vector<324x128xf32>
    %42 = tpu.matmul %39, %41, %cst_47 {dimension_numbers = #tpu.dot_dimension_numbers<[1], [0], [0], [1], [0, 0, 1, 1], [], []>} : vector<324x128xbf16>, vector<128x128xbf16>, vector<324x128xf32> -> vector<324x128xf32>
    %c0_48 = arith.constant 0 : index
    %c0_49 = arith.constant 0 : index
    %43 = vector.load %arg9[%c0_48, %c0_49] : memref<324x128xf32, #tpu.memory_space<vmem>>, vector<324x128xf32>
    %44 = arith.addf %43, %42 : vector<324x128xf32>
    %c0_50 = arith.constant 0 : index
    %c0_51 = arith.constant 0 : index
    %45 = vector.load %arg9[%c0_50, %c0_51] : memref<324x128xf32, #tpu.memory_space<vmem>>, vector<324x128xf32>
    tpu.vector_store %arg9[%c0_50, %c0_51], %44 {strides = array<i32>} : memref<324x128xf32, #tpu.memory_space<vmem>>, vector<324x128xf32>,
    %c0_52 = arith.constant 0 : index
    %c41 = arith.constant 41 : index
    %c0_53 = arith.constant 0 : index
    %46 = vector.load %arg1[%c0_52, %c41, %c0_53] : memref<1x372x128xbf16, #tpu.memory_space<vmem>>, vector<1x324x128xbf16>
    %47 = vector.shape_cast %46 : vector<1x324x128xbf16> to vector<324x128xbf16>
    %c6_54 = arith.constant 6 : index
    %c0_55 = arith.constant 0 : index
    %c0_56 = arith.constant 0 : index
    %48 = vector.load %arg2[%c6_54, %c0_55, %c0_56] : memref<9x128x128xbf16, #tpu.memory_space<vmem>>, vector<1x128x128xbf16>
    %49 = vector.shape_cast %48 : vector<1x128x128xbf16> to vector<128x128xbf16>
    %cst_57 = arith.constant dense<0.000000e+00> : vector<324x128xf32>
    %50 = tpu.matmul %47, %49, %cst_57 {dimension_numbers = #tpu.dot_dimension_numbers<[1], [0], [0], [1], [0, 0, 1, 1], [], []>} : vector<324x128xbf16>, vector<128x128xbf16>, vector<324x128xf32> -> vector<324x128xf32>
    %c0_58 = arith.constant 0 : index
    %c0_59 = arith.constant 0 : index
    %51 = vector.load %arg9[%c0_58, %c0_59] : memref<324x128xf32, #tpu.memory_space<vmem>>, vector<324x128xf32>
    %52 = arith.addf %51, %50 : vector<324x128xf32>
    %c0_60 = arith.constant 0 : index
    %c0_61 = arith.constant 0 : index
    %53 = vector.load %arg9[%c0_60, %c0_61] : memref<324x128xf32, #tpu.memory_space<vmem>>, vector<324x128xf32>
    tpu.vector_store %arg9[%c0_60, %c0_61], %52 {strides = array<i32>} : memref<324x128xf32, #tpu.memory_space<vmem>>, vector<324x128xf32>,
    %c0_62 = arith.constant 0 : index
    %c42 = arith.constant 42 : index
    %c0_63 = arith.constant 0 : index
    %54 = vector.load %arg1[%c0_62, %c42, %c0_63] : memref<1x372x128xbf16, #tpu.memory_space<vmem>>, vector<1x324x128xbf16>
    %55 = vector.shape_cast %54 : vector<1x324x128xbf16> to vector<324x128xbf16>
    %c7_64 = arith.constant 7 : index
    %c0_65 = arith.constant 0 : index
    %c0_66 = arith.constant 0 : index
    %56 = vector.load %arg2[%c7_64, %c0_65, %c0_66] : memref<9x128x128xbf16, #tpu.memory_space<vmem>>, vector<1x128x128xbf16>
    %57 = vector.shape_cast %56 : vector<1x128x128xbf16> to vector<128x128xbf16>
    %cst_67 = arith.constant dense<0.000000e+00> : vector<324x128xf32>
    %58 = tpu.matmul %55, %57, %cst_67 {dimension_numbers = #tpu.dot_dimension_numbers<[1], [0], [0], [1], [0, 0, 1, 1], [], []>} : vector<324x128xbf16>, vector<128x128xbf16>, vector<324x128xf32> -> vector<324x128xf32>
    %c0_68 = arith.constant 0 : index
    %c0_69 = arith.constant 0 : index
    %59 = vector.load %arg9[%c0_68, %c0_69] : memref<324x128xf32, #tpu.memory_space<vmem>>, vector<324x128xf32>
    %60 = arith.addf %59, %58 : vector<324x128xf32>
    %c0_70 = arith.constant 0 : index
    %c0_71 = arith.constant 0 : index
    %61 = vector.load %arg9[%c0_70, %c0_71] : memref<324x128xf32, #tpu.memory_space<vmem>>, vector<324x128xf32>
    tpu.vector_store %arg9[%c0_70, %c0_71], %60 {strides = array<i32>} : memref<324x128xf32, #tpu.memory_space<vmem>>, vector<324x128xf32>,
    %c0_72 = arith.constant 0 : index
    %c43 = arith.constant 43 : index
    %c0_73 = arith.constant 0 : index
    %62 = vector.load %arg1[%c0_72, %c43, %c0_73] : memref<1x372x128xbf16, #tpu.memory_space<vmem>>, vector<1x324x128xbf16>
    %63 = vector.shape_cast %62 : vector<1x324x128xbf16> to vector<324x128xbf16>
    %c8 = arith.constant 8 : index
    %c0_74 = arith.constant 0 : index
    %c0_75 = arith.constant 0 : index
    %64 = vector.load %arg2[%c8, %c0_74, %c0_75] : memref<9x128x128xbf16, #tpu.memory_space<vmem>>, vector<1x128x128xbf16>
    %65 = vector.shape_cast %64 : vector<1x128x128xbf16> to vector<128x128xbf16>
    %cst_76 = arith.constant dense<0.000000e+00> : vector<324x128xf32>
    %66 = tpu.matmul %63, %65, %cst_76 {dimension_numbers = #tpu.dot_dimension_numbers<[1], [0], [0], [1], [0, 0, 1, 1], [], []>} : vector<324x128xbf16>, vector<128x128xbf16>, vector<324x128xf32> -> vector<324x128xf32>
    %c0_77 = arith.constant 0 : index
    %c0_78 = arith.constant 0 : index
    %67 = vector.load %arg9[%c0_77, %c0_78] : memref<324x128xf32, #tpu.memory_space<vmem>>, vector<324x128xf32>
    %68 = arith.addf %67, %66 : vector<324x128xf32>
    %c0_79 = arith.constant 0 : index
    %c0_80 = arith.constant 0 : index
    %69 = vector.load %arg9[%c0_79, %c0_80] : memref<324x128xf32, #tpu.memory_space<vmem>>, vector<324x128xf32>
    tpu.vector_store %arg9[%c0_79, %c0_80], %68 {strides = array<i32>} : memref<324x128xf32, #tpu.memory_space<vmem>>, vector<324x128xf32>,
    %c0_81 = arith.constant 0 : index
    %c0_82 = arith.constant 0 : index
    %70 = vector.load %arg9[%c0_81, %c0_82] : memref<324x128xf32, #tpu.memory_space<vmem>>, vector<324x128xf32>
    %c0_83 = arith.constant 0 : index
    %c0_84 = arith.constant 0 : index
    %71 = vector.load %arg3[%c0_83, %c0_84] : memref<1x128xf32, #tpu.memory_space<vmem>>, vector<1x128xf32>
    %72 = vector.broadcast %71 : vector<1x128xf32> to vector<324x128xf32>
    %73 = arith.addf %70, %72 : vector<324x128xf32>
    %cst_85 = arith.constant 0.000000e+00 : f32
    %74 = vector.broadcast %cst_85 : f32 to vector<324x128xf32>
    %75 = arith.maximumf %73, %74 : vector<324x128xf32>
    %c0_86 = arith.constant 0 : index
    %c0_87 = arith.constant 0 : index
    %76 = vector.load %arg7[%c0_86, %c0_87] : memref<324x1xf32, #tpu.memory_space<vmem>>, vector<324x1xf32>
    %77 = vector.broadcast %76 : vector<324x1xf32> to vector<324x128xf32>
    %78 = arith.mulf %75, %77 : vector<324x128xf32>
    %cst_88 = arith.constant 0.000000e+00 : bf16
    %79 = vector.broadcast %cst_88 : bf16 to vector<24x128xbf16>
    %c0_89 = arith.constant 0 : index
    %c0_90 = arith.constant 0 : index
    %80 = vector.load %arg10[%c0_89, %c0_90] : memref<372x128xbf16, #tpu.memory_space<vmem>>, vector<24x128xbf16>
    tpu.vector_store %arg10[%c0_89, %c0_90], %79 {strides = array<i32>} : memref<372x128xbf16, #tpu.memory_space<vmem>>, vector<24x128xbf16>,
    %81 = arith.truncf %78 : vector<324x128xf32> to vector<324x128xbf16>
    %c24_91 = arith.constant 24 : index
    %c0_92 = arith.constant 0 : index
    %82 = vector.load %arg10[%c24_91, %c0_92] : memref<372x128xbf16, #tpu.memory_space<vmem>>, vector<324x128xbf16>
    tpu.vector_store %arg10[%c24_91, %c0_92], %81 {strides = array<i32>} : memref<372x128xbf16, #tpu.memory_space<vmem>>, vector<324x128xbf16>,
    %cst_93 = arith.constant 0.000000e+00 : bf16
    %83 = vector.broadcast %cst_93 : bf16 to vector<24x128xbf16>
    %c348 = arith.constant 348 : index
    %c0_94 = arith.constant 0 : index
    %84 = vector.load %arg10[%c348, %c0_94] : memref<372x128xbf16, #tpu.memory_space<vmem>>, vector<24x128xbf16>
    tpu.vector_store %arg10[%c348, %c0_94], %83 {strides = array<i32>} : memref<372x128xbf16, #tpu.memory_space<vmem>>, vector<24x128xbf16>,
    %c5_95 = arith.constant 5 : index
    %c0_96 = arith.constant 0 : index
    %85 = vector.load %arg10[%c5_95, %c0_96] : memref<372x128xbf16, #tpu.memory_space<vmem>>, vector<324x128xbf16>
    %c0_97 = arith.constant 0 : index
    %c0_98 = arith.constant 0 : index
    %c0_99 = arith.constant 0 : index
    %86 = vector.load %arg4[%c0_97, %c0_98, %c0_99] : memref<9x128x128xbf16, #tpu.memory_space<vmem>>, vector<1x128x128xbf16>
    %87 = vector.shape_cast %86 : vector<1x128x128xbf16> to vector<128x128xbf16>
    %cst_100 = arith.constant dense<0.000000e+00> : vector<324x128xf32>
    %88 = tpu.matmul %85, %87, %cst_100 {dimension_numbers = #tpu.dot_dimension_numbers<[1], [0], [0], [1], [0, 0, 1, 1], [], []>} : vector<324x128xbf16>, vector<128x128xbf16>, vector<324x128xf32> -> vector<324x128xf32>
    %c0_101 = arith.constant 0 : index
    %c0_102 = arith.constant 0 : index
    %89 = vector.load %arg9[%c0_101, %c0_102] : memref<324x128xf32, #tpu.memory_space<vmem>>, vector<324x128xf32>
    tpu.vector_store %arg9[%c0_101, %c0_102], %88 {strides = array<i32>} : memref<324x128xf32, #tpu.memory_space<vmem>>, vector<324x128xf32>,
    %c6_103 = arith.constant 6 : index
    %c0_104 = arith.constant 0 : index
    %90 = vector.load %arg10[%c6_103, %c0_104] : memref<372x128xbf16, #tpu.memory_space<vmem>>, vector<324x128xbf16>
    %c1_105 = arith.constant 1 : index
    %c0_106 = arith.constant 0 : index
    %c0_107 = arith.constant 0 : index
    %91 = vector.load %arg4[%c1_105, %c0_106, %c0_107] : memref<9x128x128xbf16, #tpu.memory_space<vmem>>, vector<1x128x128xbf16>
    %92 = vector.shape_cast %91 : vector<1x128x128xbf16> to vector<128x128xbf16>
    %cst_108 = arith.constant dense<0.000000e+00> : vector<324x128xf32>
    %93 = tpu.matmul %90, %92, %cst_108 {dimension_numbers = #tpu.dot_dimension_numbers<[1], [0], [0], [1], [0, 0, 1, 1], [], []>} : vector<324x128xbf16>, vector<128x128xbf16>, vector<324x128xf32> -> vector<324x128xf32>
    %c0_109 = arith.constant 0 : index
    %c0_110 = arith.constant 0 : index
    %94 = vector.load %arg9[%c0_109, %c0_110] : memref<324x128xf32, #tpu.memory_space<vmem>>, vector<324x128xf32>
    %95 = arith.addf %94, %93 : vector<324x128xf32>
    %c0_111 = arith.constant 0 : index
    %c0_112 = arith.constant 0 : index
    %96 = vector.load %arg9[%c0_111, %c0_112] : memref<324x128xf32, #tpu.memory_space<vmem>>, vector<324x128xf32>
    tpu.vector_store %arg9[%c0_111, %c0_112], %95 {strides = array<i32>} : memref<324x128xf32, #tpu.memory_space<vmem>>, vector<324x128xf32>,
    %c7_113 = arith.constant 7 : index
    %c0_114 = arith.constant 0 : index
    %97 = vector.load %arg10[%c7_113, %c0_114] : memref<372x128xbf16, #tpu.memory_space<vmem>>, vector<324x128xbf16>
    %c2_115 = arith.constant 2 : index
    %c0_116 = arith.constant 0 : index
    %c0_117 = arith.constant 0 : index
    %98 = vector.load %arg4[%c2_115, %c0_116, %c0_117] : memref<9x128x128xbf16, #tpu.memory_space<vmem>>, vector<1x128x128xbf16>
    %99 = vector.shape_cast %98 : vector<1x128x128xbf16> to vector<128x128xbf16>
    %cst_118 = arith.constant dense<0.000000e+00> : vector<324x128xf32>
    %100 = tpu.matmul %97, %99, %cst_118 {dimension_numbers = #tpu.dot_dimension_numbers<[1], [0], [0], [1], [0, 0, 1, 1], [], []>} : vector<324x128xbf16>, vector<128x128xbf16>, vector<324x128xf32> -> vector<324x128xf32>
    %c0_119 = arith.constant 0 : index
    %c0_120 = arith.constant 0 : index
    %101 = vector.load %arg9[%c0_119, %c0_120] : memref<324x128xf32, #tpu.memory_space<vmem>>, vector<324x128xf32>
    %102 = arith.addf %101, %100 : vector<324x128xf32>
    %c0_121 = arith.constant 0 : index
    %c0_122 = arith.constant 0 : index
    %103 = vector.load %arg9[%c0_121, %c0_122] : memref<324x128xf32, #tpu.memory_space<vmem>>, vector<324x128xf32>
    tpu.vector_store %arg9[%c0_121, %c0_122], %102 {strides = array<i32>} : memref<324x128xf32, #tpu.memory_space<vmem>>, vector<324x128xf32>,
    %c23_123 = arith.constant 23 : index
    %c0_124 = arith.constant 0 : index
    %104 = vector.load %arg10[%c23_123, %c0_124] : memref<372x128xbf16, #tpu.memory_space<vmem>>, vector<324x128xbf16>
    %c3_125 = arith.constant 3 : index
    %c0_126 = arith.constant 0 : index
    %c0_127 = arith.constant 0 : index
    %105 = vector.load %arg4[%c3_125, %c0_126, %c0_127] : memref<9x128x128xbf16, #tpu.memory_space<vmem>>, vector<1x128x128xbf16>
    %106 = vector.shape_cast %105 : vector<1x128x128xbf16> to vector<128x128xbf16>
    %cst_128 = arith.constant dense<0.000000e+00> : vector<324x128xf32>
    %107 = tpu.matmul %104, %106, %cst_128 {dimension_numbers = #tpu.dot_dimension_numbers<[1], [0], [0], [1], [0, 0, 1, 1], [], []>} : vector<324x128xbf16>, vector<128x128xbf16>, vector<324x128xf32> -> vector<324x128xf32>
    %c0_129 = arith.constant 0 : index
    %c0_130 = arith.constant 0 : index
    %108 = vector.load %arg9[%c0_129, %c0_130] : memref<324x128xf32, #tpu.memory_space<vmem>>, vector<324x128xf32>
    %109 = arith.addf %108, %107 : vector<324x128xf32>
    %c0_131 = arith.constant 0 : index
    %c0_132 = arith.constant 0 : index
    %110 = vector.load %arg9[%c0_131, %c0_132] : memref<324x128xf32, #tpu.memory_space<vmem>>, vector<324x128xf32>
    tpu.vector_store %arg9[%c0_131, %c0_132], %109 {strides = array<i32>} : memref<324x128xf32, #tpu.memory_space<vmem>>, vector<324x128xf32>,
    %c24_133 = arith.constant 24 : index
    %c0_134 = arith.constant 0 : index
    %111 = vector.load %arg10[%c24_133, %c0_134] : memref<372x128xbf16, #tpu.memory_space<vmem>>, vector<324x128xbf16>
    %c4_135 = arith.constant 4 : index
    %c0_136 = arith.constant 0 : index
    %c0_137 = arith.constant 0 : index
    %112 = vector.load %arg4[%c4_135, %c0_136, %c0_137] : memref<9x128x128xbf16, #tpu.memory_space<vmem>>, vector<1x128x128xbf16>
    %113 = vector.shape_cast %112 : vector<1x128x128xbf16> to vector<128x128xbf16>
    %cst_138 = arith.constant dense<0.000000e+00> : vector<324x128xf32>
    %114 = tpu.matmul %111, %113, %cst_138 {dimension_numbers = #tpu.dot_dimension_numbers<[1], [0], [0], [1], [0, 0, 1, 1], [], []>} : vector<324x128xbf16>, vector<128x128xbf16>, vector<324x128xf32> -> vector<324x128xf32>
    %c0_139 = arith.constant 0 : index
    %c0_140 = arith.constant 0 : index
    %115 = vector.load %arg9[%c0_139, %c0_140] : memref<324x128xf32, #tpu.memory_space<vmem>>, vector<324x128xf32>
    %116 = arith.addf %115, %114 : vector<324x128xf32>
    %c0_141 = arith.constant 0 : index
    %c0_142 = arith.constant 0 : index
    %117 = vector.load %arg9[%c0_141, %c0_142] : memref<324x128xf32, #tpu.memory_space<vmem>>, vector<324x128xf32>
    tpu.vector_store %arg9[%c0_141, %c0_142], %116 {strides = array<i32>} : memref<324x128xf32, #tpu.memory_space<vmem>>, vector<324x128xf32>,
    %c25_143 = arith.constant 25 : index
    %c0_144 = arith.constant 0 : index
    %118 = vector.load %arg10[%c25_143, %c0_144] : memref<372x128xbf16, #tpu.memory_space<vmem>>, vector<324x128xbf16>
    %c5_145 = arith.constant 5 : index
    %c0_146 = arith.constant 0 : index
    %c0_147 = arith.constant 0 : index
    %119 = vector.load %arg4[%c5_145, %c0_146, %c0_147] : memref<9x128x128xbf16, #tpu.memory_space<vmem>>, vector<1x128x128xbf16>
    %120 = vector.shape_cast %119 : vector<1x128x128xbf16> to vector<128x128xbf16>
    %cst_148 = arith.constant dense<0.000000e+00> : vector<324x128xf32>
    %121 = tpu.matmul %118, %120, %cst_148 {dimension_numbers = #tpu.dot_dimension_numbers<[1], [0], [0], [1], [0, 0, 1, 1], [], []>} : vector<324x128xbf16>, vector<128x128xbf16>, vector<324x128xf32> -> vector<324x128xf32>
    %c0_149 = arith.constant 0 : index
    %c0_150 = arith.constant 0 : index
    %122 = vector.load %arg9[%c0_149, %c0_150] : memref<324x128xf32, #tpu.memory_space<vmem>>, vector<324x128xf32>
    %123 = arith.addf %122, %121 : vector<324x128xf32>
    %c0_151 = arith.constant 0 : index
    %c0_152 = arith.constant 0 : index
    %124 = vector.load %arg9[%c0_151, %c0_152] : memref<324x128xf32, #tpu.memory_space<vmem>>, vector<324x128xf32>
    tpu.vector_store %arg9[%c0_151, %c0_152], %123 {strides = array<i32>} : memref<324x128xf32, #tpu.memory_space<vmem>>, vector<324x128xf32>,
    %c41_153 = arith.constant 41 : index
    %c0_154 = arith.constant 0 : index
    %125 = vector.load %arg10[%c41_153, %c0_154] : memref<372x128xbf16, #tpu.memory_space<vmem>>, vector<324x128xbf16>
    %c6_155 = arith.constant 6 : index
    %c0_156 = arith.constant 0 : index
    %c0_157 = arith.constant 0 : index
    %126 = vector.load %arg4[%c6_155, %c0_156, %c0_157] : memref<9x128x128xbf16, #tpu.memory_space<vmem>>, vector<1x128x128xbf16>
    %127 = vector.shape_cast %126 : vector<1x128x128xbf16> to vector<128x128xbf16>
    %cst_158 = arith.constant dense<0.000000e+00> : vector<324x128xf32>
    %128 = tpu.matmul %125, %127, %cst_158 {dimension_numbers = #tpu.dot_dimension_numbers<[1], [0], [0], [1], [0, 0, 1, 1], [], []>} : vector<324x128xbf16>, vector<128x128xbf16>, vector<324x128xf32> -> vector<324x128xf32>
    %c0_159 = arith.constant 0 : index
    %c0_160 = arith.constant 0 : index
    %129 = vector.load %arg9[%c0_159, %c0_160] : memref<324x128xf32, #tpu.memory_space<vmem>>, vector<324x128xf32>
    %130 = arith.addf %129, %128 : vector<324x128xf32>
    %c0_161 = arith.constant 0 : index
    %c0_162 = arith.constant 0 : index
    %131 = vector.load %arg9[%c0_161, %c0_162] : memref<324x128xf32, #tpu.memory_space<vmem>>, vector<324x128xf32>
    tpu.vector_store %arg9[%c0_161, %c0_162], %130 {strides = array<i32>} : memref<324x128xf32, #tpu.memory_space<vmem>>, vector<324x128xf32>,
    %c42_163 = arith.constant 42 : index
    %c0_164 = arith.constant 0 : index
    %132 = vector.load %arg10[%c42_163, %c0_164] : memref<372x128xbf16, #tpu.memory_space<vmem>>, vector<324x128xbf16>
    %c7_165 = arith.constant 7 : index
    %c0_166 = arith.constant 0 : index
    %c0_167 = arith.constant 0 : index
    %133 = vector.load %arg4[%c7_165, %c0_166, %c0_167] : memref<9x128x128xbf16, #tpu.memory_space<vmem>>, vector<1x128x128xbf16>
    %134 = vector.shape_cast %133 : vector<1x128x128xbf16> to vector<128x128xbf16>
    %cst_168 = arith.constant dense<0.000000e+00> : vector<324x128xf32>
    %135 = tpu.matmul %132, %134, %cst_168 {dimension_numbers = #tpu.dot_dimension_numbers<[1], [0], [0], [1], [0, 0, 1, 1], [], []>} : vector<324x128xbf16>, vector<128x128xbf16>, vector<324x128xf32> -> vector<324x128xf32>
    %c0_169 = arith.constant 0 : index
    %c0_170 = arith.constant 0 : index
    %136 = vector.load %arg9[%c0_169, %c0_170] : memref<324x128xf32, #tpu.memory_space<vmem>>, vector<324x128xf32>
    %137 = arith.addf %136, %135 : vector<324x128xf32>
    %c0_171 = arith.constant 0 : index
    %c0_172 = arith.constant 0 : index
    %138 = vector.load %arg9[%c0_171, %c0_172] : memref<324x128xf32, #tpu.memory_space<vmem>>, vector<324x128xf32>
    tpu.vector_store %arg9[%c0_171, %c0_172], %137 {strides = array<i32>} : memref<324x128xf32, #tpu.memory_space<vmem>>, vector<324x128xf32>,
    %c43_173 = arith.constant 43 : index
    %c0_174 = arith.constant 0 : index
    %139 = vector.load %arg10[%c43_173, %c0_174] : memref<372x128xbf16, #tpu.memory_space<vmem>>, vector<324x128xbf16>
    %c8_175 = arith.constant 8 : index
    %c0_176 = arith.constant 0 : index
    %c0_177 = arith.constant 0 : index
    %140 = vector.load %arg4[%c8_175, %c0_176, %c0_177] : memref<9x128x128xbf16, #tpu.memory_space<vmem>>, vector<1x128x128xbf16>
    %141 = vector.shape_cast %140 : vector<1x128x128xbf16> to vector<128x128xbf16>
    %cst_178 = arith.constant dense<0.000000e+00> : vector<324x128xf32>
    %142 = tpu.matmul %139, %141, %cst_178 {dimension_numbers = #tpu.dot_dimension_numbers<[1], [0], [0], [1], [0, 0, 1, 1], [], []>} : vector<324x128xbf16>, vector<128x128xbf16>, vector<324x128xf32> -> vector<324x128xf32>
    %c0_179 = arith.constant 0 : index
    %c0_180 = arith.constant 0 : index
    %143 = vector.load %arg9[%c0_179, %c0_180] : memref<324x128xf32, #tpu.memory_space<vmem>>, vector<324x128xf32>
    %144 = arith.addf %143, %142 : vector<324x128xf32>
    %c0_181 = arith.constant 0 : index
    %c0_182 = arith.constant 0 : index
    %145 = vector.load %arg9[%c0_181, %c0_182] : memref<324x128xf32, #tpu.memory_space<vmem>>, vector<324x128xf32>
    tpu.vector_store %arg9[%c0_181, %c0_182], %144 {strides = array<i32>} : memref<324x128xf32, #tpu.memory_space<vmem>>, vector<324x128xf32>,
    %c0_183 = arith.constant 0 : index
    %c0_184 = arith.constant 0 : index
    %146 = vector.load %arg9[%c0_183, %c0_184] : memref<324x128xf32, #tpu.memory_space<vmem>>, vector<324x128xf32>
    %c0_185 = arith.constant 0 : index
    %c24_186 = arith.constant 24 : index
    %c0_187 = arith.constant 0 : index
    %147 = vector.load %arg1[%c0_185, %c24_186, %c0_187] : memref<1x372x128xbf16, #tpu.memory_space<vmem>>, vector<1x324x128xbf16>
    %148 = vector.shape_cast %147 : vector<1x324x128xbf16> to vector<324x128xbf16>
    %c0_188 = arith.constant 0 : index
    %c0_189 = arith.constant 0 : index
    %149 = vector.load %arg5[%c0_188, %c0_189] : memref<128x128xbf16, #tpu.memory_space<vmem>>, vector<128x128xbf16>
    %cst_190 = arith.constant dense<0.000000e+00> : vector<324x128xf32>
    %150 = tpu.matmul %148, %149, %cst_190 {dimension_numbers = #tpu.dot_dimension_numbers<[1], [0], [0], [1], [0, 0, 1, 1], [], []>} : vector<324x128xbf16>, vector<128x128xbf16>, vector<324x128xf32> -> vector<324x128xf32>
    %151 = arith.addf %146, %150 : vector<324x128xf32>
    %c0_191 = arith.constant 0 : index
    %c0_192 = arith.constant 0 : index
    %152 = vector.load %arg9[%c0_191, %c0_192] : memref<324x128xf32, #tpu.memory_space<vmem>>, vector<324x128xf32>
    tpu.vector_store %arg9[%c0_191, %c0_192], %151 {strides = array<i32>} : memref<324x128xf32, #tpu.memory_space<vmem>>, vector<324x128xf32>,
    %c0_193 = arith.constant 0 : index
    %c0_194 = arith.constant 0 : index
    %153 = vector.load %arg9[%c0_193, %c0_194] : memref<324x128xf32, #tpu.memory_space<vmem>>, vector<324x128xf32>
    %c0_195 = arith.constant 0 : index
    %c0_196 = arith.constant 0 : index
    %154 = vector.load %arg6[%c0_195, %c0_196] : memref<1x128xf32, #tpu.memory_space<vmem>>, vector<1x128xf32>
    %155 = vector.broadcast %154 : vector<1x128xf32> to vector<324x128xf32>
    %156 = arith.addf %153, %155 : vector<324x128xf32>
    %cst_197 = arith.constant 0.000000e+00 : f32
    %157 = vector.broadcast %cst_197 : f32 to vector<324x128xf32>
    %158 = arith.maximumf %156, %157 : vector<324x128xf32>
    %c0_198 = arith.constant 0 : index
    %c0_199 = arith.constant 0 : index
    %c0_200 = arith.constant 0 : index
    %159 = vector.load %arg8[%c0_198, %c0_199, %c0_200] : memref<1x324x128xf32, #tpu.memory_space<vmem>>, vector<1x324x128xf32>
    %160 = vector.shape_cast %159 : vector<1x324x128xf32> to vector<324x128xf32>
    %161 = vector.shape_cast %158 : vector<324x128xf32> to vector<1x324x128xf32>
    tpu.vector_store %arg8[%c0_198, %c0_199, %c0_200], %161 {strides = array<i32>} : memref<1x324x128xf32, #tpu.memory_space<vmem>>, vector<1x324x128xf32>,
    return
  }
  func.func @transform_0(%arg0: i32) -> (i32, i32, i32) {
    %c0_i32 = arith.constant 0 : i32
    %c0_i32_0 = arith.constant 0 : i32
    %c0_i32_1 = arith.constant 0 : i32
    return %arg0, %c0_i32, %c0_i32_0 : i32, i32, i32
  }
  func.func @transform_1(%arg0: i32) -> (i32, i32, i32) {
    %c0_i32 = arith.constant 0 : i32
    %c0_i32_0 = arith.constant 0 : i32
    %c0_i32_1 = arith.constant 0 : i32
    %c0_i32_2 = arith.constant 0 : i32
    return %c0_i32, %c0_i32_0, %c0_i32_1 : i32, i32, i32
  }
  func.func @transform_2(%arg0: i32) -> (i32, i32) {
    %c0_i32 = arith.constant 0 : i32
    %c0_i32_0 = arith.constant 0 : i32
    %c0_i32_1 = arith.constant 0 : i32
    return %c0_i32, %c0_i32_0 : i32, i32
  }
  func.func @transform_3(%arg0: i32) -> (i32, i32, i32) {
    %c0_i32 = arith.constant 0 : i32
    %c0_i32_0 = arith.constant 0 : i32
    %c0_i32_1 = arith.constant 0 : i32
    %c0_i32_2 = arith.constant 0 : i32
    return %c0_i32, %c0_i32_0, %c0_i32_1 : i32, i32, i32
  }
  func.func @transform_4(%arg0: i32) -> (i32, i32) {
    %c0_i32 = arith.constant 0 : i32
    %c0_i32_0 = arith.constant 0 : i32
    %c0_i32_1 = arith.constant 0 : i32
    return %c0_i32, %c0_i32_0 : i32, i32
  }
  func.func @transform_5(%arg0: i32) -> (i32, i32) {
    %c0_i32 = arith.constant 0 : i32
    %c0_i32_0 = arith.constant 0 : i32
    %c0_i32_1 = arith.constant 0 : i32
    return %c0_i32, %c0_i32_0 : i32, i32
  }
  func.func @transform_6(%arg0: i32) -> (i32, i32) {
    %c0_i32 = arith.constant 0 : i32
    %c0_i32_0 = arith.constant 0 : i32
    %c0_i32_1 = arith.constant 0 : i32
    return %c0_i32, %c0_i32_0 : i32, i32
  }
  func.func @transform_7(%arg0: i32) -> (i32, i32, i32) {
    %c0_i32 = arith.constant 0 : i32
    %c0_i32_0 = arith.constant 0 : i32
    %c0_i32_1 = arith.constant 0 : i32
    return %arg0, %c0_i32, %c0_i32_0 : i32, i32, i32
  }
}

</mosaic_0001>

<bundles_post_ra>
// kernel: resblock_pallas.1
= control target key start
LH: loop header
LB: loop body
LE: loop exit
PB: predicated region body
PF: predicated region fallthrough
CT: control target
= control target key end

     0   :  { %s17941_s24 = smov 0   ;;  %s20935_s0 = inlined_call_operand.vmem [shape: bf16[2,372,128], index: 0, kind: input, shape index: {}]   ;;  %s20936_s1 = inlined_call_operand.vmem [shape: bf16[9,128,128], index: 1, kind: input, shape index: {}]   ;;  %s20937_s2 = inlined_call_operand.vmem [shape: f32[1,128], index: 2, kind: input, shape index: {}]   ;;  %s20938_s3 = inlined_call_operand.vmem [shape: bf16[9,128,128], index: 3, kind: input, shape index: {}]   ;;  %s20939_s4 = inlined_call_operand.vmem [shape: bf16[128,128], index: 4, kind: input, shape index: {}]   ;;  %s20940_s5 = inlined_call_operand.vmem [shape: f32[1,128], index: 5, kind: input, shape index: {}]   ;;  %s20941_s6 = inlined_call_operand.vmem [shape: f32[324,1], index: 6, kind: input, shape index: {}]   ;;  %s20942_s7 = inlined_call_operand.vmem [shape: f32[2,324,128], index: 7, kind: output, shape index: {}]  }
   0x1 LB: > { %s13842_s25 = sadd.s32 4294967295, %s17896_s24   ;;  %p13846_p0 = scmp.ge.s32.totalorder %s17896_s24, 1  ;;  %s17896_s24 = sphi %s17941_s24, %s17_s24  }
   0x2   : > { %p237_p1 = scmp.lt.s32.totalorder %s17896_s24, 3 }
   0x4   : > { %p238_p2 = pnand %p13846_p0, %p237_p1 }
   0x6   : > { %241 = sbr.rel (%p238_p2) target bundleno = 1946 (0x79a), region = 48 }
   0xd   : > { %v17338_v0 = vld [vmem:[%s20936_s1] sm:$0xff]   ;;  %v17898_v1 = vmov 0.0   ;;  %v17339_v2 = vld [vmem:[%s20936_s1 + $0x8] sm:$0xff]   ;;  %p269_p3 = scmp.lt.s32.totalorder %s13842_s25, 1  ;;  %vm17899_vm0 = vmmov 0   ;;  %v17340_v3 = vld [vmem:[%s20936_s1 + $0x10] sm:$0xff]  }
   0xe   : > { %15407 = vmatprep.subr.bf16.mxu0 %v17898_v1  ;;  %17307 = vmatprep.subr.bf16.mxu1 %v17898_v1  ;;  %v17341_v4 = vld [vmem:[%s20936_s1 + $0x18] sm:$0xff]   ;;  %v17342_v9 = vld [vmem:[%s20936_s1 + $0x20] sm:$0xff]   ;;  %v17343_v14 = vld [vmem:[%s20936_s1 + $0x28] sm:$0xff]   ;;  %vm443_vm1 = vsmask.f32 5376  ;;  %vm1106_vm2 = vcmask 1044480  }
   0xf   : > { %15408 = vmatpush3.bf16.msra.mxu0 %v17338_v0  ;;  %17315 = vmatpush3.bf16.msra.mxu1 %v17338_v0  ;;  %s20946_s25 = smov (!%p269_p3, %s13842_s25), 1  ;;  %v17344_v21 = vld [vmem:[%s20936_s1 + $0x30] sm:$0xff]   ;;  %v17345_v34 = vld [vmem:[%s20936_s1 + $0x38] sm:$0xff]   ;;  %v17350_v39 = vld [vmem:[%s20936_s1 + $0x40] sm:$0xff]   ;;  %vm1704_vm3 = vsmask.f32 4352 }
  0x10   : > { %15409 = vmatprep.subr.bf16.mxu0 %v17898_v1  ;;  %17308 = vmatprep.subr.bf16.mxu1 %v17898_v1  ;;  %s17323_s9 = smul.u32 188, %s20946_s25  ;;  %v17351_v40 = vld [vmem:[%s20936_s1 + $0x80] sm:$0xff]   ;;  %v17354_v49 = vld [vmem:[%s20936_s1 + $0x48] sm:$0xff]   ;;  %v17358_v60 = vld [vmem:[%s20936_s1 + $0x50] sm:$0xff]   ;;  %vm3743_vm4 = vsmask.f32 7424 }
  0x11   : > { %15423 = vmatprep.mubr.msk.bf16.mxu0 %vm17899_vm0, %v17898_v1  ;;  %15467 = vmatprep.mubr.msk.bf16.mxu1 %vm17899_vm0, %v17898_v1  ;;  %v17355_v50 = vld [vmem:[%s20936_s1 + $0x88] sm:$0xff]   ;;  %vm5184_vm5 = vcmask 1046528   ;;  %vm5779_vm6 = vsmask.f32 6400 }
  0x12   : > { %s17974_s12 = scalar_lea.vmem %s20935_s0, %s17323_s9 }
  0x13   : > { %15410 = vmatpush3.bf16.msra.mxu0 %v17339_v2  ;;  %17316 = vmatpush3.bf16.msra.mxu1 %v17339_v2  ;;  %v17346_v5 = vld [vmem:[%s17974_s12] sm:$0xfc]   ;;  %v17347_v6 = vld [vmem:[%s17974_s12 + $0x8] sm:$0xff]   ;;  %v17348_v7 = vld [vmem:[%s17974_s12 + $0x58] sm:$0xff]  }
  0x14   : > { %15411 = vmatprep.subr.bf16.mxu0 %v17898_v1  ;;  %17309 = vmatprep.subr.bf16.mxu1 %v17898_v1  ;;  %v17349_v8 = vld [vmem:[%s17974_s12 + $0x60] sm:$0xff]   ;;  %v445_v10 = vshrl.u32 %v17346_v5, 16  ;;  %v448_v11 = vshll.u32 %v17346_v5, 16  ;;  %v453_v12 = vshrl.u32 %v17347_v6, 16  ;;  %v456_v13 = vshll.u32 %v17347_v6, 16  ;;  %v17352_v23 = vld [vmem:[%s17974_s12 + $0x10] sm:$0xff]  }
  0x15   : > { %v543_v15 = vshrl.u32 %v17348_v7, 16  ;;  %v546_v16 = vshll.u32 %v17348_v7, 16  ;;  %v552_v17 = vshrl.u32 %v17349_v8, 16  ;;  %v555_v18 = vshll.u32 %v17349_v8, 16  ;;  %v17353_v25 = vld [vmem:[%s17974_s12 + $0x68] sm:$0xff]   ;;  %v17356_v44 = vld [vmem:[%s17974_s12 + $0x18] sm:$0xff]  }
  0x16   : > { %v447_v19 = vrot.slane %v445_v10, 2  ;;  %v450_v20 = vrot.slane %v448_v11, 3  ;;  %v455_v22 = vrot.slane %v453_v12, 2  ;;  %v458_v24 = vrot.slane %v456_v13, 3  ;;  %v17357_v48 = vld [vmem:[%s17974_s12 + $0x70] sm:$0xff]   ;;  %v17359_v57 = vld [vmem:[%s17974_s12 + $0x20] sm:$0xff]  }
  0x17   : > { %15412 = vmatpush3.bf16.msra.mxu0 %v17340_v3  ;;  %17317 = vmatpush3.bf16.msra.mxu1 %v17340_v3  ;;  %v545_v26 = vrot.slane %v543_v15, 2  ;;  %v548_v27 = vrot.slane %v546_v16, 3  ;;  %v554_v28 = vrot.slane %v552_v17, 2  ;;  %v557_v29 = vrot.slane %v555_v18, 3  ;;  %v17360_v61 = vld [vmem:[%s17974_s12 + $0x78] sm:$0xff]   ;;  %v17361_v3 = vld [vmem:[%s20936_s1 + $0x90] sm:$0xff]  }
  0x18   : > { %15413 = vmatprep.subr.bf16.mxu0 %v17898_v1  ;;  %17310 = vmatprep.subr.bf16.mxu1 %v17898_v1  ;;  %v462_v30 = vshrl.u32 %v17352_v23, 16  ;;  %v451_v31 = vor.u32 %v450_v20, %v447_v19  ;;  %v465_v32 = vshll.u32 %v17352_v23, 16  ;;  %v561_v33 = vshrl.u32 %v17353_v25, 16  ;;  %v17362_v10 = vld [vmem:[%s20936_s1 + $0x58] sm:$0xff]   ;;  %v17363_v11 = vld [vmem:[%s17974_s12 + $0x28] sm:$0xff]   ;;  %v17364_v15 = vld [vmem:[%s17974_s12 + $0x80] sm:$0xff]  }
  0x19   : > { %v459_v35 = vor.u32 %v458_v24, %v455_v22  ;;  %v18005_v36 = vor.u32 %v548_v27, %v545_v26  ;;  %v558_v37 = vor.u32 %v557_v29, %v554_v28  ;;  %v564_v38 = vshll.u32 %v17353_v25, 16  ;;  %v17365_v12 = vld [vmem:[%s20936_s1 + $0x98] sm:$0xff]   ;;  %v17368_v20 = vld [vmem:[%s20936_s1 + $0x60] sm:$0xff]   ;;  %v17366_v27 = vld [vmem:[%s17974_s12 + $0x30] sm:$0xff]  }
  0x1a   : > { %v464_v41 = vrot.slane %v462_v30, 2  ;;  %v467_v42 = vrot.slane %v465_v32, 3  ;;  %v563_v43 = vrot.slane %v561_v33, 2  ;;  %v471_v51 = vshrl.u32 %v17356_v44, 16  ;;  %v17372_v29 = vld [vmem:[%s20936_s1 + $0x68] sm:$0xff]  }
  0x1b   : > { %15414 = vmatpush3.bf16.msra.mxu0 %v17341_v4  ;;  %17318 = vmatpush3.bf16.msra.mxu1 %v17341_v4  ;;  %v460_v45 = vsel %vm443_vm1, %v451_v31, %v459_v35  ;;  %v559_v46 = vsel %vm443_vm1, %v18005_v36, %v558_v37  ;;  %v566_v47 = vrot.slane %v564_v38, 3  ;;  %v474_v52 = vshll.u32 %v17356_v44, 16  ;;  %v17375_v30 = vld [vmem:[%s20936_s1 + $0xa8] sm:$0xff]  }
  0x1c   : > { %15415 = vmatprep.subr.bf16.mxu0 %v17898_v1  ;;  %17311 = vmatprep.subr.bf16.mxu1 %v17898_v1  ;;  %v468_v53 = vor.u32 %v467_v42, %v464_v41  ;;  %v570_v55 = vshrl.u32 %v17357_v48, 16  ;;  %v573_v56 = vshll.u32 %v17357_v48, 16  ;;  %v473_v58 = vrot.slane %v471_v51, 2  ;;  %v17367_v31 = vld [vmem:[%s17974_s12 + $0x88] sm:$0xff]   ;;  %v17379_v41 = vld [vmem:[%s20936_s1 + $0xb0] sm:$0xff]   ;;  %v17384_v48 = vld [vmem:[%s20936_s1 + $0xb8] sm:$0xff]  }
  0x1d   : > { %v567_v54 = vor.u32 %v566_v47, %v563_v43  ;;  %v476_v59 = vrot.slane %v474_v52, 3  ;;  %v480_v4 = vshrl.u32 %v17359_v57, 16  ;;  %v483_v5 = vshll.u32 %v17359_v57, 16  ;;  %v17370_v51 = vld [vmem:[%s17974_s12 + $0x38] sm:$0xff]   ;;  %v17371_v52 = vld [vmem:[%s17974_s12 + $0x90] sm:$0xff]  }
  0x1e   : > { %v469_v62 = vsel %vm443_vm1, %v459_v35, %v468_v53  ;;  %v572_v0 = vrot.slane %v570_v55, 2  ;;  %v575_v2 = vrot.slane %v573_v56, 3  ;;  %v579_v6 = vshrl.u32 %v17360_v61, 16 }
  0x1f   : > { %15416 = vmatpush3.bf16.msra.mxu0 %v17342_v9  ;;  %17319 = vmatpush3.bf16.msra.mxu1 %v17342_v9  ;;  %v568_v63 = vsel %vm443_vm1, %v558_v37, %v567_v54  ;;  %v477_v7 = vor.u32 %v476_v59, %v473_v58  ;;  %v582_v9 = vshll.u32 %v17360_v61, 16  ;;  %v482_v13 = vrot.slane %v480_v4, 2 }
  0x20   : > { %15417 = vmatprep.subr.bf16.mxu0 %v17898_v1  ;;  %17312 = vmatprep.subr.bf16.mxu1 %v17898_v1  ;;  %v576_v8 = vor.u32 %v575_v2, %v572_v0  ;;  %v581_v18 = vrot.slane %v579_v6, 2  ;;  %v489_v22 = vshrl.u32 %v17363_v11, 16  ;;  %v492_v24 = vshll.u32 %v17363_v11, 16 }
  0x21   : > { %v478_v16 = vsel %vm443_vm1, %v468_v53, %v477_v7  ;;  %v584_v19 = vrot.slane %v582_v9, 3  ;;  %v588_v25 = vshrl.u32 %v17364_v15, 16  ;;  %v591_v26 = vshll.u32 %v17364_v15, 16 }
  0x22   : > { %v577_v17 = vsel %vm443_vm1, %v567_v54, %v576_v8  ;;  %v491_v33 = vrot.slane %v489_v22, 2  ;;  %v494_v35 = vrot.slane %v492_v24, 3  ;;  %v501_v42 = vshll.u32 %v17366_v27, 16 }
  0x23   : > { %15418 = vmatpush3.bf16.msra.mxu0 %v17343_v14  ;;  %17320 = vmatpush3.bf16.msra.mxu1 %v17343_v14  ;;  %v485_v14 = vrot.slane %v483_v5, 3  ;;  %v585_v28 = vor.u32 %v584_v19, %v581_v18  ;;  %v590_v37 = vrot.slane %v588_v25, 2  ;;  %v593_v38 = vrot.slane %v591_v26, 3 }
  0x24   : > { %15419 = vmatprep.subr.bf16.mxu0 %v17898_v1  ;;  %17313 = vmatprep.subr.bf16.mxu1 %v17898_v1  ;;  %v597_v43 = vshrl.u32 %v17367_v31, 16  ;;  %v600_v44 = vshll.u32 %v17367_v31, 16  ;;  %v507_v57 = vshrl.u32 %v17370_v51, 16  ;;  %v510_v58 = vshll.u32 %v17370_v51, 16 }
  0x25   : > { %v486_v23 = vor.u32 %v485_v14, %v482_v13  ;;  %v594_v47 = vor.u32 %v593_v38, %v590_v37  ;;  %v606_v59 = vshrl.u32 %v17371_v52, 16 }
  0x26   : > { %v599_v55 = vrot.slane %v597_v43, 2  ;;  %v602_v56 = vrot.slane %v600_v44, 3  ;;  %v509_v0 = vrot.slane %v507_v57, 2  ;;  %v512_v2 = vrot.slane %v510_v58, 3  ;;  %v17386_v57 = vld [vmem:[%s17974_s12 + $0x10] sm:$0xff]  }
  0x27   : > { %15420 = vmatpush3.bf16.msra.mxu0 %v17344_v21  ;;  %17321 = vmatpush3.bf16.msra.mxu1 %v17344_v21  ;;  %v17369_v21 = vld [vmem:[%s20936_s1 + $0xa0] sm:$0xff]   ;;  %v487_v32 = vsel %vm443_vm1, %v477_v7, %v486_v23  ;;  %v595_v54 = vsel %vm443_vm1, %v585_v28, %v594_v47  ;;  %v17374_v7 = vld [vmem:[%s17974_s12 + $0x98] sm:$0xff]  }
  0x28   : > { %15421 = vmatprep.subr.bf16.mxu0 %v17898_v1  ;;  %17314 = vmatprep.subr.bf16.mxu1 %v17898_v1  ;;  %v618_v13 = vshll.u32 %v17374_v7, 16 }
  0x2b   : > { %15422 = vmatpush3.bf16.msra.mxu0 %v17345_v34  ;;  %17322 = vmatpush3.bf16.msra.mxu1 %v17345_v34  ;;  %v586_v34 = vsel %vm443_vm1, %v576_v8, %v585_v28 }
  0x2c   : > { %15507 = vmatprep.subr.bf16.mxu1 %v17898_v1  ;;  %15607 = vmatprep.subr.bf16.mxu0 %v17898_v1 }
  0x2e   : > { %15424 = vmatmul.mubr.bf16.vlgmr.msra.gmra.mrb[0].mxu0 %v460_v45  ;;  %15468 = vmatmul.mubr.bf16.vlgmr.msra.gmra.mrb[0].mxu1 %v559_v46  ;;  %v17380_v45 = vld [vmem:[%s20936_s1 + $0x78] sm:$0xff]   ;;  %v495_v46 = vor.u32 %v494_v35, %v491_v33 }
  0x2f   : > { %15508 = vmatpush3.bf16.msra.mxu1 %v17350_v39  ;;  %15608 = vmatpush3.bf16.msra.mxu0 %v17351_v40  ;;  %v498_v39 = vshrl.u32 %v17366_v27, 16  ;;  %v17376_v40 = vld [vmem:[%s20936_s1 + $0x70] sm:$0xff]  }
  0x30   : > { %15427 = vmatprep.mubr.msk.bf16.mxu0 %vm17899_vm0, %v17898_v1  ;;  %15471 = vmatprep.mubr.msk.bf16.mxu1 %vm17899_vm0, %v17898_v1  ;;  %v496_v53 = vsel %vm443_vm1, %v486_v23, %v495_v46 }
  0x31   : > { %15509 = vmatprep.subr.bf16.mxu1 %v17898_v1  ;;  %15609 = vmatprep.subr.bf16.mxu0 %v17898_v1 }
  0x33   : > { %15510 = vmatpush3.bf16.msra.mxu1 %v17354_v49  ;;  %15610 = vmatpush3.bf16.msra.mxu0 %v17355_v50  ;;  %v500_v49 = vrot.slane %v498_v39, 2  ;;  %v503_v50 = vrot.slane %v501_v42, 3 }
  0x34   : > { %15511 = vmatprep.subr.bf16.mxu1 %v17898_v1  ;;  %15611 = vmatprep.subr.bf16.mxu0 %v17898_v1 }
  0x35   : > { %v504_v61 = vor.u32 %v503_v50, %v500_v49  ;;  %v17387_v49 = vld [vmem:[%s17974_s12] sm:$0xf8]  }
  0x36   : > { %15428 = vmatmul.mubr.bf16.gmra.mrb[4].mxu0 %v469_v62  ;;  %15472 = vmatmul.mubr.bf16.gmra.mrb[4].mxu1 %v568_v63  ;;  %v603_v62 = vor.u32 %v602_v56, %v599_v55  ;;  %v17373_v63 = vld [vmem:[%s17974_s12 + $0x40] sm:$0xff]   ;;  %v1709_v55 = vshll.u32 %v17387_v49, 16 }
  0x37   : > { %15431 = vmatprep.mubr.msk.bf16.mxu0 %vm17899_vm0, %v17898_v1  ;;  %15475 = vmatprep.mubr.msk.bf16.mxu1 %vm17899_vm0, %v17898_v1  ;;  %v505_v4 = vsel %vm443_vm1, %v495_v46, %v504_v61  ;;  %v516_v8 = vshrl.u32 %v17373_v63, 16  ;;  %v519_v9 = vshll.u32 %v17373_v63, 16  ;;  %v17383_v46 = vld [vmem:[%s17974_s12 + $0x8] sm:$0xff]   ;;  %v17385_v56 = vld [vmem:[%s20936_s1 + $0xc0] sm:$0xff]  }
  0x38   : > { %15512 = vmatpush3.bf16.msra.mxu1 %v17358_v60  ;;  %15612 = vmatpush3.bf16.msra.mxu0 %v17361_v3  ;;  %v609_v60 = vshll.u32 %v17371_v52, 16  ;;  %v608_v3 = vrot.slane %v606_v59, 2  ;;  %v604_v5 = vsel %vm443_vm1, %v594_v47, %v603_v62  ;;  %v17388_v47 = vld [vmem:[%s17974_s12 + $0x8] sm:$0xff]   ;;  %v1108_v51 = vrot.slane %v17383_v46, 3  ;;  %v17428_v46 = vld [vmem:[%s20936_s1 + $0xf0] sm:$0xff]  }
  0x39   : > { %15513 = vmatprep.subr.bf16.mxu1 %v17898_v1  ;;  %15613 = vmatprep.subr.bf16.mxu0 %v17898_v1  ;;  %v518_v14 = vrot.slane %v516_v8, 2  ;;  %v521_v15 = vrot.slane %v519_v9, 3  ;;  %v1714_v52 = vshrl.u32 %v17388_v47, 16  ;;  %v17390_v8 = vld [vmem:[%s17974_s12 + $0x18] sm:$0xff]  }
  0x3a   : > { %v611_v6 = vrot.slane %v609_v60, 3  ;;  %v17391_v60 = vld [vmem:[%s17974_s12 + $0x10] sm:$0xff]   ;;  %v17394_v9 = vld [vmem:[%s17974_s12 + $0x18] sm:$0xff]  }
  0x3b   : > { %v522_v26 = vor.u32 %v521_v15, %v518_v14  ;;  %v1716_v58 = vrot.slane %v1714_v52, 3  ;;  %v18178_v14 = vld [vmem:[%s17974_s12 + $0x20] sm:$0xff]   ;;  %v1732_v15 = vshrl.u32 %v17394_v9, 16 }
  0x3c   : > { %15514 = vmatpush3.bf16.msra.mxu1 %v17362_v10  ;;  %15614 = vmatpush3.bf16.msra.mxu0 %v17365_v12  ;;  %v513_v10 = vor.u32 %v512_v2, %v509_v0  ;;  %v612_v11 = vor.u32 %v611_v6, %v608_v3  ;;  %v615_v12 = vshrl.u32 %v17374_v7, 16  ;;  %v1711_v0 = vrot.slane %v1709_v55, 4  ;;  %v17389_v7 = vld [vmem:[%s20936_s1 + $0x100] sm:$0xff]  }
  0x3d   : > { %15515 = vmatprep.subr.bf16.mxu1 %v17898_v1  ;;  %15615 = vmatprep.subr.bf16.mxu0 %v17898_v1  ;;  %v1110_v2 = vrot.slane %v17386_v57, 3  ;;  %v1723_v3 = vshrl.u32 %v17391_v60, 16  ;;  %v1726_v6 = vshll.u32 %v17391_v60, 16 }
  0x3e   : > { %15432 = vmatmul.mubr.bf16.gmra.mrb[8].mxu0 %v478_v16  ;;  %15476 = vmatmul.mubr.bf16.gmra.mrb[8].mxu1 %v577_v17  ;;  %v17377_v16 = vld [vmem:[%s17974_s12 + $0x48] sm:$0xff]   ;;  %v17378_v17 = vld [vmem:[%s17974_s12 + $0xa0] sm:$0x1f]   ;;  %v514_v18 = vsel %vm443_vm1, %v504_v61, %v513_v10  ;;  %v613_v19 = vsel %vm443_vm1, %v603_v62, %v612_v11  ;;  %v523_v33 = vsel %vm443_vm1, %v513_v10, %v522_v26 }
  0x3f   : > { %15435 = vmatprep.mubr.msk.bf16.mxu0 %vm17899_vm0, %v17898_v1  ;;  %15479 = vmatprep.mubr.msk.bf16.mxu1 %vm17899_vm0, %v17898_v1  ;;  %v525_v22 = vshrl.u32 %v17377_v16, 16  ;;  %v528_v23 = vshll.u32 %v17377_v16, 16  ;;  %v624_v24 = vshrl.u32 %v17378_v17, 16  ;;  %v627_v25 = vshll.u32 %v17378_v17, 16  ;;  %v17400_v16 = vld [vmem:[%s20936_s1 + $0xd0] sm:$0xff]  }
  0x40   : > { %15516 = vmatpush3.bf16.msra.mxu1 %v17368_v20  ;;  %15616 = vmatpush3.bf16.msra.mxu0 %v17369_v21  ;;  %v617_v20 = vrot.slane %v615_v12, 2  ;;  %v620_v21 = vrot.slane %v618_v13, 3  ;;  %v1111_v10 = vsel %vm1106_vm2, %v1108_v51, %v1110_v2  ;;  %v1725_v12 = vrot.slane %v1723_v3, 3 }
  0x41   : > { %15517 = vmatprep.subr.bf16.mxu1 %v17898_v1  ;;  %15617 = vmatprep.subr.bf16.mxu0 %v17898_v1  ;;  %v527_v28 = vrot.slane %v525_v22, 2  ;;  %v629_v31 = vrot.slane %v627_v25, 3  ;;  %v1728_v13 = vrot.slane %v1726_v6, 4  ;;  %v1112_v17 = vrot.slane %v17390_v8, 3  ;;  %v17407_v8 = vld [vmem:[%s17974_s12 + $0x40] sm:$0xff]  }
  0x42   : > { %v621_v27 = vor.u32 %v620_v21, %v617_v20  ;;  %v17397_v20 = vld [vmem:[%s20936_s1 + $0x108] sm:$0xff]   ;;  %v1114_v21 = vrot.slane %v18178_v14, 3  ;;  %v1734_v22 = vrot.slane %v1732_v15, 3  ;;  %v1777_v14 = vshrl.u32 %v17407_v8, 16 }
  0x43   : > { %v1113_v25 = vsel %vm1106_vm2, %v1110_v2, %v1112_v17  ;;  %v17405_v2 = vld [vmem:[%s17974_s12 + $0x38] sm:$0xff]   ;;  %v1780_v15 = vshll.u32 %v17407_v8, 16 }
  0x44   : > { %15518 = vmatpush3.bf16.msra.mxu1 %v17372_v29  ;;  %15618 = vmatpush3.bf16.msra.mxu0 %v17375_v30  ;;  %v530_v29 = vrot.slane %v528_v23, 3  ;;  %v626_v30 = vrot.slane %v624_v24, 2  ;;  %v17396_v23 = vld [vmem:[%s17974_s12 + $0x20] sm:$0xff]   ;;  %v17408_v24 = vld [vmem:[%s20936_s1 + $0xd8] sm:$0xff]   ;;  %v1771_v6 = vshll.u32 %v17405_v2, 16 }
  0x45   : > { %15519 = vmatprep.subr.bf16.mxu1 %v17898_v1  ;;  %15619 = vmatprep.subr.bf16.mxu0 %v17898_v1 }
  0x46   : > { %15436 = vmatmul.mubr.bf16.gmra.mrb[12].mxu0 %v487_v32  ;;  %15480 = vmatmul.mubr.bf16.gmra.mrb[12].mxu1 %v586_v34  ;;  %v17381_v32 = vld [vmem:[%s17974_s12 + $0x50] sm:$0xff]   ;;  %v622_v34 = vsel %vm443_vm1, %v612_v11, %v621_v27  ;;  %v531_v35 = vor.u32 %v530_v29, %v527_v28  ;;  %v630_v37 = vor.u32 %v629_v31, %v626_v30  ;;  %v18201_v28 = vld [vmem:[%s17974_s12 + $0x28] sm:$0xff]   ;;  %v1741_v31 = vshrl.u32 %v17396_v23, 16 }
  0x47   : > { %15439 = vmatprep.mubr.msk.bf16.mxu0 %vm17899_vm0, %v17898_v1  ;;  %15483 = vmatprep.mubr.msk.bf16.mxu1 %vm17899_vm0, %v17898_v1  ;;  %v534_v38 = vshrl.u32 %v17381_v32, 16  ;;  %v537_v39 = vshll.u32 %v17381_v32, 16  ;;  %v17403_v29 = vld [vmem:[%s20936_s1 + $0x110] sm:$0xff]   ;;  %v17399_v30 = vld [vmem:[%s17974_s12 + $0x28] sm:$0xff]   ;;  %v17414_v32 = vld [vmem:[%s20936_s1 + $0xe0] sm:$0xff]  }
  0x48   : > { %15520 = vmatpush3.bf16.msra.mxu1 %v17376_v40  ;;  %15620 = vmatpush3.bf16.msra.mxu0 %v17379_v41  ;;  %v532_v40 = vsel %vm443_vm1, %v522_v26, %v531_v35  ;;  %v631_v41 = vsel %vm443_vm1, %v621_v27, %v630_v37 }
  0x49   : > { %15521 = vmatprep.subr.bf16.mxu1 %v17898_v1  ;;  %15621 = vmatprep.subr.bf16.mxu0 %v17898_v1  ;;  %v536_v42 = vrot.slane %v534_v38, 2  ;;  %v539_v43 = vrot.slane %v537_v39, 3  ;;  %v17422_v38 = vld [vmem:[%s20936_s1 + $0xe8] sm:$0xff]   ;;  %v1743_v39 = vrot.slane %v1741_v31, 3  ;;  %v17413_v31 = vld [vmem:[%s17974_s12 + $0x50] sm:$0xff]  }
  0x4b   : > { %v540_v44 = vor.u32 %v539_v43, %v536_v42 }
  0x4c   : > { %15522 = vmatpush3.bf16.msra.mxu1 %v17380_v45  ;;  %15622 = vmatpush3.bf16.msra.mxu0 %v17384_v48  ;;  %v17382_v45 = vld [vmem:[%s17974_s12] sm:$0xf8]  }
  0x4d   : > { %15707 = vmatprep.subr.bf16.mxu1 %v17898_v1  ;;  %15807 = vmatprep.subr.bf16.mxu0 %v17898_v1  ;;  %v541_v48 = vsel %vm443_vm1, %v531_v35, %v540_v44  ;;  %v1107_v50 = vrot.slane %v17382_v45, 3  ;;  %v550_v61 = vsel %vm443_vm1, %v540_v44, %v18005_v36  ;;  %v17392_v36 = vld [vmem:[%s20936_s1 + $0xc8] sm:$0xff]   ;;  %v17411_v35 = vld [vmem:[%s20936_s1 + $0x118] sm:$0xff]   ;;  %v17417_v44 = vld [vmem:[%s20936_s1 + $0x120] sm:$0xff]   ;;  %v1753_v45 = vshll.u32 %v17399_v30, 16 }
  0x4e   : > { %15440 = vmatmul.mubr.bf16.gmra.mrb[16].mxu0 %v496_v53  ;;  %15484 = vmatmul.mubr.bf16.gmra.mrb[16].mxu1 %v595_v54  ;;  %v1717_v53 = vshll.u32 %v17388_v47, 16  ;;  %v1706_v54 = vshrl.u32 %v17387_v49, 16  ;;  %v17402_v49 = vld [vmem:[%s17974_s12 + $0x30] sm:$0xff]  }
  0x4f   : > { %15443 = vmatprep.mubr.msk.bf16.mxu0 %vm17899_vm0, %v17898_v1  ;;  %15487 = vmatprep.mubr.msk.bf16.mxu1 %vm17899_vm0, %v17898_v1  ;;  %v1109_v62 = vsel %vm1106_vm2, %v1107_v50, %v1108_v51  ;;  %v17425_v50 = vld [vmem:[%s20936_s1 + $0x128] sm:$0xff]   ;;  %v17398_v51 = vld [vmem:[%s17974_s12 + $0x30] sm:$0xff]   ;;  %v1755_v52 = vrot.slane %v1753_v45, 4  ;;  %v1759_v57 = vshrl.u32 %v17402_v49, 16 }
  0x50   : > { %v1719_v59 = vrot.slane %v1717_v53, 4  ;;  %v1708_v63 = vrot.slane %v1706_v54, 3  ;;  %v17436_v53 = vld [vmem:[%s20936_s1 + $0xf8] sm:$0xff]  }
  0x56   : > { %15444 = vmatmul.mubr.bf16.gmra.mrb[20].mxu0 %v505_v4  ;;  %15488 = vmatmul.mubr.bf16.gmra.mrb[20].mxu1 %v604_v5  ;;  %v1712_v4 = vor.u32 %v1711_v0, %v1708_v63  ;;  %v1720_v5 = vor.u32 %v1719_v59, %v1716_v58  ;;  %v1762_v58 = vshll.u32 %v17402_v49, 16  ;;  %v1118_v59 = vrot.slane %v17398_v51, 3  ;;  %v17419_v49 = vld [vmem:[%s17974_s12 + $0x60] sm:$0xff]  }
  0x57   : > { %15447 = vmatprep.mubr.msk.bf16.mxu0 %vm17899_vm0, %v17898_v1  ;;  %15491 = vmatprep.mubr.msk.bf16.mxu1 %vm17899_vm0, %v17898_v1  ;;  %v1761_v63 = vrot.slane %v1759_v57, 3  ;;  %v17421_v57 = vld [vmem:[%s17974_s12 + $0x68] sm:$0xff]  }
  0x58   : > { %v1721_v11 = vsel %vm1704_vm3, %v1712_v4, %v1720_v5  ;;  %v1764_v0 = vrot.slane %v1762_v58, 4 }
  0x5e   : > { %15448 = vmatmul.mubr.bf16.gmra.mrb[24].mxu0 %v514_v18  ;;  %15492 = vmatmul.mubr.bf16.gmra.mrb[24].mxu1 %v613_v19  ;;  %v1729_v18 = vor.u32 %v1728_v13, %v1725_v12  ;;  %v1735_v19 = vshll.u32 %v17394_v9, 16  ;;  %v17404_v9 = vld [vmem:[%s17974_s12 + $0x40] sm:$0xff]  }
  0x5f   : > { %15451 = vmatprep.mubr.msk.bf16.mxu0 %vm17899_vm0, %v17898_v1  ;;  %15495 = vmatprep.mubr.msk.bf16.mxu1 %vm17899_vm0, %v17898_v1 }
  0x60   : > { %v1730_v26 = vsel %vm1704_vm3, %v1720_v5, %v1729_v18  ;;  %v1737_v27 = vrot.slane %v1735_v19, 4  ;;  %v1768_v5 = vshrl.u32 %v17405_v2, 16  ;;  %v17406_v19 = vld [vmem:[%s17974_s12 + $0x48] sm:$0xff]  }
  0x66   : > { %15452 = vmatmul.mubr.bf16.gmra.mrb[28].mxu0 %v523_v33  ;;  %15496 = vmatmul.mubr.bf16.gmra.mrb[28].mxu1 %v622_v34  ;;  %v1738_v33 = vor.u32 %v1737_v27, %v1734_v22  ;;  %v1744_v34 = vshll.u32 %v17396_v23, 16 }
  0x67   : > { %15455 = vmatprep.mubr.msk.bf16.mxu0 %vm17899_vm0, %v17898_v1  ;;  %15499 = vmatprep.mubr.msk.bf16.mxu1 %vm17899_vm0, %v17898_v1 }
  0x68   : > { %v1739_v42 = vsel %vm1704_vm3, %v1729_v18, %v1738_v33  ;;  %v1746_v43 = vrot.slane %v1744_v34, 4  ;;  %v1795_v34 = vshrl.u32 %v17413_v31, 16 }
  0x6a   : > { %v1747_v47 = vor.u32 %v1746_v43, %v1743_v39  ;;  %v17416_v39 = vld [vmem:[%s17974_s12 + $0x58] sm:$0xff]  }
  0x6b   : > { %v1804_v45 = vshrl.u32 %v17416_v39, 16 }
  0x6c   : > { %v1748_v55 = vsel %vm1704_vm3, %v1738_v33, %v1747_v47 }
  0x6d   : > { %v1806_v51 = vrot.slane %v1804_v45, 3 }
  0x6e   : > { %15456 = vmatmul.mubr.bf16.gmra.mrb[32].mxu0 %v532_v40  ;;  %15500 = vmatmul.mubr.bf16.gmra.mrb[32].mxu1 %v631_v41  ;;  %v1750_v40 = vshrl.u32 %v17399_v30, 16  ;;  %v1115_v41 = vsel %vm1106_vm2, %v1112_v17, %v1114_v21  ;;  %v1122_v17 = vrot.slane %v17404_v9, 3 }
  0x6f   : > { %15459 = vmatprep.mubr.msk.bf16.mxu0 %vm17899_vm0, %v17898_v1  ;;  %15503 = vmatprep.mubr.msk.bf16.mxu1 %vm17899_vm0, %v17898_v1 }
  0x76   : > { %15460 = vmatmul.mubr.bf16.gmra.mrb[36].mxu0 %v541_v48  ;;  %15504 = vmatmul.mubr.bf16.gmra.mrb[36].mxu1 %v630_v37  ;;  %v1116_v37 = vrot.slane %v18201_v28, 3  ;;  %v1752_v48 = vrot.slane %v1750_v40, 3  ;;  %v17412_v40 = vld [vmem:[%s17974_s12 + $0x58] sm:$0xff]  }
  0x77   : > { %15463 = vmatprep.mubr.msk.bf16.mxu0 %vm17899_vm0, %v17898_v1  ;;  %15523 = vmatprep.mubr.msk.bf16.mxu1 %vm17899_vm0, %v17898_v1 }
  0x78   : > { %v1117_v54 = vsel %vm1106_vm2, %v1114_v21, %v1116_v37  ;;  %v1756_v60 = vor.u32 %v1755_v52, %v1752_v48  ;;  %v1119_v3 = vsel %vm1106_vm2, %v1116_v37, %v1118_v59  ;;  %v1782_v21 = vrot.slane %v1780_v15, 4 }
  0x7a   : > { %v1757_v4 = vsel %vm1704_vm3, %v1747_v47, %v1756_v60  ;;  %v1128_v47 = vrot.slane %v17412_v40, 3 }
  0x7e   : > { %15464 = vmatmul.mubr.bf16.gmra.mrb[40].mxu0 %v550_v61  ;;  %15524 = vmatmul.mubr.bf16.vlgmr.msra.gmra.mrb[40].mxu1 %v1109_v62  ;;  %v17439_v61 = vld [vmem:[%s20936_s1 + $0x138] sm:$0xff]  }
  0x7f   : > { %15708 = vmatpush3.bf16.msra.mxu1 %v17385_v56  ;;  %15527 = vmatprep.mubr.msk.bf16.mxu1 %vm17899_vm0, %v17898_v1  ;;  %v17433_v56 = vld [vmem:[%s20936_s1 + $0x130] sm:$0xff]   ;;  %v17401_v62 = vld [vmem:[%s17974_s12 + $0x38] sm:$0xff]  }
  0x80   : > { %15623 = vmatprep.mubr.msk.bf16.mxu0 %vm17899_vm0, %v17898_v1  ;;  %15709 = vmatprep.subr.bf16.mxu1 %v17898_v1 }
  0x83   : > { %15710 = vmatpush3.bf16.msra.mxu1 %v17392_v36  ;;  %v1120_v36 = vrot.slane %v17401_v62, 3 }
  0x84   : > { %15711 = vmatprep.subr.bf16.mxu1 %v17898_v1 }
  0x85   : > { %v1121_v12 = vsel %vm1106_vm2, %v1118_v59, %v1120_v36  ;;  %v1123_v23 = vsel %vm1106_vm2, %v1120_v36, %v1122_v17 }
  0x86   : > { %15528 = vmatmul.mubr.bf16.gmra.mrb[44].mxu1 %v1111_v10  ;;  %15624 = vmatmul.mubr.bf16.vlgmr.msra.gmra.mrb[44].mxu0 %v1721_v11  ;;  %v1770_v10 = vrot.slane %v1768_v5, 3  ;;  %v1773_v11 = vrot.slane %v1771_v6, 4 }
  0x87   : > { %15808 = vmatpush3.bf16.msra.mxu0 %v17389_v7  ;;  %15531 = vmatprep.mubr.msk.bf16.mxu1 %vm17899_vm0, %v17898_v1  ;;  %v1765_v7 = vor.u32 %v1764_v0, %v1761_v63  ;;  %v1822_v63 = vshrl.u32 %v17421_v57, 16 }
  0x88   : > { %15627 = vmatprep.mubr.msk.bf16.mxu0 %vm17899_vm0, %v17898_v1  ;;  %15809 = vmatprep.subr.bf16.mxu0 %v17898_v1  ;;  %v1774_v18 = vor.u32 %v1773_v11, %v1770_v10 }
  0x89   : > { %15712 = vmatpush3.bf16.msra.mxu1 %v17400_v16  ;;  %v1766_v13 = vsel %vm1704_vm3, %v1756_v60, %v1765_v7  ;;  %v17410_v16 = vld [vmem:[%s17974_s12 + $0x48] sm:$0xff]   ;;  %v1824_v36 = vrot.slane %v1822_v63, 3 }
  0x8a   : > { %15713 = vmatprep.subr.bf16.mxu1 %v17898_v1  ;;  %v1786_v22 = vshrl.u32 %v17410_v16, 16  ;;  %v17418_v60 = vld [vmem:[%s17974_s12 + $0x68] sm:$0xff]  }
  0x8b   : > { %15810 = vmatpush3.bf16.msra.mxu0 %v17397_v20  ;;  %v1779_v20 = vrot.slane %v1777_v14, 3  ;;  %v1132_v5 = vrot.slane %v17418_v60, 3 }
  0x8c   : > { %15811 = vmatprep.subr.bf16.mxu0 %v17898_v1  ;;  %v1788_v28 = vrot.slane %v1786_v22, 3 }
  0x8d   : > { %15714 = vmatpush3.bf16.msra.mxu1 %v17408_v24  ;;  %v1775_v24 = vsel %vm1704_vm3, %v1765_v7, %v1774_v18  ;;  %v1783_v27 = vor.u32 %v1782_v21, %v1779_v20  ;;  %v17420_v7 = vld [vmem:[%s17974_s12 + $0x70] sm:$0xff]  }
  0x8e   : > { %15532 = vmatmul.mubr.bf16.gmra.mrb[48].mxu1 %v1113_v25  ;;  %15628 = vmatmul.mubr.bf16.gmra.mrb[48].mxu0 %v1730_v26  ;;  %v1789_v25 = vshll.u32 %v17410_v16, 16  ;;  %v1124_v26 = vrot.slane %v17406_v19, 3  ;;  %v1134_v14 = vrot.slane %v17420_v7, 3 }
  0x8f   : > { %15535 = vmatprep.mubr.msk.bf16.mxu1 %vm17899_vm0, %v17898_v1  ;;  %15631 = vmatprep.mubr.msk.bf16.mxu0 %vm17899_vm0, %v17898_v1  ;;  %v1784_v33 = vsel %vm1704_vm3, %v1774_v18, %v1783_v27 }
  0x90   : > { %15812 = vmatpush3.bf16.msra.mxu0 %v17403_v29  ;;  %15715 = vmatprep.subr.bf16.mxu1 %v17898_v1  ;;  %v17409_v29 = vld [vmem:[%s17974_s12 + $0x50] sm:$0xff]   ;;  %v1791_v30 = vrot.slane %v1789_v25, 4  ;;  %v1135_v20 = vsel %vm1106_vm2, %v1132_v5, %v1134_v14 }
  0x91   : > { %15813 = vmatprep.subr.bf16.mxu0 %v17898_v1  ;;  %15716 = vmatpush3.bf16.msra.mxu1 %v17414_v32  ;;  %v1125_v32 = vsel %vm1106_vm2, %v1122_v17, %v1124_v26  ;;  %v1126_v37 = vrot.slane %v17409_v29, 3  ;;  %v17423_v17 = vld [vmem:[%s17974_s12 + $0x78] sm:$0xff]  }
  0x92   : > { %15717 = vmatprep.subr.bf16.mxu1 %v17898_v1 }
  0x93   : > { %v1127_v43 = vsel %vm1106_vm2, %v1124_v26, %v1126_v37 }
  0x94   : > { %15814 = vmatpush3.bf16.msra.mxu0 %v17411_v35  ;;  %v1798_v35 = vshll.u32 %v17413_v31, 16 }
  0x95   : > { %15815 = vmatprep.subr.bf16.mxu0 %v17898_v1  ;;  %15718 = vmatpush3.bf16.msra.mxu1 %v17422_v38  ;;  %v1792_v38 = vor.u32 %v1791_v30, %v1788_v28 }
  0x96   : > { %15536 = vmatmul.mubr.bf16.gmra.mrb[52].mxu1 %v1115_v41  ;;  %15632 = vmatmul.mubr.bf16.gmra.mrb[52].mxu0 %v1739_v42  ;;  %v1797_v41 = vrot.slane %v1795_v34, 3  ;;  %v1800_v42 = vrot.slane %v1798_v35, 4 }
  0x97   : > { %15539 = vmatprep.mubr.msk.bf16.mxu1 %vm17899_vm0, %v17898_v1  ;;  %15635 = vmatprep.mubr.msk.bf16.mxu0 %vm17899_vm0, %v17898_v1 }
  0x98   : > { %15816 = vmatpush3.bf16.msra.mxu0 %v17417_v44  ;;  %15719 = vmatprep.subr.bf16.mxu1 %v17898_v1  ;;  %v1793_v44 = vsel %vm1704_vm3, %v1783_v27, %v1792_v38  ;;  %v1801_v48 = vor.u32 %v1800_v42, %v1797_v41  ;;  %v17426_v27 = vld [vmem:[%s17974_s12 + $0x80] sm:$0xff]  }
  0x99   : > { %15817 = vmatprep.subr.bf16.mxu0 %v17898_v1  ;;  %15720 = vmatpush3.bf16.msra.mxu1 %v17428_v46  ;;  %v1807_v46 = vshll.u32 %v17416_v39, 16  ;;  %v1138_v34 = vrot.slane %v17426_v27, 3 }
  0x9a   : > { %15721 = vmatprep.subr.bf16.mxu1 %v17898_v1 }
  0x9b   : > { %v1809_v52 = vrot.slane %v1807_v46, 4 }
  0x9c   : > { %15818 = vmatpush3.bf16.msra.mxu0 %v17425_v50  ;;  %v17415_v50 = vld [vmem:[%s17974_s12 + $0x60] sm:$0xff]  }
  0x9d   : > { %15819 = vmatprep.subr.bf16.mxu0 %v17898_v1  ;;  %15722 = vmatpush3.bf16.msra.mxu1 %v17436_v53  ;;  %v1129_v53 = vsel %vm1106_vm2, %v1126_v37, %v1128_v47  ;;  %v1130_v58 = vrot.slane %v17415_v50, 3  ;;  %v1810_v59 = vor.u32 %v1809_v52, %v1806_v51 }
  0x9e   : > { %15540 = vmatmul.mubr.bf16.gmra.mrb[56].mxu1 %v1117_v54  ;;  %15636 = vmatmul.mubr.bf16.gmra.mrb[56].mxu0 %v1748_v55  ;;  %v1802_v54 = vsel %vm1704_vm3, %v1792_v38, %v1801_v48  ;;  %v1813_v55 = vshrl.u32 %v17419_v49, 16  ;;  %v17429_v38 = vld [vmem:[%s17974_s12 + $0x88] sm:$0xff]  }
  0x9f   : > { %15543 = vmatprep.mubr.msk.bf16.mxu1 %vm17899_vm0, %v17898_v1  ;;  %15639 = vmatprep.mubr.msk.bf16.mxu0 %vm17899_vm0, %v17898_v1  ;;  %v1131_v0 = vsel %vm1106_vm2, %v1128_v47, %v1130_v58  ;;  %v1811_v2 = vsel %vm1704_vm3, %v1801_v48, %v1810_v59  ;;  %v1133_v10 = vsel %vm1106_vm2, %v1130_v58, %v1132_v5  ;;  %v1140_v45 = vrot.slane %v17429_v38, 3  ;;  %v17431_v48 = vld [vmem:[%s17974_s12 + $0x90] sm:$0xff]  }
  0xa0   : > { %15820 = vmatpush3.bf16.msra.mxu0 %v17433_v56  ;;  %15907 = vmatprep.subr.bf16.mxu1 %v17898_v1  ;;  %v1816_v56 = vshll.u32 %v17419_v49, 16 }
  0xa1   : > { %15821 = vmatprep.subr.bf16.mxu0 %v17898_v1  ;;  %v1141_v51 = vsel %vm1106_vm2, %v1138_v34, %v1140_v45 }
  0xa2   : > { %v1818_v62 = vrot.slane %v1816_v56, 4 }
  0xa4   : > { %15822 = vmatpush3.bf16.msra.mxu0 %v17439_v61  ;;  %v1815_v61 = vrot.slane %v1813_v55, 3 }
  0xa5   : > { %16007 = vmatprep.subr.bf16.mxu0 %v17898_v1 }
  0xa6   : > { %15544 = vmatmul.mubr.bf16.gmra.mrb[60].mxu1 %v1119_v3  ;;  %15640 = vmatmul.mubr.bf16.gmra.mrb[60].mxu0 %v1757_v4  ;;  %v1825_v3 = vshll.u32 %v17421_v57, 16  ;;  %v17424_v4 = vld [vmem:[%s17974_s12 + $0x70] sm:$0xff]   ;;  %v1819_v6 = vor.u32 %v1818_v62, %v1815_v61  ;;  %v17434_v57 = vld [vmem:[%s17974_s12 + $0x98] sm:$0xff]  }
  0xa7   : > { %15547 = vmatprep.mubr.msk.bf16.mxu1 %vm17899_vm0, %v17898_v1  ;;  %15643 = vmatprep.mubr.msk.bf16.mxu0 %vm17899_vm0, %v17898_v1  ;;  %v1831_v9 = vshrl.u32 %v17424_v4, 16  ;;  %v17438_v61 = vld [vmem:[%s17974_s12 + $0x98] sm:$0xff]  }
  0xa8   : > { %v1827_v8 = vrot.slane %v1825_v3, 4  ;;  %v1820_v11 = vsel %vm1704_vm3, %v1810_v59, %v1819_v6 }
  0xa9   : > { %v1833_v16 = vrot.slane %v1831_v9, 3  ;;  %v1879_v9 = vshll.u32 %v17438_v61, 16 }
  0xaa   : > { %v1828_v15 = vor.u32 %v1827_v8, %v1824_v36  ;;  %v1144_v36 = vrot.slane %v17434_v57, 3  ;;  %v1876_v8 = vshrl.u32 %v17438_v61, 16 }
  0xac   : > { %v1829_v21 = vsel %vm1704_vm3, %v1819_v6, %v1828_v15 }
  0xae   : > { %15548 = vmatmul.mubr.bf16.gmra.mrb[64].mxu1 %v1121_v12  ;;  %15644 = vmatmul.mubr.bf16.gmra.mrb[64].mxu0 %v1766_v13  ;;  %v1834_v12 = vshll.u32 %v17424_v4, 16  ;;  %v17427_v13 = vld [vmem:[%s17974_s12 + $0x78] sm:$0xff]  }
  0xaf   : > { %15551 = vmatprep.mubr.msk.bf16.mxu1 %vm17899_vm0, %v17898_v1  ;;  %15647 = vmatprep.mubr.msk.bf16.mxu0 %vm17899_vm0, %v17898_v1  ;;  %v1840_v19 = vshrl.u32 %v17427_v13, 16  ;;  %v1843_v22 = vshll.u32 %v17427_v13, 16  ;;  %v17440_v13 = vld [vmem:[%s17974_s12 + $0xa0] sm:$0x3f]  }
  0xb0   : > { %v1836_v18 = vrot.slane %v1834_v12, 4  ;;  %v18376_v12 = vld [vmem:[%s17974_s12 + $0xa0] sm:$0x1f]  }
  0xb1   : > { %v1842_v26 = vrot.slane %v1840_v19, 3  ;;  %v1845_v28 = vrot.slane %v1843_v22, 4 }
  0xb2   : > { %v1837_v25 = vor.u32 %v1836_v18, %v1833_v16 }
  0xb3   : > { %v1846_v35 = vor.u32 %v1845_v28, %v1842_v26  ;;  %v1888_v26 = vshll.u32 %v17440_v13, 16  ;;  %v17441_v28 = vld [vmem:[%s17974_s12 + $0x8] sm:$0xf8]  }
  0xb4   : > { %v1838_v31 = vsel %vm1704_vm3, %v1828_v15, %v1837_v25 }
  0xb5   : > { %v1847_v42 = vsel %vm1704_vm3, %v1837_v25, %v1846_v35  ;;  %v1885_v25 = vshrl.u32 %v17440_v13, 16 }
  0xb6   : > { %15552 = vmatmul.mubr.bf16.gmra.mrb[68].mxu1 %v1123_v23  ;;  %15648 = vmatmul.mubr.bf16.gmra.mrb[68].mxu0 %v1775_v24  ;;  %v17430_v23 = vld [vmem:[%s17974_s12 + $0x80] sm:$0xff]   ;;  %v1136_v24 = vrot.slane %v17423_v17, 3 }
  0xb7   : > { %15555 = vmatprep.mubr.msk.bf16.mxu1 %vm17899_vm0, %v17898_v1  ;;  %15651 = vmatprep.mubr.msk.bf16.mxu0 %vm17899_vm0, %v17898_v1  ;;  %v1849_v29 = vshrl.u32 %v17430_v23, 16 }
  0xb8   : > { %v1137_v30 = vsel %vm1106_vm2, %v1134_v14, %v1136_v24  ;;  %v1139_v41 = vsel %vm1106_vm2, %v1136_v24, %v1138_v34  ;;  %v1146_v24 = vrot.slane %v18376_v12, 3 }
  0xb9   : > { %v1851_v37 = vrot.slane %v1849_v29, 3 }
  0xbe   : > { %15556 = vmatmul.mubr.bf16.gmra.mrb[72].mxu1 %v1125_v32  ;;  %15652 = vmatmul.mubr.bf16.gmra.mrb[72].mxu0 %v1784_v33  ;;  %v1852_v32 = vshll.u32 %v17430_v23, 16  ;;  %v17432_v33 = vld [vmem:[%s17974_s12 + $0x88] sm:$0xff]  }
  0xbf   : > { %15559 = vmatprep.mubr.msk.bf16.mxu1 %vm17899_vm0, %v17898_v1  ;;  %15655 = vmatprep.mubr.msk.bf16.mxu0 %vm17899_vm0, %v17898_v1  ;;  %v1858_v40 = vshrl.u32 %v17432_v33, 16 }
  0xc0   : > { %v1854_v39 = vrot.slane %v1852_v32, 4 }
  0xc1   : > { %v1860_v47 = vrot.slane %v1858_v40, 3  ;;  %v1890_v40 = vrot.slane %v1888_v26, 4 }
  0xc2   : > { %v1855_v46 = vor.u32 %v1854_v39, %v1851_v37  ;;  %v1147_v37 = vsel %vm1106_vm2, %v1144_v36, %v1146_v24  ;;  %v1887_v39 = vrot.slane %v1885_v25, 3  ;;  %v17445_v25 = vld [vmem:[%s17974_s12 + $0xc] sm:$0xff]  }
  0xc4   : > { %v1856_v52 = vsel %vm1704_vm3, %v1846_v35, %v1855_v46 }
  0xc6   : > { %15560 = vmatmul.mubr.bf16.gmra.mrb[76].mxu1 %v1127_v43  ;;  %15656 = vmatmul.mubr.bf16.gmra.mrb[76].mxu0 %v1793_v44  ;;  %v1861_v43 = vshll.u32 %v17432_v33, 16  ;;  %v17435_v44 = vld [vmem:[%s17974_s12 + $0x90] sm:$0xff]  }
  0xc7   : > { %15563 = vmatprep.mubr.msk.bf16.mxu1 %vm17899_vm0, %v17898_v1  ;;  %15659 = vmatprep.mubr.msk.bf16.mxu0 %vm17899_vm0, %v17898_v1  ;;  %v1867_v50 = vshrl.u32 %v17435_v44, 16 }
  0xc8   : > { %v1863_v49 = vrot.slane %v1861_v43, 4  ;;  %v2450_v43 = vshrl.u32 %v17441_v28, 16 }
  0xc9   : > { %v1869_v56 = vrot.slane %v1867_v50, 3 }
  0xca   : > { %v1864_v55 = vor.u32 %v1863_v49, %v1860_v47  ;;  %v2452_v50 = vrot.slane %v2450_v43, 3 }
  0xcc   : > { %v1865_v4 = vsel %vm1704_vm3, %v1855_v46, %v1864_v55  ;;  %v1891_v46 = vor.u32 %v1890_v40, %v1887_v39  ;;  %v17457_v40 = vld [vmem:[%s20936_s1 + $0x150] sm:$0xff]  }
  0xce   : > { %15564 = vmatmul.mubr.bf16.gmra.mrb[80].mxu1 %v1129_v53  ;;  %15660 = vmatmul.mubr.bf16.gmra.mrb[80].mxu0 %v1802_v54  ;;  %v1870_v53 = vshll.u32 %v17435_v44, 16  ;;  %v1142_v54 = vrot.slane %v17431_v48, 3  ;;  %v2453_v44 = vshll.u32 %v17441_v28, 16 }
  0xcf   : > { %15567 = vmatprep.mubr.msk.bf16.mxu1 %vm17899_vm0, %v17898_v1  ;;  %15663 = vmatprep.mubr.msk.bf16.mxu0 %vm17899_vm0, %v17898_v1 }
  0xd0   : > { %v1872_v60 = vrot.slane %v1870_v53, 4  ;;  %v1143_v3 = vsel %vm1106_vm2, %v1140_v45, %v1142_v54  ;;  %v1145_v18 = vsel %vm1106_vm2, %v1142_v54, %v1144_v36  ;;  %v17443_v36 = vld [vmem:[%s20936_s1 + $0x140] sm:$0xff]  }
  0xd2   : > { %v1873_v7 = vor.u32 %v1872_v60, %v1869_v56  ;;  %v17444_v60 = vld [vmem:[%s17974_s12 + $0x18] sm:$0xff]  }
  0xd4   : > { %v1874_v19 = vsel %vm1704_vm3, %v1864_v55, %v1873_v7 }
  0xd6   : > { %15568 = vmatmul.mubr.bf16.gmra.mrb[84].mxu1 %v1131_v0  ;;  %15664 = vmatmul.mubr.bf16.gmra.mrb[84].mxu0 %v1811_v2 }
  0xd7   : > { %15571 = vmatprep.mubr.msk.bf16.mxu1 %vm17899_vm0, %v17898_v1  ;;  %15667 = vmatprep.mubr.msk.bf16.mxu0 %vm17899_vm0, %v17898_v1 }
  0xde   : > { %15572 = vmatmul.mubr.bf16.gmra.mrb[88].mxu1 %v1133_v10  ;;  %15668 = vmatmul.mubr.bf16.gmra.mrb[88].mxu0 %v1820_v11 }
  0xdf   : > { %15575 = vmatprep.mubr.msk.bf16.mxu1 %vm17899_vm0, %v17898_v1  ;;  %15671 = vmatprep.mubr.msk.bf16.mxu0 %vm17899_vm0, %v17898_v1 }
  0xe6   : > { %15576 = vmatmul.mubr.bf16.gmra.mrb[92].mxu1 %v1135_v20  ;;  %15672 = vmatmul.mubr.bf16.gmra.mrb[92].mxu0 %v1829_v21  ;;  %v1878_v20 = vrot.slane %v1876_v8, 3  ;;  %v1881_v21 = vrot.slane %v1879_v9, 4 }
  0xe7   : > { %15579 = vmatprep.mubr.msk.bf16.mxu1 %vm17899_vm0, %v17898_v1  ;;  %15675 = vmatprep.mubr.msk.bf16.mxu0 %vm17899_vm0, %v17898_v1 }
  0xe8   : > { %v1882_v27 = vor.u32 %v1881_v21, %v1878_v20 }
  0xea   : > { %v1883_v38 = vsel %vm1704_vm3, %v1873_v7, %v1882_v27  ;;  %v1892_v57 = vsel %vm1704_vm3, %v1882_v27, %v1891_v46  ;;  %v17447_v7 = vld [vmem:[%s17974_s12 + $0x20] sm:$0xff]   ;;  %v17450_v27 = vld [vmem:[%s17974_s12 + $0x28] sm:$0xff]  }
  0xeb   : > { %v2479_v21 = vshll.u32 %v17447_v7, 16 }
  0xee   : > { %15580 = vmatmul.mubr.bf16.gmra.mrb[96].mxu1 %v1137_v30  ;;  %15676 = vmatmul.mubr.bf16.gmra.mrb[96].mxu0 %v1838_v31  ;;  %v17442_v31 = vld [vmem:[%s17974_s12 + $0x10] sm:$0xff]  }
  0xef   : > { %15583 = vmatprep.mubr.msk.bf16.mxu1 %vm17899_vm0, %v17898_v1  ;;  %15679 = vmatprep.mubr.msk.bf16.mxu0 %vm17899_vm0, %v17898_v1  ;;  %v2458_v45 = vshrl.u32 %v17442_v31, 16  ;;  %v2461_v47 = vshll.u32 %v17442_v31, 16 }
  0xf6   : > { %15584 = vmatmul.mubr.bf16.gmra.mrb[100].mxu1 %v1139_v41  ;;  %15680 = vmatmul.mubr.bf16.gmra.mrb[100].mxu0 %v1847_v42 }
  0xf7   : > { %15587 = vmatprep.mubr.msk.bf16.mxu1 %vm17899_vm0, %v17898_v1  ;;  %15683 = vmatprep.mubr.msk.bf16.mxu0 %vm17899_vm0, %v17898_v1 }
  0xfe   : > { %15588 = vmatmul.mubr.bf16.gmra.mrb[104].mxu1 %v1141_v51  ;;  %15684 = vmatmul.mubr.bf16.gmra.mrb[104].mxu0 %v1856_v52  ;;  %v2455_v51 = vrot.slane %v2453_v44, 4  ;;  %v2460_v52 = vrot.slane %v2458_v45, 3  ;;  %v2488_v44 = vshll.u32 %v17450_v27, 16  ;;  %v17454_v45 = vld [vmem:[%s20936_s1 + $0x188] sm:$0xff]  }
  0xff   : > { %15591 = vmatprep.mubr.msk.bf16.mxu1 %vm17899_vm0, %v17898_v1  ;;  %15687 = vmatprep.mubr.msk.bf16.mxu0 %vm17899_vm0, %v17898_v1 }
 0x101   : > { %v18362_v58 = vpop.f32.mrb[0].mxu0  ;;  %v823_v59 = vpop.f32.mrb[0].mxu1 }
 0x102   : > { %923 = vst [vmem:[#allocation2 + $0xb0] sm:$0xff] %v823_v59  ;;  %v15425_v62 = vpop.f32.mrb[1].mxu0  ;;  %v15469_v63 = vpop.f32.mrb[1].mxu1  ;;  %v2463_v59 = vrot.slane %v2461_v47, 4 }
 0x103   : > { %v18365_v0 = vpop.f32.mrb[2].mxu0  ;;  %v826_v2 = vpop.f32.mrb[2].mxu1  ;;  %v2456_v63 = vor.u32 %v2455_v51, %v2452_v50  ;;  %v17465_v50 = vld [vmem:[%s20936_s1 + $0x158] sm:$0xff]  }
 0x104   : > { %924 = vst [vmem:[#allocation2 + $0xb8] sm:$0xff] %v826_v2  ;;  %v15426_v5 = vpop.f32.mrb[3].mxu0  ;;  %v15470_v6 = vpop.f32.mrb[3].mxu1  ;;  %v2464_v2 = vor.u32 %v2463_v59, %v2460_v52  ;;  %v2490_v59 = vrot.slane %v2488_v44, 4 }
 0x106   : > { %15592 = vmatmul.mubr.bf16.gmra.mrb[108].mxu1 %v1143_v3  ;;  %15688 = vmatmul.mubr.bf16.gmra.mrb[108].mxu0 %v1865_v4  ;;  %v2467_v3 = vshrl.u32 %v17444_v60, 16  ;;  %v2470_v4 = vshll.u32 %v17444_v60, 16  ;;  %v2465_v13 = vsel %vm1704_vm3, %v2456_v63, %v2464_v2  ;;  %v17460_v63 = vld [vmem:[%s20936_s1 + $0x190] sm:$0xff]  }
 0x107   : > { %15595 = vmatprep.mubr.msk.bf16.mxu1 %vm17899_vm0, %v17898_v1  ;;  %15691 = vmatprep.mubr.msk.bf16.mxu0 %vm17899_vm0, %v17898_v1 }
 0x109   : > { %v18373_v10 = vpop.f32.mrb[4].mxu0  ;;  %v831_v11 = vpop.f32.mrb[4].mxu1 }
 0x10a   : > { %925 = vst [vmem:[#allocation2 + $0xc0] sm:$0xff] %v831_v11  ;;  %v15429_v14 = vpop.f32.mrb[5].mxu0  ;;  %v15473_v15 = vpop.f32.mrb[5].mxu1 }
 0x10b   : > { %v18379_v16 = vpop.f32.mrb[6].mxu0  ;;  %v834_v17 = vpop.f32.mrb[6].mxu1  ;;  %v2469_v14 = vrot.slane %v2467_v3, 3  ;;  %v2472_v15 = vrot.slane %v2470_v4, 4  ;;  %v17455_v3 = vld [vmem:[%s17974_s12 + $0x38] sm:$0xff]   ;;  %v17471_v4 = vld [vmem:[%s20936_s1 + $0x160] sm:$0xff]  }
 0x10c   : > { %926 = vst [vmem:[#allocation2 + $0xc8] sm:$0xff] %v834_v17  ;;  %v15430_v22 = vpop.f32.mrb[7].mxu0  ;;  %v15474_v23 = vpop.f32.mrb[7].mxu1 }
 0x10d   : > { %v2473_v20 = vor.u32 %v2472_v15, %v2469_v14  ;;  %v17449_v22 = vld [vmem:[%s20936_s1 + $0x148] sm:$0xff]  }
 0x10e   : > { %15596 = vmatmul.mubr.bf16.gmra.mrb[112].mxu1 %v1145_v18  ;;  %15692 = vmatmul.mubr.bf16.gmra.mrb[112].mxu0 %v1874_v19  ;;  %v2476_v19 = vshrl.u32 %v17447_v7, 16  ;;  %v17479_v14 = vld [vmem:[%s20936_s1 + $0x168] sm:$0xff]  }
 0x10f   : > { %15599 = vmatprep.mubr.msk.bf16.mxu1 %vm17899_vm0, %v17898_v1  ;;  %15695 = vmatprep.mubr.msk.bf16.mxu0 %vm17899_vm0, %v17898_v1 }
 0x110   : > { %v2478_v26 = vrot.slane %v2476_v19, 3 }
 0x111   : > { %v18389_v29 = vpop.f32.mrb[8].mxu0  ;;  %v839_v30 = vpop.f32.mrb[8].mxu1 }
 0x112   : > { %927 = vst [vmem:[#allocation2 + $0xd0] sm:$0xff] %v839_v30  ;;  %v15433_v32 = vpop.f32.mrb[9].mxu0  ;;  %v15477_v33 = vpop.f32.mrb[9].mxu1 }
 0x113   : > { %v18392_v34 = vpop.f32.mrb[10].mxu0  ;;  %v842_v35 = vpop.f32.mrb[10].mxu1  ;;  %v2474_v33 = vsel %vm1704_vm3, %v2464_v2, %v2473_v20 }
 0x114   : > { %928 = vst [vmem:[#allocation2 + $0xd8] sm:$0xff] %v842_v35  ;;  %v15434_v41 = vpop.f32.mrb[11].mxu0  ;;  %v15478_v42 = vpop.f32.mrb[11].mxu1  ;;  %v17446_v35 = vld [vmem:[%s20936_s1 + $0x180] sm:$0xff]  }
 0x115   : > { %v2485_v41 = vshrl.u32 %v17450_v27, 16  ;;  %v17452_v42 = vld [vmem:[%s17974_s12 + $0x30] sm:$0xff]  }
 0x116   : > { %15600 = vmatmul.mubr.bf16.gmra.mrb[116].mxu1 %v1147_v37  ;;  %15696 = vmatmul.mubr.bf16.gmra.mrb[116].mxu0 %v1883_v38  ;;  %v2481_v37 = vrot.slane %v2479_v21, 4  ;;  %v2497_v2 = vshll.u32 %v17452_v42, 16  ;;  %v2503_v21 = vshrl.u32 %v17455_v3, 16  ;;  %v17485_v27 = vld [vmem:[%s20936_s1 + $0x170] sm:$0xff]  }
 0x117   : > { %15603 = vmatprep.mubr.msk.bf16.mxu1 %vm17899_vm0, %v17898_v1  ;;  %15699 = vmatprep.mubr.msk.bf16.mxu0 %vm17899_vm0, %v17898_v1 }
 0x118   : > { %v2482_v43 = vor.u32 %v2481_v37, %v2478_v26  ;;  %v17474_v26 = vld [vmem:[%s20936_s1 + $0x1a0] sm:$0xff]   ;;  %v2505_v44 = vrot.slane %v2503_v21, 3 }
 0x119   : > { %v18400_v48 = vpop.f32.mrb[12].mxu0  ;;  %v847_v49 = vpop.f32.mrb[12].mxu1  ;;  %v17458_v37 = vld [vmem:[%s17974_s12 + $0x40] sm:$0xff]  }
 0x11a   : > { %929 = vst [vmem:[#allocation2 + $0xe0] sm:$0xff] %v847_v49  ;;  %v15437_v53 = vpop.f32.mrb[13].mxu0  ;;  %v15481_v54 = vpop.f32.mrb[13].mxu1  ;;  %v17448_v49 = vld [vmem:[%s17974_s12 + $0x14] sm:$0xff]  }
 0x11b   : > { %v18402_v55 = vpop.f32.mrb[14].mxu0  ;;  %v850_v56 = vpop.f32.mrb[14].mxu1 }
 0x11c   : > { %930 = vst [vmem:[#allocation2 + $0xe8] sm:$0xff] %v850_v56  ;;  %v15438_v61 = vpop.f32.mrb[15].mxu0  ;;  %v15482_v62 = vpop.f32.mrb[15].mxu1  ;;  %v2483_v56 = vsel %vm1704_vm3, %v2473_v20, %v2482_v43 }
 0x11d   : > { %v2494_v62 = vshrl.u32 %v17452_v42, 16 }
 0x11e   : > { %15604 = vmatmul.mubr.bf16.gmra.mrb[120].mxu1 %v1146_v24  ;;  %15700 = vmatmul.mubr.bf16.gmra.mrb[120].mxu0 %v1892_v57  ;;  %v2487_v57 = vrot.slane %v2485_v41, 3 }
 0x11f   : > { %15703 = vmatprep.mubr.msk.bf16.mxu0 %vm17899_vm0, %v17898_v1  ;;  %15723 = vmatprep.mubr.msk.bf16.mxu1 %vm17899_vm0, %v17898_v1 }
 0x121   : > { %v18410_v5 = vpop.f32.mrb[16].mxu0  ;;  %v855_v6 = vpop.f32.mrb[16].mxu1 }
 0x122   : > { %931 = vst [vmem:[#allocation2 + $0xf0] sm:$0xff] %v855_v6  ;;  %v15441_v8 = vpop.f32.mrb[17].mxu0  ;;  %v15485_v9 = vpop.f32.mrb[17].mxu1  ;;  %v2491_v6 = vor.u32 %v2490_v59, %v2487_v57 }
 0x123   : > { %v18416_v11 = vpop.f32.mrb[18].mxu0  ;;  %v858_v12 = vpop.f32.mrb[18].mxu1  ;;  %v17451_v9 = vld [vmem:[%s17974_s12 + $0x1c] sm:$0xff]  }
 0x124   : > { %932 = vst [vmem:[#allocation2 + $0xf8] sm:$0xff] %v858_v12  ;;  %v15442_v17 = vpop.f32.mrb[19].mxu0  ;;  %v15486_v18 = vpop.f32.mrb[19].mxu1  ;;  %v2496_v12 = vrot.slane %v2494_v62, 3  ;;  %v2492_v20 = vsel %vm1704_vm3, %v2482_v43, %v2491_v6 }
 0x126   : > { %15704 = vmatmul.mubr.bf16.gmra.mrb[124].mxu0 %v1891_v46  ;;  %15724 = vmatmul.mubr.bf16.vlgmr.msra.gmra.mrb[124].mxu1 %v2465_v13  ;;  %v2499_v13 = vrot.slane %v2497_v2, 4 }
 0x127   : > { %15908 = vmatpush3.bf16.msra.mxu1 %v17443_v36  ;;  %15727 = vmatprep.mubr.msk.bf16.mxu1 %vm17899_vm0, %v17898_v1  ;;  %v17468_v36 = vld [vmem:[%s20936_s1 + $0x198] sm:$0xff]  }
 0x128   : > { %15823 = vmatprep.mubr.msk.bf16.mxu0 %vm17899_vm0, %v17898_v1  ;;  %15909 = vmatprep.subr.bf16.mxu1 %v17898_v1 }
 0x129   : > { %v18427_v23 = vpop.f32.mrb[20].mxu0  ;;  %v863_v24 = vpop.f32.mrb[20].mxu1 }
 0x12a   : > { %933 = vst [vmem:[#allocation2 + $0x100] sm:$0xff] %v863_v24  ;;  %v15445_v28 = vpop.f32.mrb[21].mxu0  ;;  %v15489_v30 = vpop.f32.mrb[21].mxu1 }
 0x12b   : > { %v18431_v31 = vpop.f32.mrb[22].mxu0  ;;  %v866_v32 = vpop.f32.mrb[22].mxu1  ;;  %15910 = vmatpush3.bf16.msra.mxu1 %v17449_v22  ;;  %v2506_v22 = vshll.u32 %v17455_v3, 16  ;;  %v17482_v28 = vld [vmem:[%s20936_s1 + $0x1a8] sm:$0xff]   ;;  %v2500_v30 = vor.u32 %v2499_v13, %v2496_v12 }
 0x12c   : > { %934 = vst [vmem:[#allocation2 + $0x108] sm:$0xff] %v866_v32  ;;  %v15446_v38 = vpop.f32.mrb[23].mxu0  ;;  %v15490_v39 = vpop.f32.mrb[23].mxu1  ;;  %15911 = vmatprep.subr.bf16.mxu1 %v17898_v1  ;;  %v17453_v32 = vld [vmem:[%s17974_s12 + $0x24] sm:$0xff]  }
 0x12d   : > { %v17493_v38 = vld [vmem:[%s20936_s1 + $0x178] sm:$0xff]   ;;  %v2501_v43 = vsel %vm1704_vm3, %v2491_v6, %v2500_v30 }
 0x12e   : > { %15728 = vmatmul.mubr.bf16.gmra.mrb[128].mxu1 %v2474_v33  ;;  %15824 = vmatmul.mubr.bf16.vlgmr.msra.gmra.mrb[128].mxu0 %v17445_v25 }
 0x12f   : > { %16008 = vmatpush3.bf16.msra.mxu0 %v17446_v35  ;;  %15731 = vmatprep.mubr.msk.bf16.mxu1 %vm17899_vm0, %v17898_v1 }
 0x130   : > { %15827 = vmatprep.mubr.msk.bf16.mxu0 %vm17899_vm0, %v17898_v1  ;;  %16009 = vmatprep.subr.bf16.mxu0 %v17898_v1 }
 0x131   : > { %v18450_v46 = vpop.f32.mrb[24].mxu0  ;;  %v871_v47 = vpop.f32.mrb[24].mxu1  ;;  %15912 = vmatpush3.bf16.msra.mxu1 %v17457_v40 }
 0x132   : > { %935 = vst [vmem:[#allocation2 + $0x110] sm:$0xff] %v871_v47  ;;  %v15449_v51 = vpop.f32.mrb[25].mxu0  ;;  %v15493_v52 = vpop.f32.mrb[25].mxu1  ;;  %15913 = vmatprep.subr.bf16.mxu1 %v17898_v1 }
 0x133   : > { %v18457_v53 = vpop.f32.mrb[26].mxu0  ;;  %v874_v54 = vpop.f32.mrb[26].mxu1  ;;  %16010 = vmatpush3.bf16.msra.mxu0 %v17454_v45  ;;  %v2508_v45 = vrot.slane %v2506_v22, 4  ;;  %v2512_v51 = vshrl.u32 %v17458_v37, 16 }
 0x134   : > { %936 = vst [vmem:[#allocation2 + $0x118] sm:$0xff] %v874_v54  ;;  %v15450_v60 = vpop.f32.mrb[27].mxu0  ;;  %v15494_v61 = vpop.f32.mrb[27].mxu1  ;;  %16011 = vmatprep.subr.bf16.mxu0 %v17898_v1  ;;  %v2515_v54 = vshll.u32 %v17458_v37, 16 }
 0x135   : > { %15914 = vmatpush3.bf16.msra.mxu1 %v17465_v50  ;;  %v17490_v50 = vld [vmem:[%s20936_s1 + $0x1b0] sm:$0xff]   ;;  %v2509_v52 = vor.u32 %v2508_v45, %v2505_v44  ;;  %v2514_v61 = vrot.slane %v2512_v51, 3 }
 0x136   : > { %15732 = vmatmul.mubr.bf16.gmra.mrb[132].mxu1 %v2483_v56  ;;  %15828 = vmatmul.mubr.bf16.gmra.mrb[132].mxu0 %v17448_v49  ;;  %v17496_v56 = vld [vmem:[%s20936_s1 + $0x1b8] sm:$0xff]   ;;  %v17456_v60 = vld [vmem:[%s17974_s12 + $0x2c] sm:$0xff]   ;;  %v2517_v6 = vrot.slane %v2515_v54, 4 }
 0x137   : > { %15735 = vmatprep.mubr.msk.bf16.mxu1 %vm17899_vm0, %v17898_v1  ;;  %15831 = vmatprep.mubr.msk.bf16.mxu0 %vm17899_vm0, %v17898_v1 }
 0x138   : > { %16012 = vmatpush3.bf16.msra.mxu0 %v17460_v63  ;;  %15915 = vmatprep.subr.bf16.mxu1 %v17898_v1  ;;  %v2518_v12 = vor.u32 %v2517_v6, %v2514_v61 }
 0x139   : > { %v18476_v7 = vpop.f32.mrb[28].mxu0  ;;  %v879_v8 = vpop.f32.mrb[28].mxu1  ;;  %16013 = vmatprep.subr.bf16.mxu0 %v17898_v1  ;;  %15916 = vmatpush3.bf16.msra.mxu1 %v17471_v4  ;;  %v2510_v4 = vsel %vm1704_vm3, %v2500_v30, %v2509_v52 }
 0x13a   : > { %937 = vst [vmem:[#allocation2 + $0x120] sm:$0xff] %v879_v8  ;;  %v15453_v15 = vpop.f32.mrb[29].mxu0  ;;  %v15497_v17 = vpop.f32.mrb[29].mxu1  ;;  %15917 = vmatprep.subr.bf16.mxu1 %v17898_v1 }
 0x13b   : > { %v18484_v18 = vpop.f32.mrb[30].mxu0  ;;  %v882_v19 = vpop.f32.mrb[30].mxu1  ;;  %v17463_v15 = vld [vmem:[%s17974_s12 + $0x50] sm:$0xff]  }
 0x13c   : > { %938 = vst [vmem:[#allocation2 + $0x128] sm:$0xff] %v882_v19  ;;  %v15454_v24 = vpop.f32.mrb[31].mxu0  ;;  %v15498_v25 = vpop.f32.mrb[31].mxu1  ;;  %16014 = vmatpush3.bf16.msra.mxu0 %v17468_v36  ;;  %v17461_v36 = vld [vmem:[%s17974_s12 + $0x48] sm:$0xff]  }
 0x13d   : > { %16015 = vmatprep.subr.bf16.mxu0 %v17898_v1  ;;  %15918 = vmatpush3.bf16.msra.mxu1 %v17479_v14  ;;  %v2521_v13 = vshrl.u32 %v17461_v36, 16  ;;  %v2524_v14 = vshll.u32 %v17461_v36, 16  ;;  %v17459_v24 = vld [vmem:[%s17974_s12 + $0x34] sm:$0xff]   ;;  %v17464_v36 = vld [vmem:[%s17974_s12 + $0x44] sm:$0xff]  }
 0x13e   : > { %15736 = vmatmul.mubr.bf16.gmra.mrb[136].mxu1 %v2492_v20  ;;  %15832 = vmatmul.mubr.bf16.gmra.mrb[136].mxu0 %v17451_v9 }
 0x13f   : > { %15739 = vmatprep.mubr.msk.bf16.mxu1 %vm17899_vm0, %v17898_v1  ;;  %15835 = vmatprep.mubr.msk.bf16.mxu0 %vm17899_vm0, %v17898_v1  ;;  %v2526_v30 = vrot.slane %v2524_v14, 4 }
 0x140   : > { %16016 = vmatpush3.bf16.msra.mxu0 %v17474_v26  ;;  %15919 = vmatprep.subr.bf16.mxu1 %v17898_v1 }
 0x141   : > { %v18503_v33 = vpop.f32.mrb[32].mxu0  ;;  %v887_v35 = vpop.f32.mrb[32].mxu1  ;;  %16017 = vmatprep.subr.bf16.mxu0 %v17898_v1  ;;  %15920 = vmatpush3.bf16.msra.mxu1 %v17485_v27  ;;  %v2519_v27 = vsel %vm1704_vm3, %v2509_v52, %v2518_v12 }
 0x142   : > { %939 = vst [vmem:[#allocation2 + $0x130] sm:$0xff] %v887_v35  ;;  %v15457_v39 = vpop.f32.mrb[33].mxu0  ;;  %v15501_v40 = vpop.f32.mrb[33].mxu1  ;;  %15921 = vmatprep.subr.bf16.mxu1 %v17898_v1 }
 0x143   : > { %v18511_v41 = vpop.f32.mrb[34].mxu0  ;;  %v890_v42 = vpop.f32.mrb[34].mxu1  ;;  %v2533_v39 = vshll.u32 %v17463_v15, 16 }
 0x144   : > { %940 = vst [vmem:[#allocation2 + $0x138] sm:$0xff] %v890_v42  ;;  %v15458_v47 = vpop.f32.mrb[35].mxu0  ;;  %v15502_v49 = vpop.f32.mrb[35].mxu1  ;;  %16018 = vmatpush3.bf16.msra.mxu0 %v17482_v28  ;;  %v2523_v28 = vrot.slane %v2521_v13, 3 }
 0x145   : > { %16019 = vmatprep.subr.bf16.mxu0 %v17898_v1  ;;  %15922 = vmatpush3.bf16.msra.mxu1 %v17493_v38  ;;  %v2530_v38 = vshrl.u32 %v17463_v15, 16  ;;  %v2535_v54 = vrot.slane %v2533_v39, 4 }
 0x146   : > { %15740 = vmatmul.mubr.bf16.gmra.mrb[140].mxu1 %v2501_v43  ;;  %15836 = vmatmul.mubr.bf16.gmra.mrb[140].mxu0 %v17453_v32  ;;  %v17462_v43 = vld [vmem:[%s17974_s12 + $0x3c] sm:$0xff]  }
 0x147   : > { %15743 = vmatprep.mubr.msk.bf16.mxu1 %vm17899_vm0, %v17898_v1  ;;  %15839 = vmatprep.mubr.msk.bf16.mxu0 %vm17899_vm0, %v17898_v1  ;;  %v2532_v44 = vrot.slane %v2530_v38, 3 }
 0x148   : > { %16020 = vmatpush3.bf16.msra.mxu0 %v17490_v50  ;;  %16107 = vmatprep.subr.bf16.mxu1 %v17898_v1 }
 0x149   : > { %v18526_v57 = vpop.f32.mrb[36].mxu0  ;;  %v895_v59 = vpop.f32.mrb[36].mxu1  ;;  %16021 = vmatprep.subr.bf16.mxu0 %v17898_v1 }
 0x14a   : > { %941 = vst [vmem:[#allocation2 + $0x140] sm:$0xf] %v895_v59  ;;  %v15461_v62 = vpop.f32.mrb[37].mxu0  ;;  %v15505_v63 = vpop.f32.mrb[37].mxu1 }
 0x14b   : > { %v18530_v2 = vpop.f32.mrb[38].mxu0  ;;  %v898_v3 = vpop.f32.mrb[38].mxu1 }
 0x14c   : > { %v15462_v8 = vpop.f32.mrb[39].mxu0  ;;  %v15506_v9 = vpop.f32.mrb[39].mxu1  ;;  %16022 = vmatpush3.bf16.msra.mxu0 %v17496_v56  ;;  %v17466_v56 = vld [vmem:[%s17974_s12 + $0x58] sm:$0xff]  }
 0x14d   : > { %16207 = vmatprep.subr.bf16.mxu0 %v17898_v1  ;;  %v2539_v63 = vshrl.u32 %v17466_v56, 16  ;;  %v2542_v3 = vshll.u32 %v17466_v56, 16 }
 0x14e   : > { %15744 = vmatmul.mubr.bf16.gmra.mrb[144].mxu1 %v2510_v4  ;;  %15840 = vmatmul.mubr.bf16.gmra.mrb[144].mxu0 %v17456_v60 }
 0x14f   : > { %15747 = vmatprep.mubr.msk.bf16.mxu1 %vm17899_vm0, %v17898_v1  ;;  %15843 = vmatprep.mubr.msk.bf16.mxu0 %vm17899_vm0, %v17898_v1 }
 0x151   : > { %v18540_v17 = vpop.f32.mrb[40].mxu0  ;;  %v1251_v19 = vpop.f32.mrb[40].mxu1 }
 0x152   : > { %v1458_v20 = vadd.f32 %v1251_v19, %v18362_v58  ;;  %v15465_v21 = vpop.f32.mrb[41].mxu0  ;;  %v15525_v22 = vpop.f32.mrb[41].mxu1  ;;  %v2527_v58 = vor.u32 %v2526_v30, %v2523_v28  ;;  %v2541_v19 = vrot.slane %v2539_v63, 3 }
 0x153   : > { %v18544_v25 = vpop.f32.mrb[42].mxu0  ;;  %v1254_v26 = vpop.f32.mrb[42].mxu1  ;;  %v17469_v21 = vld [vmem:[%s17974_s12 + $0x60] sm:$0xff]  }
 0x154   : > { %v1459_v32 = vadd.f32 %v1254_v26, %v18365_v0  ;;  %v15466_v35 = vpop.f32.mrb[43].mxu0  ;;  %v15526_v37 = vpop.f32.mrb[43].mxu1  ;;  %v2528_v52 = vsel %vm1704_vm3, %v2518_v12, %v2527_v58  ;;  %v2548_v28 = vshrl.u32 %v17469_v21, 16  ;;  %v2551_v30 = vshll.u32 %v17469_v21, 16  ;;  %v17473_v21 = vld [vmem:[%s17974_s12 + $0x5c] sm:$0xff]  }
 0x155   : > { %v17467_v37 = vld [vmem:[%s17974_s12 + $0x4c] sm:$0xff]  }
 0x156   : > { %15748 = vmatmul.mubr.bf16.gmra.mrb[148].mxu1 %v2519_v27  ;;  %15844 = vmatmul.mubr.bf16.gmra.mrb[148].mxu0 %v17459_v24 }
 0x157   : > { %15751 = vmatprep.mubr.msk.bf16.mxu1 %vm17899_vm0, %v17898_v1  ;;  %15847 = vmatprep.mubr.msk.bf16.mxu0 %vm17899_vm0, %v17898_v1 }
 0x159   : > { %v1259_v40 = vpop.f32.mrb[44].mxu1  ;;  %v1996_v42 = vpop.f32.mrb[44].mxu0 }
 0x15a   : > { %v1460_v0 = vadd.f32 %v1259_v40, %v18373_v10  ;;  %v2203_v45 = vadd.f32 %v1996_v42, %v1458_v20  ;;  %v15529_v47 = vpop.f32.mrb[45].mxu1  ;;  %v15625_v49 = vpop.f32.mrb[45].mxu0  ;;  %v2536_v10 = vor.u32 %v2535_v54, %v2532_v44  ;;  %v2544_v20 = vrot.slane %v2542_v3, 4 }
 0x15b   : > { %v1262_v50 = vpop.f32.mrb[46].mxu1  ;;  %v1999_v51 = vpop.f32.mrb[46].mxu0  ;;  %v2550_v44 = vrot.slane %v2548_v28, 3 }
 0x15c   : > { %2244 = vst [vmem:[#allocation2] sm:$0xff] %v2203_v45  ;;  %v1461_v59 = vadd.f32 %v1262_v50, %v18379_v16  ;;  %v2204_v60 = vadd.f32 %v1999_v51, %v1459_v32  ;;  %v15530_v61 = vpop.f32.mrb[47].mxu1  ;;  %v15626_v62 = vpop.f32.mrb[47].mxu0  ;;  %v2537_v15 = vsel %vm1704_vm3, %v2527_v58, %v2536_v10  ;;  %v17472_v45 = vld [vmem:[%s17974_s12 + $0x68] sm:$0xff]  }
 0x15d   : > { %v2560_v54 = vshll.u32 %v17472_v45, 16 }
 0x15e   : > { %2245 = vst [vmem:[#allocation2 + $0x8] sm:$0xff] %v2204_v60  ;;  %15752 = vmatmul.mubr.bf16.gmra.mrb[152].mxu1 %v2528_v52  ;;  %15848 = vmatmul.mubr.bf16.gmra.mrb[152].mxu0 %v17462_v43  ;;  %v2557_v52 = vshrl.u32 %v17472_v45, 16  ;;  %v17470_v60 = vld [vmem:[%s17974_s12 + $0x54] sm:$0xff]  }
 0x15f   : > { %15755 = vmatprep.mubr.msk.bf16.mxu1 %vm17899_vm0, %v17898_v1  ;;  %15851 = vmatprep.mubr.msk.bf16.mxu0 %vm17899_vm0, %v17898_v1 }
 0x161   : > { %v1267_v4 = vpop.f32.mrb[48].mxu1  ;;  %v2004_v6 = vpop.f32.mrb[48].mxu0 }
 0x162   : > { %v1462_v16 = vadd.f32 %v1267_v4, %v18389_v29  ;;  %v2205_v8 = vadd.f32 %v2004_v6, %v1460_v0  ;;  %v15533_v9 = vpop.f32.mrb[49].mxu1  ;;  %v15629_v12 = vpop.f32.mrb[49].mxu0  ;;  %v2545_v29 = vor.u32 %v2544_v20, %v2541_v19  ;;  %v2553_v0 = vrot.slane %v2551_v30, 4 }
 0x163   : > { %v1270_v13 = vpop.f32.mrb[50].mxu1  ;;  %v2007_v14 = vpop.f32.mrb[50].mxu0  ;;  %v2559_v6 = vrot.slane %v2557_v52, 3 }
 0x164   : > { %2246 = vst [vmem:[#allocation2 + $0x10] sm:$0xff] %v2205_v8  ;;  %v1463_v22 = vadd.f32 %v1270_v13, %v18392_v34  ;;  %v2206_v24 = vadd.f32 %v2007_v14, %v1461_v59  ;;  %v15534_v26 = vpop.f32.mrb[51].mxu1  ;;  %v15630_v27 = vpop.f32.mrb[51].mxu0  ;;  %v2546_v43 = vsel %vm1704_vm3, %v2536_v10, %v2545_v29 }
 0x166   : > { %2247 = vst [vmem:[#allocation2 + $0x18] sm:$0xff] %v2206_v24  ;;  %15756 = vmatmul.mubr.bf16.gmra.mrb[156].mxu1 %v2537_v15  ;;  %15852 = vmatmul.mubr.bf16.gmra.mrb[156].mxu0 %v17464_v36  ;;  %v2562_v36 = vrot.slane %v2560_v54, 4  ;;  %v17480_v54 = vld [vmem:[%s17974_s12 + $0x80] sm:$0xff]  }
 0x167   : > { %15759 = vmatprep.mubr.msk.bf16.mxu1 %vm17899_vm0, %v17898_v1  ;;  %15855 = vmatprep.mubr.msk.bf16.mxu0 %vm17899_vm0, %v17898_v1 }
 0x169   : > { %v1275_v32 = vpop.f32.mrb[52].mxu1  ;;  %v2012_v35 = vpop.f32.mrb[52].mxu0 }
 0x16a   : > { %v1464_v34 = vadd.f32 %v1275_v32, %v18400_v48  ;;  %v2207_v38 = vadd.f32 %v2012_v35, %v1462_v16  ;;  %v15537_v58 = vpop.f32.mrb[53].mxu1  ;;  %v15633_v39 = vpop.f32.mrb[53].mxu0  ;;  %v2554_v48 = vor.u32 %v2553_v0, %v2550_v44  ;;  %v17475_v16 = vld [vmem:[%s17974_s12 + $0x70] sm:$0xff]   ;;  %v17477_v35 = vld [vmem:[%s17974_s12 + $0x78] sm:$0xff]   ;;  %v17476_v44 = vld [vmem:[%s17974_s12 + $0x64] sm:$0xff]  }
 0x16b   : > { %v1278_v40 = vpop.f32.mrb[54].mxu1  ;;  %v2015_v42 = vpop.f32.mrb[54].mxu0  ;;  %v2566_v14 = vshrl.u32 %v17475_v16, 16  ;;  %v2569_v15 = vshll.u32 %v17475_v16, 16  ;;  %v2575_v39 = vshrl.u32 %v17477_v35, 16 }
 0x16c   : > { %2248 = vst [vmem:[#allocation2 + $0x20] sm:$0xff] %v2207_v38  ;;  %v1465_v47 = vadd.f32 %v1278_v40, %v18402_v55  ;;  %v2208_v49 = vadd.f32 %v2015_v42, %v1463_v22  ;;  %v15538_v50 = vpop.f32.mrb[55].mxu1  ;;  %v15634_v51 = vpop.f32.mrb[55].mxu0  ;;  %v2555_v4 = vsel %vm1704_vm3, %v2545_v29, %v2554_v48  ;;  %v2578_v40 = vshll.u32 %v17477_v35, 16 }
 0x16d   : > { %v2568_v30 = vrot.slane %v2566_v14, 3  ;;  %v2571_v32 = vrot.slane %v2569_v15, 4 }
 0x16e   : > { %2249 = vst [vmem:[#allocation2 + $0x28] sm:$0xff] %v2208_v49  ;;  %15760 = vmatmul.mubr.bf16.gmra.mrb[160].mxu1 %v2546_v43  ;;  %15856 = vmatmul.mubr.bf16.gmra.mrb[160].mxu0 %v17467_v37  ;;  %v2580_v52 = vrot.slane %v2578_v40, 4 }
 0x16f   : > { %15763 = vmatprep.mubr.msk.bf16.mxu1 %vm17899_vm0, %v17898_v1  ;;  %15859 = vmatprep.mubr.msk.bf16.mxu0 %vm17899_vm0, %v17898_v1 }
 0x171   : > { %v1283_v56 = vpop.f32.mrb[56].mxu1  ;;  %v2020_v59 = vpop.f32.mrb[56].mxu0 }
 0x172   : > { %v1466_v55 = vadd.f32 %v1283_v56, %v18410_v5  ;;  %v2209_v61 = vadd.f32 %v2020_v59, %v1464_v34  ;;  %v15541_v62 = vpop.f32.mrb[57].mxu1  ;;  %v15637_v10 = vpop.f32.mrb[57].mxu0  ;;  %v2563_v5 = vor.u32 %v2562_v36, %v2559_v6  ;;  %v17478_v36 = vld [vmem:[%s17974_s12 + $0x6c] sm:$0xff]  }
 0x173   : > { %v1286_v63 = vpop.f32.mrb[58].mxu1  ;;  %v2023_v3 = vpop.f32.mrb[58].mxu0  ;;  %v2587_v62 = vshll.u32 %v17480_v54, 16 }
 0x174   : > { %2250 = vst [vmem:[#allocation2 + $0x30] sm:$0xff] %v2209_v61  ;;  %v1467_v8 = vadd.f32 %v1286_v63, %v18416_v11  ;;  %v2210_v9 = vadd.f32 %v2023_v3, %v1465_v47  ;;  %v15542_v12 = vpop.f32.mrb[59].mxu1  ;;  %v15638_v13 = vpop.f32.mrb[59].mxu0  ;;  %v2564_v28 = vsel %vm1704_vm3, %v2554_v48, %v2563_v5  ;;  %v2577_v48 = vrot.slane %v2575_v39, 3 }
 0x175   : > { %v2584_v61 = vshrl.u32 %v17480_v54, 16  ;;  %v2589_v13 = vrot.slane %v2587_v62, 4 }
 0x176   : > { %2251 = vst [vmem:[#allocation2 + $0x38] sm:$0xff] %v2210_v9  ;;  %15764 = vmatmul.mubr.bf16.gmra.mrb[164].mxu1 %v2555_v4  ;;  %15860 = vmatmul.mubr.bf16.gmra.mrb[164].mxu0 %v17470_v60 }
 0x177   : > { %15767 = vmatprep.mubr.msk.bf16.mxu1 %vm17899_vm0, %v17898_v1  ;;  %15863 = vmatprep.mubr.msk.bf16.mxu0 %vm17899_vm0, %v17898_v1  ;;  %v2586_v12 = vrot.slane %v2584_v61, 3 }
 0x179   : > { %v1291_v19 = vpop.f32.mrb[60].mxu1  ;;  %v2028_v20 = vpop.f32.mrb[60].mxu0 }
 0x17a   : > { %v1468_v11 = vadd.f32 %v1291_v19, %v18427_v23  ;;  %v2211_v22 = vadd.f32 %v2028_v20, %v1466_v55  ;;  %v15545_v24 = vpop.f32.mrb[61].mxu1  ;;  %v15641_v26 = vpop.f32.mrb[61].mxu0  ;;  %v2572_v23 = vor.u32 %v2571_v32, %v2568_v30 }
 0x17b   : > { %v1294_v27 = vpop.f32.mrb[62].mxu1  ;;  %v2031_v29 = vpop.f32.mrb[62].mxu0 }
 0x17c   : > { %2252 = vst [vmem:[#allocation2 + $0x40] sm:$0xff] %v2211_v22  ;;  %v1469_v37 = vadd.f32 %v1294_v27, %v18431_v31  ;;  %v2212_v34 = vadd.f32 %v2031_v29, %v1467_v8  ;;  %v15546_v38 = vpop.f32.mrb[63].mxu1  ;;  %v15642_v58 = vpop.f32.mrb[63].mxu0  ;;  %v2573_v51 = vsel %vm1704_vm3, %v2563_v5, %v2572_v23  ;;  %v17483_v5 = vld [vmem:[%s17974_s12 + $0x88] sm:$0xff]  }
 0x17d   : > { %v17486_v38 = vld [vmem:[%s17974_s12 + $0x90] sm:$0xff]  }
 0x17e   : > { %2253 = vst [vmem:[#allocation2 + $0x48] sm:$0xff] %v2212_v34  ;;  %15768 = vmatmul.mubr.bf16.gmra.mrb[168].mxu1 %v2564_v28  ;;  %15864 = vmatmul.mubr.bf16.gmra.mrb[168].mxu0 %v17473_v21  ;;  %v2593_v21 = vshrl.u32 %v17483_v5, 16  ;;  %v17481_v28 = vld [vmem:[%s17974_s12 + $0x74] sm:$0xff]  }
 0x17f   : > { %15771 = vmatprep.mubr.msk.bf16.mxu1 %vm17899_vm0, %v17898_v1  ;;  %15867 = vmatprep.mubr.msk.bf16.mxu0 %vm17899_vm0, %v17898_v1 }
 0x181   : > { %v1299_v42 = vpop.f32.mrb[64].mxu1  ;;  %v2036_v43 = vpop.f32.mrb[64].mxu0 }
 0x182   : > { %v1470_v31 = vadd.f32 %v1299_v42, %v18450_v46  ;;  %v2213_v0 = vadd.f32 %v2036_v43, %v1468_v11  ;;  %v15549_v45 = vpop.f32.mrb[65].mxu1  ;;  %v15645_v47 = vpop.f32.mrb[65].mxu0  ;;  %v2581_v46 = vor.u32 %v2580_v52, %v2577_v48  ;;  %v2596_v11 = vshll.u32 %v17483_v5, 16 }
 0x183   : > { %v1302_v49 = vpop.f32.mrb[66].mxu1  ;;  %v2039_v50 = vpop.f32.mrb[66].mxu0  ;;  %v2602_v42 = vshrl.u32 %v17486_v38, 16  ;;  %v2605_v43 = vshll.u32 %v17486_v38, 16  ;;  %v1439_v38 = vld [vmem:[#allocation2 + $0xb0] sm:$0xff] }
 0x184   : > { %2254 = vst [vmem:[#allocation2 + $0x50] sm:$0xff] %v2213_v0  ;;  %v1471_v56 = vadd.f32 %v1302_v49, %v18457_v53  ;;  %v2214_v59 = vadd.f32 %v2039_v50, %v1469_v37  ;;  %v15550_v60 = vpop.f32.mrb[67].mxu1  ;;  %v15646_v55 = vpop.f32.mrb[67].mxu0  ;;  %v2582_v9 = vsel %vm1704_vm3, %v2572_v23, %v2581_v46  ;;  %v2595_v37 = vrot.slane %v2593_v21, 3  ;;  %v17484_v49 = vld [vmem:[%s17974_s12 + $0x7c] sm:$0xff]  }
 0x185   : > { %v2598_v34 = vrot.slane %v2596_v11, 4  ;;  %v2604_v52 = vrot.slane %v2602_v42, 3  ;;  %v2607_v54 = vrot.slane %v2605_v43, 4 }
 0x186   : > { %2255 = vst [vmem:[#allocation2 + $0x58] sm:$0xff] %v2214_v59  ;;  %15772 = vmatmul.mubr.bf16.gmra.mrb[172].mxu1 %v2573_v51  ;;  %15868 = vmatmul.mubr.bf16.gmra.mrb[172].mxu0 %v17476_v44 }
 0x187   : > { %15775 = vmatprep.mubr.msk.bf16.mxu1 %vm17899_vm0, %v17898_v1  ;;  %15871 = vmatprep.mubr.msk.bf16.mxu0 %vm17899_vm0, %v17898_v1 }
 0x189   : > { %v1307_v10 = vpop.f32.mrb[68].mxu1  ;;  %v2044_v63 = vpop.f32.mrb[68].mxu0 }
 0x18a   : > { %v1472_v53 = vadd.f32 %v1307_v10, %v18476_v7  ;;  %v2215_v3 = vadd.f32 %v2044_v63, %v1470_v31  ;;  %v15553_v4 = vpop.f32.mrb[69].mxu1  ;;  %v15649_v6 = vpop.f32.mrb[69].mxu0  ;;  %v2590_v7 = vor.u32 %v2589_v13, %v2586_v12  ;;  %v17491_v13 = vld [vmem:[%s17974_s12 + $0xa0] sm:$0xff]  }
 0x18b   : > { %v1310_v16 = vpop.f32.mrb[70].mxu1  ;;  %v2047_v8 = vpop.f32.mrb[70].mxu0  ;;  %v17487_v6 = vld [vmem:[%s17974_s12 + $0x84] sm:$0xff]  }
 0x18c   : > { %2256 = vst [vmem:[#allocation2 + $0x60] sm:$0xff] %v2215_v3  ;;  %v1473_v14 = vadd.f32 %v1310_v16, %v18484_v18  ;;  %v2216_v15 = vadd.f32 %v2047_v8, %v1471_v56  ;;  %v15554_v19 = vpop.f32.mrb[71].mxu1  ;;  %v15650_v20 = vpop.f32.mrb[71].mxu0  ;;  %v2591_v35 = vsel %vm1704_vm3, %v2581_v46, %v2590_v7  ;;  %v17488_v56 = vld [vmem:[%s17974_s12 + $0x98] sm:$0xff]  }
 0x18d   : > { %v2611_v61 = vshrl.u32 %v17488_v56, 16  ;;  %v2614_v62 = vshll.u32 %v17488_v56, 16  ;;  %v2620_v20 = vshrl.u32 %v17491_v13, 16 }
 0x18e   : > { %2257 = vst [vmem:[#allocation2 + $0x68] sm:$0xff] %v2216_v15  ;;  %15776 = vmatmul.mubr.bf16.gmra.mrb[176].mxu1 %v2582_v9  ;;  %15872 = vmatmul.mubr.bf16.gmra.mrb[176].mxu0 %v17478_v36 }
 0x18f   : > { %15779 = vmatprep.mubr.msk.bf16.mxu1 %vm17899_vm0, %v17898_v1  ;;  %15875 = vmatprep.mubr.msk.bf16.mxu0 %vm17899_vm0, %v17898_v1  ;;  %v2613_v9 = vrot.slane %v2611_v61, 3  ;;  %v2616_v12 = vrot.slane %v2614_v62, 4 }
 0x191   : > { %v1315_v22 = vpop.f32.mrb[72].mxu1  ;;  %v2052_v24 = vpop.f32.mrb[72].mxu0 }
 0x192   : > { %v1474_v18 = vadd.f32 %v1315_v22, %v18503_v33  ;;  %v2217_v26 = vadd.f32 %v2052_v24, %v1472_v53  ;;  %v15557_v27 = vpop.f32.mrb[73].mxu1  ;;  %v15653_v29 = vpop.f32.mrb[73].mxu0  ;;  %v2599_v33 = vor.u32 %v2598_v34, %v2595_v37 }
 0x193   : > { %v1318_v30 = vpop.f32.mrb[74].mxu1  ;;  %v2055_v32 = vpop.f32.mrb[74].mxu0 }
 0x194   : > { %2258 = vst [vmem:[#allocation2 + $0x70] sm:$0xff] %v2217_v26  ;;  %v1475_v58 = vadd.f32 %v1318_v30, %v18511_v41  ;;  %v2218_v23 = vadd.f32 %v2055_v32, %v1473_v14  ;;  %v15558_v39 = vpop.f32.mrb[75].mxu1  ;;  %v15654_v40 = vpop.f32.mrb[75].mxu0  ;;  %v2600_v48 = vsel %vm1704_vm3, %v2590_v7, %v2599_v33  ;;  %v2623_v7 = vshll.u32 %v17491_v13, 16  ;;  %v17494_v32 = vld [vmem:[%s17974_s12 + $0xa8] sm:$0x3f]  }
 0x195   : > { %v2632_v39 = vshll.u32 %v17494_v32, 16  ;;  %v17500_v13 = vld [vmem:[%s17974_s12 + $0x14] sm:$0xff]  }
 0x196   : > { %2259 = vst [vmem:[#allocation2 + $0x78] sm:$0xff] %v2218_v23  ;;  %15780 = vmatmul.mubr.bf16.gmra.mrb[180].mxu1 %v2591_v35  ;;  %15876 = vmatmul.mubr.bf16.gmra.mrb[180].mxu0 %v17481_v28  ;;  %v2622_v28 = vrot.slane %v2620_v20, 3  ;;  %v2625_v30 = vrot.slane %v2623_v7, 4  ;;  %v2629_v23 = vshrl.u32 %v17494_v32, 16 }
 0x197   : > { %15783 = vmatprep.mubr.msk.bf16.mxu1 %vm17899_vm0, %v17898_v1  ;;  %15879 = vmatprep.mubr.msk.bf16.mxu0 %vm17899_vm0, %v17898_v1 }
 0x199   : > { %v1323_v44 = vpop.f32.mrb[76].mxu1  ;;  %v2060_v31 = vpop.f32.mrb[76].mxu0 }
 0x19a   : > { %v1476_v41 = vadd.f32 %v1323_v44, %v18526_v57  ;;  %v2219_v0 = vadd.f32 %v2060_v31, %v1474_v18  ;;  %v15561_v45 = vpop.f32.mrb[77].mxu1  ;;  %v15657_v47 = vpop.f32.mrb[77].mxu0  ;;  %v2608_v57 = vor.u32 %v2607_v54, %v2604_v52  ;;  %v17489_v18 = vld [vmem:[%s17974_s12 + $0x8c] sm:$0xff]  }
 0x19b   : > { %v1326_v50 = vpop.f32.mrb[78].mxu1  ;;  %v2063_v51 = vpop.f32.mrb[78].mxu0  ;;  %v17492_v45 = vld [vmem:[%s17974_s12 + $0x94] sm:$0xff]  }
 0x19c   : > { %2260 = vst [vmem:[#allocation2 + $0x80] sm:$0xff] %v2219_v0  ;;  %v1477_v59 = vadd.f32 %v1326_v50, %v18530_v2  ;;  %v2220_v60 = vadd.f32 %v2063_v51, %v1475_v58  ;;  %v15562_v55 = vpop.f32.mrb[79].mxu1  ;;  %v15658_v46 = vpop.f32.mrb[79].mxu0  ;;  %v2609_v8 = vsel %vm1704_vm3, %v2599_v33, %v2608_v57  ;;  %v2626_v58 = vor.u32 %v2625_v30, %v2622_v28  ;;  %v1440_v33 = vld [vmem:[#allocation2 + $0xb8] sm:$0xff] }
 0x19d   : > { %v2631_v51 = vrot.slane %v2629_v23, 3  ;;  %v1442_v46 = vld [vmem:[#allocation2 + $0xc8] sm:$0xff] }
 0x19e   : > { %2261 = vst [vmem:[#allocation2 + $0x88] sm:$0xff] %v2220_v60  ;;  %15784 = vmatmul.mubr.bf16.gmra.mrb[184].mxu1 %v2600_v48  ;;  %15880 = vmatmul.mubr.bf16.gmra.mrb[184].mxu0 %v17484_v49  ;;  %v2634_v48 = vrot.slane %v2632_v39, 4 }
 0x19f   : > { %15787 = vmatprep.mubr.msk.bf16.mxu1 %vm17899_vm0, %v17898_v1  ;;  %15883 = vmatprep.mubr.msk.bf16.mxu0 %vm17899_vm0, %v17898_v1 }
 0x1a0   : > { %v2635_v60 = vor.u32 %v2634_v48, %v2631_v51  ;;  %v17501_v48 = vld [vmem:[%s20936_s1 + $0x1c0] sm:$0xff]  }
 0x1a1   : > { %v1331_v10 = vpop.f32.mrb[80].mxu1  ;;  %v2068_v63 = vpop.f32.mrb[80].mxu0 }
 0x1a2   : > { %v1478_v2 = vadd.f32 %v1331_v10, %v18540_v17  ;;  %v2221_v53 = vadd.f32 %v2068_v63, %v1476_v41  ;;  %v15565_v3 = vpop.f32.mrb[81].mxu1  ;;  %v15661_v4 = vpop.f32.mrb[81].mxu0  ;;  %v2617_v17 = vor.u32 %v2616_v12, %v2613_v9  ;;  %v1443_v12 = vld [vmem:[#allocation2 + $0xd0] sm:$0xff] }
 0x1a3   : > { %v1334_v36 = vpop.f32.mrb[82].mxu1  ;;  %v2071_v16 = vpop.f32.mrb[82].mxu0 }
 0x1a4   : > { %2262 = vst [vmem:[#allocation2 + $0x90] sm:$0xff] %v2221_v53  ;;  %v1479_v5 = vadd.f32 %v1334_v36, %v18544_v25  ;;  %v2222_v14 = vadd.f32 %v2071_v16, %v1477_v59  ;;  %v15566_v15 = vpop.f32.mrb[83].mxu1  ;;  %v15662_v19 = vpop.f32.mrb[83].mxu0  ;;  %v2618_v29 = vsel %vm1704_vm3, %v2608_v57, %v2617_v17  ;;  %v2627_v50 = vsel %vm1704_vm3, %v2617_v17, %v2626_v58  ;;  %v1441_v59 = vld [vmem:[#allocation2 + $0xc0] sm:$0xff]  ;;  %v17499_v36 = vld [vmem:[%s17974_s12 + $0xc] sm:$0xff]  }
 0x1a5   : > { %v17495_v53 = vld [vmem:[%s17974_s12 + $0x9c] sm:$0xff]  }
 0x1a6   : > { %2263 = vst [vmem:[#allocation2 + $0x98] sm:$0xff] %v2222_v14  ;;  %15788 = vmatmul.mubr.bf16.gmra.mrb[188].mxu1 %v2609_v8  ;;  %15884 = vmatmul.mubr.bf16.gmra.mrb[188].mxu0 %v17487_v6  ;;  %v2636_v6 = vsel %vm1704_vm3, %v2626_v58, %v2635_v60  ;;  %v1444_v15 = vld [vmem:[#allocation2 + $0xd8] sm:$0xff] }
 0x1a7   : > { %15791 = vmatprep.mubr.msk.bf16.mxu1 %vm17899_vm0, %v17898_v1  ;;  %15887 = vmatprep.mubr.msk.bf16.mxu0 %vm17899_vm0, %v17898_v1  ;;  %v18673_v58 = vld [vmem:[%s17974_s12 + $0x1c] sm:$0xff]  }
 0x1a9   : > { %v1339_v21 = vpop.f32.mrb[84].mxu1  ;;  %v2076_v11 = vpop.f32.mrb[84].mxu0 }
 0x1aa   : > { %v2223_v25 = vadd.f32 %v2076_v11, %v1478_v2  ;;  %v15569_v22 = vpop.f32.mrb[85].mxu1  ;;  %v15665_v24 = vpop.f32.mrb[85].mxu0  ;;  %v1480_v40 = vadd.f32 %v1439_v38, %v1339_v21 }
 0x1ab   : > { %v1342_v26 = vpop.f32.mrb[86].mxu1  ;;  %v2079_v27 = vpop.f32.mrb[86].mxu0 }
 0x1ac   : > { %2264 = vst [vmem:[#allocation2 + $0xa0] sm:$0xff] %v2223_v25  ;;  %v2224_v35 = vadd.f32 %v2079_v27, %v1479_v5  ;;  %v15570_v37 = vpop.f32.mrb[87].mxu1  ;;  %v15666_v34 = vpop.f32.mrb[87].mxu0  ;;  %v1481_v44 = vadd.f32 %v1440_v33, %v1342_v26  ;;  %v3747_v5 = vshll.u32 %v17499_v36, 16  ;;  %v17497_v25 = vld [vmem:[%s17974_s12 + $0xa4] sm:$0xff]   ;;  %v3752_v27 = vshll.u32 %v17500_v13, 16 }
 0x1ad   : > { %v1445_v37 = vld [vmem:[#allocation2 + $0xe0] sm:$0xff] }
 0x1ae   : > { %2265 = vst [vmem:[#allocation2 + $0xa8] sm:$0xff] %v2224_v35  ;;  %15792 = vmatmul.mubr.bf16.gmra.mrb[192].mxu1 %v2618_v29  ;;  %15888 = vmatmul.mubr.bf16.gmra.mrb[192].mxu0 %v17489_v18  ;;  %v3745_v18 = vshrl.u32 %v17499_v36, 16  ;;  %v3749_v26 = vrot.slane %v3747_v5, 1  ;;  %v17503_v29 = vld [vmem:[%s17974_s12 + $0x14] sm:$0xff]   ;;  %v18666_v35 = vld [vmem:[%s17974_s12 + $0x1c] sm:$0xff]   ;;  %v3754_v38 = vrot.slane %v3752_v27, 1 }
 0x1af   : > { %15795 = vmatprep.mubr.msk.bf16.mxu1 %vm17899_vm0, %v17898_v1  ;;  %15891 = vmatprep.mubr.msk.bf16.mxu0 %vm17899_vm0, %v17898_v1  ;;  %v4467_v23 = vshll.u32 %v17503_v29, 16  ;;  %v3764_v5 = vshrl.u32 %v18666_v35, 16  ;;  %v1449_v27 = vld [vmem:[#allocation2 + $0x100] sm:$0xff] }
 0x1b0   : > { %v3750_v34 = vor.u32 %v3749_v26, %v3745_v18  ;;  %v17516_v18 = vld [vmem:[%s20936_s1 + $0x1d0] sm:$0xff]  }
 0x1b1   : > { %v1347_v42 = vpop.f32.mrb[88].mxu1  ;;  %v2084_v43 = vpop.f32.mrb[88].mxu0  ;;  %v18713_v26 = vld [vmem:[%s17974_s12 + $0x2c] sm:$0xff]  }
 0x1b2   : > { %v2225_v31 = vadd.f32 %v2084_v43, %v1480_v40  ;;  %v15573_v41 = vpop.f32.mrb[89].mxu1  ;;  %v15669_v0 = vpop.f32.mrb[89].mxu0  ;;  %v1482_v55 = vadd.f32 %v1441_v59, %v1347_v42  ;;  %v1446_v40 = vld [vmem:[#allocation2 + $0xe8] sm:$0xff]  ;;  %v3755_v51 = vsel %vm3743_vm4, %v3750_v34, %v3754_v38 }
 0x1b3   : > { %v1350_v47 = vpop.f32.mrb[90].mxu1  ;;  %v2087_v49 = vpop.f32.mrb[90].mxu0  ;;  %v17498_v43 = vld [vmem:[%s17974_s12 + $0xac] ss:$0 sps:$4 sm:$0x33]  }
 0x1b4   : > { %2266 = vst [vmem:[#allocation2 + $0xb0] sm:$0xff] %v2225_v31  ;;  %v2226_v52 = vadd.f32 %v2087_v49, %v1481_v44  ;;  %v15574_v54 = vpop.f32.mrb[91].mxu1  ;;  %v15670_v56 = vpop.f32.mrb[91].mxu0  ;;  %v1483_v62 = vadd.f32 %v1442_v46, %v1350_v47  ;;  %v3760_v47 = vshll.u32 %v18666_v35, 16  ;;  %v1447_v46 = vld [vmem:[#allocation2 + $0xf0] sm:$0xff]  ;;  %v17513_v35 = vld [vmem:[%s20936_s1 + $0x208] sm:$0xff]  }
 0x1b5   : > { %v4469_v54 = vrot.slane %v4467_v23, 1  ;;  %v4472_v56 = vshll.u32 %v18673_v58, 16  ;;  %v1450_v34 = vld [vmem:[#allocation2 + $0x108] sm:$0xff] }
 0x1b6   : > { %2267 = vst [vmem:[#allocation2 + $0xb8] sm:$0xff] %v2226_v52  ;;  %15796 = vmatmul.mubr.bf16.gmra.mrb[196].mxu1 %v2627_v50  ;;  %15892 = vmatmul.mubr.bf16.gmra.mrb[196].mxu0 %v17492_v45  ;;  %v3756_v45 = vshrl.u32 %v17500_v13, 16  ;;  %v4465_v52 = vshrl.u32 %v17503_v29, 16 }
 0x1b7   : > { %15799 = vmatprep.mubr.msk.bf16.mxu1 %vm17899_vm0, %v17898_v1  ;;  %15895 = vmatprep.mubr.msk.bf16.mxu0 %vm17899_vm0, %v17898_v1 }
 0x1b9   : > { %v1355_v57 = vpop.f32.mrb[92].mxu1  ;;  %v2092_v61 = vpop.f32.mrb[92].mxu0 }
 0x1ba   : > { %v2227_v10 = vadd.f32 %v2092_v61, %v1482_v55  ;;  %v15577_v63 = vpop.f32.mrb[93].mxu1  ;;  %v15673_v2 = vpop.f32.mrb[93].mxu0  ;;  %v1484_v14 = vadd.f32 %v1443_v12, %v1355_v57  ;;  %v3758_v57 = vor.u32 %v3756_v45, %v3754_v38  ;;  %v3762_v61 = vrot.slane %v3760_v47, 1 }
 0x1bb   : > { %v1358_v3 = vpop.f32.mrb[94].mxu1  ;;  %v2095_v4 = vpop.f32.mrb[94].mxu0  ;;  %v18685_v63 = vld [vmem:[%s17974_s12 + $0x24] sm:$0xff]  }
 0x1bc   : > { %2268 = vst [vmem:[#allocation2 + $0xc0] sm:$0xff] %v2227_v10  ;;  %v2228_v16 = vadd.f32 %v2095_v4, %v1483_v62  ;;  %v15578_v8 = vpop.f32.mrb[95].mxu1  ;;  %v15674_v9 = vpop.f32.mrb[95].mxu0  ;;  %v1485_v20 = vadd.f32 %v1444_v15, %v1358_v3  ;;  %v4470_v62 = vor.u32 %v4469_v54, %v4465_v52  ;;  %v4474_v10 = vrot.slane %v4472_v56, 1  ;;  %v18688_v2 = vld [vmem:[%s17974_s12 + $0x24] sm:$0xff]   ;;  %v1448_v4 = vld [vmem:[#allocation2 + $0xf8] sm:$0xff] }
 0x1bd   : > { %v3763_v13 = vsel %vm3743_vm4, %v3758_v57, %v3762_v61  ;;  %v3766_v29 = vor.u32 %v3764_v5, %v3762_v61  ;;  %v3772_v23 = vshrl.u32 %v18685_v63, 16  ;;  %v17519_v52 = vld [vmem:[%s20936_s1 + $0x210] sm:$0xff]   ;;  %v17530_v54 = vld [vmem:[%s20936_s1 + $0x1e0] sm:$0xff]  }
 0x1be   : > { %2269 = vst [vmem:[#allocation2 + $0xc8] sm:$0xff] %v2228_v16  ;;  %15800 = vmatmul.mubr.bf16.gmra.mrb[200].mxu1 %v2636_v6  ;;  %15896 = vmatmul.mubr.bf16.gmra.mrb[200].mxu0 %v17495_v53  ;;  %v17508_v53 = vld [vmem:[%s20936_s1 + $0x1c8] sm:$0xff]   ;;  %v18745_v57 = vld [vmem:[%s17974_s12 + $0x34] sm:$0xff]  }
 0x1bf   : > { %15803 = vmatprep.mubr.msk.bf16.mxu1 %vm17899_vm0, %v17898_v1  ;;  %15899 = vmatprep.mubr.msk.bf16.mxu0 %vm17899_vm0, %v17898_v1  ;;  %v18748_v61 = vld [vmem:[%s17974_s12 + $0x34] sm:$0xff]  }
 0x1c1   : > { %v1363_v19 = vpop.f32.mrb[96].mxu1  ;;  %v2100_v17 = vpop.f32.mrb[96].mxu0 }
 0x1c2   : > { %v2229_v7 = vadd.f32 %v2100_v17, %v1484_v14  ;;  %v15581_v21 = vpop.f32.mrb[97].mxu1  ;;  %v15677_v11 = vpop.f32.mrb[97].mxu0  ;;  %v1486_v39 = vadd.f32 %v1445_v37, %v1363_v19  ;;  %v4475_v19 = vsel %vm3743_vm4, %v4470_v62, %v4474_v10  ;;  %v17505_v17 = vld [vmem:[%s20936_s1 + $0x200] sm:$0xff]  }
 0x1c3   : > { %v1366_v22 = vpop.f32.mrb[98].mxu1  ;;  %v2103_v24 = vpop.f32.mrb[98].mxu0  ;;  %v4480_v21 = vshll.u32 %v18688_v2, 16 }
 0x1c4   : > { %2270 = vst [vmem:[#allocation2 + $0xd0] sm:$0xff] %v2229_v7  ;;  %v2230_v28 = vadd.f32 %v2103_v24, %v1485_v20  ;;  %v15582_v30 = vpop.f32.mrb[99].mxu1  ;;  %v15678_v32 = vpop.f32.mrb[99].mxu0  ;;  %v1487_v44 = vadd.f32 %v1446_v40, %v1366_v22  ;;  %v3768_v20 = vshll.u32 %v18685_v63, 16  ;;  %v4476_v7 = vshrl.u32 %v18673_v58, 16  ;;  %v18707_v24 = vld [vmem:[%s17974_s12 + $0x2c] sm:$0xff]  }
 0x1c5   : > { %v4482_v32 = vrot.slane %v4480_v21, 1  ;;  %v17524_v40 = vld [vmem:[%s20936_s1 + $0x1d8] sm:$0xff]   ;;  %v3780_v5 = vshrl.u32 %v18707_v24, 16  ;;  %v17533_v21 = vld [vmem:[%s20936_s1 + $0x220] sm:$0xff]  }
 0x1c6   : > { %2271 = vst [vmem:[#allocation2 + $0xd8] sm:$0xff] %v2230_v28  ;;  %15804 = vmatmul.mubr.bf16.gmra.mrb[204].mxu1 %v2635_v60  ;;  %15900 = vmatmul.mubr.bf16.gmra.mrb[204].mxu0 %v17497_v25  ;;  %v3770_v28 = vrot.slane %v3768_v20, 1  ;;  %v4478_v30 = vor.u32 %v4476_v7, %v4474_v10  ;;  %v17527_v10 = vld [vmem:[%s20936_s1 + $0x218] sm:$0xff]  }
 0x1c7   : > { %15903 = vmatprep.mubr.msk.bf16.mxu0 %vm17899_vm0, %v17898_v1  ;;  %15923 = vmatprep.mubr.msk.bf16.mxu1 %vm17899_vm0, %v17898_v1  ;;  %v1452_v63 = vld [vmem:[#allocation2 + $0x118] sm:$0xff] }
 0x1c8   : > { %v3771_v47 = vsel %vm3743_vm4, %v3766_v29, %v3770_v28  ;;  %v3774_v56 = vor.u32 %v3772_v23, %v3770_v28 }
 0x1c9   : > { %v1371_v33 = vpop.f32.mrb[100].mxu1  ;;  %v2108_v42 = vpop.f32.mrb[100].mxu0 }
 0x1ca   : > { %v2231_v31 = vadd.f32 %v2108_v42, %v1486_v39  ;;  %v15585_v41 = vpop.f32.mrb[101].mxu1  ;;  %v15681_v0 = vpop.f32.mrb[101].mxu0  ;;  %v1488_v3 = vadd.f32 %v1447_v46, %v1371_v33  ;;  %v3776_v39 = vshll.u32 %v18707_v24, 16  ;;  %v1451_v46 = vld [vmem:[#allocation2 + $0x110] sm:$0xff]  ;;  %v1453_v24 = vld [vmem:[#allocation2 + $0x120] sm:$0xff] }
 0x1cb   : > { %v1374_v49 = vpop.f32.mrb[102].mxu1  ;;  %v2111_v50 = vpop.f32.mrb[102].mxu0  ;;  %v4488_v41 = vshll.u32 %v18713_v26, 16 }
 0x1cc   : > { %2272 = vst [vmem:[#allocation2 + $0xe0] sm:$0xff] %v2231_v31  ;;  %v2232_v59 = vadd.f32 %v2111_v50, %v1487_v44  ;;  %v15586_v60 = vpop.f32.mrb[103].mxu1  ;;  %v15682_v55 = vpop.f32.mrb[103].mxu0  ;;  %v1489_v16 = vadd.f32 %v1448_v4, %v1374_v49  ;;  %v4484_v31 = vshrl.u32 %v18688_v2, 16  ;;  %v4483_v49 = vsel %vm3743_vm4, %v4478_v30, %v4482_v32  ;;  %v17541_v30 = vld [vmem:[%s20936_s1 + $0x228] sm:$0xff]  }
 0x1cd   : > { %v4490_v55 = vrot.slane %v4488_v41, 1 }
 0x1ce   : > { %2273 = vst [vmem:[#allocation2 + $0xe8] sm:$0xff] %v2232_v59  ;;  %15904 = vmatmul.mubr.bf16.gmra.mrb[208].mxu0 %v17498_v43  ;;  %15924 = vmatmul.mubr.bf16.vlgmr.msra.gmra.mrb[208].mxu1 %v3755_v51  ;;  %v3778_v59 = vrot.slane %v3776_v39, 1  ;;  %v4486_v60 = vor.u32 %v4484_v31, %v4482_v32  ;;  %v1454_v32 = vld [vmem:[#allocation2 + $0x128] sm:$0xff] }
 0x1cf   : > { %16108 = vmatpush3.bf16.msra.mxu1 %v17501_v48  ;;  %15927 = vmatprep.mubr.msk.bf16.mxu1 %vm17899_vm0, %v17898_v1 }
 0x1d0   : > { %16023 = vmatprep.mubr.msk.bf16.mxu0 %vm17899_vm0, %v17898_v1  ;;  %16109 = vmatprep.subr.bf16.mxu1 %v17898_v1 }
 0x1d1   : > { %v1379_v6 = vpop.f32.mrb[104].mxu1  ;;  %v2116_v36 = vpop.f32.mrb[104].mxu0 }
 0x1d2   : > { %v2233_v8 = vadd.f32 %v2116_v36, %v1488_v3  ;;  %v15589_v9 = vpop.f32.mrb[105].mxu1  ;;  %v15685_v12 = vpop.f32.mrb[105].mxu0  ;;  %v1490_v37 = vadd.f32 %v1449_v27, %v1379_v6  ;;  %v17538_v3 = vld [vmem:[%s20936_s1 + $0x1e8] sm:$0xff]  }
 0x1d3   : > { %v1382_v14 = vpop.f32.mrb[106].mxu1  ;;  %v2119_v15 = vpop.f32.mrb[106].mxu0  ;;  %16110 = vmatpush3.bf16.msra.mxu1 %v17508_v53  ;;  %v4491_v9 = vsel %vm3743_vm4, %v4486_v60, %v4490_v55  ;;  %v18809_v60 = vld [vmem:[%s17974_s12 + $0x44] sm:$0xff]  }
 0x1d4   : > { %2274 = vst [vmem:[#allocation2 + $0xf0] sm:$0xff] %v2233_v8  ;;  %v2234_v11 = vadd.f32 %v2119_v15, %v1489_v16  ;;  %v15590_v25 = vpop.f32.mrb[107].mxu1  ;;  %v15686_v22 = vpop.f32.mrb[107].mxu0  ;;  %16111 = vmatprep.subr.bf16.mxu1 %v17898_v1  ;;  %v1491_v33 = vadd.f32 %v1450_v34, %v1382_v14  ;;  %v3779_v8 = vsel %vm3743_vm4, %v3774_v56, %v3778_v59  ;;  %v3784_v14 = vshll.u32 %v18745_v57, 16  ;;  %v1455_v56 = vld [vmem:[#allocation2 + $0x130] sm:$0xff] }
 0x1d5   : > { %v4492_v15 = vshrl.u32 %v18713_v26, 16  ;;  %v17544_v25 = vld [vmem:[%s20936_s1 + $0x1f0] sm:$0xff]   ;;  %v18776_v22 = vld [vmem:[%s17974_s12 + $0x3c] sm:$0xff]   ;;  %v3788_v34 = vshrl.u32 %v18745_v57, 16 }
 0x1d6   : > { %2275 = vst [vmem:[#allocation2 + $0xf8] sm:$0xff] %v2234_v11  ;;  %15928 = vmatmul.mubr.bf16.gmra.mrb[212].mxu1 %v3763_v13  ;;  %16024 = vmatmul.mubr.bf16.vlgmr.msra.gmra.mrb[212].mxu0 %v4475_v19  ;;  %v4496_v19 = vshll.u32 %v18748_v61, 16  ;;  %v18769_v11 = vld [vmem:[%s17974_s12 + $0x3c] sm:$0xff]   ;;  %v3786_v26 = vrot.slane %v3784_v14, 1 }
 0x1d7   : > { %16208 = vmatpush3.bf16.msra.mxu0 %v17505_v17  ;;  %15931 = vmatprep.mubr.msk.bf16.mxu1 %vm17899_vm0, %v17898_v1  ;;  %v4494_v27 = vor.u32 %v4492_v15, %v4490_v55  ;;  %v1457_v57 = vld [vmem:[#allocation2 + $0x140] sm:$0xf] }
 0x1d8   : > { %16027 = vmatprep.mubr.msk.bf16.mxu0 %vm17899_vm0, %v17898_v1  ;;  %16209 = vmatprep.subr.bf16.mxu0 %v17898_v1  ;;  %v4498_v29 = vrot.slane %v4496_v19, 1 }
 0x1d9   : > { %v1387_v38 = vpop.f32.mrb[108].mxu1  ;;  %v2124_v58 = vpop.f32.mrb[108].mxu0  ;;  %16112 = vmatpush3.bf16.msra.mxu1 %v17516_v18  ;;  %v3782_v18 = vor.u32 %v3780_v5, %v3778_v59  ;;  %v18806_v59 = vld [vmem:[%s17974_s12 + $0x44] sm:$0xff]   ;;  %v4512_v5 = vshll.u32 %v18809_v60, 16 }
 0x1da   : > { %v2235_v42 = vadd.f32 %v2124_v58, %v1490_v37  ;;  %v15593_v43 = vpop.f32.mrb[109].mxu1  ;;  %v15689_v44 = vpop.f32.mrb[109].mxu0  ;;  %16113 = vmatprep.subr.bf16.mxu1 %v17898_v1  ;;  %v1492_v62 = vadd.f32 %v1451_v46, %v1387_v38  ;;  %v3792_v38 = vshll.u32 %v18769_v11, 16  ;;  %v17552_v58 = vld [vmem:[%s20936_s1 + $0x1f8] sm:$0xff]  }
 0x1db   : > { %v1390_v0 = vpop.f32.mrb[110].mxu1  ;;  %v2127_v45 = vpop.f32.mrb[110].mxu0  ;;  %16210 = vmatpush3.bf16.msra.mxu0 %v17513_v35  ;;  %v4504_v43 = vshll.u32 %v18776_v22, 16  ;;  %v3787_v41 = vsel %vm3743_vm4, %v3782_v18, %v3786_v26  ;;  %v17555_v46 = vld [vmem:[%s20936_s1 + $0x238] sm:$0xff]  }
 0x1dc   : > { %2276 = vst [vmem:[#allocation2 + $0x100] sm:$0xff] %v2235_v42  ;;  %v2236_v50 = vadd.f32 %v2127_v45, %v1491_v33  ;;  %v15594_v51 = vpop.f32.mrb[111].mxu1  ;;  %v15690_v48 = vpop.f32.mrb[111].mxu0  ;;  %16211 = vmatprep.subr.bf16.mxu0 %v17898_v1  ;;  %v1493_v4 = vadd.f32 %v1452_v63, %v1390_v0  ;;  %v4500_v42 = vshrl.u32 %v18748_v61, 16  ;;  %v4499_v0 = vsel %vm3743_vm4, %v4494_v27, %v4498_v29  ;;  %v1456_v61 = vld [vmem:[#allocation2 + $0x138] sm:$0xff] }
 0x1dd   : > { %16114 = vmatpush3.bf16.msra.mxu1 %v17524_v40  ;;  %v3790_v51 = vor.u32 %v3788_v34, %v3786_v26  ;;  %v3794_v48 = vrot.slane %v3792_v38, 1  ;;  %v3804_v27 = vshrl.u32 %v18806_v59, 16  ;;  %v4516_v34 = vshrl.u32 %v18809_v60, 16 }
 0x1de   : > { %2277 = vst [vmem:[#allocation2 + $0x108] sm:$0xff] %v2236_v50  ;;  %15932 = vmatmul.mubr.bf16.gmra.mrb[216].mxu1 %v3771_v47  ;;  %16028 = vmatmul.mubr.bf16.gmra.mrb[216].mxu0 %v4483_v49  ;;  %v17549_v50 = vld [vmem:[%s20936_s1 + $0x230] sm:$0xff]  }
 0x1df   : > { %15935 = vmatprep.mubr.msk.bf16.mxu1 %vm17899_vm0, %v17898_v1  ;;  %16031 = vmatprep.mubr.msk.bf16.mxu0 %vm17899_vm0, %v17898_v1  ;;  %v3795_v63 = vsel %vm3743_vm4, %v3790_v51, %v3794_v48 }
 0x1e0   : > { %16212 = vmatpush3.bf16.msra.mxu0 %v17519_v52  ;;  %16115 = vmatprep.subr.bf16.mxu1 %v17898_v1  ;;  %v4502_v52 = vor.u32 %v4500_v42, %v4498_v29 }
 0x1e1   : > { %v1395_v2 = vpop.f32.mrb[112].mxu1  ;;  %v2132_v53 = vpop.f32.mrb[112].mxu0  ;;  %16213 = vmatprep.subr.bf16.mxu0 %v17898_v1  ;;  %16116 = vmatpush3.bf16.msra.mxu1 %v17530_v54  ;;  %v4506_v54 = vrot.slane %v4504_v43, 1 }
 0x1e2   : > { %v2237_v6 = vadd.f32 %v2132_v53, %v1492_v62  ;;  %v15597_v36 = vpop.f32.mrb[113].mxu1  ;;  %v15693_v16 = vpop.f32.mrb[113].mxu0  ;;  %16117 = vmatprep.subr.bf16.mxu1 %v17898_v1  ;;  %v1494_v28 = vadd.f32 %v1453_v24, %v1395_v2 }
 0x1e3   : > { %v1398_v12 = vpop.f32.mrb[114].mxu1  ;;  %v2135_v13 = vpop.f32.mrb[114].mxu0  ;;  %v4507_v36 = vsel %vm3743_vm4, %v4502_v52, %v4506_v54 }
 0x1e4   : > { %2278 = vst [vmem:[#allocation2 + $0x110] sm:$0xff] %v2237_v6  ;;  %v2238_v17 = vadd.f32 %v2135_v13, %v1493_v4  ;;  %v15598_v20 = vpop.f32.mrb[115].mxu1  ;;  %v15694_v7 = vpop.f32.mrb[115].mxu0  ;;  %16214 = vmatpush3.bf16.msra.mxu0 %v17527_v10  ;;  %v1495_v23 = vadd.f32 %v1454_v32, %v1398_v12  ;;  %v3800_v12 = vshll.u32 %v18806_v59, 16  ;;  %v4508_v13 = vshrl.u32 %v18776_v22, 16 }
 0x1e5   : > { %16215 = vmatprep.subr.bf16.mxu0 %v17898_v1  ;;  %16118 = vmatpush3.bf16.msra.mxu1 %v17538_v3 }
 0x1e6   : > { %2279 = vst [vmem:[#allocation2 + $0x118] sm:$0xff] %v2238_v17  ;;  %15936 = vmatmul.mubr.bf16.gmra.mrb[220].mxu1 %v3779_v8  ;;  %16032 = vmatmul.mubr.bf16.gmra.mrb[220].mxu0 %v4491_v9  ;;  %v3796_v9 = vshrl.u32 %v18769_v11, 16  ;;  %v17520_v17 = vld [vmem:[%s17974_s12 + $0x4c] sm:$0xff]   ;;  %v3802_v7 = vrot.slane %v3800_v12, 1  ;;  %v4514_v11 = vrot.slane %v4512_v5, 1 }
 0x1e7   : > { %15939 = vmatprep.mubr.msk.bf16.mxu1 %vm17899_vm0, %v17898_v1  ;;  %16035 = vmatprep.mubr.msk.bf16.mxu0 %vm17899_vm0, %v17898_v1  ;;  %v3808_v29 = vshll.u32 %v17520_v17, 16 }
 0x1e8   : > { %16216 = vmatpush3.bf16.msra.mxu0 %v17533_v21  ;;  %16119 = vmatprep.subr.bf16.mxu1 %v17898_v1  ;;  %v3798_v20 = vor.u32 %v3796_v9, %v3794_v48  ;;  %v4510_v21 = vor.u32 %v4508_v13, %v4506_v54  ;;  %v3806_v42 = vor.u32 %v3804_v27, %v3802_v7  ;;  %v3812_v54 = vshrl.u32 %v17520_v17, 16  ;;  %v6490_v9 = vld [vmem:[%s20941_s6] sm:$0xff]  ;;  %v2909_v13 = vld [vmem:[#allocation2 + $0x18] sm:$0xff]  ;;  %v6491_v27 = vld [vmem:[%s20941_s6 + $0x8] sm:$0xff] }
 0x1e9   : > { %v1403_v35 = vpop.f32.mrb[116].mxu1  ;;  %v2140_v37 = vpop.f32.mrb[116].mxu0  ;;  %16217 = vmatprep.subr.bf16.mxu0 %v17898_v1  ;;  %16120 = vmatpush3.bf16.msra.mxu1 %v17544_v25  ;;  %v17521_v25 = vld [vmem:[%s17974_s12 + $0x4c] sm:$0xff]   ;;  %v3810_v43 = vrot.slane %v3808_v29, 1 }
 0x1ea   : > { %v2239_v39 = vadd.f32 %v2140_v37, %v1494_v28  ;;  %v15601_v40 = vpop.f32.mrb[117].mxu1  ;;  %v15697_v33 = vpop.f32.mrb[117].mxu0  ;;  %16121 = vmatprep.subr.bf16.mxu1 %v17898_v1  ;;  %v1496_v55 = vadd.f32 %v1455_v56, %v1403_v35  ;;  %v3803_v35 = vsel %vm3743_vm4, %v3798_v20, %v3802_v7  ;;  %v4515_v37 = vsel %vm3743_vm4, %v4510_v21, %v4514_v11 }
 0x1eb   : > { %v1406_v44 = vpop.f32.mrb[118].mxu1  ;;  %v2143_v31 = vpop.f32.mrb[118].mxu0  ;;  %v4520_v38 = vshll.u32 %v17521_v25, 16  ;;  %v18834_v40 = vld [vmem:[%s17974_s12 + $0x54] sm:$0xff]   ;;  %v2906_v33 = vld [vmem:[#allocation2] sm:$0xff] }
 0x1ec   : > { %2280 = vst [vmem:[#allocation2 + $0x120] sm:$0xff] %v2239_v39  ;;  %v2240_v45 = vadd.f32 %v2143_v31, %v1495_v23  ;;  %v15602_v47 = vpop.f32.mrb[119].mxu1  ;;  %v15698_v49 = vpop.f32.mrb[119].mxu0  ;;  %16218 = vmatpush3.bf16.msra.mxu0 %v17541_v30  ;;  %v1497_v2 = vadd.f32 %v1456_v61, %v1406_v44  ;;  %v4518_v44 = vor.u32 %v4516_v34, %v4514_v11  ;;  %v3816_v56 = vshll.u32 %v18834_v40, 16 }
 0x1ed   : > { %16219 = vmatprep.subr.bf16.mxu0 %v17898_v1  ;;  %16122 = vmatpush3.bf16.msra.mxu1 %v17552_v58  ;;  %v4522_v31 = vrot.slane %v4520_v38, 1  ;;  %v3820_v21 = vshrl.u32 %v18834_v40, 16 }
 0x1ee   : > { %2281 = vst [vmem:[#allocation2 + $0x128] sm:$0xff] %v2240_v45  ;;  %15940 = vmatmul.mubr.bf16.gmra.mrb[224].mxu1 %v3787_v41  ;;  %16036 = vmatmul.mubr.bf16.gmra.mrb[224].mxu0 %v4499_v0  ;;  %v18841_v41 = vld [vmem:[%s17974_s12 + $0x54] sm:$0xff]   ;;  %v2907_v45 = vld [vmem:[#allocation2 + $0x8] sm:$0xff] }
 0x1ef   : > { %15943 = vmatprep.mubr.msk.bf16.mxu1 %vm17899_vm0, %v17898_v1  ;;  %16039 = vmatprep.mubr.msk.bf16.mxu0 %vm17899_vm0, %v17898_v1  ;;  %v4528_v61 = vshll.u32 %v18841_v41, 16 }
 0x1f0   : > { %16220 = vmatpush3.bf16.msra.mxu0 %v17549_v50  ;;  %16307 = vmatprep.subr.bf16.mxu1 %v17898_v1 }
 0x1f1   : > { %v1411_v62 = vpop.f32.mrb[120].mxu1  ;;  %v2148_v10 = vpop.f32.mrb[120].mxu0  ;;  %16221 = vmatprep.subr.bf16.mxu0 %v17898_v1 }
 0x1f2   : > { %v1498_v53 = vadd.f32 %v1457_v57, %v1411_v62  ;;  %v2241_v3 = vadd.f32 %v2148_v10, %v1496_v55  ;;  %v15605_v4 = vpop.f32.mrb[121].mxu1  ;;  %v15701_v6 = vpop.f32.mrb[121].mxu0  ;;  %v3811_v55 = vsel %vm3743_vm4, %v3806_v42, %v3810_v43  ;;  %v4524_v57 = vshrl.u32 %v17521_v25, 16 }
 0x1f3   : > { %v1414_v16 = vpop.f32.mrb[122].mxu1  ;;  %v2151_v8 = vpop.f32.mrb[122].mxu0  ;;  %v4530_v6 = vrot.slane %v4528_v61, 1  ;;  %v18895_v61 = vld [vmem:[%s17974_s12 + $0x6c] sm:$0xff]  }
 0x1f4   : > { %1539 = vst [vmem:[#allocation2 + $0x140] sm:$0xf] %v1498_v53  ;;  %2282 = vst [vmem:[#allocation2 + $0x130] sm:$0xff] %v2241_v3  ;;  %v2242_v14 = vadd.f32 %v2151_v8, %v1497_v2  ;;  %v15606_v15 = vpop.f32.mrb[123].mxu1  ;;  %v15702_v19 = vpop.f32.mrb[123].mxu0  ;;  %16222 = vmatpush3.bf16.msra.mxu0 %v17555_v46  ;;  %v4523_v46 = vsel %vm3743_vm4, %v4518_v44, %v4522_v31  ;;  %v2908_v2 = vld [vmem:[#allocation2 + $0x10] sm:$0xff]  ;;  %v3814_v53 = vor.u32 %v3812_v54, %v3810_v43 }
 0x1f5   : > { %16407 = vmatprep.subr.bf16.mxu0 %v17898_v1  ;;  %v3818_v3 = vrot.slane %v3816_v56, 1  ;;  %v4526_v4 = vor.u32 %v4524_v57, %v4522_v31  ;;  %v18855_v16 = vld [vmem:[%s17974_s12 + $0x5c] sm:$0xff]   ;;  %v17900_v8 = vmov 0   ;;  %v6492_v56 = vld [vmem:[%s20941_s6 + $0x10] sm:$0xff] }
 0x1f6   : > { %2283 = vst [vmem:[#allocation2 + $0x138] sm:$0xff] %v2242_v14  ;;  %15944 = vmatmul.mubr.bf16.gmra.mrb[228].mxu1 %v3795_v63  ;;  %16040 = vmatmul.mubr.bf16.gmra.mrb[228].mxu0 %v4507_v36  ;;  %v18852_v36 = vld [vmem:[%s17974_s12 + $0x5c] sm:$0xff]   ;;  %6777 = vst [vmem:[#allocation3] sm:$0xf] %v17900_v8  ;;  %v2912_v57 = vld [vmem:[#allocation2 + $0x30] sm:$0xff] }
 0x1f7   : > { %15947 = vmatprep.mubr.msk.bf16.mxu1 %vm17899_vm0, %v17898_v1  ;;  %16043 = vmatprep.mubr.msk.bf16.mxu0 %vm17899_vm0, %v17898_v1  ;;  %6778 = vst [vmem:[#allocation3 + $0x4] sm:$0xf] %v17900_v8  ;;  %6779 = vst [vmem:[#allocation3 + $0x8] sm:$0xf] %v17900_v8  ;;  %v3819_v7 = vsel %vm3743_vm4, %v3814_v53, %v3818_v3  ;;  %v3828_v44 = vshrl.u32 %v18852_v36, 16 }
 0x1f8   : > { %6986 = vst [vmem:[#allocation3 + $0xac] sm:$0xc] %v17900_v8  ;;  %6987 = vst [vmem:[#allocation3 + $0xb0] sm:$0xf] %v17900_v8  ;;  %17336 = vset.pattern.permute.xlu0 %v17900_v8  ;;  %17337 = vset.pattern.permute.xlu1 %v17900_v8 }
 0x1f9   : > { %v2156_v22 = vpop.f32.mrb[124].mxu0  ;;  %v2740_v24 = vpop.f32.mrb[124].mxu1  ;;  %6988 = vst [vmem:[#allocation3 + $0xb4] sm:$0xf] %v17900_v8  ;;  %6533 = vperm.xlu0 %17336, %v6490_v9   ;;  %6543 = vperm.xlu1 %17337, %v6492_v56  }
 0x1fa   : > { %v15705_v18 = vpop.f32.mrb[125].mxu0  ;;  %v15725_v26 = vpop.f32.mrb[125].mxu1  ;;  %v2947_v0 = vadd.f32 %v2906_v33, %v2740_v24  ;;  %v3824_v24 = vshll.u32 %v18852_v36, 16  ;;  %v2911_v33 = vld [vmem:[#allocation2 + $0x28] sm:$0xff]  ;;  %v2913_v36 = vld [vmem:[#allocation2 + $0x38] sm:$0xff] }
 0x1fb   : > { %v2202_v28 = vld [vmem:[#allocation2 + $0x140] sm:$0xf]  ;;  %v2159_v30 = vpop.f32.mrb[126].mxu0  ;;  %v2743_v32 = vpop.f32.mrb[126].mxu1  ;;  %v4532_v18 = vshrl.u32 %v18841_v41, 16  ;;  %v4536_v26 = vshll.u32 %v18855_v16, 16 }
 0x1fc   : > { %v2243_v58 = vadd.f32 %v2202_v28, %v2156_v22  ;;  %v15706_v23 = vpop.f32.mrb[127].mxu0  ;;  %v15726_v39 = vpop.f32.mrb[127].mxu1  ;;  %v2948_v50 = vadd.f32 %v2907_v45, %v2743_v32  ;;  %v4531_v22 = vsel %vm3743_vm4, %v4526_v4, %v4530_v6  ;;  %v2910_v32 = vld [vmem:[#allocation2 + $0x20] sm:$0xff]  ;;  %v3826_v34 = vrot.slane %v3824_v24, 1 }
 0x1fd   : > { %6538 = vperm.xlu0 %17336, %v6491_v27   ;;  %v4534_v38 = vor.u32 %v4532_v18, %v4530_v6  ;;  %v18877_v23 = vld [vmem:[%s17974_s12 + $0x64] sm:$0xff]  }
 0x1fe   : > { %2284 = vst [vmem:[#allocation2 + $0x140] sm:$0xf] %v2243_v58  ;;  %15948 = vmatmul.mubr.bf16.gmra.mrb[232].mxu1 %v3803_v35  ;;  %16044 = vmatmul.mubr.bf16.gmra.mrb[232].mxu0 %v4515_v37  ;;  %v18870_v35 = vld [vmem:[%s17974_s12 + $0x64] sm:$0xff]   ;;  %v3822_v37 = vor.u32 %v3820_v21, %v3818_v3  ;;  %v4538_v58 = vrot.slane %v4536_v26, 1  ;;  %v4544_v54 = vshll.u32 %v18877_v23, 16  ;;  %v6493_v3 = vld [vmem:[%s20941_s6 + $0x18] sm:$0xff] }
 0x1ff   : > { %15951 = vmatprep.mubr.msk.bf16.mxu1 %vm17899_vm0, %v17898_v1  ;;  %16047 = vmatprep.mubr.msk.bf16.mxu0 %vm17899_vm0, %v17898_v1  ;;  %v6494_v39 = vld [vmem:[%s20941_s6 + $0x20] sm:$0xff]  ;;  %v3832_v31 = vshll.u32 %v18870_v35, 16  ;;  %v4548_v21 = vshrl.u32 %v18877_v23, 16  ;;  %v2915_v23 = vld [vmem:[#allocation2 + $0x48] sm:$0xff] }
 0x200   : > { %v4546_v53 = vrot.slane %v4544_v54, 1  ;;  %v6498_v4 = vld [vmem:[%s20941_s6 + $0x40] sm:$0xff]  ;;  %6548 = vperm.xlu1 %17337, %v6493_v3   ;;  %v2917_v3 = vld [vmem:[#allocation2 + $0x58] sm:$0xff] }
 0x201   : > { %v2748_v47 = vpop.f32.mrb[128].mxu1  ;;  %v3293_v49 = vpop.f32.mrb[128].mxu0  ;;  %6553 = vperm.xlu0 %17336, %v6494_v39   ;;  %v2914_v27 = vld [vmem:[#allocation2 + $0x40] sm:$0xff] }
 0x202   : > { %v3500_v51 = vadd.f32 %v3293_v49, %v2947_v0  ;;  %v15729_v48 = vpop.f32.mrb[129].mxu1  ;;  %v15825_v52 = vpop.f32.mrb[129].mxu0  ;;  %v2949_v12 = vadd.f32 %v2908_v2, %v2748_v47 }
 0x203   : > { %v2751_v59 = vpop.f32.mrb[130].mxu1  ;;  %v3296_v60 = vpop.f32.mrb[130].mxu0  ;;  %v4539_v48 = vsel %vm3743_vm4, %v4534_v38, %v4538_v58  ;;  %v4540_v52 = vshrl.u32 %v18855_v16, 16  ;;  %v6502_v38 = vld [vmem:[%s20941_s6 + $0x60] sm:$0xff] }
 0x204   : > { %3541 = vst [vmem:[#allocation2] sm:$0xff] %v3500_v51  ;;  %v3501_v62 = vadd.f32 %v3296_v60, %v2948_v50  ;;  %v15730_v10 = vpop.f32.mrb[131].mxu1  ;;  %v15826_v63 = vpop.f32.mrb[131].mxu0  ;;  %v2950_v15 = vadd.f32 %v2909_v13, %v2751_v59  ;;  %v3827_v51 = vsel %vm3743_vm4, %v3822_v37, %v3826_v34  ;;  %v6496_v59 = vld [vmem:[%s20941_s6 + $0x30] sm:$0xff] }
 0x205   : > { %6563 = vperm.xlu0 %17336, %v6496_v59   ;;  %v3830_v10 = vor.u32 %v3828_v44, %v3826_v34  ;;  %v3834_v63 = vrot.slane %v3832_v31, 1  ;;  %v4542_v2 = vor.u32 %v4540_v52, %v4538_v58  ;;  %v18930_v37 = vld [vmem:[%s17974_s12 + $0x74] sm:$0xff]   ;;  %v3844_v31 = vshrl.u32 %v18895_v61, 16 }
 0x206   : > { %3542 = vst [vmem:[#allocation2 + $0x8] sm:$0xff] %v3501_v62  ;;  %15952 = vmatmul.mubr.bf16.gmra.mrb[236].mxu1 %v3811_v55  ;;  %16048 = vmatmul.mubr.bf16.gmra.mrb[236].mxu0 %v4523_v46  ;;  %v18898_v62 = vld [vmem:[%s17974_s12 + $0x6c] sm:$0xff]   ;;  %v6497_v34 = vld [vmem:[%s20941_s6 + $0x38] sm:$0xff] }
 0x207   : > { %15955 = vmatprep.mubr.msk.bf16.mxu1 %vm17899_vm0, %v17898_v1  ;;  %16051 = vmatprep.mubr.msk.bf16.mxu0 %vm17899_vm0, %v17898_v1  ;;  %v6504_v52 = vld [vmem:[%s20941_s6 + $0x70] sm:$0xff] }
 0x209   : > { %v2756_v5 = vpop.f32.mrb[132].mxu1  ;;  %v3301_v14 = vpop.f32.mrb[132].mxu0  ;;  %6573 = vperm.xlu0 %17336, %v6498_v4  }
 0x20a   : > { %v3502_v19 = vadd.f32 %v3301_v14, %v2949_v12  ;;  %v15733_v17 = vpop.f32.mrb[133].mxu1  ;;  %v15829_v20 = vpop.f32.mrb[133].mxu0  ;;  %v2951_v40 = vadd.f32 %v2910_v32, %v2756_v5  ;;  %v3836_v14 = vshrl.u32 %v18870_v35, 16  ;;  %v4550_v32 = vor.u32 %v4548_v21, %v4546_v53  ;;  %v6508_v21 = vld [vmem:[%s20941_s6 + $0x90] sm:$0xff] }
 0x20b   : > { %v2759_v11 = vpop.f32.mrb[134].mxu1  ;;  %v3304_v25 = vpop.f32.mrb[134].mxu0  ;;  %v3835_v20 = vsel %vm3743_vm4, %v3830_v10, %v3834_v63  ;;  %v18958_v10 = vld [vmem:[%s17974_s12 + $0x7c] sm:$0xff]  }
 0x20c   : > { %3543 = vst [vmem:[#allocation2 + $0x10] sm:$0xff] %v3502_v19  ;;  %v3503_v29 = vadd.f32 %v3304_v25, %v2950_v15  ;;  %v15734_v28 = vpop.f32.mrb[135].mxu1  ;;  %v15830_v30 = vpop.f32.mrb[135].mxu0  ;;  %v2952_v41 = vadd.f32 %v2911_v33, %v2759_v11  ;;  %v3840_v15 = vshll.u32 %v18895_v61, 16  ;;  %v4552_v11 = vshll.u32 %v18898_v62, 16  ;;  %v6495_v25 = vld [vmem:[%s20941_s6 + $0x28] sm:$0xff] }
 0x20d   : > { %6558 = vperm.xlu1 %17337, %v6495_v25   ;;  %v3838_v28 = vor.u32 %v3836_v14, %v3834_v63  ;;  %v6501_v63 = vld [vmem:[%s20941_s6 + $0x58] sm:$0xff] }
 0x20e   : > { %3544 = vst [vmem:[#allocation2 + $0x18] sm:$0xff] %v3503_v29  ;;  %15956 = vmatmul.mubr.bf16.gmra.mrb[240].mxu1 %v3819_v7  ;;  %16052 = vmatmul.mubr.bf16.gmra.mrb[240].mxu0 %v4531_v22  ;;  %v4547_v7 = vsel %vm3743_vm4, %v4542_v2, %v4546_v53  ;;  %v6500_v22 = vld [vmem:[%s20941_s6 + $0x50] sm:$0xff]  ;;  %v3842_v30 = vrot.slane %v3840_v15, 1  ;;  %v4554_v35 = vrot.slane %v4552_v11, 1  ;;  %v6506_v2 = vld [vmem:[%s20941_s6 + $0x80] sm:$0xff] }
 0x20f   : > { %15959 = vmatprep.mubr.msk.bf16.mxu1 %vm17899_vm0, %v17898_v1  ;;  %16055 = vmatprep.mubr.msk.bf16.mxu0 %vm17899_vm0, %v17898_v1  ;;  %v18923_v29 = vld [vmem:[%s17974_s12 + $0x74] sm:$0xff]  }
 0x210   : > { %6583 = vperm.xlu0 %17336, %v6500_v22  }
 0x211   : > { %v2764_v42 = vpop.f32.mrb[136].mxu1  ;;  %v3309_v43 = vpop.f32.mrb[136].mxu0  ;;  %6568 = vperm.xlu1 %17337, %v6497_v34   ;;  %v2919_v34 = vld [vmem:[#allocation2 + $0x68] sm:$0xff] }
 0x212   : > { %v3504_v0 = vadd.f32 %v3309_v43, %v2951_v40  ;;  %v15737_v45 = vpop.f32.mrb[137].mxu1  ;;  %v15833_v47 = vpop.f32.mrb[137].mxu0  ;;  %v2953_v6 = vadd.f32 %v2912_v57, %v2764_v42 }
 0x213   : > { %v2767_v49 = vpop.f32.mrb[138].mxu1  ;;  %v3312_v50 = vpop.f32.mrb[138].mxu0  ;;  %v3843_v47 = vsel %vm3743_vm4, %v3838_v28, %v3842_v30 }
 0x214   : > { %3545 = vst [vmem:[#allocation2 + $0x20] sm:$0xff] %v3504_v0  ;;  %v3505_v60 = vadd.f32 %v3312_v50, %v2952_v41  ;;  %v15738_v55 = vpop.f32.mrb[139].mxu1  ;;  %v15834_v46 = vpop.f32.mrb[139].mxu0  ;;  %v2954_v9 = vadd.f32 %v2913_v36, %v2767_v49  ;;  %6593 = vperm.xlu0 %17336, %v6502_v38   ;;  %v4556_v41 = vshrl.u32 %v18898_v62, 16  ;;  %v4555_v49 = vsel %vm3743_vm4, %v4550_v32, %v4554_v35  ;;  %v6505_v32 = vld [vmem:[%s20941_s6 + $0x78] sm:$0xff] }
 0x215   : > { %v3848_v50 = vshll.u32 %v18923_v29, 16  ;;  %v18951_v55 = vld [vmem:[%s17974_s12 + $0x7c] sm:$0xff]   ;;  %v3846_v46 = vor.u32 %v3844_v31, %v3842_v30  ;;  %v18986_v30 = vld [vmem:[%s17974_s12 + $0x84] sm:$0xff]  }
 0x216   : > { %3546 = vst [vmem:[#allocation2 + $0x28] sm:$0xff] %v3505_v60  ;;  %15960 = vmatmul.mubr.bf16.gmra.mrb[244].mxu1 %v3827_v51  ;;  %16056 = vmatmul.mubr.bf16.gmra.mrb[244].mxu0 %v4539_v48  ;;  %v4560_v51 = vshll.u32 %v18930_v37, 16  ;;  %v6499_v48 = vld [vmem:[%s20941_s6 + $0x48] sm:$0xff]  ;;  %v2916_v60 = vld [vmem:[#allocation2 + $0x50] sm:$0xff]  ;;  %v4558_v57 = vor.u32 %v4556_v41, %v4554_v35  ;;  %v6510_v35 = vld [vmem:[%s20941_s6 + $0xa0] sm:$0xff] }
 0x217   : > { %15963 = vmatprep.mubr.msk.bf16.mxu1 %vm17899_vm0, %v17898_v1  ;;  %16059 = vmatprep.mubr.msk.bf16.mxu0 %vm17899_vm0, %v17898_v1  ;;  %v3850_v61 = vrot.slane %v3848_v50, 1  ;;  %v6512_v50 = vld [vmem:[%s20941_s6 + $0xb0] sm:$0xff] }
 0x218   : > { %6578 = vperm.xlu1 %17337, %v6499_v48   ;;  %6603 = vperm.xlu0 %17336, %v6504_v52   ;;  %v4562_v62 = vrot.slane %v4560_v51, 1 }
 0x219   : > { %v2772_v16 = vpop.f32.mrb[140].mxu1  ;;  %v3317_v8 = vpop.f32.mrb[140].mxu0  ;;  %v3851_v15 = vsel %vm3743_vm4, %v3846_v46, %v3850_v61 }
 0x21a   : > { %v3506_v12 = vadd.f32 %v3317_v8, %v2953_v6  ;;  %v15741_v13 = vpop.f32.mrb[141].mxu1  ;;  %v15837_v5 = vpop.f32.mrb[141].mxu0  ;;  %v2955_v58 = vadd.f32 %v2914_v27, %v2772_v16 }
 0x21b   : > { %v2775_v19 = vpop.f32.mrb[142].mxu1  ;;  %v3320_v17 = vpop.f32.mrb[142].mxu0  ;;  %v3856_v13 = vshll.u32 %v18951_v55, 16 }
 0x21c   : > { %3547 = vst [vmem:[#allocation2 + $0x30] sm:$0xff] %v3506_v12  ;;  %v3507_v24 = vadd.f32 %v3320_v17, %v2954_v9  ;;  %v15742_v18 = vpop.f32.mrb[143].mxu1  ;;  %v15838_v26 = vpop.f32.mrb[143].mxu0  ;;  %v2956_v33 = vadd.f32 %v2915_v23, %v2775_v19  ;;  %6588 = vperm.xlu1 %17337, %v6501_v63   ;;  %6613 = vperm.xlu0 %17336, %v6506_v2   ;;  %v3852_v12 = vshrl.u32 %v18923_v29, 16  ;;  %v4564_v17 = vshrl.u32 %v18930_v37, 16  ;;  %v2921_v63 = vld [vmem:[#allocation2 + $0x78] sm:$0xff] }
 0x21d   : > { %v4563_v19 = vsel %vm3743_vm4, %v4558_v57, %v4562_v62  ;;  %v18979_v18 = vld [vmem:[%s17974_s12 + $0x84] sm:$0xff]   ;;  %v3858_v27 = vrot.slane %v3856_v13, 1  ;;  %v19014_v57 = vld [vmem:[%s17974_s12 + $0x8c] sm:$0xff]  }
 0x21e   : > { %3548 = vst [vmem:[#allocation2 + $0x38] sm:$0xff] %v3507_v24  ;;  %15964 = vmatmul.mubr.bf16.gmra.mrb[248].mxu1 %v3835_v20  ;;  %16060 = vmatmul.mubr.bf16.gmra.mrb[248].mxu0 %v4547_v7  ;;  %v4568_v20 = vshll.u32 %v18958_v10, 16  ;;  %v6503_v7 = vld [vmem:[%s20941_s6 + $0x68] sm:$0xff]  ;;  %v2918_v24 = vld [vmem:[#allocation2 + $0x60] sm:$0xff]  ;;  %v3854_v26 = vor.u32 %v3852_v12, %v3850_v61  ;;  %v4566_v29 = vor.u32 %v4564_v17, %v4562_v62  ;;  %v6509_v61 = vld [vmem:[%s20941_s6 + $0x98] sm:$0xff] }
 0x21f   : > { %15967 = vmatprep.mubr.msk.bf16.mxu1 %vm17899_vm0, %v17898_v1  ;;  %16063 = vmatprep.mubr.msk.bf16.mxu0 %vm17899_vm0, %v17898_v1  ;;  %v6514_v62 = vld [vmem:[%s20941_s6 + $0xc0] sm:$0xff]  ;;  %v6516_v17 = vld [vmem:[%s20941_s6 + $0xd0] sm:$0xff] }
 0x220   : > { %6598 = vperm.xlu1 %17337, %v6503_v7   ;;  %6623 = vperm.xlu0 %17336, %v6508_v21   ;;  %v4570_v28 = vrot.slane %v4568_v20, 1  ;;  %v3859_v41 = vsel %vm3743_vm4, %v3854_v26, %v3858_v27 }
 0x221   : > { %v2780_v39 = vpop.f32.mrb[144].mxu1  ;;  %v3325_v40 = vpop.f32.mrb[144].mxu0 }
 0x222   : > { %v3508_v42 = vadd.f32 %v3325_v40, %v2955_v58  ;;  %v15745_v43 = vpop.f32.mrb[145].mxu1  ;;  %v15841_v44 = vpop.f32.mrb[145].mxu0  ;;  %v2957_v53 = vadd.f32 %v2916_v60, %v2780_v39 }
 0x223   : > { %v2783_v0 = vpop.f32.mrb[146].mxu1  ;;  %v3328_v45 = vpop.f32.mrb[146].mxu0  ;;  %v3864_v43 = vshll.u32 %v18979_v18, 16 }
 0x224   : > { %3549 = vst [vmem:[#allocation2 + $0x40] sm:$0xff] %v3508_v42  ;;  %v3509_v54 = vadd.f32 %v3328_v45, %v2956_v33  ;;  %v15746_v56 = vpop.f32.mrb[147].mxu1  ;;  %v15842_v59 = vpop.f32.mrb[147].mxu0  ;;  %v2958_v36 = vadd.f32 %v2917_v3, %v2783_v0  ;;  %6608 = vperm.xlu1 %17337, %v6505_v32   ;;  %6633 = vperm.xlu0 %17336, %v6510_v35   ;;  %v3860_v42 = vshrl.u32 %v18951_v55, 16  ;;  %v4572_v45 = vshrl.u32 %v18958_v10, 16  ;;  %v2923_v32 = vld [vmem:[#allocation2 + $0x88] sm:$0xff] }
 0x225   : > { %v4571_v0 = vsel %vm3743_vm4, %v4566_v29, %v4570_v28  ;;  %v19007_v56 = vld [vmem:[%s17974_s12 + $0x8c] sm:$0xff]   ;;  %v3866_v60 = vrot.slane %v3864_v43, 1  ;;  %v6513_v29 = vld [vmem:[%s20941_s6 + $0xb8] sm:$0xff] }
 0x226   : > { %3550 = vst [vmem:[#allocation2 + $0x48] sm:$0xff] %v3509_v54  ;;  %15968 = vmatmul.mubr.bf16.gmra.mrb[252].mxu1 %v3843_v47  ;;  %16064 = vmatmul.mubr.bf16.gmra.mrb[252].mxu0 %v4555_v49  ;;  %v4576_v47 = vshll.u32 %v18986_v30, 16  ;;  %v6507_v49 = vld [vmem:[%s20941_s6 + $0x88] sm:$0xff]  ;;  %v2920_v54 = vld [vmem:[#allocation2 + $0x70] sm:$0xff]  ;;  %v3862_v59 = vor.u32 %v3860_v42, %v3858_v27  ;;  %v4574_v55 = vor.u32 %v4572_v45, %v4570_v28  ;;  %v6518_v28 = vld [vmem:[%s20941_s6 + $0xe0] sm:$0xff] }
 0x227   : > { %15971 = vmatprep.mubr.msk.bf16.mxu1 %vm17899_vm0, %v17898_v1  ;;  %16067 = vmatprep.mubr.msk.bf16.mxu0 %vm17899_vm0, %v17898_v1  ;;  %v19042_v27 = vld [vmem:[%s17974_s12 + $0x94] sm:$0xff]  }
 0x228   : > { %6618 = vperm.xlu1 %17337, %v6507_v49   ;;  %6643 = vperm.xlu0 %17336, %v6512_v50   ;;  %v4578_v46 = vrot.slane %v4576_v47, 1  ;;  %v3867_v13 = vsel %vm3743_vm4, %v3862_v59, %v3866_v60  ;;  %v6520_v45 = vld [vmem:[%s20941_s6 + $0xf0] sm:$0xff] }
 0x229   : > { %v2788_v4 = vpop.f32.mrb[148].mxu1  ;;  %v3333_v6 = vpop.f32.mrb[148].mxu0 }
 0x22a   : > { %v3510_v16 = vadd.f32 %v3333_v6, %v2957_v53  ;;  %v15749_v8 = vpop.f32.mrb[149].mxu1  ;;  %v15845_v9 = vpop.f32.mrb[149].mxu0  ;;  %v2959_v37 = vadd.f32 %v2918_v24, %v2788_v4 }
 0x22b   : > { %v2791_v5 = vpop.f32.mrb[150].mxu1  ;;  %v3336_v14 = vpop.f32.mrb[150].mxu0  ;;  %v3872_v8 = vshll.u32 %v19007_v56, 16 }
 0x22c   : > { %3551 = vst [vmem:[#allocation2 + $0x50] sm:$0xff] %v3510_v16  ;;  %v3511_v11 = vadd.f32 %v3336_v14, %v2958_v36  ;;  %v15750_v25 = vpop.f32.mrb[151].mxu1  ;;  %v15846_v22 = vpop.f32.mrb[151].mxu0  ;;  %v2960_v23 = vadd.f32 %v2919_v34, %v2791_v5  ;;  %6628 = vperm.xlu1 %17337, %v6509_v61   ;;  %6653 = vperm.xlu0 %17336, %v6514_v62   ;;  %v3868_v16 = vshrl.u32 %v18979_v18, 16  ;;  %v4580_v14 = vshrl.u32 %v18986_v30, 16  ;;  %v2925_v61 = vld [vmem:[#allocation2 + $0x98] sm:$0xff] }
 0x22d   : > { %v4579_v5 = vsel %vm3743_vm4, %v4574_v55, %v4578_v46  ;;  %v19035_v25 = vld [vmem:[%s17974_s12 + $0x94] sm:$0xff]   ;;  %v3874_v24 = vrot.slane %v3872_v8, 1 }
 0x22e   : > { %3552 = vst [vmem:[#allocation2 + $0x58] sm:$0xff] %v3511_v11  ;;  %15972 = vmatmul.mubr.bf16.gmra.mrb[0].mxu1 %v3851_v15  ;;  %16068 = vmatmul.mubr.bf16.gmra.mrb[0].mxu0 %v4563_v19  ;;  %v4584_v15 = vshll.u32 %v19014_v57, 16  ;;  %v6511_v19 = vld [vmem:[%s20941_s6 + $0xa8] sm:$0xff]  ;;  %v2922_v11 = vld [vmem:[#allocation2 + $0x80] sm:$0xff]  ;;  %v3870_v22 = vor.u32 %v3868_v16, %v3866_v60  ;;  %v4582_v18 = vor.u32 %v4580_v14, %v4578_v46  ;;  %v6517_v55 = vld [vmem:[%s20941_s6 + $0xd8] sm:$0xff] }
 0x22f   : > { %15975 = vmatprep.mubr.msk.bf16.mxu1 %vm17899_vm0, %v17898_v1  ;;  %16071 = vmatprep.mubr.msk.bf16.mxu0 %vm17899_vm0, %v17898_v1  ;;  %v19070_v60 = vld [vmem:[%s17974_s12 + $0x9c] sm:$0xff]   ;;  %v6524_v14 = vld [vmem:[%s20941_s6 + $0x110] sm:$0xff] }
 0x230   : > { %6638 = vperm.xlu1 %17337, %v6511_v19   ;;  %6663 = vperm.xlu0 %17336, %v6516_v17   ;;  %v4586_v26 = vrot.slane %v4584_v15, 1  ;;  %v3875_v43 = vsel %vm3743_vm4, %v3870_v22, %v3874_v24  ;;  %v6522_v46 = vld [vmem:[%s20941_s6 + $0x100] sm:$0xff] }
 0x231   : > { %v2796_v38 = vpop.f32.mrb[152].mxu1  ;;  %v3341_v58 = vpop.f32.mrb[152].mxu0 }
 0x232   : > { %v3512_v39 = vadd.f32 %v3341_v58, %v2959_v37  ;;  %v15753_v40 = vpop.f32.mrb[153].mxu1  ;;  %v15849_v33 = vpop.f32.mrb[153].mxu0  ;;  %v2961_v10 = vadd.f32 %v2920_v54, %v2796_v38 }
 0x233   : > { %v2799_v44 = vpop.f32.mrb[154].mxu1  ;;  %v3344_v31 = vpop.f32.mrb[154].mxu0  ;;  %v3880_v40 = vshll.u32 %v19035_v25, 16 }
 0x234   : > { %3553 = vst [vmem:[#allocation2 + $0x60] sm:$0xff] %v3512_v39  ;;  %v3513_v51 = vadd.f32 %v3344_v31, %v2960_v23  ;;  %v15754_v48 = vpop.f32.mrb[155].mxu1  ;;  %v15850_v52 = vpop.f32.mrb[155].mxu0  ;;  %v2962_v3 = vadd.f32 %v2921_v63, %v2799_v44  ;;  %6648 = vperm.xlu1 %17337, %v6513_v29   ;;  %6673 = vperm.xlu0 %17336, %v6518_v28   ;;  %v3876_v39 = vshrl.u32 %v19007_v56, 16  ;;  %v4588_v31 = vshrl.u32 %v19014_v57, 16  ;;  %v2927_v29 = vld [vmem:[#allocation2 + $0xa8] sm:$0xff] }
 0x235   : > { %v4587_v44 = vsel %vm3743_vm4, %v4582_v18, %v4586_v26  ;;  %v19063_v48 = vld [vmem:[%s17974_s12 + $0x9c] sm:$0xff]   ;;  %v3882_v54 = vrot.slane %v3880_v40, 1 }
 0x236   : > { %3554 = vst [vmem:[#allocation2 + $0x68] sm:$0xff] %v3513_v51  ;;  %15976 = vmatmul.mubr.bf16.gmra.mrb[4].mxu1 %v3859_v41  ;;  %16072 = vmatmul.mubr.bf16.gmra.mrb[4].mxu0 %v4571_v0  ;;  %v4592_v41 = vshll.u32 %v19042_v27, 16  ;;  %v6515_v0 = vld [vmem:[%s20941_s6 + $0xc8] sm:$0xff]  ;;  %v2924_v51 = vld [vmem:[#allocation2 + $0x90] sm:$0xff]  ;;  %v3878_v52 = vor.u32 %v3876_v39, %v3874_v24  ;;  %v4590_v56 = vor.u32 %v4588_v31, %v4586_v26  ;;  %v6521_v18 = vld [vmem:[%s20941_s6 + $0xf8] sm:$0xff] }
 0x237   : > { %15979 = vmatprep.mubr.msk.bf16.mxu1 %vm17899_vm0, %v17898_v1  ;;  %16075 = vmatprep.mubr.msk.bf16.mxu0 %vm17899_vm0, %v17898_v1  ;;  %v19098_v24 = vld [vmem:[%s17974_s12 + $0xa4] sm:$0xff]   ;;  %v6528_v31 = vld [vmem:[%s20941_s6 + $0x130] sm:$0xff] }
 0x238   : > { %6658 = vperm.xlu1 %17337, %v6515_v0   ;;  %6683 = vperm.xlu0 %17336, %v6520_v45   ;;  %v4594_v59 = vrot.slane %v4592_v41, 1  ;;  %v3883_v8 = vsel %vm3743_vm4, %v3878_v52, %v3882_v54  ;;  %v6526_v26 = vld [vmem:[%s20941_s6 + $0x120] sm:$0xff] }
 0x239   : > { %v2804_v2 = vpop.f32.mrb[156].mxu1  ;;  %v3349_v53 = vpop.f32.mrb[156].mxu0 }
 0x23a   : > { %v3514_v4 = vadd.f32 %v3349_v53, %v2961_v10  ;;  %v15757_v6 = vpop.f32.mrb[157].mxu1  ;;  %v15853_v36 = vpop.f32.mrb[157].mxu0  ;;  %v2963_v30 = vadd.f32 %v2922_v11, %v2804_v2 }
 0x23b   : > { %v2807_v9 = vpop.f32.mrb[158].mxu1  ;;  %v3352_v12 = vpop.f32.mrb[158].mxu0  ;;  %v3888_v6 = vshll.u32 %v19063_v48, 16 }
 0x23c   : > { %3555 = vst [vmem:[#allocation2 + $0x70] sm:$0xff] %v3514_v4  ;;  %v3515_v20 = vadd.f32 %v3352_v12, %v2962_v3  ;;  %v15758_v7 = vpop.f32.mrb[159].mxu1  ;;  %v15854_v21 = vpop.f32.mrb[159].mxu0  ;;  %v2964_v34 = vadd.f32 %v2923_v32, %v2807_v9  ;;  %6668 = vperm.xlu1 %17337, %v6517_v55   ;;  %6693 = vperm.xlu0 %17336, %v6522_v46   ;;  %v3884_v4 = vshrl.u32 %v19035_v25, 16  ;;  %v4596_v12 = vshrl.u32 %v19042_v27, 16  ;;  %v2929_v55 = vld [vmem:[#allocation2 + $0xb8] sm:$0xff] }
 0x23d   : > { %v4595_v9 = vsel %vm3743_vm4, %v4590_v56, %v4594_v59  ;;  %v19091_v7 = vld [vmem:[%s17974_s12 + $0xa4] sm:$0xff]   ;;  %v3890_v11 = vrot.slane %v3888_v6, 1  ;;  %v6525_v56 = vld [vmem:[%s20941_s6 + $0x118] sm:$0xff] }
 0x23e   : > { %3556 = vst [vmem:[#allocation2 + $0x78] sm:$0xff] %v3515_v20  ;;  %15980 = vmatmul.mubr.bf16.gmra.mrb[8].mxu1 %v3867_v13  ;;  %16076 = vmatmul.mubr.bf16.gmra.mrb[8].mxu0 %v4579_v5  ;;  %v4600_v13 = vshll.u32 %v19070_v60, 16  ;;  %v6519_v5 = vld [vmem:[%s20941_s6 + $0xe8] sm:$0xff]  ;;  %v2926_v20 = vld [vmem:[#allocation2 + $0xa0] sm:$0xff]  ;;  %v3886_v21 = vor.u32 %v3884_v4, %v3882_v54  ;;  %v4598_v25 = vor.u32 %v4596_v12, %v4594_v59 }
 0x23f   : > { %15983 = vmatprep.mubr.msk.bf16.mxu1 %vm17899_vm0, %v17898_v1  ;;  %16079 = vmatprep.mubr.msk.bf16.mxu0 %vm17899_vm0, %v17898_v1  ;;  %v19126_v54 = vld [vmem:[%s17974_s12 + $0xac] sm:$0xff]   ;;  %v6530_v59 = vld [vmem:[%s20941_s6 + $0x140] sm:$0xf] }
 0x240   : > { %6678 = vperm.xlu1 %17337, %v6519_v5   ;;  %6703 = vperm.xlu0 %17336, %v6524_v14   ;;  %v4602_v22 = vrot.slane %v4600_v13, 1  ;;  %v3891_v40 = vsel %vm3743_vm4, %v3886_v21, %v3890_v11  ;;  %v2930_v14 = vld [vmem:[#allocation2 + $0xc0] sm:$0xff]  ;;  %v6529_v21 = vld [vmem:[%s20941_s6 + $0x138] sm:$0xff] }
 0x241   : > { %v2812_v35 = vpop.f32.mrb[160].mxu1  ;;  %v3357_v37 = vpop.f32.mrb[160].mxu0 }
 0x242   : > { %v3516_v38 = vadd.f32 %v3357_v37, %v2963_v30  ;;  %v15761_v58 = vpop.f32.mrb[161].mxu1  ;;  %v15857_v23 = vpop.f32.mrb[161].mxu0  ;;  %v2965_v57 = vadd.f32 %v2924_v51, %v2812_v35  ;;  %v19119_v51 = vld [vmem:[%s17974_s12 + $0xac] ss:$0 sps:$4 sm:$0x77]  }
 0x243   : > { %v2815_v33 = vpop.f32.mrb[162].mxu1  ;;  %v3360_v42 = vpop.f32.mrb[162].mxu0  ;;  %v3896_v58 = vshll.u32 %v19091_v7, 16 }
 0x244   : > { %3557 = vst [vmem:[#allocation2 + $0x80] sm:$0xff] %v3516_v38  ;;  %v3517_v47 = vadd.f32 %v3360_v42, %v2964_v34  ;;  %v15762_v49 = vpop.f32.mrb[163].mxu1  ;;  %v15858_v50 = vpop.f32.mrb[163].mxu0  ;;  %v2966_v63 = vadd.f32 %v2925_v61, %v2815_v33  ;;  %6688 = vperm.xlu1 %17337, %v6521_v18   ;;  %6713 = vperm.xlu0 %17336, %v6526_v26   ;;  %v3892_v38 = vshrl.u32 %v19063_v48, 16  ;;  %v4604_v42 = vshrl.u32 %v19070_v60, 16 }
 0x245   : > { %v4603_v33 = vsel %vm3743_vm4, %v4598_v25, %v4602_v22  ;;  %v3898_v50 = vrot.slane %v3896_v58, 1  ;;  %v2931_v25 = vld [vmem:[#allocation2 + $0xc8] sm:$0xff] }
 0x246   : > { %3558 = vst [vmem:[#allocation2 + $0x88] sm:$0xff] %v3517_v47  ;;  %15984 = vmatmul.mubr.bf16.gmra.mrb[12].mxu1 %v3875_v43  ;;  %16080 = vmatmul.mubr.bf16.gmra.mrb[12].mxu0 %v4587_v44  ;;  %v4608_v43 = vshll.u32 %v19098_v24, 16  ;;  %v6523_v44 = vld [vmem:[%s20941_s6 + $0x108] sm:$0xff]  ;;  %v2928_v47 = vld [vmem:[#allocation2 + $0xb0] sm:$0xff]  ;;  %v3894_v49 = vor.u32 %v3892_v38, %v3890_v11  ;;  %v4606_v48 = vor.u32 %v4604_v42, %v4602_v22 }
 0x247   : > { %15987 = vmatprep.mubr.msk.bf16.mxu1 %vm17899_vm0, %v17898_v1  ;;  %16083 = vmatprep.mubr.msk.bf16.mxu0 %vm17899_vm0, %v17898_v1 }
 0x248   : > { %6698 = vperm.xlu1 %17337, %v6523_v44   ;;  %6723 = vperm.xlu0 %17336, %v6528_v31   ;;  %v4610_v52 = vrot.slane %v4608_v43, 1  ;;  %v2933_v44 = vld [vmem:[#allocation2 + $0xd8] sm:$0xff] }
 0x249   : > { %v2820_v62 = vpop.f32.mrb[164].mxu1  ;;  %v3365_v10 = vpop.f32.mrb[164].mxu0 }
 0x24a   : > { %v3518_v2 = vadd.f32 %v3365_v10, %v2965_v57  ;;  %v15765_v53 = vpop.f32.mrb[165].mxu1  ;;  %v15861_v3 = vpop.f32.mrb[165].mxu0  ;;  %v2967_v27 = vadd.f32 %v2926_v20, %v2820_v62  ;;  %v4611_v6 = vsel %vm3743_vm4, %v4606_v48, %v4610_v52  ;;  %v17560_v48 = vld [vmem:[%s17974_s12 + $0x14] sm:$0xfe]  }
 0x24b   : > { %v2823_v36 = vpop.f32.mrb[166].mxu1  ;;  %v3368_v16 = vpop.f32.mrb[166].mxu0  ;;  %v3900_v53 = vshrl.u32 %v19091_v7, 16  ;;  %v19148_v7 = vld [vmem:[%s17974_s12 + $0xb4] ss:$0 sps:$4 sm:$0x77]  }
 0x24c   : > { %3559 = vst [vmem:[#allocation2 + $0x90] sm:$0xff] %v3518_v2  ;;  %v3519_v15 = vadd.f32 %v3368_v16, %v2966_v63  ;;  %v15766_v19 = vpop.f32.mrb[167].mxu1  ;;  %v15862_v17 = vpop.f32.mrb[167].mxu0  ;;  %v2968_v32 = vadd.f32 %v2927_v29, %v2823_v36  ;;  %6708 = vperm.xlu1 %17337, %v6525_v56   ;;  %6733 = vperm.xlu0 %17336, %v6530_v59   ;;  %v3904_v36 = vshll.u32 %v19119_v51, 16  ;;  %v4612_v16 = vshrl.u32 %v19098_v24, 16  ;;  %v19166_v59 = vld [vmem:[%s17974_s12 + $0x1c] sm:$0xff]  }
 0x24d   : > { %v3899_v2 = vsel %vm3743_vm4, %v3894_v49, %v3898_v50 }
 0x24e   : > { %3560 = vst [vmem:[#allocation2 + $0x98] sm:$0xff] %v3519_v15  ;;  %15988 = vmatmul.mubr.bf16.gmra.mrb[16].mxu1 %v3883_v8  ;;  %16084 = vmatmul.mubr.bf16.gmra.mrb[16].mxu0 %v4595_v9  ;;  %v4616_v8 = vshll.u32 %v19126_v54, 16  ;;  %v6527_v9 = vld [vmem:[%s20941_s6 + $0x128] sm:$0xff]  ;;  %v3902_v15 = vor.u32 %v3900_v53, %v3898_v50  ;;  %v3906_v19 = vrot.slane %v3904_v36, 1  ;;  %v4614_v17 = vor.u32 %v4612_v16, %v4610_v52 }
 0x24f   : > { %15991 = vmatprep.mubr.msk.bf16.mxu1 %vm17899_vm0, %v17898_v1  ;;  %16087 = vmatprep.mubr.msk.bf16.mxu0 %vm17899_vm0, %v17898_v1  ;;  %v5784_v53 = vshll.u32 %v17560_v48, 16  ;;  %v2935_v36 = vld [vmem:[#allocation2 + $0xe8] sm:$0xff] }
 0x250   : > { %6718 = vperm.xlu1 %17337, %v6527_v9   ;;  %v4618_v20 = vrot.slane %v4616_v8, 1 }
 0x251   : > { %v2828_v28 = vpop.f32.mrb[168].mxu1  ;;  %v3373_v30 = vpop.f32.mrb[168].mxu0 }
 0x252   : > { %v3520_v35 = vadd.f32 %v3373_v30, %v2967_v27  ;;  %v15769_v37 = vpop.f32.mrb[169].mxu1  ;;  %v15865_v34 = vpop.f32.mrb[169].mxu0  ;;  %v2969_v60 = vadd.f32 %v2928_v47, %v2828_v28 }
 0x253   : > { %v2831_v23 = vpop.f32.mrb[170].mxu1  ;;  %v3376_v39 = vpop.f32.mrb[170].mxu0  ;;  %v4620_v37 = vshrl.u32 %v19126_v54, 16  ;;  %v4624_v34 = vshll.u32 %v19148_v7, 16 }
 0x254   : > { %3561 = vst [vmem:[#allocation2 + $0xa0] sm:$0xff] %v3520_v35  ;;  %v3521_v41 = vadd.f32 %v3376_v39, %v2968_v32  ;;  %v15770_v0 = vpop.f32.mrb[171].mxu1  ;;  %v15866_v45 = vpop.f32.mrb[171].mxu0  ;;  %v2970_v61 = vadd.f32 %v2929_v55, %v2831_v23  ;;  %6728 = vperm.xlu1 %17337, %v6529_v21   ;;  %v3907_v32 = vsel %vm3743_vm4, %v3902_v15, %v3906_v19  ;;  %v3908_v39 = vshrl.u32 %v19119_v51, 16  ;;  %v17557_v51 = vld [vmem:[%s17974_s12 + $0x14] sm:$0xfe]  }
 0x255   : > { %v4619_v35 = vsel %vm3743_vm4, %v4614_v17, %v4618_v20  ;;  %v4626_v42 = vrot.slane %v4624_v34, 1  ;;  %v19176_v15 = vld [vmem:[%s17974_s12 + $0x24] sm:$0xff]   ;;  %v5786_v21 = vrot.slane %v5784_v53, 2 }
 0x256   : > { %3562 = vst [vmem:[#allocation2 + $0xa8] sm:$0xff] %v3521_v41  ;;  %15992 = vmatmul.mubr.bf16.gmra.mrb[20].mxu1 %v3891_v40  ;;  %16088 = vmatmul.mubr.bf16.gmra.mrb[20].mxu0 %v4603_v33  ;;  %v2932_v40 = vld [vmem:[#allocation2 + $0xd0] sm:$0xff]  ;;  %v4622_v33 = vor.u32 %v4620_v37, %v4618_v20  ;;  %v3910_v45 = vor.u32 %v3908_v39, %v3906_v19 }
 0x257   : > { %15995 = vmatprep.mubr.msk.bf16.mxu1 %vm17899_vm0, %v17898_v1  ;;  %16091 = vmatprep.mubr.msk.bf16.mxu0 %vm17899_vm0, %v17898_v1 }
 0x258   : > { %v4627_v56 = vsel %vm3743_vm4, %v4622_v33, %v4626_v42 }
 0x259   : > { %v2836_v46 = vpop.f32.mrb[172].mxu1  ;;  %v3381_v57 = vpop.f32.mrb[172].mxu0 }
 0x25a   : > { %v3522_v62 = vadd.f32 %v3381_v57, %v2969_v60  ;;  %v15773_v10 = vpop.f32.mrb[173].mxu1  ;;  %v15869_v63 = vpop.f32.mrb[173].mxu0  ;;  %v2971_v11 = vadd.f32 %v2930_v14, %v2836_v46  ;;  %v17561_v60 = vld [vmem:[%s17974_s12 + $0x1c] sm:$0xff]  }
 0x25b   : > { %v2839_v3 = vpop.f32.mrb[174].mxu1  ;;  %v3384_v4 = vpop.f32.mrb[174].mxu0  ;;  %v5781_v10 = vshrl.u32 %v17560_v48, 16  ;;  %v2934_v63 = vld [vmem:[#allocation2 + $0xe0] sm:$0xff] }
 0x25c   : > { %3563 = vst [vmem:[#allocation2 + $0xb0] sm:$0xff] %v3522_v62  ;;  %v3523_v12 = vadd.f32 %v3384_v4, %v2970_v61  ;;  %v15774_v13 = vpop.f32.mrb[175].mxu1  ;;  %v15870_v5 = vpop.f32.mrb[175].mxu0  ;;  %v2972_v18 = vadd.f32 %v2931_v25, %v2839_v3  ;;  %v4628_v61 = vshrl.u32 %v19148_v7, 16  ;;  %v5185_v62 = vrot.slane %v17557_v51, 1 }
 0x25d   : > { %v5789_v3 = vshrl.u32 %v17561_v60, 16  ;;  %v5792_v4 = vshll.u32 %v17561_v60, 16  ;;  %v5783_v19 = vrot.slane %v5781_v10, 1  ;;  %v2939_v10 = vld [vmem:[#allocation2 + $0x108] sm:$0xff] }
 0x25e   : > { %3564 = vst [vmem:[#allocation2 + $0xb8] sm:$0xff] %v3523_v12  ;;  %15996 = vmatmul.mubr.bf16.gmra.mrb[24].mxu1 %v3899_v2  ;;  %16092 = vmatmul.mubr.bf16.gmra.mrb[24].mxu0 %v4611_v6  ;;  %v5186_v2 = vrot.slane %v19166_v59, 1  ;;  %v4630_v12 = vor.u32 %v4628_v61, %v4626_v42  ;;  %v2938_v59 = vld [vmem:[#allocation2 + $0x100] sm:$0xff] }
 0x25f   : > { %15999 = vmatprep.mubr.msk.bf16.mxu1 %vm17899_vm0, %v17898_v1  ;;  %16095 = vmatprep.mubr.msk.bf16.mxu0 %vm17899_vm0, %v17898_v1  ;;  %v5794_v25 = vrot.slane %v5792_v4, 2 }
 0x260   : > { %v5187_v7 = vsel %vm5184_vm5, %v5185_v62, %v5186_v2  ;;  %v17593_v62 = vld [vmem:[%s20938_s3 + $0x48] sm:$0xff]  }
 0x261   : > { %v2844_v22 = vpop.f32.mrb[176].mxu1  ;;  %v3389_v24 = vpop.f32.mrb[176].mxu0 }
 0x262   : > { %v3524_v26 = vadd.f32 %v3389_v24, %v2971_v11  ;;  %v15777_v27 = vpop.f32.mrb[177].mxu1  ;;  %v15873_v29 = vpop.f32.mrb[177].mxu0  ;;  %v2973_v43 = vadd.f32 %v2932_v40, %v2844_v22  ;;  %v5791_v11 = vrot.slane %v5789_v3, 1  ;;  %v17563_v22 = vld [vmem:[%s17974_s12 + $0x24] sm:$0xff]  }
 0x263   : > { %v2847_v28 = vpop.f32.mrb[178].mxu1  ;;  %v3392_v30 = vpop.f32.mrb[178].mxu0  ;;  %v17582_v27 = vld [vmem:[%s20938_s3] sm:$0xff]   ;;  %v5188_v29 = vrot.slane %v19176_v15, 1  ;;  %v5801_v37 = vshll.u32 %v17563_v22, 16 }
 0x264   : > { %3565 = vst [vmem:[#allocation2 + $0xc0] sm:$0xff] %v3524_v26  ;;  %v3525_v38 = vadd.f32 %v3392_v30, %v2972_v18  ;;  %v15778_v58 = vpop.f32.mrb[179].mxu1  ;;  %v15874_v23 = vpop.f32.mrb[179].mxu0  ;;  %v2974_v0 = vadd.f32 %v2933_v44, %v2847_v28  ;;  %v2936_v28 = vld [vmem:[#allocation2 + $0xf0] sm:$0xff]  ;;  %v5787_v30 = vor.u32 %v5786_v21, %v5783_v19 }
 0x265   : > { %v2937_v58 = vld [vmem:[#allocation2 + $0xf8] sm:$0xff] }
 0x266   : > { %3566 = vst [vmem:[#allocation2 + $0xc8] sm:$0xff] %v3525_v38  ;;  %16000 = vmatmul.mubr.bf16.gmra.mrb[28].mxu1 %v3907_v32  ;;  %16096 = vmatmul.mubr.bf16.gmra.mrb[28].mxu0 %v4619_v35  ;;  %v5795_v32 = vor.u32 %v5794_v25, %v5791_v11  ;;  %v5798_v35 = vshrl.u32 %v17563_v22, 16  ;;  %v17588_v38 = vld [vmem:[%s20938_s3 + $0x8] sm:$0xff]  }
 0x267   : > { %16003 = vmatprep.mubr.msk.bf16.mxu1 %vm17899_vm0, %v17898_v1  ;;  %16099 = vmatprep.mubr.msk.bf16.mxu0 %vm17899_vm0, %v17898_v1 }
 0x269   : > { %v2852_v31 = vpop.f32.mrb[180].mxu1  ;;  %v3397_v41 = vpop.f32.mrb[180].mxu0 }
 0x26a   : > { %v3526_v47 = vadd.f32 %v3397_v41, %v2973_v43  ;;  %v15781_v49 = vpop.f32.mrb[181].mxu1  ;;  %v15877_v50 = vpop.f32.mrb[181].mxu0  ;;  %v2975_v6 = vadd.f32 %v2934_v63, %v2852_v31  ;;  %v5189_v41 = vsel %vm5184_vm5, %v5186_v2, %v5188_v29 }
 0x26b   : > { %v2855_v52 = vpop.f32.mrb[182].mxu1  ;;  %v3400_v54 = vpop.f32.mrb[182].mxu0  ;;  %v5803_v49 = vrot.slane %v5801_v37, 2  ;;  %v17565_v50 = vld [vmem:[%s17974_s12 + $0x2c] sm:$0xff]  }
 0x26c   : > { %3567 = vst [vmem:[#allocation2 + $0xd0] sm:$0xff] %v3526_v47  ;;  %v3527_v55 = vadd.f32 %v3400_v54, %v2974_v0  ;;  %v15782_v46 = vpop.f32.mrb[183].mxu1  ;;  %v15878_v57 = vpop.f32.mrb[183].mxu0  ;;  %v2976_v9 = vadd.f32 %v2935_v36, %v2855_v52  ;;  %v5796_v0 = vsel %vm5779_vm6, %v5787_v30, %v5795_v32  ;;  %v5800_v47 = vrot.slane %v5798_v35, 1  ;;  %v17585_v54 = vld [vmem:[%s20938_s3 + $0x40] sm:$0xff]  }
 0x26d   : > { %v5807_v46 = vshrl.u32 %v17565_v50, 16  ;;  %v5810_v57 = vshll.u32 %v17565_v50, 16  ;;  %v2943_v50 = vld [vmem:[#allocation2 + $0x128] sm:$0xff] }
 0x26e   : > { %3568 = vst [vmem:[#allocation2 + $0xd8] sm:$0xff] %v3527_v55  ;;  %16004 = vmatmul.mubr.bf16.gmra.mrb[32].mxu1 %v3910_v45  ;;  %16100 = vmatmul.mubr.bf16.gmra.mrb[32].mxu0 %v4627_v56  ;;  %v19195_v45 = vld [vmem:[%s17974_s12 + $0x2c] sm:$0xff]   ;;  %v5804_v55 = vor.u32 %v5803_v49, %v5800_v47 }
 0x26f   : > { %16103 = vmatprep.mubr.msk.bf16.mxu0 %vm17899_vm0, %v17898_v1  ;;  %16123 = vmatprep.mubr.msk.bf16.mxu1 %vm17899_vm0, %v17898_v1  ;;  %v17596_v56 = vld [vmem:[%s20938_s3 + $0x10] sm:$0xff]   ;;  %v5190_v60 = vrot.slane %v19195_v45, 1 }
 0x271   : > { %v2860_v16 = vpop.f32.mrb[184].mxu1  ;;  %v3405_v8 = vpop.f32.mrb[184].mxu0 }
 0x272   : > { %v3528_v13 = vadd.f32 %v3405_v8, %v2975_v6  ;;  %v15785_v5 = vpop.f32.mrb[185].mxu1  ;;  %v15881_v14 = vpop.f32.mrb[185].mxu0  ;;  %v2977_v34 = vadd.f32 %v2936_v28, %v2860_v16  ;;  %v5191_v8 = vsel %vm5184_vm5, %v5188_v29, %v5190_v60 }
 0x273   : > { %v2863_v17 = vpop.f32.mrb[186].mxu1  ;;  %v3408_v20 = vpop.f32.mrb[186].mxu0  ;;  %v5812_v5 = vrot.slane %v5810_v57, 2  ;;  %v17567_v14 = vld [vmem:[%s17974_s12 + $0x34] sm:$0xff]  }
 0x274   : > { %3569 = vst [vmem:[#allocation2 + $0xe0] sm:$0xff] %v3528_v13  ;;  %v3529_v24 = vadd.f32 %v3408_v20, %v2976_v9  ;;  %v15786_v18 = vpop.f32.mrb[187].mxu1  ;;  %v15882_v26 = vpop.f32.mrb[187].mxu0  ;;  %v2978_v40 = vadd.f32 %v2937_v58, %v2863_v17  ;;  %v5805_v9 = vsel %vm5779_vm6, %v5795_v32, %v5804_v55  ;;  %v5809_v13 = vrot.slane %v5807_v46, 1  ;;  %v17599_v20 = vld [vmem:[%s20938_s3 + $0x50] sm:$0xff]   ;;  %v19234_v58 = vld [vmem:[%s17974_s12 + $0x3c] sm:$0xff]  }
 0x275   : > { %v5816_v25 = vshrl.u32 %v17567_v14, 16  ;;  %v5819_v22 = vshll.u32 %v17567_v14, 16  ;;  %v2941_v18 = vld [vmem:[#allocation2 + $0x118] sm:$0xff] }
 0x276   : > { %3570 = vst [vmem:[#allocation2 + $0xe8] sm:$0xff] %v3529_v24  ;;  %16104 = vmatmul.mubr.bf16.gmra.mrb[36].mxu0 %v4630_v12  ;;  %16124 = vmatmul.mubr.bf16.vlgmr.msra.gmra.mrb[36].mxu1 %v5187_v7  ;;  %v19218_v12 = vld [vmem:[%s17974_s12 + $0x34] sm:$0xff]   ;;  %v5813_v11 = vor.u32 %v5812_v5, %v5809_v13 }
 0x277   : > { %16127 = vmatprep.mubr.msk.bf16.mxu1 %vm17899_vm0, %v17898_v1  ;;  %16223 = vmatprep.mubr.msk.bf16.mxu0 %vm17899_vm0, %v17898_v1  ;;  %v2940_v7 = vld [vmem:[#allocation2 + $0x110] sm:$0xff]  ;;  %v5192_v21 = vrot.slane %v19218_v12, 1  ;;  %v2946_v12 = vld [vmem:[#allocation2 + $0x140] sm:$0xf]  ;;  %v2945_v13 = vld [vmem:[#allocation2 + $0x138] sm:$0xff] }
 0x278   : > { %16308 = vmatpush3.bf16.msra.mxu1 %v17582_v27 }
 0x279   : > { %v2868_v23 = vpop.f32.mrb[188].mxu1  ;;  %v3413_v39 = vpop.f32.mrb[188].mxu0  ;;  %16309 = vmatprep.subr.bf16.mxu1 %v17898_v1 }
 0x27a   : > { %v3530_v33 = vadd.f32 %v3413_v39, %v2977_v34  ;;  %v15789_v42 = vpop.f32.mrb[189].mxu1  ;;  %v15885_v43 = vpop.f32.mrb[189].mxu0  ;;  %v2979_v61 = vadd.f32 %v2938_v59, %v2868_v23  ;;  %v5193_v34 = vsel %vm5184_vm5, %v5190_v60, %v5192_v21  ;;  %v5818_v23 = vrot.slane %v5816_v25, 1 }
 0x27b   : > { %v2871_v44 = vpop.f32.mrb[190].mxu1  ;;  %v3416_v31 = vpop.f32.mrb[190].mxu0  ;;  %v5821_v39 = vrot.slane %v5819_v22, 2 }
 0x27c   : > { %3571 = vst [vmem:[#allocation2 + $0xf0] sm:$0xff] %v3530_v33  ;;  %v3531_v51 = vadd.f32 %v3416_v31, %v2978_v40  ;;  %v15790_v48 = vpop.f32.mrb[191].mxu1  ;;  %v15886_v52 = vpop.f32.mrb[191].mxu0  ;;  %16310 = vmatpush3.bf16.msra.mxu1 %v17588_v38  ;;  %v2980_v53 = vadd.f32 %v2939_v10, %v2871_v44  ;;  %v5814_v38 = vsel %vm5779_vm6, %v5804_v55, %v5813_v11  ;;  %v17569_v40 = vld [vmem:[%s17974_s12 + $0x3c] sm:$0xff]  }
 0x27d   : > { %16311 = vmatprep.subr.bf16.mxu1 %v17898_v1  ;;  %v17604_v44 = vld [vmem:[%s20938_s3 + $0x18] sm:$0xff]   ;;  %v2942_v31 = vld [vmem:[#allocation2 + $0x120] sm:$0xff]  ;;  %v5825_v45 = vshrl.u32 %v17569_v40, 16  ;;  %v5828_v47 = vshll.u32 %v17569_v40, 16 }
 0x27e   : > { %3572 = vst [vmem:[#allocation2 + $0xf8] sm:$0xff] %v3531_v51  ;;  %16128 = vmatmul.mubr.bf16.gmra.mrb[40].mxu1 %v5189_v41  ;;  %16224 = vmatmul.mubr.bf16.vlgmr.msra.gmra.mrb[40].mxu0 %v5796_v0  ;;  %v5194_v41 = vrot.slane %v19234_v58, 1  ;;  %v5822_v0 = vor.u32 %v5821_v39, %v5818_v23 }
 0x27f   : > { %16131 = vmatprep.mubr.msk.bf16.mxu1 %vm17899_vm0, %v17898_v1  ;;  %16227 = vmatprep.mubr.msk.bf16.mxu0 %vm17899_vm0, %v17898_v1  ;;  %v5830_v10 = vrot.slane %v5828_v47, 2  ;;  %v17575_v47 = vld [vmem:[%s17974_s12 + $0x54] sm:$0xff]  }
 0x280   : > { %16408 = vmatpush3.bf16.msra.mxu0 %v17585_v54  ;;  %16312 = vmatpush3.bf16.msra.mxu1 %v17596_v56  ;;  %v5195_v46 = vsel %vm5184_vm5, %v5192_v21, %v5194_v41  ;;  %v5823_v57 = vsel %vm5779_vm6, %v5813_v11, %v5822_v0  ;;  %v17573_v21 = vld [vmem:[%s17974_s12 + $0x4c] sm:$0xff]  }
 0x281   : > { %v2876_v63 = vpop.f32.mrb[192].mxu1  ;;  %v3421_v2 = vpop.f32.mrb[192].mxu0  ;;  %16409 = vmatprep.subr.bf16.mxu0 %v17898_v1  ;;  %16313 = vmatprep.subr.bf16.mxu1 %v17898_v1 }
 0x282   : > { %v3532_v3 = vadd.f32 %v3421_v2, %v2979_v61  ;;  %v15793_v4 = vpop.f32.mrb[193].mxu1  ;;  %v15889_v6 = vpop.f32.mrb[193].mxu0  ;;  %v2981_v24 = vadd.f32 %v2940_v7, %v2876_v63  ;;  %v19249_v61 = vld [vmem:[%s17974_s12 + $0x44] sm:$0xff]  }
 0x283   : > { %v2879_v36 = vpop.f32.mrb[194].mxu1  ;;  %v3424_v16 = vpop.f32.mrb[194].mxu0  ;;  %v17571_v63 = vld [vmem:[%s17974_s12 + $0x44] sm:$0xff]   ;;  %v2944_v4 = vld [vmem:[#allocation2 + $0x130] sm:$0xff]  ;;  %v5196_v6 = vrot.slane %v19249_v61, 1 }
 0x284   : > { %3573 = vst [vmem:[#allocation2 + $0x100] sm:$0xff] %v3532_v3  ;;  %v3533_v15 = vadd.f32 %v3424_v16, %v2980_v53  ;;  %v15794_v19 = vpop.f32.mrb[195].mxu1  ;;  %v15890_v17 = vpop.f32.mrb[195].mxu0  ;;  %16410 = vmatpush3.bf16.msra.mxu0 %v17593_v62  ;;  %v2982_v29 = vadd.f32 %v2941_v18, %v2879_v36  ;;  %16314 = vmatpush3.bf16.msra.mxu1 %v17604_v44  ;;  %v5827_v62 = vrot.slane %v5825_v45, 1  ;;  %v5834_v16 = vshrl.u32 %v17571_v63, 16  ;;  %v17570_v18 = vld [vmem:[%s17974_s12 + $0x4c] sm:$0xff]  }
 0x285   : > { %16411 = vmatprep.subr.bf16.mxu0 %v17898_v1  ;;  %16315 = vmatprep.subr.bf16.mxu1 %v17898_v1  ;;  %v5197_v22 = vsel %vm5184_vm5, %v5194_v41, %v5196_v6 }
 0x286   : > { %3574 = vst [vmem:[#allocation2 + $0x108] sm:$0xff] %v3533_v15  ;;  %16132 = vmatmul.mubr.bf16.gmra.mrb[44].mxu1 %v5191_v8  ;;  %16228 = vmatmul.mubr.bf16.gmra.mrb[44].mxu0 %v5805_v9  ;;  %v5831_v36 = vor.u32 %v5830_v10, %v5827_v62  ;;  %v5837_v8 = vshll.u32 %v17571_v63, 16 }
 0x287   : > { %16135 = vmatprep.mubr.msk.bf16.mxu1 %vm17899_vm0, %v17898_v1  ;;  %16231 = vmatprep.mubr.msk.bf16.mxu0 %vm17899_vm0, %v17898_v1 }
 0x288   : > { %16412 = vmatpush3.bf16.msra.mxu0 %v17599_v20 }
 0x289   : > { %v2884_v26 = vpop.f32.mrb[196].mxu1  ;;  %v3429_v27 = vpop.f32.mrb[196].mxu0  ;;  %16413 = vmatprep.subr.bf16.mxu0 %v17898_v1 }
 0x28a   : > { %v3534_v28 = vadd.f32 %v3429_v27, %v2981_v24  ;;  %v15797_v30 = vpop.f32.mrb[197].mxu1  ;;  %v15893_v32 = vpop.f32.mrb[197].mxu0  ;;  %v2983_v49 = vadd.f32 %v2942_v31, %v2884_v26  ;;  %v5832_v24 = vsel %vm5779_vm6, %v5822_v0, %v5831_v36  ;;  %v5836_v26 = vrot.slane %v5834_v16, 1 }
 0x28b   : > { %v2887_v35 = vpop.f32.mrb[198].mxu1  ;;  %v3432_v37 = vpop.f32.mrb[198].mxu0  ;;  %v5839_v27 = vrot.slane %v5837_v8, 2  ;;  %v17606_v32 = vld [vmem:[%s20938_s3 + $0x58] sm:$0xff]  }
 0x28c   : > { %3575 = vst [vmem:[#allocation2 + $0x110] sm:$0xff] %v3534_v28  ;;  %v3535_v33 = vadd.f32 %v3432_v37, %v2982_v29  ;;  %v15798_v42 = vpop.f32.mrb[199].mxu1  ;;  %v15894_v43 = vpop.f32.mrb[199].mxu0  ;;  %v2984_v52 = vadd.f32 %v2943_v50, %v2887_v35  ;;  %v5843_v35 = vshrl.u32 %v17573_v21, 16  ;;  %v5198_v37 = vrot.slane %v17570_v18, 1  ;;  %16414 = vmatpush3.bf16.msra.mxu0 %v17606_v32 }
 0x28d   : > { %16415 = vmatprep.subr.bf16.mxu0 %v17898_v1 }
 0x28e   : > { %3576 = vst [vmem:[#allocation2 + $0x118] sm:$0xff] %v3535_v33  ;;  %16136 = vmatmul.mubr.bf16.gmra.mrb[48].mxu1 %v5193_v34  ;;  %16232 = vmatmul.mubr.bf16.gmra.mrb[48].mxu0 %v5814_v38  ;;  %v5840_v34 = vor.u32 %v5839_v27, %v5836_v26  ;;  %v5846_v38 = vshll.u32 %v17573_v21, 16  ;;  %v19270_v33 = vld [vmem:[%s17974_s12 + $0x54] sm:$0xff]   ;;  %v5845_v42 = vrot.slane %v5843_v35, 1  ;;  %v5199_v41 = vsel %vm5184_vm5, %v5196_v6, %v5198_v37  ;;  %v19302_v35 = vld [vmem:[%s17974_s12 + $0x64] sm:$0xff]  }
 0x28f   : > { %16139 = vmatprep.mubr.msk.bf16.mxu1 %vm17899_vm0, %v17898_v1  ;;  %16235 = vmatprep.mubr.msk.bf16.mxu0 %vm17899_vm0, %v17898_v1 }
 0x290   : > { %v5841_v0 = vsel %vm5779_vm6, %v5831_v36, %v5840_v34  ;;  %v5848_v45 = vrot.slane %v5846_v38, 2  ;;  %v19287_v36 = vld [vmem:[%s17974_s12 + $0x5c] sm:$0xff]   ;;  %v17579_v38 = vld [vmem:[%s17974_s12 + $0x64] sm:$0xff]  }
 0x291   : > { %v2892_v51 = vpop.f32.mrb[200].mxu1  ;;  %v3437_v48 = vpop.f32.mrb[200].mxu0 }
 0x292   : > { %v3536_v54 = vadd.f32 %v3437_v48, %v2983_v49  ;;  %v15801_v56 = vpop.f32.mrb[201].mxu1  ;;  %v15897_v59 = vpop.f32.mrb[201].mxu0  ;;  %v2985_v9 = vadd.f32 %v2944_v4, %v2892_v51  ;;  %v17607_v48 = vld [vmem:[%s20938_s3 + $0x20] sm:$0xff]  }
 0x293   : > { %v2895_v60 = vpop.f32.mrb[202].mxu1  ;;  %v3440_v55 = vpop.f32.mrb[202].mxu0  ;;  %v5849_v56 = vor.u32 %v5848_v45, %v5845_v42  ;;  %v5852_v59 = vshrl.u32 %v17575_v47, 16  ;;  %16316 = vmatpush3.bf16.msra.mxu1 %v17607_v48 }
 0x294   : > { %3577 = vst [vmem:[#allocation2 + $0x120] sm:$0xff] %v3536_v54  ;;  %v3537_v2 = vadd.f32 %v3440_v55, %v2984_v52  ;;  %v15802_v53 = vpop.f32.mrb[203].mxu1  ;;  %v15898_v3 = vpop.f32.mrb[203].mxu0  ;;  %v2986_v15 = vadd.f32 %v2945_v13, %v2895_v60  ;;  %v4180_v52 = vld [vmem:[#allocation2] sm:$0xff]  ;;  %v5200_v54 = vrot.slane %v19270_v33, 1  ;;  %v5855_v60 = vshll.u32 %v17575_v47, 16  ;;  %16317 = vmatprep.subr.bf16.mxu1 %v17898_v1 }
 0x295   : > { %v5850_v6 = vsel %vm5779_vm6, %v5840_v34, %v5849_v56  ;;  %v5854_v16 = vrot.slane %v5852_v59, 1  ;;  %v5204_v33 = vrot.slane %v19302_v35, 1  ;;  %v19313_v59 = vld [vmem:[%s17974_s12 + $0x6c] sm:$0xff]  }
 0x296   : > { %3578 = vst [vmem:[#allocation2 + $0x128] sm:$0xff] %v3537_v2  ;;  %16140 = vmatmul.mubr.bf16.gmra.mrb[52].mxu1 %v5195_v46  ;;  %16236 = vmatmul.mubr.bf16.gmra.mrb[52].mxu0 %v5823_v57  ;;  %v4181_v46 = vld [vmem:[#allocation2 + $0x8] sm:$0xff]  ;;  %v5201_v4 = vsel %vm5184_vm5, %v5198_v37, %v5200_v54  ;;  %v5857_v8 = vrot.slane %v5855_v60, 2 }
 0x297   : > { %16143 = vmatprep.mubr.msk.bf16.mxu1 %vm17899_vm0, %v17898_v1  ;;  %16239 = vmatprep.mubr.msk.bf16.mxu0 %vm17899_vm0, %v17898_v1  ;;  %v4189_v35 = vld [vmem:[#allocation2 + $0x48] sm:$0xff] }
 0x299   : > { %v2900_v5 = vpop.f32.mrb[204].mxu1  ;;  %v3445_v14 = vpop.f32.mrb[204].mxu0 }
 0x29a   : > { %v2987_v19 = vadd.f32 %v2946_v12, %v2900_v5  ;;  %v3538_v17 = vadd.f32 %v3445_v14, %v2985_v9  ;;  %v15805_v20 = vpop.f32.mrb[205].mxu1  ;;  %v15901_v7 = vpop.f32.mrb[205].mxu0  ;;  %v17577_v9 = vld [vmem:[%s17974_s12 + $0x5c] sm:$0xff]  }
 0x29b   : > { %v2903_v11 = vpop.f32.mrb[206].mxu1  ;;  %v3448_v25 = vpop.f32.mrb[206].mxu0  ;;  %v17608_v14 = vld [vmem:[%s20938_s3 + $0x60] sm:$0xff]   ;;  %v5861_v20 = vshrl.u32 %v17577_v9, 16  ;;  %v5864_v7 = vshll.u32 %v17577_v9, 16 }
 0x29c   : > { %3028 = vst [vmem:[#allocation2 + $0x140] sm:$0xf] %v2987_v19  ;;  %3579 = vst [vmem:[#allocation2 + $0x130] sm:$0xff] %v3538_v17  ;;  %v3539_v29 = vadd.f32 %v3448_v25, %v2986_v15  ;;  %v15806_v28 = vpop.f32.mrb[207].mxu1  ;;  %v15902_v30 = vpop.f32.mrb[207].mxu0  ;;  %v4182_v15 = vld [vmem:[#allocation2 + $0x10] sm:$0xff]  ;;  %v5858_v17 = vor.u32 %v5857_v8, %v5854_v16  ;;  %16416 = vmatpush3.bf16.msra.mxu0 %v17608_v14 }
 0x29d   : > { %v5202_v19 = vrot.slane %v19287_v36, 1  ;;  %v4183_v11 = vld [vmem:[#allocation2 + $0x18] sm:$0xff]  ;;  %16417 = vmatprep.subr.bf16.mxu0 %v17898_v1  ;;  %v5863_v37 = vrot.slane %v5861_v20, 1  ;;  %v5866_v34 = vrot.slane %v5864_v7, 2 }
 0x29e   : > { %3580 = vst [vmem:[#allocation2 + $0x138] sm:$0xff] %v3539_v29  ;;  %16144 = vmatmul.mubr.bf16.gmra.mrb[56].mxu1 %v5197_v22  ;;  %16240 = vmatmul.mubr.bf16.gmra.mrb[56].mxu0 %v5832_v24  ;;  %v5859_v32 = vsel %vm5779_vm6, %v5849_v56, %v5858_v17  ;;  %v4187_v36 = vld [vmem:[#allocation2 + $0x38] sm:$0xff] }
 0x29f   : > { %16147 = vmatprep.mubr.msk.bf16.mxu1 %vm17899_vm0, %v17898_v1  ;;  %16243 = vmatprep.mubr.msk.bf16.mxu0 %vm17899_vm0, %v17898_v1  ;;  %v5203_v30 = vsel %vm5184_vm5, %v5200_v54, %v5202_v19  ;;  %v5867_v42 = vor.u32 %v5866_v34, %v5863_v37  ;;  %v5205_v54 = vsel %vm5184_vm5, %v5202_v19, %v5204_v33  ;;  %v19328_v20 = vld [vmem:[%s17974_s12 + $0x74] sm:$0xff]  }
 0x2a1   : > { %v3453_v58 = vpop.f32.mrb[208].mxu0  ;;  %v4014_v23 = vpop.f32.mrb[208].mxu1  ;;  %v5868_v56 = vsel %vm5779_vm6, %v5858_v17, %v5867_v42 }
 0x2a2   : > { %v15905_v39 = vpop.f32.mrb[209].mxu0  ;;  %v15925_v40 = vpop.f32.mrb[209].mxu1  ;;  %v4221_v55 = vadd.f32 %v4180_v52, %v4014_v23 }
 0x2a3   : > { %v3499_v43 = vld [vmem:[#allocation2 + $0x140] sm:$0xf]  ;;  %v3456_v44 = vpop.f32.mrb[210].mxu0  ;;  %v4017_v31 = vpop.f32.mrb[210].mxu1 }
 0x2a4   : > { %v3540_v49 = vadd.f32 %v3499_v43, %v3453_v58  ;;  %v15906_v50 = vpop.f32.mrb[211].mxu0  ;;  %v15926_v51 = vpop.f32.mrb[211].mxu1  ;;  %v4222_v62 = vadd.f32 %v4181_v46, %v4017_v31  ;;  %v4184_v40 = vld [vmem:[#allocation2 + $0x20] sm:$0xff]  ;;  %v5870_v43 = vshrl.u32 %v17579_v38, 16  ;;  %v5873_v44 = vshll.u32 %v17579_v38, 16  ;;  %v17581_v46 = vld [vmem:[%s17974_s12 + $0x6c] sm:$0xff]  }
 0x2a6   : > { %3581 = vst [vmem:[#allocation2 + $0x140] sm:$0xf] %v3540_v49  ;;  %16148 = vmatmul.mubr.bf16.gmra.mrb[60].mxu1 %v5199_v41  ;;  %16244 = vmatmul.mubr.bf16.gmra.mrb[60].mxu0 %v5841_v0  ;;  %v4185_v41 = vld [vmem:[#allocation2 + $0x28] sm:$0xff]  ;;  %v5872_v60 = vrot.slane %v5870_v43, 1 }
 0x2a7   : > { %16151 = vmatprep.mubr.msk.bf16.mxu1 %vm17899_vm0, %v17898_v1  ;;  %16247 = vmatprep.mubr.msk.bf16.mxu0 %vm17899_vm0, %v17898_v1 }
 0x2a9   : > { %v4022_v57 = vpop.f32.mrb[212].mxu1  ;;  %v4734_v61 = vpop.f32.mrb[212].mxu0 }
 0x2aa   : > { %v4941_v10 = vadd.f32 %v4734_v61, %v4221_v55  ;;  %v15929_v63 = vpop.f32.mrb[213].mxu1  ;;  %v16025_v2 = vpop.f32.mrb[213].mxu0  ;;  %v4223_v21 = vadd.f32 %v4182_v15, %v4022_v57  ;;  %v5875_v55 = vrot.slane %v5873_v44, 2  ;;  %v19343_v44 = vld [vmem:[%s17974_s12 + $0x7c] sm:$0xff]  }
 0x2ab   : > { %v4025_v53 = vpop.f32.mrb[214].mxu1  ;;  %v4737_v3 = vpop.f32.mrb[214].mxu0  ;;  %v4186_v63 = vld [vmem:[#allocation2 + $0x30] sm:$0xff]  ;;  %v5206_v2 = vrot.slane %v19313_v59, 1 }
 0x2ac   : > { %4982 = vst [vmem:[#allocation2] sm:$0xff] %v4941_v10  ;;  %v4942_v12 = vadd.f32 %v4737_v3, %v4222_v62  ;;  %v15930_v13 = vpop.f32.mrb[215].mxu1  ;;  %v16026_v5 = vpop.f32.mrb[215].mxu0  ;;  %v4224_v24 = vadd.f32 %v4183_v11, %v4025_v53  ;;  %v17609_v10 = vld [vmem:[%s20938_s3 + $0x28] sm:$0xff]   ;;  %v5876_v53 = vor.u32 %v5875_v55, %v5872_v60  ;;  %v5879_v3 = vshrl.u32 %v17581_v46, 16  ;;  %v17584_v11 = vld [vmem:[%s17974_s12 + $0x74] sm:$0xff]  }
 0x2ad   : > { %16318 = vmatpush3.bf16.msra.mxu1 %v17609_v10  ;;  %v5207_v19 = vsel %vm5184_vm5, %v5204_v33, %v5206_v2  ;;  %v4191_v60 = vld [vmem:[#allocation2 + $0x58] sm:$0xff] }
 0x2ae   : > { %4983 = vst [vmem:[#allocation2 + $0x8] sm:$0xff] %v4942_v12  ;;  %16152 = vmatmul.mubr.bf16.gmra.mrb[64].mxu1 %v5201_v4  ;;  %16248 = vmatmul.mubr.bf16.gmra.mrb[64].mxu0 %v5850_v6  ;;  %v5882_v4 = vshll.u32 %v17581_v46, 16  ;;  %v5877_v17 = vsel %vm5779_vm6, %v5867_v42, %v5876_v53  ;;  %v5881_v7 = vrot.slane %v5879_v3, 1 }
 0x2af   : > { %16155 = vmatprep.mubr.msk.bf16.mxu1 %vm17899_vm0, %v17898_v1  ;;  %16251 = vmatprep.mubr.msk.bf16.mxu0 %vm17899_vm0, %v17898_v1 }
 0x2b0   : > { %16319 = vmatprep.subr.bf16.mxu1 %v17898_v1 }
 0x2b1   : > { %v4030_v25 = vpop.f32.mrb[216].mxu1  ;;  %v4742_v22 = vpop.f32.mrb[216].mxu0 }
 0x2b2   : > { %v4943_v18 = vadd.f32 %v4742_v22, %v4223_v21  ;;  %v15933_v26 = vpop.f32.mrb[217].mxu1  ;;  %v16029_v27 = vpop.f32.mrb[217].mxu0  ;;  %v4225_v31 = vadd.f32 %v4184_v40, %v4030_v25  ;;  %v5884_v21 = vrot.slane %v5882_v4, 2  ;;  %v19358_v4 = vld [vmem:[%s17974_s12 + $0x84] sm:$0xff]  }
 0x2b3   : > { %v4033_v29 = vpop.f32.mrb[218].mxu1  ;;  %v4745_v28 = vpop.f32.mrb[218].mxu0  ;;  %v4188_v26 = vld [vmem:[#allocation2 + $0x40] sm:$0xff]  ;;  %v5208_v27 = vrot.slane %v19328_v20, 1  ;;  %v4193_v20 = vld [vmem:[#allocation2 + $0x68] sm:$0xff] }
 0x2b4   : > { %4984 = vst [vmem:[#allocation2 + $0x10] sm:$0xff] %v4943_v18  ;;  %v4944_v58 = vadd.f32 %v4745_v28, %v4224_v24  ;;  %v15934_v23 = vpop.f32.mrb[219].mxu1  ;;  %v16030_v39 = vpop.f32.mrb[219].mxu0  ;;  %v4226_v47 = vadd.f32 %v4185_v41, %v4033_v29  ;;  %v17610_v18 = vld [vmem:[%s20938_s3 + $0x68] sm:$0xff]   ;;  %v5885_v29 = vor.u32 %v5884_v21, %v5881_v7  ;;  %v5888_v28 = vshrl.u32 %v17584_v11, 16 }
 0x2b5   : > { %16418 = vmatpush3.bf16.msra.mxu0 %v17610_v18  ;;  %v5209_v42 = vsel %vm5184_vm5, %v5206_v2, %v5208_v27 }
 0x2b6   : > { %4985 = vst [vmem:[#allocation2 + $0x18] sm:$0xff] %v4944_v58  ;;  %16156 = vmatmul.mubr.bf16.gmra.mrb[68].mxu1 %v5203_v30  ;;  %16252 = vmatmul.mubr.bf16.gmra.mrb[68].mxu0 %v5859_v32  ;;  %v5891_v30 = vshll.u32 %v17584_v11, 16  ;;  %v5886_v43 = vsel %vm5779_vm6, %v5876_v53, %v5885_v29 }
 0x2b7   : > { %16159 = vmatprep.mubr.msk.bf16.mxu1 %vm17899_vm0, %v17898_v1  ;;  %16255 = vmatprep.mubr.msk.bf16.mxu0 %vm17899_vm0, %v17898_v1 }
 0x2b8   : > { %16419 = vmatprep.subr.bf16.mxu0 %v17898_v1  ;;  %v5893_v41 = vrot.slane %v5891_v30, 2 }
 0x2b9   : > { %v4038_v0 = vpop.f32.mrb[220].mxu1  ;;  %v4750_v45 = vpop.f32.mrb[220].mxu0 }
 0x2ba   : > { %v4945_v49 = vadd.f32 %v4750_v45, %v4225_v31  ;;  %v15937_v50 = vpop.f32.mrb[221].mxu1  ;;  %v16033_v51 = vpop.f32.mrb[221].mxu0  ;;  %v4227_v6 = vadd.f32 %v4186_v63, %v4038_v0  ;;  %v5890_v31 = vrot.slane %v5888_v28, 1  ;;  %v17587_v0 = vld [vmem:[%s17974_s12 + $0x7c] sm:$0xff]   ;;  %v19369_v28 = vld [vmem:[%s17974_s12 + $0x8c] sm:$0xff]  }
 0x2bb   : > { %v4041_v48 = vpop.f32.mrb[222].mxu1  ;;  %v4753_v52 = vpop.f32.mrb[222].mxu0  ;;  %v17611_v50 = vld [vmem:[%s20938_s3 + $0x30] sm:$0xff]  }
 0x2bc   : > { %4986 = vst [vmem:[#allocation2 + $0x20] sm:$0xff] %v4945_v49  ;;  %v4946_v57 = vadd.f32 %v4753_v52, %v4226_v47  ;;  %v15938_v61 = vpop.f32.mrb[223].mxu1  ;;  %v16034_v62 = vpop.f32.mrb[223].mxu0  ;;  %v4228_v9 = vadd.f32 %v4187_v36, %v4041_v48  ;;  %v4190_v51 = vld [vmem:[#allocation2 + $0x50] sm:$0xff]  ;;  %v5210_v48 = vrot.slane %v19343_v44, 1  ;;  %v5894_v52 = vor.u32 %v5893_v41, %v5890_v31  ;;  %16320 = vmatpush3.bf16.msra.mxu1 %v17611_v50  ;;  %v4195_v44 = vld [vmem:[#allocation2 + $0x78] sm:$0xff] }
 0x2bd   : > { %16321 = vmatprep.subr.bf16.mxu1 %v17898_v1  ;;  %v19382_v50 = vld [vmem:[%s17974_s12 + $0x94] sm:$0xff]  }
 0x2be   : > { %4987 = vst [vmem:[#allocation2 + $0x28] sm:$0xff] %v4946_v57  ;;  %16160 = vmatmul.mubr.bf16.gmra.mrb[72].mxu1 %v5205_v54  ;;  %16256 = vmatmul.mubr.bf16.gmra.mrb[72].mxu0 %v5868_v56  ;;  %v5897_v54 = vshrl.u32 %v17587_v0, 16  ;;  %v5900_v56 = vshll.u32 %v17587_v0, 16  ;;  %v5211_v53 = vsel %vm5184_vm5, %v5208_v27, %v5210_v48  ;;  %v5895_v3 = vsel %vm5779_vm6, %v5885_v29, %v5894_v52 }
 0x2bf   : > { %16163 = vmatprep.mubr.msk.bf16.mxu1 %vm17899_vm0, %v17898_v1  ;;  %16259 = vmatprep.mubr.msk.bf16.mxu0 %vm17899_vm0, %v17898_v1 }
 0x2c0   : > { %v5902_v36 = vrot.slane %v5900_v56, 2 }
 0x2c1   : > { %v4046_v16 = vpop.f32.mrb[224].mxu1  ;;  %v4758_v8 = vpop.f32.mrb[224].mxu0 }
 0x2c2   : > { %v4947_v12 = vadd.f32 %v4758_v8, %v4227_v6  ;;  %v15941_v13 = vpop.f32.mrb[225].mxu1  ;;  %v16037_v5 = vpop.f32.mrb[225].mxu0  ;;  %v4229_v32 = vadd.f32 %v4188_v26, %v4046_v16  ;;  %v5899_v6 = vrot.slane %v5897_v54, 1  ;;  %v17590_v16 = vld [vmem:[%s17974_s12 + $0x84] sm:$0xff]  }
 0x2c3   : > { %v4049_v14 = vpop.f32.mrb[226].mxu1  ;;  %v4761_v15 = vpop.f32.mrb[226].mxu0  ;;  %v4192_v13 = vld [vmem:[#allocation2 + $0x60] sm:$0xff]  ;;  %v5212_v5 = vrot.slane %v19358_v4, 1 }
 0x2c4   : > { %4988 = vst [vmem:[#allocation2 + $0x30] sm:$0xff] %v4947_v12  ;;  %v4948_v25 = vadd.f32 %v4761_v15, %v4228_v9  ;;  %v15942_v22 = vpop.f32.mrb[227].mxu1  ;;  %v16038_v24 = vpop.f32.mrb[227].mxu0  ;;  %v4230_v38 = vadd.f32 %v4189_v35, %v4049_v14  ;;  %v5903_v14 = vor.u32 %v5902_v36, %v5899_v6  ;;  %v5906_v15 = vshrl.u32 %v17590_v16, 16  ;;  %v17592_v35 = vld [vmem:[%s17974_s12 + $0x8c] sm:$0xff]  }
 0x2c5   : > { %v5213_v27 = vsel %vm5184_vm5, %v5210_v48, %v5212_v5  ;;  %v4197_v6 = vld [vmem:[#allocation2 + $0x88] sm:$0xff] }
 0x2c6   : > { %4989 = vst [vmem:[#allocation2 + $0x38] sm:$0xff] %v4948_v25  ;;  %16164 = vmatmul.mubr.bf16.gmra.mrb[76].mxu1 %v5207_v19  ;;  %16260 = vmatmul.mubr.bf16.gmra.mrb[76].mxu0 %v5877_v17  ;;  %v5909_v19 = vshll.u32 %v17590_v16, 16  ;;  %v5904_v29 = vsel %vm5779_vm6, %v5894_v52, %v5903_v14  ;;  %v5908_v30 = vrot.slane %v5906_v15, 1 }
 0x2c7   : > { %16167 = vmatprep.mubr.msk.bf16.mxu1 %vm17899_vm0, %v17898_v1  ;;  %16263 = vmatprep.mubr.msk.bf16.mxu0 %vm17899_vm0, %v17898_v1 }
 0x2c9   : > { %v4054_v37 = vpop.f32.mrb[228].mxu1  ;;  %v4766_v34 = vpop.f32.mrb[228].mxu0 }
 0x2ca   : > { %v4949_v58 = vadd.f32 %v4766_v34, %v4229_v32  ;;  %v15945_v23 = vpop.f32.mrb[229].mxu1  ;;  %v16041_v39 = vpop.f32.mrb[229].mxu0  ;;  %v4231_v59 = vadd.f32 %v4190_v51, %v4054_v37  ;;  %v5911_v32 = vrot.slane %v5909_v19, 2 }
 0x2cb   : > { %v4057_v40 = vpop.f32.mrb[230].mxu1  ;;  %v4769_v33 = vpop.f32.mrb[230].mxu0  ;;  %v4194_v23 = vld [vmem:[#allocation2 + $0x70] sm:$0xff]  ;;  %v5214_v39 = vrot.slane %v19369_v28, 1 }
 0x2cc   : > { %4990 = vst [vmem:[#allocation2 + $0x40] sm:$0xff] %v4949_v58  ;;  %v4950_v45 = vadd.f32 %v4769_v33, %v4230_v38  ;;  %v15946_v47 = vpop.f32.mrb[231].mxu1  ;;  %v16042_v49 = vpop.f32.mrb[231].mxu0  ;;  %v4232_v57 = vadd.f32 %v4191_v60, %v4057_v40  ;;  %v17612_v58 = vld [vmem:[%s20938_s3 + $0x70] sm:$0xff]   ;;  %v5912_v40 = vor.u32 %v5911_v32, %v5908_v30  ;;  %v5915_v33 = vshrl.u32 %v17592_v35, 16  ;;  %v4199_v30 = vld [vmem:[#allocation2 + $0x98] sm:$0xff] }
 0x2cd   : > { %16420 = vmatpush3.bf16.msra.mxu0 %v17612_v58  ;;  %v5215_v52 = vsel %vm5184_vm5, %v5212_v5, %v5214_v39  ;;  %v17595_v60 = vld [vmem:[%s17974_s12 + $0x94] sm:$0xff]  }
 0x2ce   : > { %4991 = vst [vmem:[#allocation2 + $0x48] sm:$0xff] %v4950_v45  ;;  %16168 = vmatmul.mubr.bf16.gmra.mrb[80].mxu1 %v5209_v42  ;;  %16264 = vmatmul.mubr.bf16.gmra.mrb[80].mxu0 %v5886_v43  ;;  %v5918_v42 = vshll.u32 %v17592_v35, 16  ;;  %v5913_v54 = vsel %vm5779_vm6, %v5903_v14, %v5912_v40  ;;  %v5917_v56 = vrot.slane %v5915_v33, 1 }
 0x2cf   : > { %16171 = vmatprep.mubr.msk.bf16.mxu1 %vm17899_vm0, %v17898_v1  ;;  %16267 = vmatprep.mubr.msk.bf16.mxu0 %vm17899_vm0, %v17898_v1 }
 0x2d0   : > { %16421 = vmatprep.subr.bf16.mxu0 %v17898_v1 }
 0x2d1   : > { %v4062_v55 = vpop.f32.mrb[232].mxu1  ;;  %v4774_v46 = vpop.f32.mrb[232].mxu0 }
 0x2d2   : > { %v4951_v61 = vadd.f32 %v4774_v46, %v4231_v59  ;;  %v15949_v62 = vpop.f32.mrb[233].mxu1  ;;  %v16045_v10 = vpop.f32.mrb[233].mxu0  ;;  %v4233_v17 = vadd.f32 %v4192_v13, %v4062_v55  ;;  %v5920_v59 = vrot.slane %v5918_v42, 2  ;;  %v17614_v55 = vld [vmem:[%s20938_s3 + $0x78] sm:$0xff]   ;;  %v17597_v42 = vld [vmem:[%s17974_s12 + $0xa4] sm:$0xff]  }
 0x2d3   : > { %v4065_v63 = vpop.f32.mrb[234].mxu1  ;;  %v4777_v2 = vpop.f32.mrb[234].mxu0  ;;  %16422 = vmatpush3.bf16.msra.mxu0 %v17614_v55  ;;  %v4196_v62 = vld [vmem:[#allocation2 + $0x80] sm:$0xff]  ;;  %v5216_v10 = vrot.slane %v19382_v50, 1 }
 0x2d4   : > { %4992 = vst [vmem:[#allocation2 + $0x50] sm:$0xff] %v4951_v61  ;;  %v4952_v8 = vadd.f32 %v4777_v2, %v4232_v57  ;;  %v15950_v9 = vpop.f32.mrb[235].mxu1  ;;  %v16046_v12 = vpop.f32.mrb[235].mxu0  ;;  %v4234_v11 = vadd.f32 %v4193_v20, %v4065_v63  ;;  %v5921_v63 = vor.u32 %v5920_v59, %v5917_v56  ;;  %v5924_v2 = vshrl.u32 %v17595_v60, 16  ;;  %16607 = vmatprep.subr.bf16.mxu0 %v17898_v1 }
 0x2d5   : > { %v5217_v15 = vsel %vm5184_vm5, %v5214_v39, %v5216_v10 }
 0x2d6   : > { %4993 = vst [vmem:[#allocation2 + $0x58] sm:$0xff] %v4952_v8  ;;  %16172 = vmatmul.mubr.bf16.gmra.mrb[84].mxu1 %v5211_v53  ;;  %16268 = vmatmul.mubr.bf16.gmra.mrb[84].mxu0 %v5895_v3  ;;  %v5927_v53 = vshll.u32 %v17595_v60, 16  ;;  %v17613_v3 = vld [vmem:[%s20938_s3 + $0x38] sm:$0xff]   ;;  %v5922_v19 = vsel %vm5779_vm6, %v5912_v40, %v5921_v63  ;;  %v5926_v20 = vrot.slane %v5924_v2, 1  ;;  %v17600_v2 = vld [vmem:[%s17974_s12 + $0xac] sm:$0xff]  }
 0x2d7   : > { %16175 = vmatprep.mubr.msk.bf16.mxu1 %vm17899_vm0, %v17898_v1  ;;  %16271 = vmatprep.mubr.msk.bf16.mxu0 %vm17899_vm0, %v17898_v1 }
 0x2d8   : > { %16322 = vmatpush3.bf16.msra.mxu1 %v17613_v3 }
 0x2d9   : > { %v4070_v7 = vpop.f32.mrb[236].mxu1  ;;  %v4782_v21 = vpop.f32.mrb[236].mxu0  ;;  %16507 = vmatprep.subr.bf16.mxu1 %v17898_v1 }
 0x2da   : > { %v4953_v25 = vadd.f32 %v4782_v21, %v4233_v17  ;;  %v15953_v22 = vpop.f32.mrb[237].mxu1  ;;  %v16049_v24 = vpop.f32.mrb[237].mxu0  ;;  %v4235_v43 = vadd.f32 %v4194_v23, %v4070_v7  ;;  %v17594_v17 = vld [vmem:[%s17974_s12 + $0x9c] sm:$0xff]   ;;  %v5929_v7 = vrot.slane %v5927_v53, 2 }
 0x2db   : > { %v4073_v18 = vpop.f32.mrb[238].mxu1  ;;  %v4785_v26 = vpop.f32.mrb[238].mxu0  ;;  %v17598_v21 = vld [vmem:[%s17974_s12 + $0x9c] sm:$0xff]   ;;  %v4198_v24 = vld [vmem:[#allocation2 + $0x90] sm:$0xff] }
 0x2dc   : > { %4994 = vst [vmem:[#allocation2 + $0x60] sm:$0xff] %v4953_v25  ;;  %v4954_v37 = vadd.f32 %v4785_v26, %v4234_v11  ;;  %v15954_v34 = vpop.f32.mrb[239].mxu1  ;;  %v16050_v38 = vpop.f32.mrb[239].mxu0  ;;  %v4236_v0 = vadd.f32 %v4195_v44, %v4073_v18  ;;  %v5218_v18 = vrot.slane %v17594_v17, 1  ;;  %v5930_v26 = vor.u32 %v5929_v7, %v5926_v20 }
 0x2de   : > { %4995 = vst [vmem:[#allocation2 + $0x68] sm:$0xff] %v4954_v37  ;;  %16176 = vmatmul.mubr.bf16.gmra.mrb[88].mxu1 %v5213_v27  ;;  %16272 = vmatmul.mubr.bf16.gmra.mrb[88].mxu0 %v5904_v29  ;;  %v5933_v27 = vshrl.u32 %v17598_v21, 16  ;;  %v5936_v29 = vshll.u32 %v17598_v21, 16  ;;  %v5219_v40 = vsel %vm5184_vm5, %v5216_v10, %v5218_v18  ;;  %v5931_v33 = vsel %vm5779_vm6, %v5921_v63, %v5930_v26 }
 0x2df   : > { %16179 = vmatprep.mubr.msk.bf16.mxu1 %vm17899_vm0, %v17898_v1  ;;  %16275 = vmatprep.mubr.msk.bf16.mxu0 %vm17899_vm0, %v17898_v1 }
 0x2e0   : > { %v5938_v44 = vrot.slane %v5936_v29, 2 }
 0x2e1   : > { %v4078_v31 = vpop.f32.mrb[240].mxu1  ;;  %v4790_v41 = vpop.f32.mrb[240].mxu0 }
 0x2e2   : > { %v4955_v45 = vadd.f32 %v4790_v41, %v4235_v43  ;;  %v15957_v47 = vpop.f32.mrb[241].mxu1  ;;  %v16053_v49 = vpop.f32.mrb[241].mxu0  ;;  %v4237_v4 = vadd.f32 %v4196_v62, %v4078_v31  ;;  %v5935_v43 = vrot.slane %v5933_v27, 1  ;;  %v17601_v31 = vld [vmem:[%s17974_s12 + $0xa4] sm:$0xff]  }
 0x2e3   : > { %v4081_v51 = vpop.f32.mrb[242].mxu1  ;;  %v4793_v48 = vpop.f32.mrb[242].mxu0  ;;  %v4200_v47 = vld [vmem:[#allocation2 + $0xa0] sm:$0xff]  ;;  %v5220_v49 = vrot.slane %v17597_v42, 1 }
 0x2e4   : > { %4996 = vst [vmem:[#allocation2 + $0x70] sm:$0xff] %v4955_v45  ;;  %v4956_v46 = vadd.f32 %v4793_v48, %v4236_v0  ;;  %v15958_v57 = vpop.f32.mrb[243].mxu1  ;;  %v16054_v61 = vpop.f32.mrb[243].mxu0  ;;  %v4238_v8 = vadd.f32 %v4197_v6, %v4081_v51  ;;  %v5939_v50 = vor.u32 %v5938_v44, %v5935_v43  ;;  %v5942_v51 = vshrl.u32 %v17601_v31, 16 }
 0x2e5   : > { %v5945_v48 = vshll.u32 %v17601_v31, 16  ;;  %v5221_v10 = vsel %vm5184_vm5, %v5218_v18, %v5220_v49 }
 0x2e6   : > { %4997 = vst [vmem:[#allocation2 + $0x78] sm:$0xff] %v4956_v46  ;;  %16180 = vmatmul.mubr.bf16.gmra.mrb[92].mxu1 %v5215_v52  ;;  %16276 = vmatmul.mubr.bf16.gmra.mrb[92].mxu0 %v5913_v54  ;;  %v4201_v54 = vld [vmem:[#allocation2 + $0xa8] sm:$0xff]  ;;  %v5940_v63 = vsel %vm5779_vm6, %v5930_v26, %v5939_v50  ;;  %v5944_v53 = vrot.slane %v5942_v51, 1 }
 0x2e7   : > { %16183 = vmatprep.mubr.msk.bf16.mxu1 %vm17899_vm0, %v17898_v1  ;;  %16279 = vmatprep.mubr.msk.bf16.mxu0 %vm17899_vm0, %v17898_v1  ;;  %v5947_v3 = vrot.slane %v5945_v48, 2 }
 0x2e9   : > { %v4086_v36 = vpop.f32.mrb[244].mxu1  ;;  %v4798_v16 = vpop.f32.mrb[244].mxu0 }
 0x2ea   : > { %v4957_v9 = vadd.f32 %v4798_v16, %v4237_v4  ;;  %v15961_v12 = vpop.f32.mrb[245].mxu1  ;;  %v16057_v13 = vpop.f32.mrb[245].mxu0  ;;  %v4239_v28 = vadd.f32 %v4198_v24, %v4086_v36  ;;  %v17603_v4 = vld [vmem:[%s17974_s12 + $0xac] sm:$0xff]  }
 0x2eb   : > { %v4089_v5 = vpop.f32.mrb[246].mxu1  ;;  %v4801_v14 = vpop.f32.mrb[246].mxu0  ;;  %v5948_v12 = vor.u32 %v5947_v3, %v5944_v53  ;;  %v5951_v13 = vshrl.u32 %v17603_v4, 16 }
 0x2ec   : > { %4998 = vst [vmem:[#allocation2 + $0x80] sm:$0xff] %v4957_v9  ;;  %v4958_v11 = vadd.f32 %v4801_v14, %v4238_v8  ;;  %v15962_v25 = vpop.f32.mrb[247].mxu1  ;;  %v16058_v22 = vpop.f32.mrb[247].mxu0  ;;  %v4240_v37 = vadd.f32 %v4199_v30, %v4089_v5  ;;  %v4202_v8 = vld [vmem:[#allocation2 + $0xb0] sm:$0xff]  ;;  %v5222_v9 = vrot.slane %v17600_v2, 1  ;;  %v5954_v5 = vshll.u32 %v17603_v4, 16 }
 0x2ed   : > { %v19425_v25 = vld [vmem:[%s17974_s12 + $0xb4] ss:$0 sps:$4 sm:$0x77]   ;;  %v5949_v26 = vsel %vm5779_vm6, %v5939_v50, %v5948_v12  ;;  %v5953_v27 = vrot.slane %v5951_v13, 1 }
 0x2ee   : > { %4999 = vst [vmem:[#allocation2 + $0x88] sm:$0xff] %v4958_v11  ;;  %16184 = vmatmul.mubr.bf16.gmra.mrb[96].mxu1 %v5217_v15  ;;  %16280 = vmatmul.mubr.bf16.gmra.mrb[96].mxu0 %v5922_v19  ;;  %v4203_v15 = vld [vmem:[#allocation2 + $0xb8] sm:$0xff]  ;;  %v5223_v18 = vsel %vm5184_vm5, %v5220_v49, %v5222_v9  ;;  %v5956_v29 = vrot.slane %v5954_v5, 2 }
 0x2ef   : > { %16187 = vmatprep.mubr.msk.bf16.mxu1 %vm17899_vm0, %v17898_v1  ;;  %16283 = vmatprep.mubr.msk.bf16.mxu0 %vm17899_vm0, %v17898_v1 }
 0x2f1   : > { %v4094_v32 = vpop.f32.mrb[248].mxu1  ;;  %v4806_v35 = vpop.f32.mrb[248].mxu0 }
 0x2f2   : > { %v4959_v34 = vadd.f32 %v4806_v35, %v4239_v28  ;;  %v15965_v38 = vpop.f32.mrb[249].mxu1  ;;  %v16061_v58 = vpop.f32.mrb[249].mxu0  ;;  %v4241_v52 = vadd.f32 %v4200_v47, %v4094_v32  ;;  %v17605_v28 = vld [vmem:[%s17974_s12 + $0xb4] ss:$0 sps:$4 sm:$0xff]  }
 0x2f3   : > { %v4097_v23 = vpop.f32.mrb[250].mxu1  ;;  %v4809_v39 = vpop.f32.mrb[250].mxu0  ;;  %v5957_v38 = vor.u32 %v5956_v29, %v5953_v27  ;;  %v5960_v58 = vshrl.u32 %v17605_v28, 16 }
 0x2f4   : > { %5000 = vst [vmem:[#allocation2 + $0x90] sm:$0xff] %v4959_v34  ;;  %v4960_v41 = vadd.f32 %v4809_v39, %v4240_v37  ;;  %v15966_v0 = vpop.f32.mrb[251].mxu1  ;;  %v16062_v45 = vpop.f32.mrb[251].mxu0  ;;  %v4242_v60 = vadd.f32 %v4201_v54, %v4097_v23  ;;  %v4204_v37 = vld [vmem:[#allocation2 + $0xc0] sm:$0xff]  ;;  %v5224_v34 = vrot.slane %v19425_v25, 1  ;;  %v5963_v23 = vshll.u32 %v17605_v28, 16 }
 0x2f5   : > { %v5958_v49 = vsel %vm5779_vm6, %v5948_v12, %v5957_v38  ;;  %v5962_v50 = vrot.slane %v5960_v58, 1  ;;  %v4210_v25 = vld [vmem:[#allocation2 + $0xf0] sm:$0xff]  ;;  %v4212_v58 = vld [vmem:[#allocation2 + $0x100] sm:$0xff] }
 0x2f6   : > { %5001 = vst [vmem:[#allocation2 + $0x98] sm:$0xff] %v4960_v41  ;;  %16188 = vmatmul.mubr.bf16.gmra.mrb[100].mxu1 %v5219_v40  ;;  %16284 = vmatmul.mubr.bf16.gmra.mrb[100].mxu0 %v5931_v33  ;;  %v4205_v40 = vld [vmem:[#allocation2 + $0xc8] sm:$0xff]  ;;  %v5225_v47 = vsel %vm5184_vm5, %v5222_v9, %v5224_v34  ;;  %v5965_v51 = vrot.slane %v5963_v23, 2 }
 0x2f7   : > { %16191 = vmatprep.mubr.msk.bf16.mxu1 %vm17899_vm0, %v17898_v1  ;;  %16287 = vmatprep.mubr.msk.bf16.mxu0 %vm17899_vm0, %v17898_v1  ;;  %v4209_v9 = vld [vmem:[#allocation2 + $0xe8] sm:$0xff] }
 0x2f9   : > { %v4102_v56 = vpop.f32.mrb[252].mxu1  ;;  %v4814_v59 = vpop.f32.mrb[252].mxu0 }
 0x2fa   : > { %v4961_v55 = vadd.f32 %v4814_v59, %v4241_v52  ;;  %v15969_v46 = vpop.f32.mrb[253].mxu1  ;;  %v16065_v57 = vpop.f32.mrb[253].mxu0  ;;  %v4243_v14 = vadd.f32 %v4202_v8, %v4102_v56  ;;  %v4206_v56 = vld [vmem:[#allocation2 + $0xd0] sm:$0xff]  ;;  %v5966_v59 = vor.u32 %v5965_v51, %v5962_v50 }
 0x2fb   : > { %v4105_v61 = vpop.f32.mrb[254].mxu1  ;;  %v4817_v62 = vpop.f32.mrb[254].mxu0  ;;  %v4214_v50 = vld [vmem:[#allocation2 + $0x110] sm:$0xff] }
 0x2fc   : > { %5002 = vst [vmem:[#allocation2 + $0xa0] sm:$0xff] %v4961_v55  ;;  %v4962_v6 = vadd.f32 %v4817_v62, %v4242_v60  ;;  %v15970_v36 = vpop.f32.mrb[255].mxu1  ;;  %v16066_v16 = vpop.f32.mrb[255].mxu0  ;;  %v4244_v20 = vadd.f32 %v4203_v15, %v4105_v61  ;;  %v4207_v55 = vld [vmem:[#allocation2 + $0xd8] sm:$0xff]  ;;  %v5967_v3 = vsel %vm5779_vm6, %v5957_v38, %v5966_v59 }
 0x2fd   : > { %v4208_v16 = vld [vmem:[#allocation2 + $0xe0] sm:$0xff] }
 0x2fe   : > { %5003 = vst [vmem:[#allocation2 + $0xa8] sm:$0xff] %v4962_v6  ;;  %16192 = vmatmul.mubr.bf16.gmra.mrb[104].mxu1 %v5221_v10  ;;  %16288 = vmatmul.mubr.bf16.gmra.mrb[104].mxu0 %v5940_v63 }
 0x2ff   : > { %16195 = vmatprep.mubr.msk.bf16.mxu1 %vm17899_vm0, %v17898_v1  ;;  %16291 = vmatprep.mubr.msk.bf16.mxu0 %vm17899_vm0, %v17898_v1 }
 0x301   : > { %v4110_v19 = vpop.f32.mrb[0].mxu1  ;;  %v4822_v17 = vpop.f32.mrb[0].mxu0 }
 0x302   : > { %v4963_v7 = vadd.f32 %v4822_v17, %v4243_v14  ;;  %v15973_v21 = vpop.f32.mrb[1].mxu1  ;;  %v16069_v11 = vpop.f32.mrb[1].mxu0  ;;  %v4245_v39 = vadd.f32 %v4204_v37, %v4110_v19 }
 0x303   : > { %v4113_v22 = vpop.f32.mrb[2].mxu1  ;;  %v4825_v24 = vpop.f32.mrb[2].mxu0 }
 0x304   : > { %5004 = vst [vmem:[#allocation2 + $0xb0] sm:$0xff] %v4963_v7  ;;  %v4964_v30 = vadd.f32 %v4825_v24, %v4244_v20  ;;  %v15974_v32 = vpop.f32.mrb[3].mxu1  ;;  %v16070_v35 = vpop.f32.mrb[3].mxu0  ;;  %v4246_v43 = vadd.f32 %v4205_v40, %v4113_v22  ;;  %v4211_v24 = vld [vmem:[#allocation2 + $0xf8] sm:$0xff] }
 0x306   : > { %5005 = vst [vmem:[#allocation2 + $0xb8] sm:$0xff] %v4964_v30  ;;  %16196 = vmatmul.mubr.bf16.gmra.mrb[108].mxu1 %v5223_v18  ;;  %16292 = vmatmul.mubr.bf16.gmra.mrb[108].mxu0 %v5949_v26 }
 0x307   : > { %16199 = vmatprep.mubr.msk.bf16.mxu1 %vm17899_vm0, %v17898_v1  ;;  %16295 = vmatprep.mubr.msk.bf16.mxu0 %vm17899_vm0, %v17898_v1 }
 0x309   : > { %v4118_v33 = vpop.f32.mrb[4].mxu1  ;;  %v4830_v42 = vpop.f32.mrb[4].mxu0 }
 0x30a   : > { %v4965_v44 = vadd.f32 %v4830_v42, %v4245_v39  ;;  %v15977_v31 = vpop.f32.mrb[5].mxu1  ;;  %v16073_v41 = vpop.f32.mrb[5].mxu0  ;;  %v4247_v60 = vadd.f32 %v4206_v56, %v4118_v33  ;;  %v4213_v39 = vld [vmem:[#allocation2 + $0x108] sm:$0xff] }
 0x30b   : > { %v4121_v0 = vpop.f32.mrb[6].mxu1  ;;  %v4833_v45 = vpop.f32.mrb[6].mxu0 }
 0x30c   : > { %5006 = vst [vmem:[#allocation2 + $0xc0] sm:$0xff] %v4965_v44  ;;  %v4966_v48 = vadd.f32 %v4833_v45, %v4246_v43  ;;  %v15978_v52 = vpop.f32.mrb[7].mxu1  ;;  %v16074_v54 = vpop.f32.mrb[7].mxu0  ;;  %v4248_v61 = vadd.f32 %v4207_v55, %v4121_v0 }
 0x30e   : > { %5007 = vst [vmem:[#allocation2 + $0xc8] sm:$0xff] %v4966_v48  ;;  %16200 = vmatmul.mubr.bf16.gmra.mrb[112].mxu1 %v5225_v47  ;;  %16296 = vmatmul.mubr.bf16.gmra.mrb[112].mxu0 %v5958_v49  ;;  %v4215_v48 = vld [vmem:[#allocation2 + $0x118] sm:$0xff] }
 0x30f   : > { %16203 = vmatprep.mubr.msk.bf16.mxu1 %vm17899_vm0, %v17898_v1  ;;  %16299 = vmatprep.mubr.msk.bf16.mxu0 %vm17899_vm0, %v17898_v1 }
 0x311   : > { %v4126_v46 = vpop.f32.mrb[8].mxu1  ;;  %v4838_v57 = vpop.f32.mrb[8].mxu0 }
 0x312   : > { %v4967_v62 = vadd.f32 %v4838_v57, %v4247_v60  ;;  %v15981_v10 = vpop.f32.mrb[9].mxu1  ;;  %v16077_v63 = vpop.f32.mrb[9].mxu0  ;;  %v4249_v8 = vadd.f32 %v4208_v16, %v4126_v46 }
 0x313   : > { %v4129_v2 = vpop.f32.mrb[10].mxu1  ;;  %v4841_v53 = vpop.f32.mrb[10].mxu0  ;;  %v4216_v63 = vld [vmem:[#allocation2 + $0x120] sm:$0xff] }
 0x314   : > { %5008 = vst [vmem:[#allocation2 + $0xd0] sm:$0xff] %v4967_v62  ;;  %v4968_v4 = vadd.f32 %v4841_v53, %v4248_v61  ;;  %v15982_v6 = vpop.f32.mrb[11].mxu1  ;;  %v16078_v36 = vpop.f32.mrb[11].mxu0  ;;  %v4250_v5 = vadd.f32 %v4209_v9, %v4129_v2  ;;  %v4217_v53 = vld [vmem:[#allocation2 + $0x128] sm:$0xff] }
 0x316   : > { %5009 = vst [vmem:[#allocation2 + $0xd8] sm:$0xff] %v4968_v4  ;;  %16204 = vmatmul.mubr.bf16.gmra.mrb[116].mxu1 %v5224_v34  ;;  %16300 = vmatmul.mubr.bf16.gmra.mrb[116].mxu0 %v5967_v3 }
 0x317   : > { %16303 = vmatprep.mubr.msk.bf16.mxu0 %vm17899_vm0, %v17898_v1  ;;  %16323 = vmatprep.mubr.msk.bf16.mxu1 %vm17899_vm0, %v17898_v1 }
 0x319   : > { %v4134_v12 = vpop.f32.mrb[12].mxu1  ;;  %v4846_v13 = vpop.f32.mrb[12].mxu0 }
 0x31a   : > { %v4969_v14 = vadd.f32 %v4846_v13, %v4249_v8  ;;  %v15985_v15 = vpop.f32.mrb[13].mxu1  ;;  %v16081_v19 = vpop.f32.mrb[13].mxu0  ;;  %v4251_v22 = vadd.f32 %v4210_v25, %v4134_v12 }
 0x31b   : > { %v4137_v17 = vpop.f32.mrb[14].mxu1  ;;  %v4849_v20 = vpop.f32.mrb[14].mxu0  ;;  %v4218_v15 = vld [vmem:[#allocation2 + $0x130] sm:$0xff] }
 0x31c   : > { %5010 = vst [vmem:[#allocation2 + $0xe0] sm:$0xff] %v4969_v14  ;;  %v4970_v7 = vadd.f32 %v4849_v20, %v4250_v5  ;;  %v15986_v21 = vpop.f32.mrb[15].mxu1  ;;  %v16082_v11 = vpop.f32.mrb[15].mxu0  ;;  %v4252_v27 = vadd.f32 %v4211_v24, %v4137_v17  ;;  %v4220_v17 = vld [vmem:[#allocation2 + $0x140] sm:$0xf]  ;;  %v4219_v20 = vld [vmem:[#allocation2 + $0x138] sm:$0xff] }
 0x31e   : > { %5011 = vst [vmem:[#allocation2 + $0xe8] sm:$0xff] %v4970_v7  ;;  %16304 = vmatmul.mubr.bf16.gmra.mrb[120].mxu0 %v5966_v59 }
 0x31f   : > { %16423 = vmatprep.mubr.msk.bf16.mxu0 %vm17899_vm0, %v17898_v1 }
 0x321   : > { %v4142_v18 = vpop.f32.mrb[16].mxu1  ;;  %v4854_v26 = vpop.f32.mrb[16].mxu0 }
 0x322   : > { %v4971_v29 = vadd.f32 %v4854_v26, %v4251_v22  ;;  %v15989_v28 = vpop.f32.mrb[17].mxu1  ;;  %v16085_v30 = vpop.f32.mrb[17].mxu0  ;;  %v4253_v23 = vadd.f32 %v4212_v58, %v4142_v18 }
 0x323   : > { %v4145_v32 = vpop.f32.mrb[18].mxu1  ;;  %v4857_v35 = vpop.f32.mrb[18].mxu0 }
 0x324   : > { %5012 = vst [vmem:[#allocation2 + $0xf0] sm:$0xff] %v4971_v29  ;;  %v4972_v37 = vadd.f32 %v4857_v35, %v4252_v27  ;;  %v15990_v34 = vpop.f32.mrb[19].mxu1  ;;  %v16086_v38 = vpop.f32.mrb[19].mxu0  ;;  %v4254_v42 = vadd.f32 %v4213_v39, %v4145_v32 }
 0x326   : > { %5013 = vst [vmem:[#allocation2 + $0xf8] sm:$0xff] %v4972_v37 }
 0x329   : > { %v4150_v40 = vpop.f32.mrb[20].mxu1  ;;  %v4862_v33 = vpop.f32.mrb[20].mxu0 }
 0x32a   : > { %v4973_v43 = vadd.f32 %v4862_v33, %v4253_v23  ;;  %v15993_v44 = vpop.f32.mrb[21].mxu1  ;;  %v16089_v31 = vpop.f32.mrb[21].mxu0  ;;  %v4255_v51 = vadd.f32 %v4214_v50, %v4150_v40 }
 0x32b   : > { %v4153_v41 = vpop.f32.mrb[22].mxu1  ;;  %v4865_v0 = vpop.f32.mrb[22].mxu0  ;;  %v5496_v44 = vld [vmem:[#allocation2 + $0x8] sm:$0xff] }
 0x32c   : > { %5014 = vst [vmem:[#allocation2 + $0x100] sm:$0xff] %v4973_v43  ;;  %v4974_v45 = vadd.f32 %v4865_v0, %v4254_v42  ;;  %v15994_v47 = vpop.f32.mrb[23].mxu1  ;;  %v16090_v49 = vpop.f32.mrb[23].mxu0  ;;  %v4256_v56 = vadd.f32 %v4215_v48, %v4153_v41  ;;  %v5495_v42 = vld [vmem:[#allocation2] sm:$0xff] }
 0x32d   : > { %v19451_v0 = vld [vmem:[%s20937_s2] ss:$0 sm:$0xff] }
 0x32e   : > { %5015 = vst [vmem:[#allocation2 + $0x108] sm:$0xff] %v4974_v45 }
 0x331   : > { %v4158_v52 = vpop.f32.mrb[24].mxu1  ;;  %v4870_v54 = vpop.f32.mrb[24].mxu0 }
 0x332   : > { %v4975_v59 = vadd.f32 %v4870_v54, %v4255_v51  ;;  %v15997_v60 = vpop.f32.mrb[25].mxu1  ;;  %v16093_v55 = vpop.f32.mrb[25].mxu0  ;;  %v4257_v2 = vadd.f32 %v4216_v63, %v4158_v52 }
 0x333   : > { %v4161_v46 = vpop.f32.mrb[26].mxu1  ;;  %v4873_v57 = vpop.f32.mrb[26].mxu0 }
 0x334   : > { %5016 = vst [vmem:[#allocation2 + $0x110] sm:$0xff] %v4975_v59  ;;  %v4976_v61 = vadd.f32 %v4873_v57, %v4256_v56  ;;  %v15998_v62 = vpop.f32.mrb[27].mxu1  ;;  %v16094_v10 = vpop.f32.mrb[27].mxu0  ;;  %v4258_v6 = vadd.f32 %v4217_v53, %v4161_v46  ;;  %v5497_v46 = vld [vmem:[#allocation2 + $0x10] sm:$0xff]  ;;  %v17617_v53 = vld [vmem:[#allocation3] sm:$0xfc]  }
 0x335   : > { %v6534_v55 = vpop.permute.xlu0 %6533  ;;  %v5498_v10 = vld [vmem:[#allocation2 + $0x18] sm:$0xff] }
 0x336   : > { %5017 = vst [vmem:[#allocation2 + $0x118] sm:$0xff] %v4976_v61 }
 0x339   : > { %v4166_v3 = vpop.f32.mrb[28].mxu1  ;;  %v4878_v4 = vpop.f32.mrb[28].mxu0 }
 0x33a   : > { %v4977_v36 = vadd.f32 %v4878_v4, %v4257_v2  ;;  %v16001_v16 = vpop.f32.mrb[29].mxu1  ;;  %v16097_v8 = vpop.f32.mrb[29].mxu0  ;;  %v4259_v19 = vadd.f32 %v4218_v15, %v4166_v3 }
 0x33b   : > { %v4169_v9 = vpop.f32.mrb[30].mxu1  ;;  %v4881_v12 = vpop.f32.mrb[30].mxu0 }
 0x33c   : > { %5018 = vst [vmem:[#allocation2 + $0x120] sm:$0xff] %v4977_v36  ;;  %v4978_v13 = vadd.f32 %v4881_v12, %v4258_v6  ;;  %v16002_v5 = vpop.f32.mrb[31].mxu1  ;;  %v16098_v14 = vpop.f32.mrb[31].mxu0  ;;  %v4260_v11 = vadd.f32 %v4219_v20, %v4169_v9  ;;  %v7157_v20 = vshll.u32 %v17617_v53, 16 }
 0x33e   : > { %5019 = vst [vmem:[#allocation2 + $0x128] sm:$0xff] %v4978_v13 }
 0x341   : > { %v4174_v7 = vpop.f32.mrb[32].mxu1  ;;  %v4886_v21 = vpop.f32.mrb[32].mxu0 }
 0x342   : > { %v4261_v25 = vadd.f32 %v4220_v17, %v4174_v7  ;;  %v4979_v22 = vadd.f32 %v4886_v21, %v4259_v19  ;;  %v16005_v24 = vpop.f32.mrb[33].mxu1  ;;  %v16101_v18 = vpop.f32.mrb[33].mxu0  ;;  %v17615_v19 = vld [vmem:[#allocation3] sm:$0xf8]   ;;  %v7154_v17 = vshrl.u32 %v17617_v53, 16 }
 0x343   : > { %v4177_v26 = vpop.f32.mrb[34].mxu1  ;;  %v4889_v27 = vpop.f32.mrb[34].mxu0 }
 0x344   : > { %4302 = vst [vmem:[#allocation2 + $0x140] sm:$0xf] %v4261_v25  ;;  %5020 = vst [vmem:[#allocation2 + $0x130] sm:$0xff] %v4979_v22  ;;  %v4980_v29 = vadd.f32 %v4889_v27, %v4260_v11  ;;  %v16006_v28 = vpop.f32.mrb[35].mxu1  ;;  %v16102_v30 = vpop.f32.mrb[35].mxu0  ;;  %v5499_v22 = vld [vmem:[#allocation2 + $0x20] sm:$0xff] }
 0x345   : > { %v6539_v11 = vpop.permute.xlu0 %6538  ;;  %v6544_v25 = vpop.permute.xlu1 %6543  ;;  %v5500_v27 = vld [vmem:[#allocation2 + $0x28] sm:$0xff]  ;;  %v7815_v30 = vrot.slane %v17615_v19, 3 }
 0x346   : > { %5021 = vst [vmem:[#allocation2 + $0x138] sm:$0xff] %v4980_v29 }
 0x349   : > { %v4894_v32 = vpop.f32.mrb[36].mxu0  ;;  %v5329_v35 = vpop.f32.mrb[36].mxu1 }
 0x34a   : > { %v16105_v37 = vpop.f32.mrb[37].mxu0  ;;  %v16125_v34 = vpop.f32.mrb[37].mxu1  ;;  %v5536_v43 = vadd.f32 %v5495_v42, %v5329_v35  ;;  %v7159_v35 = vrot.slane %v7157_v20, 3 }
 0x34b   : > { %v4940_v38 = vld [vmem:[#allocation2 + $0x140] sm:$0xf]  ;;  %v4897_v58 = vpop.f32.mrb[38].mxu0  ;;  %v5332_v23 = vpop.f32.mrb[38].mxu1 }
 0x34c   : > { %v4981_v39 = vadd.f32 %v4940_v38, %v4894_v32  ;;  %v16106_v40 = vpop.f32.mrb[39].mxu0  ;;  %v16126_v33 = vpop.f32.mrb[39].mxu1  ;;  %v5537_v45 = vadd.f32 %v5496_v44, %v5332_v23  ;;  %v7156_v32 = vrot.slane %v7154_v17, 2 }
 0x34e   : > { %5022 = vst [vmem:[#allocation2 + $0x140] sm:$0xf] %v4981_v39 }
 0x351   : > { %v5337_v31 = vpop.f32.mrb[40].mxu1  ;;  %v6071_v41 = vpop.f32.mrb[40].mxu0 }
 0x352   : > { %v6278_v47 = vadd.f32 %v6071_v41, %v5536_v43  ;;  %v16129_v49 = vpop.f32.mrb[41].mxu1  ;;  %v16225_v50 = vpop.f32.mrb[41].mxu0  ;;  %v5538_v57 = vadd.f32 %v5497_v46, %v5337_v31 }
 0x353   : > { %v5340_v51 = vpop.f32.mrb[42].mxu1  ;;  %v6074_v48 = vpop.f32.mrb[42].mxu0 }
 0x354   : > { %v6408_v52 = vadd.f32 %v19451_v0, %v6278_v47  ;;  %v6279_v54 = vadd.f32 %v6074_v48, %v5537_v45  ;;  %v16130_v56 = vpop.f32.mrb[43].mxu1  ;;  %v16226_v59 = vpop.f32.mrb[43].mxu0  ;;  %v5539_v4 = vadd.f32 %v5498_v10, %v5340_v51  ;;  %v17622_v51 = vld [vmem:[%s20938_s3 + $0xc0] sm:$0xff]  }
 0x355   : > { %v6549_v56 = vpop.permute.xlu1 %6548  ;;  %v5501_v59 = vld [vmem:[#allocation2 + $0x30] sm:$0xff] }
 0x356   : > { %v6449_v60 = vmax.f32 %v6408_v52, 0.0  ;;  %v6409_v62 = vadd.f32 %v19451_v0, %v6279_v54  ;;  %v6554_v54 = vpop.permute.xlu0 %6553 }
 0x358   : > { %v6736_v61 = vmul.f32 %v6534_v55, %v6449_v60  ;;  %v6450_v12 = vmax.f32 %v6409_v62, 0.0  ;;  %v7160_v55 = vor.u32 %v7159_v35, %v7156_v32  ;;  %v17637_v35 = vld [vmem:[%s20938_s3 + $0xd0] sm:$0xff]  }
 0x359   : > { %v5345_v63 = vpop.f32.mrb[44].mxu1  ;;  %v6079_v2 = vpop.f32.mrb[44].mxu0 }
 0x35a   : > { %v14701_v3 = vpack.c.bf16 %v6736_v61, %v6736_v61  ;;  %v6280_v6 = vadd.f32 %v6079_v2, %v5538_v57  ;;  %v16133_v36 = vpop.f32.mrb[45].mxu1  ;;  %v16229_v16 = vpop.f32.mrb[45].mxu0  ;;  %v6737_v24 = vmul.f32 %v6539_v11, %v6450_v12  ;;  %v5540_v18 = vadd.f32 %v5499_v22, %v5345_v63  ;;  %v5502_v63 = vld [vmem:[#allocation2 + $0x38] sm:$0xff] }
 0x35b   : > { %v5348_v8 = vpop.f32.mrb[46].mxu1  ;;  %v6082_v9 = vpop.f32.mrb[46].mxu0 }
 0x35c   : > { %6945 = vst [vmem:[#allocation3 + $0xc] sm:$0xf] %v14701_v3  ;;  %v6410_v13 = vadd.f32 %v19451_v0, %v6280_v6  ;;  %v6281_v5 = vadd.f32 %v6082_v9, %v5539_v4  ;;  %v16134_v14 = vpop.f32.mrb[47].mxu1  ;;  %v16230_v15 = vpop.f32.mrb[47].mxu0  ;;  %v5541_v34 = vadd.f32 %v5500_v27, %v5348_v8  ;;  %v17619_v4 = vld [vmem:[%s20938_s3 + $0x80] sm:$0xff]  }
 0x35d   : > { %v6559_v22 = vpop.permute.xlu1 %6558 }
 0x35e   : > { %v6451_v7 = vmax.f32 %v6410_v13, 0.0  ;;  %v6411_v21 = vadd.f32 %v19451_v0, %v6281_v5  ;;  %v17630_v13 = vld [vmem:[%s20938_s3 + $0xc8] sm:$0xff]  }
 0x360   : > { %v6738_v26 = vmul.f32 %v6544_v25, %v6451_v7  ;;  %v6452_v38 = vmax.f32 %v6411_v21, 0.0  ;;  %v17626_v25 = vld [vmem:[%s20938_s3 + $0x88] sm:$0xff]  }
 0x361   : > { %v5353_v29 = vpop.f32.mrb[48].mxu1  ;;  %v6087_v28 = vpop.f32.mrb[48].mxu0 }
 0x362   : > { %v14745_v37 = vpack.c.bf16 %v6738_v26, %v6737_v24  ;;  %v6282_v58 = vadd.f32 %v6087_v28, %v5540_v18  ;;  %v16137_v23 = vpop.f32.mrb[49].mxu1  ;;  %v16233_v39 = vpop.f32.mrb[49].mxu0  ;;  %v6739_v61 = vmul.f32 %v6549_v56, %v6452_v38  ;;  %v5542_v62 = vadd.f32 %v5501_v59, %v5353_v29  ;;  %v5504_v38 = vld [vmem:[#allocation2 + $0x48] sm:$0xff] }
 0x363   : > { %v5356_v40 = vpop.f32.mrb[50].mxu1  ;;  %v6090_v33 = vpop.f32.mrb[50].mxu0  ;;  %v19457_v42 = vld [vmem:[#allocation3 + $0x8] sm:$0xff]  }
 0x364   : > { %v17618_v43 = vld [vmem:[#allocation3 + $0x8] sm:$0xff]   ;;  %14837 = vst [vmem:[#allocation3 + $0x10] sm:$0xff] %v14745_v37   ;;  %v6412_v44 = vadd.f32 %v19451_v0, %v6282_v58  ;;  %v6283_v31 = vadd.f32 %v6090_v33, %v5541_v34  ;;  %v16138_v41 = vpop.f32.mrb[51].mxu1  ;;  %v16234_v45 = vpop.f32.mrb[51].mxu0  ;;  %v7816_v47 = vrot.slane %v19457_v42, 3  ;;  %v5543_v36 = vadd.f32 %v5502_v63, %v5356_v40 }
 0x365   : > { %v7162_v49 = vshrl.u32 %v17618_v43, 16  ;;  %v7165_v50 = vshll.u32 %v17618_v43, 16  ;;  %v6564_v29 = vpop.permute.xlu0 %6563 }
 0x366   : > { %v6453_v48 = vmax.f32 %v6412_v44, 0.0  ;;  %v6413_v52 = vadd.f32 %v19451_v0, %v6283_v31  ;;  %v7817_v60 = vsel %vm1106_vm2, %v7815_v30, %v7816_v47  ;;  %v5503_v30 = vld [vmem:[#allocation2 + $0x40] sm:$0xff]  ;;  %v17633_v44 = vld [vmem:[%s20938_s3 + $0x90] sm:$0xff]   ;;  %v17644_v31 = vld [vmem:[%s20938_s3 + $0xd8] sm:$0xff]  }
 0x367   : > { %v7164_v46 = vrot.slane %v7162_v49, 2  ;;  %v7167_v57 = vrot.slane %v7165_v50, 3  ;;  %16424 = vmatmul.mubr.bf16.vlgmr.msra.gmra.mrb[124].mxu0 %v7817_v60 }
 0x368   : > { %v6740_v10 = vmul.f32 %v6554_v54, %v6453_v48  ;;  %16427 = vmatprep.mubr.msk.bf16.mxu0 %vm17899_vm0, %v17898_v1  ;;  %16608 = vmatpush3.bf16.msra.mxu0 %v17622_v51  ;;  %v6454_v16 = vmax.f32 %v6413_v52, 0.0 }
 0x369   : > { %v5361_v2 = vpop.f32.mrb[52].mxu1  ;;  %v6095_v53 = vpop.f32.mrb[52].mxu0  ;;  %v19468_v3 = vor.u32 %v7167_v57, %v7164_v46  ;;  %16609 = vmatprep.subr.bf16.mxu0 %v17898_v1  ;;  %v17641_v57 = vld [vmem:[%s20938_s3 + $0x98] sm:$0xff]  }
 0x36a   : > { %v14750_v6 = vpack.c.bf16 %v6740_v10, %v6739_v61  ;;  %v6284_v8 = vadd.f32 %v6095_v53, %v5542_v62  ;;  %v16141_v9 = vpop.f32.mrb[53].mxu1  ;;  %v16237_v12 = vpop.f32.mrb[53].mxu0  ;;  %v6741_v28 = vmul.f32 %v6559_v22, %v6454_v16  ;;  %v5544_v37 = vadd.f32 %v5503_v30, %v5361_v2 }
 0x36b   : > { %v5364_v5 = vpop.f32.mrb[54].mxu1  ;;  %v6098_v14 = vpop.f32.mrb[54].mxu0  ;;  %v7169_v15 = vsel %vm443_vm1, %v7160_v55, %v19468_v3  ;;  %v19482_v21 = vld [vmem:[#allocation3 + $0x10] sm:$0xff]  }
 0x36c   : > { %14838 = vst [vmem:[#allocation3 + $0x18] sm:$0xff] %v14750_v6   ;;  %v6414_v19 = vadd.f32 %v19451_v0, %v6284_v8  ;;  %v6285_v17 = vadd.f32 %v6098_v14, %v5543_v36  ;;  %v16142_v20 = vpop.f32.mrb[55].mxu1  ;;  %v16238_v7 = vpop.f32.mrb[55].mxu0  ;;  %16324 = vmatmul.mubr.bf16.vlgmr.msra.gmra.mrb[120].mxu1 %v7169_v15  ;;  %v17621_v11 = vld [vmem:[#allocation3 + $0x10] sm:$0xff]   ;;  %v7818_v26 = vrot.slane %v19482_v21, 3  ;;  %16610 = vmatpush3.bf16.msra.mxu0 %v17630_v13  ;;  %v5505_v6 = vld [vmem:[#allocation2 + $0x50] sm:$0xff] }
 0x36d   : > { %16508 = vmatpush3.bf16.msra.mxu1 %v17619_v4  ;;  %16327 = vmatprep.mubr.msk.bf16.mxu1 %vm17899_vm0, %v17898_v1  ;;  %v7171_v27 = vshrl.u32 %v17621_v11, 16  ;;  %v7174_v32 = vshll.u32 %v17621_v11, 16  ;;  %v5545_v45 = vadd.f32 %v5504_v38, %v5364_v5  ;;  %v6569_v61 = vpop.permute.xlu1 %6568  ;;  %v6574_v53 = vpop.permute.xlu0 %6573  ;;  %v17651_v36 = vld [vmem:[%s20938_s3 + $0xe0] sm:$0xff]   ;;  %v5506_v9 = vld [vmem:[#allocation2 + $0x58] sm:$0xff]  ;;  %v17659_v20 = vld [vmem:[%s20938_s3 + $0xe8] sm:$0xff]  }
 0x36e   : > { %v6455_v24 = vmax.f32 %v6414_v19, 0.0  ;;  %v6415_v18 = vadd.f32 %v19451_v0, %v6285_v17  ;;  %16509 = vmatprep.subr.bf16.mxu1 %v17898_v1  ;;  %16611 = vmatprep.subr.bf16.mxu0 %v17898_v1  ;;  %v7819_v58 = vsel %vm1106_vm2, %v7816_v47, %v7818_v26  ;;  %v17648_v17 = vld [vmem:[%s20938_s3 + $0xa0] sm:$0xff]  }
 0x36f   : > { %v7173_v23 = vrot.slane %v7171_v27, 2  ;;  %16428 = vmatmul.mubr.bf16.gmra.mrb[128].mxu0 %v7819_v58  ;;  %v7176_v43 = vrot.slane %v7174_v32, 3 }
 0x370   : > { %v6742_v34 = vmul.f32 %v6564_v29, %v6455_v24  ;;  %v6456_v39 = vmax.f32 %v6415_v18, 0.0  ;;  %16431 = vmatprep.mubr.msk.bf16.mxu0 %vm17899_vm0, %v17898_v1  ;;  %16612 = vmatpush3.bf16.msra.mxu0 %v17637_v35 }
 0x371   : > { %v5369_v40 = vpop.f32.mrb[56].mxu1  ;;  %v6103_v33 = vpop.f32.mrb[56].mxu0  ;;  %16510 = vmatpush3.bf16.msra.mxu1 %v17626_v25  ;;  %v7177_v48 = vor.u32 %v7176_v43, %v7173_v23  ;;  %16613 = vmatprep.subr.bf16.mxu0 %v17898_v1 }
 0x372   : > { %v14755_v41 = vpack.c.bf16 %v6742_v34, %v6741_v28  ;;  %v6286_v42 = vadd.f32 %v6103_v33, %v5544_v37  ;;  %v16145_v49 = vpop.f32.mrb[57].mxu1  ;;  %v16241_v47 = vpop.f32.mrb[57].mxu0  ;;  %16511 = vmatprep.subr.bf16.mxu1 %v17898_v1  ;;  %v6743_v4 = vmul.f32 %v6569_v61, %v6456_v39  ;;  %v5546_v16 = vadd.f32 %v5505_v6, %v5369_v40  ;;  %v17655_v34 = vld [vmem:[%s20938_s3 + $0xa8] sm:$0xff]  }
 0x373   : > { %v5372_v50 = vpop.f32.mrb[58].mxu1  ;;  %v6106_v51 = vpop.f32.mrb[58].mxu0  ;;  %v19511_v60 = vld [vmem:[#allocation3 + $0x18] sm:$0xff]   ;;  %v7178_v46 = vsel %vm443_vm1, %v19468_v3, %v7177_v48 }
 0x374   : > { %14839 = vst [vmem:[#allocation3 + $0x20] sm:$0xff] %v14755_v41   ;;  %v6416_v52 = vadd.f32 %v19451_v0, %v6286_v42  ;;  %v6287_v54 = vadd.f32 %v6106_v51, %v5545_v45  ;;  %v16146_v56 = vpop.f32.mrb[59].mxu1  ;;  %v16242_v59 = vpop.f32.mrb[59].mxu0  ;;  %v17624_v55 = vld [vmem:[#allocation3 + $0x18] sm:$0xff]   ;;  %16328 = vmatmul.mubr.bf16.gmra.mrb[124].mxu1 %v7178_v46  ;;  %v7820_v63 = vrot.slane %v19511_v60, 3  ;;  %16614 = vmatpush3.bf16.msra.mxu0 %v17644_v31  ;;  %v17666_v41 = vld [vmem:[%s20938_s3 + $0xf0] sm:$0xff]  }
 0x375   : > { %16512 = vmatpush3.bf16.msra.mxu1 %v17633_v44  ;;  %v7180_v2 = vshrl.u32 %v17624_v55, 16  ;;  %16331 = vmatprep.mubr.msk.bf16.mxu1 %vm17899_vm0, %v17898_v1  ;;  %v7183_v3 = vshll.u32 %v17624_v55, 16  ;;  %v5547_v21 = vadd.f32 %v5506_v9, %v5372_v50  ;;  %v6579_v38 = vpop.permute.xlu1 %6578  ;;  %v6584_v33 = vpop.permute.xlu0 %6583  ;;  %v5507_v44 = vld [vmem:[#allocation2 + $0x60] sm:$0xff]  ;;  %v5508_v50 = vld [vmem:[#allocation2 + $0x68] sm:$0xff]  ;;  %v17662_v56 = vld [vmem:[%s20938_s3 + $0xb0] sm:$0xff]  }
 0x376   : > { %v6457_v62 = vmax.f32 %v6416_v52, 0.0  ;;  %v6417_v10 = vadd.f32 %v19451_v0, %v6287_v54  ;;  %16513 = vmatprep.subr.bf16.mxu1 %v17898_v1  ;;  %v7821_v12 = vsel %vm1106_vm2, %v7818_v26, %v7820_v63  ;;  %16615 = vmatprep.subr.bf16.mxu0 %v17898_v1 }
 0x377   : > { %v7182_v13 = vrot.slane %v7180_v2, 2  ;;  %16432 = vmatmul.mubr.bf16.gmra.mrb[132].mxu0 %v7821_v12  ;;  %v7185_v19 = vrot.slane %v7183_v3, 3 }
 0x378   : > { %v6744_v8 = vmul.f32 %v6574_v53, %v6457_v62  ;;  %v6458_v5 = vmax.f32 %v6417_v10, 0.0  ;;  %16435 = vmatprep.mubr.msk.bf16.mxu0 %vm17899_vm0, %v17898_v1  ;;  %16616 = vmatpush3.bf16.msra.mxu0 %v17651_v36 }
 0x379   : > { %v5377_v14 = vpop.f32.mrb[60].mxu1  ;;  %v6111_v15 = vpop.f32.mrb[60].mxu0  ;;  %16514 = vmatpush3.bf16.msra.mxu1 %v17641_v57  ;;  %v7186_v26 = vor.u32 %v7185_v19, %v7182_v13  ;;  %16617 = vmatprep.subr.bf16.mxu0 %v17898_v1  ;;  %v5509_v19 = vld [vmem:[#allocation2 + $0x70] sm:$0xff] }
 0x37a   : > { %v14760_v7 = vpack.c.bf16 %v6744_v8, %v6743_v4  ;;  %v6288_v11 = vadd.f32 %v6111_v15, %v5546_v16  ;;  %v16149_v25 = vpop.f32.mrb[61].mxu1  ;;  %v16245_v22 = vpop.f32.mrb[61].mxu0  ;;  %16515 = vmatprep.subr.bf16.mxu1 %v17898_v1  ;;  %v6745_v43 = vmul.f32 %v6579_v38, %v6458_v5  ;;  %v5548_v45 = vadd.f32 %v5507_v44, %v5377_v14  ;;  %v17670_v16 = vld [vmem:[%s20938_s3 + $0xb8] sm:$0xff]  }
 0x37b   : > { %v5380_v24 = vpop.f32.mrb[62].mxu1  ;;  %v6114_v18 = vpop.f32.mrb[62].mxu0  ;;  %v19543_v32 = vld [vmem:[#allocation3 + $0x20] sm:$0xff]   ;;  %v7187_v37 = vsel %vm443_vm1, %v7177_v48, %v7186_v26  ;;  %v5510_v25 = vld [vmem:[#allocation2 + $0x78] sm:$0xff] }
 0x37c   : > { %14840 = vst [vmem:[#allocation3 + $0x28] sm:$0xff] %v14760_v7   ;;  %v6418_v27 = vadd.f32 %v19451_v0, %v6288_v11  ;;  %v6289_v29 = vadd.f32 %v6114_v18, %v5547_v21  ;;  %v16150_v28 = vpop.f32.mrb[63].mxu1  ;;  %v16246_v30 = vpop.f32.mrb[63].mxu0  ;;  %v17627_v35 = vld [vmem:[#allocation3 + $0x20] sm:$0xff]   ;;  %16332 = vmatmul.mubr.bf16.gmra.mrb[128].mxu1 %v7187_v37  ;;  %v7822_v39 = vrot.slane %v19543_v32, 3  ;;  %16618 = vmatpush3.bf16.msra.mxu0 %v17659_v20 }
 0x37d   : > { %16516 = vmatpush3.bf16.msra.mxu1 %v17648_v17  ;;  %v7189_v40 = vshrl.u32 %v17627_v35, 16  ;;  %16335 = vmatprep.mubr.msk.bf16.mxu1 %vm17899_vm0, %v17898_v1  ;;  %v7192_v31 = vshll.u32 %v17627_v35, 16  ;;  %v5549_v55 = vadd.f32 %v5508_v50, %v5380_v24  ;;  %v6589_v8 = vpop.permute.xlu1 %6588  ;;  %v6594_v14 = vpop.permute.xlu0 %6593 }
 0x37e   : > { %v6459_v58 = vmax.f32 %v6418_v27, 0.0  ;;  %v6419_v23 = vadd.f32 %v19451_v0, %v6289_v29  ;;  %16517 = vmatprep.subr.bf16.mxu1 %v17898_v1  ;;  %v7823_v49 = vsel %vm1106_vm2, %v7820_v63, %v7822_v39  ;;  %16619 = vmatprep.subr.bf16.mxu0 %v17898_v1 }
 0x37f   : > { %v7191_v47 = vrot.slane %v7189_v40, 2  ;;  %16436 = vmatmul.mubr.bf16.gmra.mrb[136].mxu0 %v7823_v49  ;;  %v7194_v54 = vrot.slane %v7192_v31, 3 }
 0x380   : > { %v6746_v42 = vmul.f32 %v6584_v33, %v6459_v58  ;;  %v6460_v51 = vmax.f32 %v6419_v23, 0.0  ;;  %16439 = vmatprep.mubr.msk.bf16.mxu0 %vm17899_vm0, %v17898_v1  ;;  %16620 = vmatpush3.bf16.msra.mxu0 %v17666_v41 }
 0x381   : > { %v5385_v48 = vpop.f32.mrb[64].mxu1  ;;  %v6119_v52 = vpop.f32.mrb[64].mxu0  ;;  %16518 = vmatpush3.bf16.msra.mxu1 %v17655_v34  ;;  %v7195_v10 = vor.u32 %v7194_v54, %v7191_v47  ;;  %16621 = vmatprep.subr.bf16.mxu0 %v17898_v1 }
 0x382   : > { %v14765_v59 = vpack.c.bf16 %v6746_v42, %v6745_v43  ;;  %v6290_v46 = vadd.f32 %v6119_v52, %v5548_v45  ;;  %v16153_v60 = vpop.f32.mrb[65].mxu1  ;;  %v16249_v57 = vpop.f32.mrb[65].mxu0  ;;  %16519 = vmatprep.subr.bf16.mxu1 %v17898_v1  ;;  %v6747_v15 = vmul.f32 %v6589_v8, %v6460_v51  ;;  %v5550_v20 = vadd.f32 %v5509_v19, %v5385_v48  ;;  %v5511_v51 = vld [vmem:[#allocation2 + $0x80] sm:$0xff] }
 0x383   : > { %v5388_v61 = vpop.f32.mrb[66].mxu1  ;;  %v6122_v62 = vpop.f32.mrb[66].mxu0  ;;  %v19569_v6 = vld [vmem:[#allocation3 + $0x28] sm:$0xff]   ;;  %v7196_v36 = vsel %vm443_vm1, %v7186_v26, %v7195_v10  ;;  %v17672_v26 = vld [vmem:[%s20938_s3 + $0xf8] sm:$0xff]  }
 0x384   : > { %14841 = vst [vmem:[#allocation3 + $0x30] sm:$0xff] %v14765_v59   ;;  %v6420_v63 = vadd.f32 %v19451_v0, %v6290_v46  ;;  %v6291_v2 = vadd.f32 %v6122_v62, %v5549_v55  ;;  %v16154_v53 = vpop.f32.mrb[67].mxu1  ;;  %v16250_v4 = vpop.f32.mrb[67].mxu0  ;;  %v17629_v3 = vld [vmem:[#allocation3 + $0x28] sm:$0xff]   ;;  %16336 = vmatmul.mubr.bf16.gmra.mrb[132].mxu1 %v7196_v36  ;;  %v7824_v13 = vrot.slane %v19569_v6, 3  ;;  %v5551_v29 = vadd.f32 %v5510_v25, %v5388_v61  ;;  %v5512_v55 = vld [vmem:[#allocation2 + $0x88] sm:$0xff] }
 0x385   : > { %16520 = vmatpush3.bf16.msra.mxu1 %v17662_v56  ;;  %v7198_v5 = vshrl.u32 %v17629_v3, 16  ;;  %16339 = vmatprep.mubr.msk.bf16.mxu1 %vm17899_vm0, %v17898_v1  ;;  %v7201_v17 = vshll.u32 %v17629_v3, 16  ;;  %v6599_v31 = vpop.permute.xlu1 %6598  ;;  %v6604_v47 = vpop.permute.xlu0 %6603 }
 0x386   : > { %v6461_v9 = vmax.f32 %v6420_v63, 0.0  ;;  %v6421_v12 = vadd.f32 %v19451_v0, %v6291_v2  ;;  %16521 = vmatprep.subr.bf16.mxu1 %v17898_v1  ;;  %v7825_v21 = vsel %vm1106_vm2, %v7822_v39, %v7824_v13  ;;  %16622 = vmatpush3.bf16.msra.mxu0 %v17672_v26 }
 0x387   : > { %v7200_v11 = vrot.slane %v7198_v5, 2  ;;  %16440 = vmatmul.mubr.bf16.gmra.mrb[140].mxu0 %v7825_v21  ;;  %v7203_v18 = vrot.slane %v7201_v17, 3  ;;  %16807 = vmatprep.subr.bf16.mxu0 %v17898_v1 }
 0x388   : > { %v6748_v7 = vmul.f32 %v6594_v14, %v6461_v9  ;;  %v6462_v28 = vmax.f32 %v6421_v12, 0.0  ;;  %16443 = vmatprep.mubr.msk.bf16.mxu0 %vm17899_vm0, %v17898_v1 }
 0x389   : > { %v5393_v22 = vpop.f32.mrb[68].mxu1  ;;  %v6127_v24 = vpop.f32.mrb[68].mxu0  ;;  %16522 = vmatpush3.bf16.msra.mxu1 %v17670_v16  ;;  %v7204_v38 = vor.u32 %v7203_v18, %v7200_v11  ;;  %v5513_v11 = vld [vmem:[#allocation2 + $0x90] sm:$0xff] }
 0x38a   : > { %v14770_v27 = vpack.c.bf16 %v6748_v7, %v6747_v15  ;;  %v6292_v30 = vadd.f32 %v6127_v24, %v5550_v20  ;;  %v16157_v32 = vpop.f32.mrb[69].mxu1  ;;  %v16253_v35 = vpop.f32.mrb[69].mxu0  ;;  %16707 = vmatprep.subr.bf16.mxu1 %v17898_v1  ;;  %v6749_v50 = vmul.f32 %v6599_v31, %v6462_v28  ;;  %v5552_v52 = vadd.f32 %v5511_v51, %v5393_v22 }
 0x38b   : > { %v5396_v37 = vpop.f32.mrb[70].mxu1  ;;  %v6130_v34 = vpop.f32.mrb[70].mxu0  ;;  %v17631_v33 = vld [vmem:[#allocation3 + $0x30] sm:$0xff]   ;;  %v7205_v44 = vsel %vm443_vm1, %v7195_v10, %v7204_v38 }
 0x38c   : > { %14842 = vst [vmem:[#allocation3 + $0x38] sm:$0xff] %v14770_v27   ;;  %v6422_v58 = vadd.f32 %v19451_v0, %v6292_v30  ;;  %v6293_v23 = vadd.f32 %v6130_v34, %v5551_v29  ;;  %v16158_v39 = vpop.f32.mrb[71].mxu1  ;;  %v16254_v40 = vpop.f32.mrb[71].mxu0  ;;  %v17632_v43 = vld [vmem:[#allocation3 + $0x30] sm:$0xff]   ;;  %16340 = vmatmul.mubr.bf16.gmra.mrb[136].mxu1 %v7205_v44  ;;  %v7826_v42 = vrot.slane %v17631_v33, 3  ;;  %v5553_v10 = vadd.f32 %v5512_v55, %v5396_v37 }
 0x38d   : > { %v7207_v49 = vshrl.u32 %v17632_v43, 16  ;;  %16343 = vmatprep.mubr.msk.bf16.mxu1 %vm17899_vm0, %v17898_v1  ;;  %v7210_v48 = vshll.u32 %v17632_v43, 16  ;;  %v6609_v14 = vpop.permute.xlu1 %6608  ;;  %v6614_v7 = vpop.permute.xlu0 %6613  ;;  %v5514_v27 = vld [vmem:[#allocation2 + $0x98] sm:$0xff] }
 0x38e   : > { %v6463_v41 = vmax.f32 %v6422_v58, 0.0  ;;  %v6423_v45 = vadd.f32 %v19451_v0, %v6293_v23  ;;  %v7827_v56 = vsel %vm1106_vm2, %v7824_v13, %v7826_v42 }
 0x38f   : > { %v7209_v59 = vrot.slane %v7207_v49, 2  ;;  %16444 = vmatmul.mubr.bf16.gmra.mrb[144].mxu0 %v7827_v56  ;;  %v7212_v61 = vrot.slane %v7210_v48, 3  ;;  %v5515_v56 = vld [vmem:[#allocation2 + $0xa0] sm:$0xff] }
 0x390   : > { %v6750_v54 = vmul.f32 %v6604_v47, %v6463_v41  ;;  %v6464_v46 = vmax.f32 %v6423_v45, 0.0  ;;  %16447 = vmatprep.mubr.msk.bf16.mxu0 %vm17899_vm0, %v17898_v1 }
 0x391   : > { %v5401_v60 = vpop.f32.mrb[72].mxu1  ;;  %v6135_v57 = vpop.f32.mrb[72].mxu0  ;;  %v7213_v3 = vor.u32 %v7212_v61, %v7209_v59  ;;  %v5516_v61 = vld [vmem:[#allocation2 + $0xa8] sm:$0xff] }
 0x392   : > { %v14775_v62 = vpack.c.bf16 %v6750_v54, %v6749_v50  ;;  %v6294_v63 = vadd.f32 %v6135_v57, %v5552_v52  ;;  %v16161_v2 = vpop.f32.mrb[73].mxu1  ;;  %v16257_v53 = vpop.f32.mrb[73].mxu0  ;;  %v6751_v21 = vmul.f32 %v6609_v14, %v6464_v46  ;;  %v5554_v22 = vadd.f32 %v5513_v11, %v5401_v60 }
 0x393   : > { %v5404_v4 = vpop.f32.mrb[74].mxu1  ;;  %v6138_v6 = vpop.f32.mrb[74].mxu0  ;;  %v17634_v12 = vld [vmem:[#allocation3 + $0x38] sm:$0xff]   ;;  %v7214_v5 = vsel %vm443_vm1, %v7204_v38, %v7213_v3 }
 0x394   : > { %14843 = vst [vmem:[#allocation3 + $0x40] sm:$0xff] %v14775_v62   ;;  %v6424_v36 = vadd.f32 %v19451_v0, %v6294_v63  ;;  %v6295_v16 = vadd.f32 %v6138_v6, %v5553_v10  ;;  %v16162_v8 = vpop.f32.mrb[75].mxu1  ;;  %v16258_v9 = vpop.f32.mrb[75].mxu0  ;;  %v17635_v13 = vld [vmem:[#allocation3 + $0x38] sm:$0xff]   ;;  %16344 = vmatmul.mubr.bf16.gmra.mrb[140].mxu1 %v7214_v5  ;;  %v7828_v17 = vrot.slane %v17634_v12, 3  ;;  %v5555_v37 = vadd.f32 %v5514_v27, %v5404_v4 }
 0x395   : > { %v7216_v20 = vshrl.u32 %v17635_v13, 16  ;;  %16347 = vmatprep.mubr.msk.bf16.mxu1 %vm17899_vm0, %v17898_v1  ;;  %v7219_v25 = vshll.u32 %v17635_v13, 16  ;;  %v6619_v49 = vpop.permute.xlu1 %6618  ;;  %v6624_v52 = vpop.permute.xlu0 %6623 }
 0x396   : > { %v6465_v15 = vmax.f32 %v6424_v36, 0.0  ;;  %v6425_v19 = vadd.f32 %v19451_v0, %v6295_v16  ;;  %v7829_v18 = vsel %vm1106_vm2, %v7826_v42, %v7828_v17 }
 0x397   : > { %v7218_v26 = vrot.slane %v7216_v20, 2  ;;  %16448 = vmatmul.mubr.bf16.gmra.mrb[148].mxu0 %v7829_v18  ;;  %v7221_v32 = vrot.slane %v7219_v25, 3  ;;  %v5517_v18 = vld [vmem:[#allocation2 + $0xb0] sm:$0xff] }
 0x398   : > { %v6752_v24 = vmul.f32 %v6614_v7, %v6465_v15  ;;  %v6466_v29 = vmax.f32 %v6425_v19, 0.0  ;;  %16451 = vmatprep.mubr.msk.bf16.mxu0 %vm17899_vm0, %v17898_v1 }
 0x399   : > { %v5409_v28 = vpop.f32.mrb[76].mxu1  ;;  %v6143_v30 = vpop.f32.mrb[76].mxu0  ;;  %v7222_v40 = vor.u32 %v7221_v32, %v7218_v26  ;;  %v5518_v32 = vld [vmem:[#allocation2 + $0xb8] sm:$0xff] }
 0x39a   : > { %v14780_v35 = vpack.c.bf16 %v6752_v24, %v6751_v21  ;;  %v6296_v34 = vadd.f32 %v6143_v30, %v5554_v22  ;;  %v16165_v38 = vpop.f32.mrb[77].mxu1  ;;  %v16261_v58 = vpop.f32.mrb[77].mxu0  ;;  %v6753_v54 = vmul.f32 %v6619_v49, %v6466_v29  ;;  %v5556_v55 = vadd.f32 %v5515_v56, %v5409_v28 }
 0x39b   : > { %v5412_v23 = vpop.f32.mrb[78].mxu1  ;;  %v6146_v39 = vpop.f32.mrb[78].mxu0  ;;  %v17636_v41 = vld [vmem:[#allocation3 + $0x40] sm:$0xff]   ;;  %v7223_v42 = vsel %vm443_vm1, %v7213_v3, %v7222_v40 }
 0x39c   : > { %14844 = vst [vmem:[#allocation3 + $0x48] sm:$0xff] %v14780_v35   ;;  %v6426_v33 = vadd.f32 %v19451_v0, %v6296_v34  ;;  %v6297_v43 = vadd.f32 %v6146_v39, %v5555_v37  ;;  %v16166_v44 = vpop.f32.mrb[79].mxu1  ;;  %v16262_v31 = vpop.f32.mrb[79].mxu0  ;;  %v17638_v45 = vld [vmem:[#allocation3 + $0x40] sm:$0xff]   ;;  %16348 = vmatmul.mubr.bf16.gmra.mrb[144].mxu1 %v7223_v42  ;;  %v7830_v51 = vrot.slane %v17636_v41, 3  ;;  %v5557_v4 = vadd.f32 %v5516_v61, %v5412_v23 }
 0x39d   : > { %v7225_v48 = vshrl.u32 %v17638_v45, 16  ;;  %16351 = vmatprep.mubr.msk.bf16.mxu1 %vm17899_vm0, %v17898_v1  ;;  %v7228_v59 = vshll.u32 %v17638_v45, 16  ;;  %v6629_v20 = vpop.permute.xlu1 %6628  ;;  %v6634_v22 = vpop.permute.xlu0 %6633  ;;  %v19624_v31 = vld [vmem:[%s20937_s2] ss:$0 sm:$0xff] }
 0x39e   : > { %v6467_v47 = vmax.f32 %v6426_v33, 0.0  ;;  %v6427_v50 = vadd.f32 %v19451_v0, %v6297_v43  ;;  %v7831_v60 = vsel %vm1106_vm2, %v7828_v17, %v7830_v51 }
 0x39f   : > { %v7227_v57 = vrot.slane %v7225_v48, 2  ;;  %16452 = vmatmul.mubr.bf16.gmra.mrb[152].mxu0 %v7831_v60  ;;  %v7230_v2 = vrot.slane %v7228_v59, 3  ;;  %v5519_v60 = vld [vmem:[#allocation2 + $0xc0] sm:$0xff] }
 0x3a0   : > { %v6754_v46 = vmul.f32 %v6624_v52, %v6467_v47  ;;  %v6468_v62 = vmax.f32 %v6427_v50, 0.0  ;;  %16455 = vmatprep.mubr.msk.bf16.mxu0 %vm17899_vm0, %v17898_v1 }
 0x3a1   : > { %v5417_v10 = vpop.f32.mrb[80].mxu1  ;;  %v6151_v63 = vpop.f32.mrb[80].mxu0  ;;  %v7231_v9 = vor.u32 %v7230_v2, %v7227_v57  ;;  %v5520_v2 = vld [vmem:[#allocation2 + $0xc8] sm:$0xff] }
 0x3a2   : > { %v14785_v53 = vpack.c.bf16 %v6754_v46, %v6753_v54  ;;  %v6298_v6 = vadd.f32 %v6151_v63, %v5556_v55  ;;  %v16169_v3 = vpop.f32.mrb[81].mxu1  ;;  %v16265_v36 = vpop.f32.mrb[81].mxu0  ;;  %v6755_v24 = vmul.f32 %v6629_v20, %v6468_v62  ;;  %v5558_v27 = vadd.f32 %v5517_v18, %v5417_v10 }
 0x3a3   : > { %v5420_v16 = vpop.f32.mrb[82].mxu1  ;;  %v6154_v8 = vpop.f32.mrb[82].mxu0  ;;  %v17639_v15 = vld [vmem:[#allocation3 + $0x48] sm:$0xff]   ;;  %v7232_v17 = vsel %vm443_vm1, %v7222_v40, %v7231_v9 }
 0x3a4   : > { %14845 = vst [vmem:[#allocation3 + $0x50] sm:$0xff] %v14785_v53   ;;  %v6428_v12 = vadd.f32 %v19451_v0, %v6298_v6  ;;  %v6299_v13 = vadd.f32 %v6154_v8, %v5557_v4  ;;  %v16170_v5 = vpop.f32.mrb[83].mxu1  ;;  %v16266_v14 = vpop.f32.mrb[83].mxu0  ;;  %v17640_v19 = vld [vmem:[#allocation3 + $0x48] sm:$0xff]   ;;  %16352 = vmatmul.mubr.bf16.gmra.mrb[148].mxu1 %v7232_v17  ;;  %v7832_v11 = vrot.slane %v17639_v15, 3  ;;  %v5559_v38 = vadd.f32 %v5518_v32, %v5420_v16 }
 0x3a5   : > { %v7234_v25 = vshrl.u32 %v17640_v19, 16  ;;  %16355 = vmatprep.mubr.msk.bf16.mxu1 %vm17899_vm0, %v17898_v1  ;;  %v7237_v26 = vshll.u32 %v17640_v19, 16  ;;  %v6639_v48 = vpop.permute.xlu1 %6638  ;;  %v6644_v55 = vpop.permute.xlu0 %6643 }
 0x3a6   : > { %v6469_v7 = vmax.f32 %v6428_v12, 0.0  ;;  %v6429_v21 = vadd.f32 %v19451_v0, %v6299_v13  ;;  %v7833_v28 = vsel %vm1106_vm2, %v7830_v51, %v7832_v11 }
 0x3a7   : > { %v7236_v30 = vrot.slane %v7234_v25, 2  ;;  %16456 = vmatmul.mubr.bf16.gmra.mrb[156].mxu0 %v7833_v28  ;;  %v7239_v0 = vrot.slane %v7237_v26, 3  ;;  %v5521_v28 = vld [vmem:[#allocation2 + $0xd0] sm:$0xff] }
 0x3a8   : > { %v6756_v29 = vmul.f32 %v6634_v22, %v6469_v7  ;;  %v6470_v58 = vmax.f32 %v6429_v21, 0.0  ;;  %16459 = vmatprep.mubr.msk.bf16.mxu0 %vm17899_vm0, %v17898_v1 }
 0x3a9   : > { %v5425_v35 = vpop.f32.mrb[84].mxu1  ;;  %v6159_v37 = vpop.f32.mrb[84].mxu0  ;;  %v7240_v44 = vor.u32 %v7239_v0, %v7236_v30 }
 0x3aa   : > { %v14790_v34 = vpack.c.bf16 %v6756_v29, %v6755_v24  ;;  %v6300_v23 = vadd.f32 %v6159_v37, %v5558_v27  ;;  %v16173_v39 = vpop.f32.mrb[85].mxu1  ;;  %v16269_v40 = vpop.f32.mrb[85].mxu0  ;;  %v6757_v46 = vmul.f32 %v6639_v48, %v6470_v58  ;;  %v5560_v61 = vadd.f32 %v5519_v60, %v5425_v35 }
 0x3ab   : > { %v5428_v33 = vpop.f32.mrb[86].mxu1  ;;  %v6162_v43 = vpop.f32.mrb[86].mxu0  ;;  %v17642_v47 = vld [vmem:[#allocation3 + $0x50] sm:$0xff]   ;;  %v7241_v51 = vsel %vm443_vm1, %v7231_v9, %v7240_v44 }
 0x3ac   : > { %14846 = vst [vmem:[#allocation3 + $0x58] sm:$0xff] %v14790_v34   ;;  %v6430_v41 = vadd.f32 %v19624_v31, %v6300_v23  ;;  %v6301_v45 = vadd.f32 %v6162_v43, %v5559_v38  ;;  %v16174_v42 = vpop.f32.mrb[87].mxu1  ;;  %v16270_v49 = vpop.f32.mrb[87].mxu0  ;;  %v17643_v50 = vld [vmem:[#allocation3 + $0x50] sm:$0xff]   ;;  %16356 = vmatmul.mubr.bf16.gmra.mrb[152].mxu1 %v7241_v51  ;;  %v7834_v56 = vrot.slane %v17642_v47, 3  ;;  %v5561_v16 = vadd.f32 %v5520_v2, %v5428_v33 }
 0x3ad   : > { %v7243_v59 = vshrl.u32 %v17643_v50, 16  ;;  %16359 = vmatprep.mubr.msk.bf16.mxu1 %vm17899_vm0, %v17898_v1  ;;  %v7246_v57 = vshll.u32 %v17643_v50, 16  ;;  %v6649_v25 = vpop.permute.xlu1 %6648  ;;  %v6654_v27 = vpop.permute.xlu0 %6653  ;;  %v5522_v34 = vld [vmem:[#allocation2 + $0xd8] sm:$0xff] }
 0x3ae   : > { %v6471_v52 = vmax.f32 %v6430_v41, 0.0  ;;  %v6431_v54 = vadd.f32 %v19624_v31, %v6301_v45  ;;  %v7835_v10 = vsel %vm1106_vm2, %v7832_v11, %v7834_v56 }
 0x3af   : > { %v7245_v63 = vrot.slane %v7243_v59, 2  ;;  %16460 = vmatmul.mubr.bf16.gmra.mrb[160].mxu0 %v7835_v10  ;;  %v7248_v3 = vrot.slane %v7246_v57, 3  ;;  %v5523_v10 = vld [vmem:[#allocation2 + $0xe0] sm:$0xff] }
 0x3b0   : > { %v6758_v62 = vmul.f32 %v6644_v55, %v6471_v52  ;;  %v6472_v53 = vmax.f32 %v6431_v54, 0.0  ;;  %16463 = vmatprep.mubr.msk.bf16.mxu0 %vm17899_vm0, %v17898_v1 }
 0x3b1   : > { %v5433_v4 = vpop.f32.mrb[88].mxu1  ;;  %v6167_v6 = vpop.f32.mrb[88].mxu0  ;;  %v7249_v14 = vor.u32 %v7248_v3, %v7245_v63  ;;  %v5524_v3 = vld [vmem:[#allocation2 + $0xe8] sm:$0xff] }
 0x3b2   : > { %v14795_v36 = vpack.c.bf16 %v6758_v62, %v6757_v46  ;;  %v6302_v8 = vadd.f32 %v6167_v6, %v5560_v61  ;;  %v16177_v9 = vpop.f32.mrb[89].mxu1  ;;  %v16273_v12 = vpop.f32.mrb[89].mxu0  ;;  %v6759_v29 = vmul.f32 %v6649_v25, %v6472_v53  ;;  %v5562_v32 = vadd.f32 %v5521_v28, %v5433_v4 }
 0x3b3   : > { %v5436_v13 = vpop.f32.mrb[90].mxu1  ;;  %v6170_v5 = vpop.f32.mrb[90].mxu0  ;;  %v17645_v7 = vld [vmem:[#allocation3 + $0x58] sm:$0xff]   ;;  %v7250_v11 = vsel %vm443_vm1, %v7240_v44, %v7249_v14 }
 0x3b4   : > { %14847 = vst [vmem:[#allocation3 + $0x60] sm:$0xff] %v14795_v36   ;;  %v6432_v15 = vadd.f32 %v19624_v31, %v6302_v8  ;;  %v6303_v19 = vadd.f32 %v6170_v5, %v5561_v16  ;;  %v16178_v17 = vpop.f32.mrb[91].mxu1  ;;  %v16274_v20 = vpop.f32.mrb[91].mxu0  ;;  %v17646_v21 = vld [vmem:[#allocation3 + $0x58] sm:$0xff]   ;;  %16360 = vmatmul.mubr.bf16.gmra.mrb[156].mxu1 %v7250_v11  ;;  %v7836_v18 = vrot.slane %v17645_v7, 3  ;;  %v5563_v33 = vadd.f32 %v5522_v34, %v5436_v13 }
 0x3b5   : > { %v7252_v26 = vshrl.u32 %v17646_v21, 16  ;;  %16363 = vmatprep.mubr.msk.bf16.mxu1 %vm17899_vm0, %v17898_v1  ;;  %v7255_v30 = vshll.u32 %v17646_v21, 16  ;;  %v6659_v59 = vpop.permute.xlu1 %6658  ;;  %v6664_v61 = vpop.permute.xlu0 %6663 }
 0x3b6   : > { %v6473_v22 = vmax.f32 %v6432_v15, 0.0  ;;  %v6433_v24 = vadd.f32 %v19624_v31, %v6303_v19  ;;  %v7837_v37 = vsel %vm1106_vm2, %v7834_v56, %v7836_v18 }
 0x3b7   : > { %v7254_v0 = vrot.slane %v7252_v26, 2  ;;  %16464 = vmatmul.mubr.bf16.gmra.mrb[164].mxu0 %v7837_v37  ;;  %v7257_v39 = vrot.slane %v7255_v30, 3  ;;  %v5525_v37 = vld [vmem:[#allocation2 + $0xf0] sm:$0xff] }
 0x3b8   : > { %v6760_v35 = vmul.f32 %v6654_v27, %v6473_v22  ;;  %v6474_v38 = vmax.f32 %v6433_v24, 0.0  ;;  %16467 = vmatprep.mubr.msk.bf16.mxu0 %vm17899_vm0, %v17898_v1 }
 0x3b9   : > { %v5441_v58 = vpop.f32.mrb[92].mxu1  ;;  %v6175_v23 = vpop.f32.mrb[92].mxu0  ;;  %v7258_v49 = vor.u32 %v7257_v39, %v7254_v0  ;;  %v5526_v39 = vld [vmem:[#allocation2 + $0xf8] sm:$0xff] }
 0x3ba   : > { %v14800_v40 = vpack.c.bf16 %v6760_v35, %v6759_v29  ;;  %v6304_v43 = vadd.f32 %v6175_v23, %v5562_v32  ;;  %v16181_v44 = vpop.f32.mrb[93].mxu1  ;;  %v16277_v41 = vpop.f32.mrb[93].mxu0  ;;  %v6761_v62 = vmul.f32 %v6659_v59, %v6474_v38  ;;  %v5564_v2 = vadd.f32 %v5523_v10, %v5441_v58 }
 0x3bb   : > { %v5444_v45 = vpop.f32.mrb[94].mxu1  ;;  %v6178_v42 = vpop.f32.mrb[94].mxu0  ;;  %v17647_v52 = vld [vmem:[#allocation3 + $0x60] sm:$0xff]   ;;  %v7259_v56 = vsel %vm443_vm1, %v7249_v14, %v7258_v49 }
 0x3bc   : > { %14848 = vst [vmem:[#allocation3 + $0x68] sm:$0xff] %v14800_v40   ;;  %v6434_v47 = vadd.f32 %v19624_v31, %v6304_v43  ;;  %v6305_v50 = vadd.f32 %v6178_v42, %v5563_v33  ;;  %v16182_v51 = vpop.f32.mrb[95].mxu1  ;;  %v16278_v48 = vpop.f32.mrb[95].mxu0  ;;  %v17649_v54 = vld [vmem:[#allocation3 + $0x60] sm:$0xff]   ;;  %16364 = vmatmul.mubr.bf16.gmra.mrb[160].mxu1 %v7259_v56  ;;  %v7838_v60 = vrot.slane %v17647_v52, 3  ;;  %v5565_v12 = vadd.f32 %v5524_v3, %v5444_v45 }
 0x3bd   : > { %v7261_v57 = vshrl.u32 %v17649_v54, 16  ;;  %16367 = vmatprep.mubr.msk.bf16.mxu1 %vm17899_vm0, %v17898_v1  ;;  %v7264_v63 = vshll.u32 %v17649_v54, 16  ;;  %v6669_v26 = vpop.permute.xlu1 %6668  ;;  %v6674_v32 = vpop.permute.xlu0 %6673 }
 0x3be   : > { %v6475_v55 = vmax.f32 %v6434_v47, 0.0  ;;  %v6435_v46 = vadd.f32 %v19624_v31, %v6305_v50  ;;  %v7839_v4 = vsel %vm1106_vm2, %v7836_v18, %v7838_v60 }
 0x3bf   : > { %v7263_v6 = vrot.slane %v7261_v57, 2  ;;  %16468 = vmatmul.mubr.bf16.gmra.mrb[168].mxu0 %v7839_v4  ;;  %v7266_v8 = vrot.slane %v7264_v63, 3  ;;  %v5527_v4 = vld [vmem:[#allocation2 + $0x100] sm:$0xff] }
 0x3c0   : > { %v6762_v53 = vmul.f32 %v6664_v61, %v6475_v55  ;;  %v6476_v13 = vmax.f32 %v6435_v46, 0.0  ;;  %16471 = vmatprep.mubr.msk.bf16.mxu0 %vm17899_vm0, %v17898_v1 }
 0x3c1   : > { %v5449_v36 = vpop.f32.mrb[96].mxu1  ;;  %v6183_v16 = vpop.f32.mrb[96].mxu0  ;;  %v7267_v20 = vor.u32 %v7266_v8, %v7263_v6 }
 0x3c2   : > { %v14805_v9 = vpack.c.bf16 %v6762_v53, %v6761_v62  ;;  %v6306_v5 = vadd.f32 %v6183_v16, %v5564_v2  ;;  %v16185_v14 = vpop.f32.mrb[97].mxu1  ;;  %v16281_v15 = vpop.f32.mrb[97].mxu0  ;;  %v6763_v35 = vmul.f32 %v6669_v26, %v6476_v13  ;;  %v5566_v34 = vadd.f32 %v5525_v37, %v5449_v36 }
 0x3c3   : > { %v5452_v19 = vpop.f32.mrb[98].mxu1  ;;  %v6186_v17 = vpop.f32.mrb[98].mxu0  ;;  %v17650_v22 = vld [vmem:[#allocation3 + $0x68] sm:$0xff]   ;;  %v7268_v18 = vsel %vm443_vm1, %v7258_v49, %v7267_v20 }
 0x3c4   : > { %14849 = vst [vmem:[#allocation3 + $0x70] sm:$0xff] %v14805_v9   ;;  %v6436_v7 = vadd.f32 %v19624_v31, %v6306_v5  ;;  %v6307_v21 = vadd.f32 %v6186_v17, %v5565_v12  ;;  %v16186_v11 = vpop.f32.mrb[99].mxu1  ;;  %v16282_v25 = vpop.f32.mrb[99].mxu0  ;;  %v17652_v24 = vld [vmem:[#allocation3 + $0x68] sm:$0xff]   ;;  %16368 = vmatmul.mubr.bf16.gmra.mrb[164].mxu1 %v7268_v18  ;;  %v7840_v28 = vrot.slane %v17650_v22, 3  ;;  %v5567_v45 = vadd.f32 %v5526_v39, %v5452_v19  ;;  %v5528_v9 = vld [vmem:[#allocation2 + $0x108] sm:$0xff] }
 0x3c5   : > { %v7270_v30 = vshrl.u32 %v17652_v24, 16  ;;  %16371 = vmatprep.mubr.msk.bf16.mxu1 %vm17899_vm0, %v17898_v1  ;;  %v7273_v0 = vshll.u32 %v17652_v24, 16  ;;  %v6679_v57 = vpop.permute.xlu1 %6678  ;;  %v6684_v2 = vpop.permute.xlu0 %6683 }
 0x3c6   : > { %v6477_v27 = vmax.f32 %v6436_v7, 0.0  ;;  %v6437_v29 = vadd.f32 %v19624_v31, %v6307_v21  ;;  %v7841_v58 = vsel %vm1106_vm2, %v7838_v60, %v7840_v28 }
 0x3c7   : > { %v7272_v23 = vrot.slane %v7270_v30, 2  ;;  %16472 = vmatmul.mubr.bf16.gmra.mrb[172].mxu0 %v7841_v58  ;;  %v7275_v44 = vrot.slane %v7273_v0, 3  ;;  %v5529_v58 = vld [vmem:[#allocation2 + $0x110] sm:$0xff] }
 0x3c8   : > { %v6764_v38 = vmul.f32 %v6674_v32, %v6477_v27  ;;  %v6478_v40 = vmax.f32 %v6437_v29, 0.0  ;;  %16475 = vmatprep.mubr.msk.bf16.mxu0 %vm17899_vm0, %v17898_v1 }
 0x3c9   : > { %v5457_v33 = vpop.f32.mrb[100].mxu1  ;;  %v6191_v43 = vpop.f32.mrb[100].mxu0  ;;  %v7276_v48 = vor.u32 %v7275_v44, %v7272_v23  ;;  %v5530_v44 = vld [vmem:[#allocation2 + $0x118] sm:$0xff] }
 0x3ca   : > { %v14810_v41 = vpack.c.bf16 %v6764_v38, %v6763_v35  ;;  %v6308_v42 = vadd.f32 %v6191_v43, %v5566_v34  ;;  %v16189_v49 = vpop.f32.mrb[101].mxu1  ;;  %v16285_v47 = vpop.f32.mrb[101].mxu0  ;;  %v6765_v53 = vmul.f32 %v6679_v57, %v6478_v40  ;;  %v5568_v3 = vadd.f32 %v5527_v4, %v5457_v33 }
 0x3cb   : > { %v5460_v50 = vpop.f32.mrb[102].mxu1  ;;  %v6194_v51 = vpop.f32.mrb[102].mxu0  ;;  %v17653_v55 = vld [vmem:[#allocation3 + $0x70] sm:$0xff]   ;;  %v7277_v60 = vsel %vm443_vm1, %v7267_v20, %v7276_v48 }
 0x3cc   : > { %14850 = vst [vmem:[#allocation3 + $0x78] sm:$0xff] %v14810_v41   ;;  %v6438_v52 = vadd.f32 %v19624_v31, %v6308_v42  ;;  %v6309_v54 = vadd.f32 %v6194_v51, %v5567_v45  ;;  %v16190_v56 = vpop.f32.mrb[103].mxu1  ;;  %v16286_v59 = vpop.f32.mrb[103].mxu0  ;;  %v17654_v46 = vld [vmem:[#allocation3 + $0x70] sm:$0xff]   ;;  %16372 = vmatmul.mubr.bf16.gmra.mrb[168].mxu1 %v7277_v60  ;;  %v7842_v10 = vrot.slane %v17653_v55, 3  ;;  %v5569_v19 = vadd.f32 %v5528_v9, %v5460_v50 }
 0x3cd   : > { %v7279_v63 = vshrl.u32 %v17654_v46, 16  ;;  %16375 = vmatprep.mubr.msk.bf16.mxu1 %vm17899_vm0, %v17898_v1  ;;  %v7282_v6 = vshll.u32 %v17654_v46, 16  ;;  %v6689_v30 = vpop.permute.xlu1 %6688  ;;  %v6694_v34 = vpop.permute.xlu0 %6693 }
 0x3ce   : > { %v6479_v61 = vmax.f32 %v6438_v52, 0.0  ;;  %v6439_v62 = vadd.f32 %v19624_v31, %v6309_v54  ;;  %v7843_v16 = vsel %vm1106_vm2, %v7840_v28, %v7842_v10 }
 0x3cf   : > { %v7281_v8 = vrot.slane %v7279_v63, 2  ;;  %16476 = vmatmul.mubr.bf16.gmra.mrb[176].mxu0 %v7843_v16  ;;  %v7284_v14 = vrot.slane %v7282_v6, 3  ;;  %v5531_v16 = vld [vmem:[#allocation2 + $0x120] sm:$0xff] }
 0x3d0   : > { %v6766_v36 = vmul.f32 %v6684_v2, %v6479_v61  ;;  %v6480_v12 = vmax.f32 %v6439_v62, 0.0  ;;  %16479 = vmatprep.mubr.msk.bf16.mxu0 %vm17899_vm0, %v17898_v1 }
 0x3d1   : > { %v5465_v13 = vpop.f32.mrb[104].mxu1  ;;  %v6199_v5 = vpop.f32.mrb[104].mxu0  ;;  %v7285_v25 = vor.u32 %v7284_v14, %v7281_v8 }
 0x3d2   : > { %v14815_v15 = vpack.c.bf16 %v6766_v36, %v6765_v53  ;;  %v6310_v17 = vadd.f32 %v6199_v5, %v5568_v3  ;;  %v16193_v20 = vpop.f32.mrb[105].mxu1  ;;  %v16289_v7 = vpop.f32.mrb[105].mxu0  ;;  %v6767_v38 = vmul.f32 %v6689_v30, %v6480_v12  ;;  %v5570_v39 = vadd.f32 %v5529_v58, %v5465_v13  ;;  %v5532_v13 = vld [vmem:[#allocation2 + $0x128] sm:$0xff] }
 0x3d3   : > { %v5468_v21 = vpop.f32.mrb[106].mxu1  ;;  %v6202_v11 = vpop.f32.mrb[106].mxu0  ;;  %v17656_v27 = vld [vmem:[#allocation3 + $0x78] sm:$0xff]   ;;  %v7286_v28 = vsel %vm443_vm1, %v7276_v48, %v7285_v25 }
 0x3d4   : > { %14851 = vst [vmem:[#allocation3 + $0x80] sm:$0xff] %v14815_v15   ;;  %v6440_v22 = vadd.f32 %v19624_v31, %v6310_v17  ;;  %v6311_v24 = vadd.f32 %v6202_v11, %v5569_v19  ;;  %v16194_v18 = vpop.f32.mrb[107].mxu1  ;;  %v16290_v26 = vpop.f32.mrb[107].mxu0  ;;  %v17657_v29 = vld [vmem:[#allocation3 + $0x78] sm:$0xff]   ;;  %16376 = vmatmul.mubr.bf16.gmra.mrb[172].mxu1 %v7286_v28  ;;  %v7844_v37 = vrot.slane %v17656_v27, 3  ;;  %v5571_v50 = vadd.f32 %v5530_v44, %v5468_v21 }
 0x3d5   : > { %v7288_v0 = vshrl.u32 %v17657_v29, 16  ;;  %16379 = vmatprep.mubr.msk.bf16.mxu1 %vm17899_vm0, %v17898_v1  ;;  %v7291_v23 = vshll.u32 %v17657_v29, 16  ;;  %v6699_v63 = vpop.permute.xlu1 %6698  ;;  %v6704_v3 = vpop.permute.xlu0 %6703 }
 0x3d6   : > { %v6481_v32 = vmax.f32 %v6440_v22, 0.0  ;;  %v6441_v35 = vadd.f32 %v19624_v31, %v6311_v24  ;;  %v7845_v33 = vsel %vm1106_vm2, %v7842_v10, %v7844_v37 }
 0x3d7   : > { %v7290_v43 = vrot.slane %v7288_v0, 2  ;;  %16480 = vmatmul.mubr.bf16.gmra.mrb[180].mxu0 %v7845_v33  ;;  %v7293_v49 = vrot.slane %v7291_v23, 3  ;;  %v5533_v33 = vld [vmem:[#allocation2 + $0x130] sm:$0xff] }
 0x3d8   : > { %v6768_v40 = vmul.f32 %v6694_v34, %v6481_v32  ;;  %v6482_v41 = vmax.f32 %v6441_v35, 0.0  ;;  %16483 = vmatprep.mubr.msk.bf16.mxu0 %vm17899_vm0, %v17898_v1 }
 0x3d9   : > { %v5473_v45 = vpop.f32.mrb[108].mxu1  ;;  %v6207_v42 = vpop.f32.mrb[108].mxu0  ;;  %v7294_v59 = vor.u32 %v7293_v49, %v7290_v43 }
 0x3da   : > { %v14820_v47 = vpack.c.bf16 %v6768_v40, %v6767_v38  ;;  %v6312_v51 = vadd.f32 %v6207_v42, %v5570_v39  ;;  %v16197_v48 = vpop.f32.mrb[109].mxu1  ;;  %v16293_v52 = vpop.f32.mrb[109].mxu0  ;;  %v6769_v36 = vmul.f32 %v6699_v63, %v6482_v41  ;;  %v5572_v9 = vadd.f32 %v5531_v16, %v5473_v45  ;;  %v5534_v45 = vld [vmem:[#allocation2 + $0x138] sm:$0xff] }
 0x3db   : > { %v5476_v54 = vpop.f32.mrb[110].mxu1  ;;  %v6210_v56 = vpop.f32.mrb[110].mxu0  ;;  %v17658_v61 = vld [vmem:[#allocation3 + $0x80] sm:$0xff]   ;;  %v7295_v10 = vsel %vm443_vm1, %v7285_v25, %v7294_v59 }
 0x3dc   : > { %14852 = vst [vmem:[#allocation3 + $0x88] sm:$0xff] %v14820_v47   ;;  %v6442_v55 = vadd.f32 %v19624_v31, %v6312_v51  ;;  %v6313_v46 = vadd.f32 %v6210_v56, %v5571_v50  ;;  %v16198_v60 = vpop.f32.mrb[111].mxu1  ;;  %v16294_v57 = vpop.f32.mrb[111].mxu0  ;;  %v17660_v62 = vld [vmem:[#allocation3 + $0x80] sm:$0xff]   ;;  %16380 = vmatmul.mubr.bf16.gmra.mrb[176].mxu1 %v7295_v10  ;;  %v7846_v4 = vrot.slane %v17658_v61, 3  ;;  %v5573_v21 = vadd.f32 %v5532_v13, %v5476_v54 }
 0x3dd   : > { %v7297_v6 = vshrl.u32 %v17660_v62, 16  ;;  %16383 = vmatprep.mubr.msk.bf16.mxu1 %vm17899_vm0, %v17898_v1  ;;  %v7300_v8 = vshll.u32 %v17660_v62, 16  ;;  %v6714_v39 = vpop.permute.xlu0 %6713  ;;  %v5535_v51 = vld [vmem:[#allocation2 + $0x140] sm:$0xf] }
 0x3de   : > { %v6483_v2 = vmax.f32 %v6442_v55, 0.0  ;;  %v6443_v53 = vadd.f32 %v19624_v31, %v6313_v46  ;;  %v7847_v5 = vsel %vm1106_vm2, %v7844_v37, %v7846_v4  ;;  %v6709_v37 = vpop.permute.xlu1 %6708 }
 0x3df   : > { %v7299_v14 = vrot.slane %v7297_v6, 2  ;;  %16484 = vmatmul.mubr.bf16.gmra.mrb[184].mxu0 %v7847_v5  ;;  %v7302_v20 = vrot.slane %v7300_v8, 3 }
 0x3e0   : > { %v6770_v12 = vmul.f32 %v6704_v3, %v6483_v2  ;;  %v6484_v15 = vmax.f32 %v6443_v53, 0.0  ;;  %16487 = vmatprep.mubr.msk.bf16.mxu0 %vm17899_vm0, %v17898_v1 }
 0x3e1   : > { %v5481_v19 = vpop.f32.mrb[112].mxu1  ;;  %v6215_v17 = vpop.f32.mrb[112].mxu0  ;;  %v7303_v26 = vor.u32 %v7302_v20, %v7299_v14 }
 0x3e2   : > { %v14825_v7 = vpack.c.bf16 %v6770_v12, %v6769_v36  ;;  %v6314_v11 = vadd.f32 %v6215_v17, %v5572_v9  ;;  %v16201_v25 = vpop.f32.mrb[113].mxu1  ;;  %v16297_v22 = vpop.f32.mrb[113].mxu0  ;;  %v6771_v40 = vmul.f32 %v6709_v37, %v6484_v15  ;;  %v5574_v44 = vadd.f32 %v5533_v33, %v5481_v19 }
 0x3e3   : > { %v5484_v24 = vpop.f32.mrb[114].mxu1  ;;  %v6218_v18 = vpop.f32.mrb[114].mxu0  ;;  %v17661_v32 = vld [vmem:[#allocation3 + $0x88] sm:$0xff]   ;;  %v7304_v0 = vsel %vm443_vm1, %v7294_v59, %v7303_v26 }
 0x3e4   : > { %14853 = vst [vmem:[#allocation3 + $0x90] sm:$0xff] %v14825_v7   ;;  %v6444_v27 = vadd.f32 %v19624_v31, %v6314_v11  ;;  %v6315_v29 = vadd.f32 %v6218_v18, %v5573_v21  ;;  %v16202_v28 = vpop.f32.mrb[115].mxu1  ;;  %v16298_v30 = vpop.f32.mrb[115].mxu0  ;;  %v17663_v35 = vld [vmem:[#allocation3 + $0x88] sm:$0xff]   ;;  %16384 = vmatmul.mubr.bf16.gmra.mrb[180].mxu1 %v7304_v0  ;;  %v7848_v58 = vrot.slane %v17661_v32, 3  ;;  %v5575_v56 = vadd.f32 %v5534_v45, %v5484_v24 }
 0x3e5   : > { %v7306_v23 = vshrl.u32 %v17663_v35, 16  ;;  %16387 = vmatprep.mubr.msk.bf16.mxu1 %vm17899_vm0, %v17898_v1  ;;  %v7309_v43 = vshll.u32 %v17663_v35, 16  ;;  %v6719_v57 = vpop.permute.xlu1 %6718  ;;  %v6724_v5 = vpop.permute.xlu0 %6723 }
 0x3e6   : > { %v6485_v34 = vmax.f32 %v6444_v27, 0.0  ;;  %v6445_v38 = vadd.f32 %v19624_v31, %v6315_v29  ;;  %v7849_v42 = vsel %vm1106_vm2, %v7846_v4, %v7848_v58 }
 0x3e7   : > { %v7308_v49 = vrot.slane %v7306_v23, 2  ;;  %16488 = vmatmul.mubr.bf16.gmra.mrb[188].mxu0 %v7849_v42  ;;  %v7311_v52 = vrot.slane %v7309_v43, 3 }
 0x3e8   : > { %v6772_v41 = vmul.f32 %v6714_v39, %v6485_v34  ;;  %v6486_v47 = vmax.f32 %v6445_v38, 0.0  ;;  %16491 = vmatprep.mubr.msk.bf16.mxu0 %vm17899_vm0, %v17898_v1 }
 0x3e9   : > { %v5489_v50 = vpop.f32.mrb[116].mxu1  ;;  %v6223_v48 = vpop.f32.mrb[116].mxu0  ;;  %v7312_v62 = vor.u32 %v7311_v52, %v7308_v49 }
 0x3ea   : > { %v14830_v54 = vpack.c.bf16 %v6772_v41, %v6771_v40  ;;  %v5576_v59 = vadd.f32 %v5535_v51, %v5489_v50  ;;  %v6316_v55 = vadd.f32 %v6223_v48, %v5574_v44  ;;  %v16301_v46 = vpop.f32.mrb[117].mxu0  ;;  %v16205_v60 = vpop.f32.mrb[117].mxu1  ;;  %v6773_v14 = vmul.f32 %v6719_v57, %v6486_v47  ;;  %v17674_v51 = vld [vmem:[#allocation3 + $0x10] sm:$0xff]   ;;  %v17675_v48 = vld [vmem:[#allocation3] sm:$0xf8]  }
 0x3eb   : > { %v6226_v61 = vpop.f32.mrb[118].mxu0  ;;  %v17664_v10 = vld [vmem:[#allocation3 + $0x90] sm:$0xff]   ;;  %v7313_v6 = vsel %vm443_vm1, %v7303_v26, %v7312_v62  ;;  %v5492_v36 = vpop.f32.mrb[118].mxu1  ;;  %v9165_v46 = vshrl.u32 %v17674_v51, 16  ;;  %v9168_v60 = vshll.u32 %v17674_v51, 16 }
 0x3ec   : > { %14854 = vst [vmem:[#allocation3 + $0x98] sm:$0xff] %v14830_v54   ;;  %5617 = vst [vmem:[#allocation2 + $0x140] sm:$0xf] %v5576_v59  ;;  %v6446_v63 = vadd.f32 %v19624_v31, %v6316_v55  ;;  %v6317_v2 = vadd.f32 %v6226_v61, %v5575_v56  ;;  %v16302_v53 = vpop.f32.mrb[119].mxu0  ;;  %v17665_v4 = vld [vmem:[#allocation3 + $0x90] sm:$0xff]   ;;  %v7850_v3 = vrot.slane %v17664_v10, 3  ;;  %16388 = vmatmul.mubr.bf16.gmra.mrb[184].mxu1 %v7313_v6  ;;  %v6729_v21 = vpop.permute.xlu1 %6728 }
 0x3ed   : > { %v7315_v9 = vshrl.u32 %v17665_v4, 16  ;;  %v7318_v12 = vshll.u32 %v17665_v4, 16  ;;  %v16206_v13 = vpop.f32.mrb[119].mxu1  ;;  %16391 = vmatprep.mubr.msk.bf16.mxu1 %vm17899_vm0, %v17898_v1  ;;  %v17673_v54 = vld [vmem:[#allocation3 + $0x8] sm:$0xf8]   ;;  %v9167_v53 = vrot.slane %v9165_v46, 3  ;;  %v6734_v36 = vpop.permute.xlu0 %6733 }
 0x3ee   : > { %v6487_v16 = vmax.f32 %v6446_v63, 0.0  ;;  %v6447_v8 = vadd.f32 %v19624_v31, %v6317_v2  ;;  %v7851_v15 = vsel %vm1106_vm2, %v7848_v58, %v7850_v3  ;;  %v17676_v56 = vld [vmem:[#allocation3 + $0x8] sm:$0xff]   ;;  %v9157_v57 = vshrl.u32 %v17673_v54, 16  ;;  %v17678_v6 = vld [vmem:[#allocation3 + $0x18] sm:$0xff]   ;;  %v17702_v51 = vld [vmem:[%s20938_s3 + $0x158] sm:$0xff]  }
 0x3ef   : > { %v7317_v20 = vrot.slane %v7315_v9, 2  ;;  %v7320_v7 = vrot.slane %v7318_v12, 3  ;;  %16492 = vmatmul.mubr.bf16.gmra.mrb[192].mxu0 %v7851_v15  ;;  %v9160_v61 = vshll.u32 %v17673_v54, 16  ;;  %v8416_v63 = vshll.u32 %v17675_v48, 16 }
 0x3f0   : > { %v6774_v19 = vmul.f32 %v6724_v5, %v6487_v16  ;;  %v6488_v17 = vmax.f32 %v6447_v8, 0.0  ;;  %16495 = vmatprep.mubr.msk.bf16.mxu0 %vm17899_vm0, %v17898_v1  ;;  %v8421_v2 = vshrl.u32 %v17676_v56, 16  ;;  %v9170_v4 = vrot.slane %v9168_v60, 4 }
 0x3f1   : > { %v6231_v11 = vpop.f32.mrb[120].mxu0  ;;  %v7321_v24 = vor.u32 %v7320_v7, %v7317_v20  ;;  %v8424_v16 = vshll.u32 %v17676_v56, 16  ;;  %v9159_v8 = vrot.slane %v9157_v57, 3  ;;  %v9162_v9 = vrot.slane %v9160_v61, 4  ;;  %v17679_v7 = vld [vmem:[#allocation3 + $0x10] sm:$0xff]   ;;  %v17709_v57 = vld [vmem:[%s20938_s3 + $0x160] sm:$0xff]  }
 0x3f2   : > { %v14835_v25 = vpack.c.bf16 %v6774_v19, %v6773_v14  ;;  %v6775_v22 = vmul.f32 %v6729_v21, %v6488_v17  ;;  %v16305_v18 = vpop.f32.mrb[121].mxu0  ;;  %v8423_v5 = vrot.slane %v8421_v2, 3  ;;  %v9171_v14 = vor.u32 %v9170_v4, %v9167_v53  ;;  %v17686_v2 = vld [vmem:[#allocation3 + $0x30] sm:$0xff]  }
 0x3f3   : > { %v6277_v26 = vld [vmem:[#allocation2 + $0x140] sm:$0xf]  ;;  %v7322_v28 = vsel %vm443_vm1, %v7312_v62, %v7321_v24  ;;  %v6234_v32 = vpop.f32.mrb[122].mxu0  ;;  %v8413_v62 = vshrl.u32 %v17675_v48, 16  ;;  %v9174_v15 = vshrl.u32 %v17678_v6, 16  ;;  %v9177_v19 = vshll.u32 %v17678_v6, 16 }
 0x3f4   : > { %14855 = vst [vmem:[#allocation3 + $0xa0] sm:$0xff] %v14835_v25   ;;  %v14740_v27 = vpack.c.bf16 %v6775_v22, %v6775_v22  ;;  %v6318_v29 = vadd.f32 %v6277_v26, %v6231_v11  ;;  %v17667_v30 = vld [vmem:[#allocation3 + $0x98] sm:$0xff]   ;;  %v16306_v37 = vpop.f32.mrb[123].mxu0  ;;  %16392 = vmatmul.mubr.bf16.gmra.mrb[188].mxu1 %v7322_v28  ;;  %v8426_v20 = vrot.slane %v8424_v16, 4  ;;  %v9163_v21 = vor.u32 %v9162_v9, %v9159_v8  ;;  %v17681_v18 = vld [vmem:[#allocation3 + $0x20] sm:$0xff]   ;;  %v17691_v48 = vld [vmem:[%s20938_s3 + $0x110] sm:$0xff]  }
 0x3f5   : > { %v17668_v35 = vld [vmem:[#allocation3 + $0x98] sm:$0xff]   ;;  %v7852_v0 = vrot.slane %v17667_v30, 3  ;;  %16395 = vmatprep.mubr.msk.bf16.mxu1 %vm17899_vm0, %v17898_v1  ;;  %v8415_v13 = vrot.slane %v8413_v62, 3  ;;  %v9176_v22 = vrot.slane %v9174_v15, 3  ;;  %v8433_v28 = vshll.u32 %v17679_v7, 16  ;;  %v17688_v30 = vld [vmem:[%s20938_s3 + $0x148] sm:$0xff]  }
 0x3f6   : > { %6984 = vst [vmem:[#allocation3 + $0xa8] sm:$0xf] %v14740_v27  ;;  %6359 = vst [vmem:[#allocation2 + $0x140] sm:$0xf] %v6318_v29  ;;  %v7324_v34 = vshrl.u32 %v17668_v35, 16  ;;  %v7327_v38 = vshll.u32 %v17668_v35, 16  ;;  %v9172_v25 = vsel %vm1704_vm3, %v9163_v21, %v9171_v14  ;;  %v8427_v27 = vor.u32 %v8426_v20, %v8423_v5 }
 0x3f7   : > { %v7853_v58 = vsel %vm1106_vm2, %v7850_v3, %v7852_v0  ;;  %v17680_v11 = vld [vmem:[%s20938_s3 + $0x140] sm:$0xff]   ;;  %v8430_v29 = vshrl.u32 %v17679_v7, 16  ;;  %v9183_v37 = vshrl.u32 %v17681_v18, 16  ;;  %v17699_v62 = vld [vmem:[%s20938_s3 + $0x118] sm:$0xff]   ;;  %v17717_v6 = vld [vmem:[%s20938_s3 + $0x168] sm:$0xff]   ;;  %v9201_v9 = vshrl.u32 %v17686_v2, 16 }
 0x3f8   : > { %16496 = vmatmul.mubr.bf16.gmra.mrb[196].mxu0 %v7853_v58  ;;  %v7326_v23 = vrot.slane %v7324_v34, 2  ;;  %v7329_v39 = vrot.slane %v7327_v38, 3  ;;  %v17677_v32 = vld [vmem:[%s20938_s3 + $0x100] sm:$0xff]   ;;  %v8435_v58 = vrot.slane %v8433_v28, 4  ;;  %v17713_v5 = vld [vmem:[%s20938_s3 + $0x128] sm:$0xff]  }
 0x3f9   : > { %16499 = vmatprep.mubr.msk.bf16.mxu0 %vm17899_vm0, %v17898_v1  ;;  %v8432_v38 = vrot.slane %v8430_v29, 3  ;;  %v17706_v16 = vld [vmem:[%s20938_s3 + $0x120] sm:$0xff]   ;;  %v9203_v15 = vrot.slane %v9201_v9, 3  ;;  %v17692_v28 = vld [vmem:[#allocation3 + $0x40] sm:$0xff]  }
 0x3fa   : > { %v7330_v40 = vor.u32 %v7329_v39, %v7326_v23  ;;  %v17682_v23 = vld [vmem:[#allocation3 + $0x18] sm:$0xff]   ;;  %v17683_v39 = vld [vmem:[#allocation3 + $0x28] sm:$0xff]  }
 0x3fb   : > { %v17669_v33 = vld [vmem:[#allocation3 + $0xa0] sm:$0x1f]   ;;  %v9195_v54 = vshll.u32 %v17683_v39, 16 }
 0x3fc   : > { %v17671_v43 = vld [vmem:[#allocation3 + $0xa0] sm:$0x1f]   ;;  %v7331_v44 = vsel %vm443_vm1, %v7321_v24, %v7330_v40  ;;  %v7854_v41 = vrot.slane %v17669_v33, 3  ;;  %v9179_v24 = vrot.slane %v9177_v19, 4 }
 0x3fd   : > { %16396 = vmatmul.mubr.bf16.gmra.mrb[192].mxu1 %v7331_v44  ;;  %v7333_v45 = vshrl.u32 %v17671_v43, 16  ;;  %v7336_v42 = vshll.u32 %v17671_v43, 16  ;;  %v6400_v59 = vld [vmem:[#allocation2 + $0x140] sm:$0xf]  ;;  %v17684_v33 = vld [vmem:[%s20938_s3 + $0x108] sm:$0xff]   ;;  %v9185_v44 = vrot.slane %v9183_v37, 3 }
 0x3fe   : > { %v7855_v49 = vsel %vm1106_vm2, %v7852_v0, %v7854_v41  ;;  %16399 = vmatprep.mubr.msk.bf16.mxu1 %vm17899_vm0, %v17898_v1  ;;  %v6448_v10 = vadd.f32 %v19624_v31, %v6400_v59  ;;  %v8418_v31 = vrot.slane %v8416_v63, 4  ;;  %v9180_v35 = vor.u32 %v9179_v24, %v9176_v22 }
 0x3ff   : > { %v7335_v47 = vrot.slane %v7333_v45, 2  ;;  %v7338_v50 = vrot.slane %v7336_v42, 3  ;;  %v9186_v0 = vshll.u32 %v17681_v18, 16  ;;  %v8436_v45 = vor.u32 %v8435_v58, %v8432_v38  ;;  %v17690_v18 = vld [vmem:[#allocation3 + $0x30] sm:$0xff]  }
 0x400   : > { %16500 = vmatmul.mubr.bf16.gmra.mrb[200].mxu0 %v7855_v49  ;;  %v6489_v3 = vmax.f32 %v6448_v10, 0.0  ;;  %v8419_v26 = vor.u32 %v8418_v31, %v8415_v13  ;;  %v9181_v43 = vsel %vm1704_vm3, %v9171_v14, %v9180_v35  ;;  %v8439_v42 = vshrl.u32 %v17682_v23, 16  ;;  %v17724_v31 = vld [vmem:[%s20938_s3 + $0x170] sm:$0xff]  }
 0x401   : > { %v7339_v52 = vor.u32 %v7338_v50, %v7335_v47  ;;  %16503 = vmatprep.mubr.msk.bf16.mxu0 %vm17899_vm0, %v17898_v1  ;;  %v8442_v49 = vshll.u32 %v17682_v23, 16  ;;  %v17685_v47 = vld [vmem:[#allocation3 + $0x20] sm:$0xff]   ;;  %v9192_v50 = vshrl.u32 %v17683_v39, 16  ;;  %v8437_v56 = vsel %vm1704_vm3, %v8427_v27, %v8436_v45 }
 0x402   : > { %v6776_v12 = vmul.f32 %v6734_v36, %v6489_v3  ;;  %v8428_v34 = vsel %vm1704_vm3, %v8419_v26, %v8427_v27  ;;  %v8441_v59 = vrot.slane %v8439_v42, 3  ;;  %v8448_v60 = vshrl.u32 %v17685_v47, 16  ;;  %v17687_v36 = vld [vmem:[#allocation3 + $0x28] sm:$0xff]  }
 0x403   : > { %v7340_v55 = vsel %vm443_vm1, %v7330_v40, %v7339_v52  ;;  %v17695_v40 = vld [vmem:[%s20938_s3 + $0x150] sm:$0xff]   ;;  %v9194_v46 = vrot.slane %v9192_v50, 3  ;;  %v8451_v61 = vshll.u32 %v17685_v47, 16  ;;  %v9197_v63 = vrot.slane %v9195_v54, 4 }
 0x404   : > { %v14741_v17 = vpack.c.bf16 %v6776_v12, %v6776_v12  ;;  %v8450_v4 = vrot.slane %v8448_v60, 3  ;;  %v9204_v12 = vshll.u32 %v17686_v2, 16  ;;  %v8457_v7 = vshrl.u32 %v17687_v36, 16  ;;  %v17696_v60 = vld [vmem:[#allocation3 + $0x40] sm:$0xff]   ;;  %v17697_v2 = vld [vmem:[#allocation3 + $0x50] sm:$0xff]  }
 0x405   : > { %16400 = vmatmul.mubr.bf16.gmra.mrb[196].mxu1 %v7340_v55  ;;  %v8444_v55 = vrot.slane %v8442_v49, 4  ;;  %v8453_v3 = vrot.slane %v8451_v61, 4  ;;  %v9198_v8 = vor.u32 %v9197_v63, %v9194_v46  ;;  %v8460_v21 = vshll.u32 %v17687_v36, 16 }
 0x406   : > { %16403 = vmatprep.mubr.msk.bf16.mxu1 %vm17899_vm0, %v17898_v1  ;;  %6985 = vst [vmem:[#allocation3 + $0xac] sm:$0x3] %v14741_v17  ;;  %v9206_v19 = vrot.slane %v9204_v12, 4  ;;  %v17689_v17 = vld [vmem:[#allocation3 + $0x38] sm:$0xff]   ;;  %v8459_v27 = vrot.slane %v8457_v7, 3  ;;  %v8469_v38 = vshll.u32 %v17690_v18, 16 }
 0x407   : > { %v8445_v53 = vor.u32 %v8444_v55, %v8441_v59  ;;  %v8454_v20 = vor.u32 %v8453_v3, %v8450_v4  ;;  %v9210_v22 = vshrl.u32 %v17689_v17, 16  ;;  %v9213_v24 = vshll.u32 %v17689_v17, 16 }
 0x408   : > { %16504 = vmatmul.mubr.bf16.gmra.mrb[204].mxu0 %v7854_v41  ;;  %v9188_v41 = vrot.slane %v9186_v0, 4  ;;  %v8462_v29 = vrot.slane %v8460_v21, 4  ;;  %v9219_v58 = vshrl.u32 %v17692_v28, 16  ;;  %v9222_v39 = vshll.u32 %v17692_v28, 16 }
 0x409   : > { %16623 = vmatprep.mubr.msk.bf16.mxu0 %vm17899_vm0, %v17898_v1  ;;  %v8446_v13 = vsel %vm1704_vm3, %v8436_v45, %v8445_v53  ;;  %v8455_v26 = vsel %vm1704_vm3, %v8445_v53, %v8454_v20  ;;  %v9215_v37 = vrot.slane %v9213_v24, 4  ;;  %v17730_v45 = vld [vmem:[%s20938_s3 + $0x178] sm:$0xff]   ;;  %v8487_v12 = vshll.u32 %v17696_v60, 16  ;;  %v17700_v24 = vld [vmem:[#allocation3 + $0x58] sm:$0xff]  }
 0x40a   : > { %v8463_v0 = vor.u32 %v8462_v29, %v8459_v27  ;;  %v9221_v42 = vrot.slane %v9219_v58, 3  ;;  %v9224_v47 = vrot.slane %v9222_v39, 4  ;;  %v9237_v17 = vshrl.u32 %v17697_v2, 16 }
 0x40c   : > { %v9225_v55 = vor.u32 %v9224_v47, %v9221_v42 }
 0x40d   : > { %16404 = vmatmul.mubr.bf16.gmra.mrb[200].mxu1 %v7339_v52  ;;  %v9189_v52 = vor.u32 %v9188_v41, %v9185_v44  ;;  %v8471_v44 = vrot.slane %v8469_v38, 4  ;;  %v17694_v41 = vld [vmem:[#allocation3 + $0x48] sm:$0xff]  }
 0x40e   : > { %16523 = vmatprep.mubr.msk.bf16.mxu1 %vm17899_vm0, %v17898_v1 }
 0x40f   : > { %v9190_v10 = vsel %vm1704_vm3, %v9180_v35, %v9189_v52  ;;  %v9199_v14 = vsel %vm1704_vm3, %v9189_v52, %v9198_v8  ;;  %v9212_v35 = vrot.slane %v9210_v22, 3  ;;  %v9228_v52 = vshrl.u32 %v17694_v41, 16 }
 0x410   : > { %16624 = vmatmul.mubr.bf16.vlgmr.msra.gmra.mrb[208].mxu0 %v9172_v25  ;;  %v9207_v25 = vor.u32 %v9206_v19, %v9203_v15 }
 0x411   : > { %16627 = vmatprep.mubr.msk.bf16.mxu0 %vm17899_vm0, %v17898_v1  ;;  %16808 = vmatpush3.bf16.msra.mxu0 %v17680_v11  ;;  %v17720_v11 = vld [vmem:[%s20938_s3 + $0x130] sm:$0xff]   ;;  %v9216_v23 = vor.u32 %v9215_v37, %v9212_v35  ;;  %v9230_v63 = vrot.slane %v9228_v52, 3 }
 0x412   : > { %16809 = vmatprep.subr.bf16.mxu0 %v17898_v1 }
 0x413   : > { %v9217_v49 = vsel %vm1704_vm3, %v9207_v25, %v9216_v23  ;;  %v9226_v36 = vsel %vm1704_vm3, %v9216_v23, %v9225_v55 }
 0x415   : > { %16524 = vmatmul.mubr.bf16.vlgmr.msra.gmra.mrb[204].mxu1 %v8428_v34  ;;  %16810 = vmatpush3.bf16.msra.mxu0 %v17688_v30  ;;  %v17728_v30 = vld [vmem:[%s20938_s3 + $0x138] sm:$0xff]   ;;  %v8466_v34 = vshrl.u32 %v17690_v18, 16 }
 0x416   : > { %16708 = vmatpush3.bf16.msra.mxu1 %v17677_v32  ;;  %16527 = vmatprep.mubr.msk.bf16.mxu1 %vm17899_vm0, %v17898_v1  ;;  %v9208_v32 = vsel %vm1704_vm3, %v9198_v8, %v9207_v25 }
 0x417   : > { %16709 = vmatprep.subr.bf16.mxu1 %v17898_v1  ;;  %16811 = vmatprep.subr.bf16.mxu0 %v17898_v1 }
 0x418   : > { %16628 = vmatmul.mubr.bf16.gmra.mrb[212].mxu0 %v9181_v43  ;;  %v8468_v43 = vrot.slane %v8466_v34, 3  ;;  %v9246_v34 = vshrl.u32 %v17700_v24, 16 }
 0x419   : > { %16631 = vmatprep.mubr.msk.bf16.mxu0 %vm17899_vm0, %v17898_v1  ;;  %16812 = vmatpush3.bf16.msra.mxu0 %v17695_v40  ;;  %v17693_v40 = vld [vmem:[#allocation3 + $0x38] sm:$0xff]  }
 0x41a   : > { %16710 = vmatpush3.bf16.msra.mxu1 %v17684_v33  ;;  %16813 = vmatprep.subr.bf16.mxu0 %v17898_v1  ;;  %v8464_v33 = vsel %vm1704_vm3, %v8454_v20, %v8463_v0  ;;  %v8475_v50 = vshrl.u32 %v17693_v40, 16  ;;  %v9240_v20 = vshll.u32 %v17697_v2, 16  ;;  %v9248_v47 = vrot.slane %v9246_v34, 3 }
 0x41b   : > { %16711 = vmatprep.subr.bf16.mxu1 %v17898_v1 }
 0x41c   : > { %v8477_v46 = vrot.slane %v8475_v50, 3  ;;  %v9242_v27 = vrot.slane %v9240_v20, 4  ;;  %v17703_v50 = vld [vmem:[#allocation3 + $0x60] sm:$0xff]  }
 0x41d   : > { %16528 = vmatmul.mubr.bf16.gmra.mrb[208].mxu1 %v8437_v56  ;;  %16814 = vmatpush3.bf16.msra.mxu0 %v17702_v51  ;;  %v8472_v51 = vor.u32 %v8471_v44, %v8468_v43  ;;  %v9231_v56 = vshll.u32 %v17694_v41, 16  ;;  %v9255_v2 = vshrl.u32 %v17703_v50, 16 }
 0x41e   : > { %16531 = vmatprep.mubr.msk.bf16.mxu1 %vm17899_vm0, %v17898_v1  ;;  %16712 = vmatpush3.bf16.msra.mxu1 %v17691_v48  ;;  %v8478_v48 = vshll.u32 %v17693_v40, 16  ;;  %v9249_v40 = vshll.u32 %v17700_v24, 16 }
 0x41f   : > { %16713 = vmatprep.subr.bf16.mxu1 %v17898_v1  ;;  %16815 = vmatprep.subr.bf16.mxu0 %v17898_v1  ;;  %v9233_v4 = vrot.slane %v9231_v56, 4 }
 0x420   : > { %16632 = vmatmul.mubr.bf16.gmra.mrb[216].mxu0 %v9190_v10 }
 0x421   : > { %16635 = vmatprep.mubr.msk.bf16.mxu0 %vm17899_vm0, %v17898_v1  ;;  %16816 = vmatpush3.bf16.msra.mxu0 %v17709_v57  ;;  %v8473_v57 = vsel %vm1704_vm3, %v8463_v0, %v8472_v51  ;;  %v9234_v15 = vor.u32 %v9233_v4, %v9230_v63 }
 0x422   : > { %16714 = vmatpush3.bf16.msra.mxu1 %v17699_v62  ;;  %16817 = vmatprep.subr.bf16.mxu0 %v17898_v1  ;;  %v8480_v62 = vrot.slane %v8478_v48, 4  ;;  %v9251_v48 = vrot.slane %v9249_v40, 4 }
 0x423   : > { %16715 = vmatprep.subr.bf16.mxu1 %v17898_v1  ;;  %v9235_v18 = vsel %vm1704_vm3, %v9225_v55, %v9234_v15 }
 0x424   : > { %v8481_v9 = vor.u32 %v8480_v62, %v8477_v46  ;;  %v9252_v63 = vor.u32 %v9251_v48, %v9248_v47 }
 0x425   : > { %16532 = vmatmul.mubr.bf16.gmra.mrb[212].mxu1 %v8446_v13  ;;  %16818 = vmatpush3.bf16.msra.mxu0 %v17717_v6 }
 0x426   : > { %16535 = vmatprep.mubr.msk.bf16.mxu1 %vm17899_vm0, %v17898_v1  ;;  %16716 = vmatpush3.bf16.msra.mxu1 %v17706_v16  ;;  %v8484_v16 = vshrl.u32 %v17696_v60, 16  ;;  %v8482_v21 = vsel %vm1704_vm3, %v8472_v51, %v8481_v9 }
 0x427   : > { %16717 = vmatprep.subr.bf16.mxu1 %v17898_v1  ;;  %16819 = vmatprep.subr.bf16.mxu0 %v17898_v1 }
 0x428   : > { %16636 = vmatmul.mubr.bf16.gmra.mrb[220].mxu0 %v9199_v14  ;;  %v8486_v19 = vrot.slane %v8484_v16, 3 }
 0x429   : > { %16639 = vmatprep.mubr.msk.bf16.mxu0 %vm17899_vm0, %v17898_v1  ;;  %16820 = vmatpush3.bf16.msra.mxu0 %v17724_v31 }
 0x42a   : > { %16718 = vmatpush3.bf16.msra.mxu1 %v17713_v5  ;;  %16821 = vmatprep.subr.bf16.mxu0 %v17898_v1  ;;  %v17698_v5 = vld [vmem:[#allocation3 + $0x48] sm:$0xff]  }
 0x42b   : > { %16719 = vmatprep.subr.bf16.mxu1 %v17898_v1 }
 0x42d   : > { %16536 = vmatmul.mubr.bf16.gmra.mrb[216].mxu1 %v8455_v26  ;;  %16822 = vmatpush3.bf16.msra.mxu0 %v17730_v45  ;;  %v9239_v26 = vrot.slane %v9237_v17, 3 }
 0x42e   : > { %16539 = vmatprep.mubr.msk.bf16.mxu1 %vm17899_vm0, %v17898_v1  ;;  %16720 = vmatpush3.bf16.msra.mxu1 %v17720_v11  ;;  %v8489_v11 = vrot.slane %v8487_v12, 4 }
 0x42f   : > { %16721 = vmatprep.subr.bf16.mxu1 %v17898_v1  ;;  %17007 = vmatprep.subr.bf16.mxu0 %v17898_v1  ;;  %v9243_v39 = vor.u32 %v9242_v27, %v9239_v26 }
 0x430   : > { %16640 = vmatmul.mubr.bf16.gmra.mrb[224].mxu0 %v9208_v32  ;;  %v8490_v28 = vor.u32 %v8489_v11, %v8486_v19  ;;  %v8496_v32 = vshll.u32 %v17698_v5, 16 }
 0x431   : > { %16643 = vmatprep.mubr.msk.bf16.mxu0 %vm17899_vm0, %v17898_v1  ;;  %v9244_v51 = vsel %vm1704_vm3, %v9234_v15, %v9243_v39  ;;  %v9253_v12 = vsel %vm1704_vm3, %v9243_v39, %v9252_v63 }
 0x432   : > { %16722 = vmatpush3.bf16.msra.mxu1 %v17728_v30  ;;  %v8493_v30 = vshrl.u32 %v17698_v5, 16  ;;  %v8491_v44 = vsel %vm1704_vm3, %v8481_v9, %v8490_v28  ;;  %v8498_v45 = vrot.slane %v8496_v32, 4  ;;  %v17705_v9 = vld [vmem:[#allocation3 + $0x68] sm:$0xff]  }
 0x433   : > { %16907 = vmatprep.subr.bf16.mxu1 %v17898_v1  ;;  %v9267_v11 = vshll.u32 %v17705_v9, 16 }
 0x434   : > { %v8495_v41 = vrot.slane %v8493_v30, 3 }
 0x435   : > { %16540 = vmatmul.mubr.bf16.gmra.mrb[220].mxu1 %v8464_v33  ;;  %v17701_v33 = vld [vmem:[#allocation3 + $0x50] sm:$0xff]   ;;  %v9269_v34 = vrot.slane %v9267_v11, 4  ;;  %v17714_v11 = vld [vmem:[#allocation3 + $0x80] sm:$0xff]  }
 0x436   : > { %16543 = vmatprep.mubr.msk.bf16.mxu1 %vm17899_vm0, %v17898_v1  ;;  %v8502_v52 = vshrl.u32 %v17701_v33, 16  ;;  %v8499_v56 = vor.u32 %v8498_v45, %v8495_v41 }
 0x438   : > { %16644 = vmatmul.mubr.bf16.gmra.mrb[228].mxu0 %v9217_v49 }
 0x439   : > { %16647 = vmatprep.mubr.msk.bf16.mxu0 %vm17899_vm0, %v17898_v1 }
 0x43a   : > { %v7959_v54 = vpop.f32.mrb[124].mxu0 }
 0x43b   : > { %v16425_v59 = vpop.f32.mrb[125].mxu0 }
 0x43c   : > { %v7962_v61 = vpop.f32.mrb[126].mxu0  ;;  %v8505_v59 = vshll.u32 %v17701_v33, 16 }
 0x43d   : > { %16544 = vmatmul.mubr.bf16.gmra.mrb[224].mxu1 %v8473_v57  ;;  %v16426_v10 = vpop.f32.mrb[127].mxu0  ;;  %v17704_v57 = vld [vmem:[#allocation3 + $0x58] sm:$0xff]  }
 0x43e   : > { %16547 = vmatprep.mubr.msk.bf16.mxu1 %vm17899_vm0, %v17898_v1  ;;  %v8511_v5 = vshrl.u32 %v17704_v57, 16  ;;  %v8514_v19 = vshll.u32 %v17704_v57, 16 }
 0x43f   : > { %v7444_v53 = vpop.f32.mrb[120].mxu1 }
 0x440   : > { %v8166_v6 = vadd.f32 %v7959_v54, %v7444_v53  ;;  %v16325_v3 = vpop.f32.mrb[121].mxu1  ;;  %16648 = vmatmul.mubr.bf16.gmra.mrb[232].mxu0 %v9226_v36  ;;  %v9258_v53 = vshll.u32 %v17703_v50, 16  ;;  %v8507_v36 = vrot.slane %v8505_v59, 4  ;;  %v8516_v30 = vrot.slane %v8514_v19, 4 }
 0x441   : > { %v7447_v8 = vpop.f32.mrb[122].mxu1  ;;  %16651 = vmatprep.mubr.msk.bf16.mxu0 %vm17899_vm0, %v17898_v1  ;;  %v8504_v3 = vrot.slane %v8502_v52, 3 }
 0x442   : > { %8207 = vst [vmem:[#allocation2] sm:$0xff] %v8166_v6  ;;  %v8167_v13 = vadd.f32 %v7962_v61, %v7447_v8  ;;  %v16326_v31 = vpop.f32.mrb[123].mxu1  ;;  %v7967_v14 = vpop.f32.mrb[128].mxu0  ;;  %v8500_v6 = vsel %vm1704_vm3, %v8490_v28, %v8499_v56  ;;  %v8513_v28 = vrot.slane %v8511_v5, 3 }
 0x443   : > { %v16429_v7 = vpop.f32.mrb[129].mxu0  ;;  %v9260_v31 = vrot.slane %v9258_v53, 4  ;;  %v8508_v15 = vor.u32 %v8507_v36, %v8504_v3 }
 0x444   : > { %8208 = vst [vmem:[#allocation2 + $0x8] sm:$0xff] %v8167_v13  ;;  %v7970_v25 = vpop.f32.mrb[130].mxu0  ;;  %v9257_v13 = vrot.slane %v9255_v2, 3  ;;  %v8517_v39 = vor.u32 %v8516_v30, %v8513_v28 }
 0x445   : > { %16548 = vmatmul.mubr.bf16.gmra.mrb[228].mxu1 %v8482_v21  ;;  %v16430_v22 = vpop.f32.mrb[131].mxu0  ;;  %v9264_v21 = vshrl.u32 %v17705_v9, 16 }
 0x446   : > { %16551 = vmatprep.mubr.msk.bf16.mxu1 %vm17899_vm0, %v17898_v1  ;;  %v9261_v26 = vor.u32 %v9260_v31, %v9257_v13  ;;  %v8518_v48 = vsel %vm1704_vm3, %v8508_v15, %v8517_v39 }
 0x447   : > { %v7452_v29 = vpop.f32.mrb[124].mxu1 }
 0x448   : > { %16652 = vmatmul.mubr.bf16.gmra.mrb[236].mxu0 %v9235_v18  ;;  %v8168_v35 = vadd.f32 %v7967_v14, %v7452_v29  ;;  %v16329_v37 = vpop.f32.mrb[125].mxu1  ;;  %v8509_v29 = vsel %vm1704_vm3, %v8499_v56, %v8508_v15  ;;  %v17710_v56 = vld [vmem:[#allocation3 + $0x68] sm:$0xff]   ;;  %v17712_v15 = vld [vmem:[#allocation3 + $0x70] sm:$0xff]  }
 0x449   : > { %16655 = vmatprep.mubr.msk.bf16.mxu0 %vm17899_vm0, %v17898_v1  ;;  %v7455_v0 = vpop.f32.mrb[126].mxu1  ;;  %v9262_v37 = vsel %vm1704_vm3, %v9252_v63, %v9261_v26  ;;  %v8529_v63 = vshrl.u32 %v17710_v56, 16  ;;  %v8532_v2 = vshll.u32 %v17710_v56, 16 }
 0x44a   : > { %8209 = vst [vmem:[#allocation2 + $0x10] sm:$0xff] %v8168_v35  ;;  %v8169_v38 = vadd.f32 %v7970_v25, %v7455_v0  ;;  %v16330_v58 = vpop.f32.mrb[127].mxu1  ;;  %v7975_v23 = vpop.f32.mrb[132].mxu0  ;;  %v17707_v25 = vld [vmem:[#allocation3 + $0x60] sm:$0xff]   ;;  %v9266_v0 = vrot.slane %v9264_v21, 3 }
 0x44b   : > { %v16433_v43 = vpop.f32.mrb[133].mxu0  ;;  %v17708_v58 = vld [vmem:[#allocation3 + $0x70] sm:$0xff]   ;;  %v8523_v40 = vshll.u32 %v17707_v25, 16  ;;  %v8531_v5 = vrot.slane %v8529_v63, 3  ;;  %v17718_v63 = vld [vmem:[#allocation3 + $0x80] sm:$0xff]  }
 0x44c   : > { %8210 = vst [vmem:[#allocation2 + $0x18] sm:$0xff] %v8169_v38  ;;  %v7978_v42 = vpop.f32.mrb[134].mxu0  ;;  %v8520_v38 = vshrl.u32 %v17707_v25, 16  ;;  %v9273_v47 = vshrl.u32 %v17708_v58, 16  ;;  %v9276_v50 = vshll.u32 %v17708_v58, 16 }
 0x44d   : > { %16552 = vmatmul.mubr.bf16.gmra.mrb[232].mxu1 %v8491_v44  ;;  %v16434_v49 = vpop.f32.mrb[135].mxu0 }
 0x44e   : > { %16555 = vmatprep.mubr.msk.bf16.mxu1 %vm17899_vm0, %v17898_v1  ;;  %v9270_v49 = vor.u32 %v9269_v34, %v9266_v0  ;;  %v8522_v52 = vrot.slane %v8520_v38, 3  ;;  %v9278_v57 = vrot.slane %v9276_v50, 4  ;;  %v9294_v0 = vshll.u32 %v17714_v11, 16 }
 0x44f   : > { %v7460_v54 = vpop.f32.mrb[128].mxu1 }
 0x450   : > { %16656 = vmatmul.mubr.bf16.gmra.mrb[240].mxu0 %v9244_v51  ;;  %v8170_v55 = vadd.f32 %v7975_v23, %v7460_v54  ;;  %v16333_v46 = vpop.f32.mrb[129].mxu1  ;;  %v8525_v54 = vrot.slane %v8523_v40, 4 }
 0x451   : > { %16659 = vmatprep.mubr.msk.bf16.mxu0 %vm17899_vm0, %v17898_v1  ;;  %v7463_v60 = vpop.f32.mrb[130].mxu1  ;;  %v9271_v46 = vsel %vm1704_vm3, %v9261_v26, %v9270_v49 }
 0x452   : > { %8211 = vst [vmem:[#allocation2 + $0x20] sm:$0xff] %v8170_v55  ;;  %v8171_v61 = vadd.f32 %v7978_v42, %v7463_v60  ;;  %v16334_v62 = vpop.f32.mrb[131].mxu1  ;;  %v7983_v10 = vpop.f32.mrb[136].mxu0  ;;  %v9275_v60 = vrot.slane %v9273_v47, 3 }
 0x453   : > { %v16437_v4 = vpop.f32.mrb[137].mxu0 }
 0x454   : > { %8212 = vst [vmem:[#allocation2 + $0x28] sm:$0xff] %v8171_v61  ;;  %v7986_v16 = vpop.f32.mrb[138].mxu0  ;;  %v17711_v61 = vld [vmem:[#allocation3 + $0x78] sm:$0xff]  }
 0x455   : > { %16556 = vmatmul.mubr.bf16.gmra.mrb[236].mxu1 %v8500_v6  ;;  %v16438_v8 = vpop.f32.mrb[139].mxu0  ;;  %v9282_v9 = vshrl.u32 %v17711_v61, 16 }
 0x456   : > { %16559 = vmatprep.mubr.msk.bf16.mxu1 %vm17899_vm0, %v17898_v1  ;;  %v9279_v8 = vor.u32 %v9278_v57, %v9275_v60 }
 0x457   : > { %v7468_v14 = vpop.f32.mrb[132].mxu1 }
 0x458   : > { %16660 = vmatmul.mubr.bf16.gmra.mrb[244].mxu0 %v9253_v12  ;;  %v8172_v17 = vadd.f32 %v7983_v10, %v7468_v14  ;;  %v16337_v20 = vpop.f32.mrb[133].mxu1  ;;  %v8526_v10 = vor.u32 %v8525_v54, %v8522_v52  ;;  %v9285_v12 = vshll.u32 %v17711_v61, 16  ;;  %v8534_v14 = vrot.slane %v8532_v2, 4 }
 0x459   : > { %16663 = vmatprep.mubr.msk.bf16.mxu0 %vm17899_vm0, %v17898_v1  ;;  %v7471_v7 = vpop.f32.mrb[134].mxu1  ;;  %v9280_v20 = vsel %vm1704_vm3, %v9270_v49, %v9279_v8 }
 0x45a   : > { %8213 = vst [vmem:[#allocation2 + $0x30] sm:$0xff] %v8172_v17  ;;  %v8173_v22 = vadd.f32 %v7986_v16, %v7471_v7  ;;  %v16338_v24 = vpop.f32.mrb[135].mxu1  ;;  %v7991_v18 = vpop.f32.mrb[140].mxu0  ;;  %v8527_v31 = vsel %vm1704_vm3, %v8517_v39, %v8526_v10  ;;  %v9284_v7 = vrot.slane %v9282_v9, 3  ;;  %v9287_v21 = vrot.slane %v9285_v12, 4  ;;  %v17715_v39 = vld [vmem:[#allocation3 + $0x78] sm:$0xff]  }
 0x45b   : > { %v16441_v27 = vpop.f32.mrb[141].mxu0  ;;  %v8538_v24 = vshrl.u32 %v17712_v15, 16  ;;  %v8547_v47 = vshrl.u32 %v17715_v39, 16  ;;  %v8550_v50 = vshll.u32 %v17715_v39, 16  ;;  %v8556_v9 = vshrl.u32 %v17718_v63, 16 }
 0x45c   : > { %8214 = vst [vmem:[#allocation2 + $0x38] sm:$0xff] %v8173_v22  ;;  %v7994_v32 = vpop.f32.mrb[142].mxu0  ;;  %v8535_v22 = vor.u32 %v8534_v14, %v8531_v5  ;;  %v8559_v12 = vshll.u32 %v17718_v63, 16 }
 0x45d   : > { %16560 = vmatmul.mubr.bf16.gmra.mrb[240].mxu1 %v8509_v29  ;;  %v16442_v35 = vpop.f32.mrb[143].mxu0  ;;  %v8540_v58 = vrot.slane %v8538_v24, 3  ;;  %v17721_v24 = vld [vmem:[#allocation3 + $0x88] sm:$0xff]  }
 0x45e   : > { %16563 = vmatprep.mubr.msk.bf16.mxu1 %vm17899_vm0, %v17898_v1  ;;  %v9288_v35 = vor.u32 %v9287_v21, %v9284_v7  ;;  %v8536_v38 = vsel %vm1704_vm3, %v8526_v10, %v8535_v22  ;;  %v8552_v10 = vrot.slane %v8550_v50, 4 }
 0x45f   : > { %v7476_v23 = vpop.f32.mrb[136].mxu1 }
 0x460   : > { %16664 = vmatmul.mubr.bf16.gmra.mrb[248].mxu0 %v9262_v37  ;;  %v8174_v33 = vadd.f32 %v7991_v18, %v7476_v23  ;;  %v16341_v43 = vpop.f32.mrb[137].mxu1  ;;  %v8541_v18 = vshll.u32 %v17712_v15, 16  ;;  %v9291_v37 = vshrl.u32 %v17714_v11, 16 }
 0x461   : > { %16667 = vmatprep.mubr.msk.bf16.mxu0 %vm17899_vm0, %v17898_v1  ;;  %v7479_v44 = vpop.f32.mrb[138].mxu1  ;;  %v9289_v43 = vsel %vm1704_vm3, %v9279_v8, %v9288_v35 }
 0x462   : > { %8215 = vst [vmem:[#allocation2 + $0x40] sm:$0xff] %v8174_v33  ;;  %v8175_v41 = vadd.f32 %v7994_v32, %v7479_v44  ;;  %v16342_v45 = vpop.f32.mrb[139].mxu1  ;;  %v7999_v42 = vpop.f32.mrb[144].mxu0  ;;  %v8543_v23 = vrot.slane %v8541_v18, 4  ;;  %v9293_v44 = vrot.slane %v9291_v37, 3  ;;  %v8565_v37 = vshrl.u32 %v17721_v24, 16 }
 0x463   : > { %v16445_v51 = vpop.f32.mrb[145].mxu0  ;;  %v17716_v45 = vld [vmem:[#allocation3 + $0x88] sm:$0xff]  }
 0x464   : > { %8216 = vst [vmem:[#allocation2 + $0x48] sm:$0xff] %v8175_v41  ;;  %v8002_v59 = vpop.f32.mrb[146].mxu0  ;;  %v9296_v41 = vrot.slane %v9294_v0, 4  ;;  %v8544_v49 = vor.u32 %v8543_v23, %v8540_v58  ;;  %v9303_v60 = vshll.u32 %v17716_v45, 16  ;;  %v8568_v0 = vshll.u32 %v17721_v24, 16 }
 0x465   : > { %16564 = vmatmul.mubr.bf16.gmra.mrb[244].mxu1 %v8518_v48  ;;  %v16446_v55 = vpop.f32.mrb[147].mxu0 }
 0x466   : > { %16567 = vmatprep.mubr.msk.bf16.mxu1 %vm17899_vm0, %v17898_v1  ;;  %v9297_v55 = vor.u32 %v9296_v41, %v9293_v44  ;;  %v8545_v61 = vsel %vm1704_vm3, %v8535_v22, %v8544_v49  ;;  %v8561_v22 = vrot.slane %v8559_v12, 4 }
 0x467   : > { %v7484_v62 = vpop.f32.mrb[140].mxu1 }
 0x468   : > { %16668 = vmatmul.mubr.bf16.gmra.mrb[252].mxu0 %v9271_v46  ;;  %v8176_v53 = vadd.f32 %v7999_v42, %v7484_v62  ;;  %v16345_v4 = vpop.f32.mrb[141].mxu1  ;;  %v9300_v46 = vshrl.u32 %v17716_v45, 16  ;;  %v8549_v62 = vrot.slane %v8547_v47, 3  ;;  %v17723_v47 = vld [vmem:[#allocation3 + $0x90] sm:$0xff]  }
 0x469   : > { %16671 = vmatprep.mubr.msk.bf16.mxu0 %vm17899_vm0, %v17898_v1  ;;  %v7487_v6 = vpop.f32.mrb[142].mxu1  ;;  %v9298_v4 = vsel %vm1704_vm3, %v9288_v35, %v9297_v55 }
 0x46a   : > { %8217 = vst [vmem:[#allocation2 + $0x50] sm:$0xff] %v8176_v53  ;;  %v8177_v3 = vadd.f32 %v8002_v59, %v7487_v6  ;;  %v16346_v36 = vpop.f32.mrb[143].mxu1  ;;  %v8007_v16 = vpop.f32.mrb[148].mxu0  ;;  %v9302_v6 = vrot.slane %v9300_v46, 3  ;;  %v8553_v8 = vor.u32 %v8552_v10, %v8549_v62  ;;  %v8574_v46 = vshrl.u32 %v17723_v47, 16 }
 0x46b   : > { %v16449_v13 = vpop.f32.mrb[149].mxu0  ;;  %v17719_v36 = vld [vmem:[#allocation3 + $0x90] sm:$0xff]  }
 0x46c   : > { %8218 = vst [vmem:[#allocation2 + $0x58] sm:$0xff] %v8177_v3  ;;  %v8010_v19 = vpop.f32.mrb[150].mxu0  ;;  %v9305_v3 = vrot.slane %v9303_v60, 4  ;;  %v9312_v7 = vshll.u32 %v17719_v36, 16  ;;  %v8554_v11 = vsel %vm1704_vm3, %v8544_v49, %v8553_v8  ;;  %v8570_v49 = vrot.slane %v8568_v0, 4 }
 0x46d   : > { %16568 = vmatmul.mubr.bf16.gmra.mrb[248].mxu1 %v8527_v31  ;;  %v16450_v17 = vpop.f32.mrb[151].mxu0  ;;  %v8577_v60 = vshll.u32 %v17723_v47, 16 }
 0x46e   : > { %16571 = vmatprep.mubr.msk.bf16.mxu1 %vm17899_vm0, %v17898_v1  ;;  %v9306_v17 = vor.u32 %v9305_v3, %v9302_v6 }
 0x46f   : > { %v7492_v25 = vpop.f32.mrb[144].mxu1 }
 0x470   : > { %16672 = vmatmul.mubr.bf16.gmra.mrb[0].mxu0 %v9280_v20  ;;  %v8178_v26 = vadd.f32 %v8007_v16, %v7492_v25  ;;  %v16349_v27 = vpop.f32.mrb[145].mxu1  ;;  %v9309_v20 = vshrl.u32 %v17719_v36, 16  ;;  %v8558_v25 = vrot.slane %v8556_v9, 3  ;;  %v17726_v9 = vld [vmem:[#allocation3 + $0x98] sm:$0xff]  }
 0x471   : > { %16675 = vmatprep.mubr.msk.bf16.mxu0 %vm17899_vm0, %v17898_v1  ;;  %v7495_v29 = vpop.f32.mrb[146].mxu1  ;;  %v9307_v27 = vsel %vm1704_vm3, %v9297_v55, %v9306_v17 }
 0x472   : > { %8219 = vst [vmem:[#allocation2 + $0x60] sm:$0xff] %v8178_v26  ;;  %v8179_v28 = vadd.f32 %v8010_v19, %v7495_v29  ;;  %v16350_v30 = vpop.f32.mrb[147].mxu1  ;;  %v8015_v32 = vpop.f32.mrb[152].mxu0  ;;  %v9311_v29 = vrot.slane %v9309_v20, 3  ;;  %v8562_v35 = vor.u32 %v8561_v22, %v8558_v25  ;;  %v8583_v20 = vshrl.u32 %v17726_v9, 16 }
 0x473   : > { %v16453_v34 = vpop.f32.mrb[153].mxu0  ;;  %v17722_v30 = vld [vmem:[#allocation3 + $0x98] sm:$0xff]  }
 0x474   : > { %8220 = vst [vmem:[#allocation2 + $0x68] sm:$0xff] %v8179_v28  ;;  %v8018_v40 = vpop.f32.mrb[154].mxu0  ;;  %v9314_v28 = vrot.slane %v9312_v7, 4  ;;  %v9321_v44 = vshll.u32 %v17722_v30, 16  ;;  %v8563_v45 = vsel %vm1704_vm3, %v8553_v8, %v8562_v35  ;;  %v8579_v8 = vrot.slane %v8577_v60, 4 }
 0x475   : > { %16572 = vmatmul.mubr.bf16.gmra.mrb[252].mxu1 %v8536_v38  ;;  %v16454_v33 = vpop.f32.mrb[155].mxu0  ;;  %v8586_v7 = vshll.u32 %v17726_v9, 16 }
 0x476   : > { %16575 = vmatprep.mubr.msk.bf16.mxu1 %vm17899_vm0, %v17898_v1  ;;  %v9315_v33 = vor.u32 %v9314_v28, %v9311_v29 }
 0x477   : > { %v7500_v42 = vpop.f32.mrb[148].mxu1 }
 0x478   : > { %16676 = vmatmul.mubr.bf16.gmra.mrb[4].mxu0 %v9289_v43  ;;  %v8180_v51 = vadd.f32 %v8015_v32, %v7500_v42  ;;  %v16353_v48 = vpop.f32.mrb[149].mxu1  ;;  %v9318_v43 = vshrl.u32 %v17722_v30, 16  ;;  %v8567_v42 = vrot.slane %v8565_v37, 3  ;;  %v17729_v37 = vld [vmem:[#allocation3 + $0xa0] sm:$0x3f]  }
 0x479   : > { %16679 = vmatprep.mubr.msk.bf16.mxu0 %vm17899_vm0, %v17898_v1  ;;  %v7503_v52 = vpop.f32.mrb[150].mxu1  ;;  %v9316_v48 = vsel %vm1704_vm3, %v9306_v17, %v9315_v33 }
 0x47a   : > { %8221 = vst [vmem:[#allocation2 + $0x70] sm:$0xff] %v8180_v51  ;;  %v8181_v54 = vadd.f32 %v8018_v40, %v7503_v52  ;;  %v16354_v56 = vpop.f32.mrb[151].mxu1  ;;  %v8023_v59 = vpop.f32.mrb[156].mxu0  ;;  %v9320_v52 = vrot.slane %v9318_v43, 3  ;;  %v8571_v55 = vor.u32 %v8570_v49, %v8567_v42  ;;  %v8595_v43 = vshll.u32 %v17729_v37, 16 }
 0x47b   : > { %v16457_v57 = vpop.f32.mrb[157].mxu0  ;;  %v17725_v56 = vld [vmem:[#allocation3 + $0xa0] sm:$0xff]  }
 0x47c   : > { %8222 = vst [vmem:[#allocation2 + $0x78] sm:$0xff] %v8181_v54  ;;  %v8026_v2 = vpop.f32.mrb[158].mxu0  ;;  %v9323_v54 = vrot.slane %v9321_v44, 4  ;;  %v9330_v6 = vshll.u32 %v17725_v56, 16  ;;  %v8572_v36 = vsel %vm1704_vm3, %v8562_v35, %v8571_v55  ;;  %v8588_v35 = vrot.slane %v8586_v7, 4 }
 0x47d   : > { %16576 = vmatmul.mubr.bf16.gmra.mrb[0].mxu1 %v8545_v61  ;;  %v16458_v53 = vpop.f32.mrb[159].mxu0 }
 0x47e   : > { %16579 = vmatprep.mubr.msk.bf16.mxu1 %vm17899_vm0, %v17898_v1  ;;  %v9324_v53 = vor.u32 %v9323_v54, %v9320_v52  ;;  %v8597_v54 = vrot.slane %v8595_v43, 4 }
 0x47f   : > { %v7508_v16 = vpop.f32.mrb[152].mxu1 }
 0x480   : > { %16680 = vmatmul.mubr.bf16.gmra.mrb[8].mxu0 %v9298_v4  ;;  %v8182_v13 = vadd.f32 %v8023_v59, %v7508_v16  ;;  %v16357_v31 = vpop.f32.mrb[153].mxu1  ;;  %v9327_v4 = vshrl.u32 %v17725_v56, 16  ;;  %v8576_v16 = vrot.slane %v8574_v46, 3 }
 0x481   : > { %16683 = vmatprep.mubr.msk.bf16.mxu0 %vm17899_vm0, %v17898_v1  ;;  %v7511_v5 = vpop.f32.mrb[154].mxu1  ;;  %v9325_v31 = vsel %vm1704_vm3, %v9315_v33, %v9324_v53  ;;  %v8592_v33 = vshrl.u32 %v17729_v37, 16  ;;  %v17734_v37 = vld [vmem:[%s20938_s3 + $0x180] sm:$0xff]  }
 0x482   : > { %8223 = vst [vmem:[#allocation2 + $0x80] sm:$0xff] %v8182_v13  ;;  %v8183_v14 = vadd.f32 %v8026_v2, %v7511_v5  ;;  %v16358_v15 = vpop.f32.mrb[155].mxu1  ;;  %v8031_v19 = vpop.f32.mrb[160].mxu0  ;;  %v9329_v5 = vrot.slane %v9327_v4, 3  ;;  %v8580_v17 = vor.u32 %v8579_v8, %v8576_v16  ;;  %v17732_v4 = vld [vmem:[#allocation3 + $0x14] sm:$0xff]  }
 0x483   : > { %v16461_v21 = vpop.f32.mrb[161].mxu0  ;;  %v17727_v15 = vld [vmem:[#allocation3 + $0xa8] sm:$0x3f]   ;;  %v8594_v52 = vrot.slane %v8592_v33, 3  ;;  %v10458_v9 = vshll.u32 %v17732_v4, 16 }
 0x484   : > { %8224 = vst [vmem:[#allocation2 + $0x88] sm:$0xff] %v8183_v14  ;;  %v8034_v18 = vpop.f32.mrb[162].mxu0  ;;  %v9332_v14 = vrot.slane %v9330_v6, 4  ;;  %v9339_v29 = vshll.u32 %v17727_v15, 16  ;;  %v8581_v30 = vsel %vm1704_vm3, %v8571_v55, %v8580_v17 }
 0x485   : > { %16580 = vmatmul.mubr.bf16.gmra.mrb[4].mxu1 %v8554_v11  ;;  %v16462_v26 = vpop.f32.mrb[163].mxu0  ;;  %v8598_v60 = vor.u32 %v8597_v54, %v8594_v52  ;;  %v10460_v7 = vrot.slane %v10458_v9, 1  ;;  %v17759_v52 = vld [vmem:[%s20938_s3 + $0x1d8] sm:$0xff]  }
 0x486   : > { %16583 = vmatprep.mubr.msk.bf16.mxu1 %vm17899_vm0, %v17898_v1  ;;  %v9333_v26 = vor.u32 %v9332_v14, %v9329_v5 }
 0x487   : > { %v7516_v32 = vpop.f32.mrb[156].mxu1 }
 0x488   : > { %16684 = vmatmul.mubr.bf16.gmra.mrb[12].mxu0 %v9307_v27  ;;  %v8184_v34 = vadd.f32 %v8031_v19, %v7516_v32  ;;  %v16361_v38 = vpop.f32.mrb[157].mxu1  ;;  %v9336_v27 = vshrl.u32 %v17727_v15, 16  ;;  %v8585_v32 = vrot.slane %v8583_v20, 3 }
 0x489   : > { %16687 = vmatprep.mubr.msk.bf16.mxu0 %vm17899_vm0, %v17898_v1  ;;  %v7519_v58 = vpop.f32.mrb[158].mxu1  ;;  %v9334_v38 = vsel %vm1704_vm3, %v9324_v53, %v9333_v26 }
 0x48a   : > { %8225 = vst [vmem:[#allocation2 + $0x90] sm:$0xff] %v8184_v34  ;;  %v8185_v23 = vadd.f32 %v8034_v18, %v7519_v58  ;;  %v16362_v39 = vpop.f32.mrb[159].mxu1  ;;  %v8039_v40 = vpop.f32.mrb[164].mxu0  ;;  %v9338_v58 = vrot.slane %v9336_v27, 3 }
 0x48b   : > { %v16465_v41 = vpop.f32.mrb[165].mxu0 }
 0x48c   : > { %8226 = vst [vmem:[#allocation2 + $0x98] sm:$0xff] %v8185_v23  ;;  %v8042_v50 = vpop.f32.mrb[166].mxu0  ;;  %v9341_v23 = vrot.slane %v9339_v29, 4 }
 0x48d   : > { %16584 = vmatmul.mubr.bf16.gmra.mrb[8].mxu1 %v8563_v45  ;;  %v16466_v51 = vpop.f32.mrb[167].mxu0 }
 0x48e   : > { %16587 = vmatprep.mubr.msk.bf16.mxu1 %vm17899_vm0, %v17898_v1 }
 0x48f   : > { %v7524_v59 = vpop.f32.mrb[160].mxu1 }
 0x490   : > { %16688 = vmatmul.mubr.bf16.gmra.mrb[16].mxu0 %v9316_v48  ;;  %v8186_v57 = vadd.f32 %v8039_v40, %v7524_v59  ;;  %v16365_v61 = vpop.f32.mrb[161].mxu1  ;;  %v8589_v40 = vor.u32 %v8588_v35, %v8585_v32  ;;  %v17745_v32 = vld [vmem:[%s20938_s3 + $0x1c8] sm:$0xff]  }
 0x491   : > { %16691 = vmatprep.mubr.msk.bf16.mxu0 %vm17899_vm0, %v17898_v1  ;;  %v7527_v62 = vpop.f32.mrb[162].mxu1 }
 0x492   : > { %8227 = vst [vmem:[#allocation2 + $0xa0] sm:$0xff] %v8186_v57  ;;  %v8187_v10 = vadd.f32 %v8042_v50, %v7527_v62  ;;  %v16366_v63 = vpop.f32.mrb[163].mxu1  ;;  %v8047_v2 = vpop.f32.mrb[168].mxu0  ;;  %v9342_v50 = vor.u32 %v9341_v23, %v9338_v58  ;;  %v8590_v48 = vsel %vm1704_vm3, %v8580_v17, %v8589_v40  ;;  %v17731_v62 = vld [vmem:[#allocation3 + $0xc] sm:$0xff]   ;;  %v10462_v23 = vshrl.u32 %v17732_v4, 16 }
 0x493   : > { %v16469_v3 = vpop.f32.mrb[169].mxu0  ;;  %v10453_v16 = vshll.u32 %v17731_v62, 16  ;;  %v10451_v20 = vshrl.u32 %v17731_v62, 16  ;;  %v17733_v58 = vld [vmem:[#allocation3 + $0xc] sm:$0xff]  }
 0x494   : > { %8228 = vst [vmem:[#allocation2 + $0xa8] sm:$0xff] %v8187_v10  ;;  %v8050_v12 = vpop.f32.mrb[170].mxu0  ;;  %v9343_v55 = vsel %vm1704_vm3, %v9333_v26, %v9342_v50  ;;  %v8599_v3 = vsel %vm1704_vm3, %v8589_v40, %v8598_v60  ;;  %v19922_v40 = vld [vmem:[#allocation3 + $0x24] sm:$0xff]   ;;  %v19946_v62 = vld [vmem:[#allocation3 + $0x2c] sm:$0xff]  }
 0x495   : > { %16588 = vmatmul.mubr.bf16.gmra.mrb[12].mxu1 %v8572_v36  ;;  %v16470_v13 = vpop.f32.mrb[171].mxu0  ;;  %v10455_v5 = vrot.slane %v10453_v16, 1 }
 0x496   : > { %16591 = vmatprep.mubr.msk.bf16.mxu1 %vm17899_vm0, %v17898_v1 }
 0x497   : > { %v7532_v19 = vpop.f32.mrb[164].mxu1 }
 0x498   : > { %16692 = vmatmul.mubr.bf16.gmra.mrb[20].mxu0 %v9325_v31  ;;  %v8188_v21 = vadd.f32 %v8047_v2, %v7532_v19  ;;  %v16369_v11 = vpop.f32.mrb[165].mxu1 }
 0x499   : > { %16695 = vmatprep.mubr.msk.bf16.mxu0 %vm17899_vm0, %v17898_v1  ;;  %v7535_v25 = vpop.f32.mrb[166].mxu1 }
 0x49a   : > { %8229 = vst [vmem:[#allocation2 + $0xb0] sm:$0xff] %v8188_v21  ;;  %v8189_v22 = vadd.f32 %v8050_v12, %v7535_v25  ;;  %v16370_v24 = vpop.f32.mrb[167].mxu1  ;;  %v8055_v18 = vpop.f32.mrb[172].mxu0  ;;  %v19904_v21 = vld [vmem:[#allocation3 + $0x1c] sm:$0xff]  }
 0x49b   : > { %v16473_v28 = vpop.f32.mrb[173].mxu0  ;;  %v17737_v24 = vld [vmem:[%s20938_s3 + $0x1c0] sm:$0xff]   ;;  %v10466_v27 = vshll.u32 %v19904_v21, 16 }
 0x49c   : > { %8230 = vst [vmem:[#allocation2 + $0xb8] sm:$0xff] %v8189_v22  ;;  %v8058_v0 = vpop.f32.mrb[174].mxu0  ;;  %v10456_v22 = vor.u32 %v10455_v5, %v10451_v20 }
 0x49d   : > { %16592 = vmatmul.mubr.bf16.gmra.mrb[16].mxu1 %v8581_v30  ;;  %v16474_v34 = vpop.f32.mrb[175].mxu0 }
 0x49e   : > { %16595 = vmatprep.mubr.msk.bf16.mxu1 %vm17899_vm0, %v17898_v1  ;;  %v10461_v26 = vsel %vm3743_vm4, %v10456_v22, %v10460_v7  ;;  %v17781_v22 = vld [vmem:[%s20938_s3 + $0x1f0] sm:$0xff]  }
 0x49f   : > { %v7540_v39 = vpop.f32.mrb[168].mxu1 }
 0x4a0   : > { %16696 = vmatmul.mubr.bf16.gmra.mrb[24].mxu0 %v9334_v38  ;;  %v8190_v44 = vadd.f32 %v8055_v18, %v7540_v39  ;;  %v16373_v41 = vpop.f32.mrb[169].mxu1  ;;  %v10468_v39 = vrot.slane %v10466_v27, 1 }
 0x4a1   : > { %16699 = vmatprep.mubr.msk.bf16.mxu0 %vm17899_vm0, %v17898_v1  ;;  %v7543_v45 = vpop.f32.mrb[170].mxu1  ;;  %v17752_v41 = vld [vmem:[%s20938_s3 + $0x1d0] sm:$0xff]  }
 0x4a2   : > { %8231 = vst [vmem:[#allocation2 + $0xc0] sm:$0xff] %v8190_v44  ;;  %v8191_v42 = vadd.f32 %v8058_v0, %v7543_v45  ;;  %v16374_v49 = vpop.f32.mrb[171].mxu1  ;;  %v8063_v47 = vpop.f32.mrb[176].mxu0  ;;  %v10464_v44 = vor.u32 %v10462_v23, %v10460_v7  ;;  %v19971_v7 = vld [vmem:[#allocation3 + $0x34] sm:$0xff]  }
 0x4a3   : > { %v16477_v51 = vpop.f32.mrb[177].mxu0  ;;  %v10490_v27 = vshll.u32 %v19971_v7, 16 }
 0x4a4   : > { %8232 = vst [vmem:[#allocation2 + $0xc8] sm:$0xff] %v8191_v42  ;;  %v8066_v56 = vpop.f32.mrb[178].mxu0  ;;  %v17741_v42 = vld [vmem:[%s20938_s3 + $0x188] sm:$0xff]   ;;  %v10469_v49 = vsel %vm3743_vm4, %v10464_v44, %v10468_v39 }
 0x4a5   : > { %16596 = vmatmul.mubr.bf16.gmra.mrb[20].mxu1 %v8590_v48  ;;  %v16478_v59 = vpop.f32.mrb[179].mxu0  ;;  %v10492_v23 = vrot.slane %v10490_v27, 1 }
 0x4a6   : > { %16599 = vmatprep.mubr.msk.bf16.mxu1 %vm17899_vm0, %v17898_v1 }
 0x4a7   : > { %v7548_v46 = vpop.f32.mrb[172].mxu1 }
 0x4a8   : > { %16700 = vmatmul.mubr.bf16.gmra.mrb[28].mxu0 %v9343_v55  ;;  %v8192_v57 = vadd.f32 %v8063_v47, %v7548_v46  ;;  %v16377_v61 = vpop.f32.mrb[173].mxu1  ;;  %v10474_v47 = vshll.u32 %v19922_v40, 16 }
 0x4a9   : > { %16703 = vmatprep.mubr.msk.bf16.mxu0 %vm17899_vm0, %v17898_v1  ;;  %v7551_v10 = vpop.f32.mrb[174].mxu1 }
 0x4aa   : > { %8233 = vst [vmem:[#allocation2 + $0xd0] sm:$0xff] %v8192_v57  ;;  %v8193_v63 = vadd.f32 %v8066_v56, %v7551_v10  ;;  %v16378_v2 = vpop.f32.mrb[175].mxu1  ;;  %v8071_v53 = vpop.f32.mrb[180].mxu0  ;;  %v17748_v56 = vld [vmem:[%s20938_s3 + $0x190] sm:$0xff]   ;;  %v10470_v57 = vshrl.u32 %v19904_v21, 16  ;;  %v10476_v61 = vrot.slane %v10474_v47, 1 }
 0x4ab   : > { %v16481_v6 = vpop.f32.mrb[181].mxu0 }
 0x4ac   : > { %8234 = vst [vmem:[#allocation2 + $0xd8] sm:$0xff] %v8193_v63  ;;  %v8074_v36 = vpop.f32.mrb[182].mxu0  ;;  %v10472_v2 = vor.u32 %v10470_v57, %v10468_v39  ;;  %v17756_v6 = vld [vmem:[%s20938_s3 + $0x198] sm:$0xff]   ;;  %v17746_v39 = vld [vmem:[#allocation3 + $0x3c] sm:$0xff]  }
 0x4ad   : > { %16600 = vmatmul.mubr.bf16.gmra.mrb[24].mxu1 %v8599_v3  ;;  %v16482_v8 = vpop.f32.mrb[183].mxu0 }
 0x4ae   : > { %16603 = vmatprep.mubr.msk.bf16.mxu1 %vm17899_vm0, %v17898_v1  ;;  %v10477_v3 = vsel %vm3743_vm4, %v10472_v2, %v10476_v61 }
 0x4af   : > { %v7556_v12 = vpop.f32.mrb[176].mxu1 }
 0x4b0   : > { %16704 = vmatmul.mubr.bf16.gmra.mrb[32].mxu0 %v9342_v50  ;;  %v8194_v13 = vadd.f32 %v8071_v53, %v7556_v12  ;;  %v16381_v31 = vpop.f32.mrb[177].mxu1  ;;  %v17766_v53 = vld [vmem:[%s20938_s3 + $0x1e0] sm:$0xff]   ;;  %v17774_v12 = vld [vmem:[%s20938_s3 + $0x1e8] sm:$0xff]  }
 0x4b1   : > { %16823 = vmatprep.mubr.msk.bf16.mxu0 %vm17899_vm0, %v17898_v1  ;;  %v7559_v14 = vpop.f32.mrb[178].mxu1  ;;  %v17763_v31 = vld [vmem:[%s20938_s3 + $0x1a0] sm:$0xff]  }
 0x4b2   : > { %8235 = vst [vmem:[#allocation2 + $0xe0] sm:$0xff] %v8194_v13  ;;  %v8195_v15 = vadd.f32 %v8074_v36, %v7559_v14  ;;  %v16382_v19 = vpop.f32.mrb[179].mxu1  ;;  %v8079_v17 = vpop.f32.mrb[184].mxu0  ;;  %v10482_v36 = vshll.u32 %v19946_v62, 16 }
 0x4b3   : > { %v16485_v11 = vpop.f32.mrb[185].mxu0  ;;  %v17739_v19 = vld [vmem:[#allocation3 + $0x1c] sm:$0xff]  }
 0x4b4   : > { %8236 = vst [vmem:[#allocation2 + $0xe8] sm:$0xff] %v8195_v15  ;;  %v8082_v25 = vpop.f32.mrb[186].mxu0  ;;  %v10484_v20 = vrot.slane %v10482_v36, 1 }
 0x4b5   : > { %16604 = vmatmul.mubr.bf16.gmra.mrb[28].mxu1 %v8598_v60  ;;  %v16486_v18 = vpop.f32.mrb[187].mxu0  ;;  %v17736_v60 = vld [vmem:[#allocation3 + $0x14] sm:$0xff]  }
 0x4b6   : > { %16723 = vmatprep.mubr.msk.bf16.mxu1 %vm17899_vm0, %v17898_v1  ;;  %v17770_v18 = vld [vmem:[%s20938_s3 + $0x1a8] sm:$0xff]  }
 0x4b7   : > { %v7564_v29 = vpop.f32.mrb[180].mxu1 }
 0x4b8   : > { %16824 = vmatmul.mubr.bf16.vlgmr.msra.gmra.mrb[36].mxu0 %v10461_v26  ;;  %v8196_v28 = vadd.f32 %v8079_v17, %v7564_v29  ;;  %v16385_v30 = vpop.f32.mrb[181].mxu1  ;;  %v10478_v17 = vshrl.u32 %v19922_v40, 16 }
 0x4b9   : > { %16827 = vmatprep.mubr.msk.bf16.mxu0 %vm17899_vm0, %v17898_v1  ;;  %17008 = vmatpush3.bf16.msra.mxu0 %v17737_v24  ;;  %v7567_v35 = vpop.f32.mrb[182].mxu1 }
 0x4ba   : > { %17009 = vmatprep.subr.bf16.mxu0 %v17898_v1  ;;  %8237 = vst [vmem:[#allocation2 + $0xf0] sm:$0xff] %v8196_v28  ;;  %v8197_v0 = vadd.f32 %v8082_v25, %v7567_v35  ;;  %v16386_v34 = vpop.f32.mrb[183].mxu1  ;;  %v8087_v38 = vpop.f32.mrb[188].mxu0  ;;  %v10480_v25 = vor.u32 %v10478_v17, %v10476_v61  ;;  %v17777_v35 = vld [vmem:[%s20938_s3 + $0x1b0] sm:$0xff]  }
 0x4bb   : > { %v16489_v33 = vpop.f32.mrb[189].mxu0 }
 0x4bc   : > { %8238 = vst [vmem:[#allocation2 + $0xf8] sm:$0xff] %v8197_v0  ;;  %v8090_v43 = vpop.f32.mrb[190].mxu0  ;;  %v10485_v26 = vsel %vm3743_vm4, %v10480_v25, %v10484_v20 }
 0x4bd   : > { %16724 = vmatmul.mubr.bf16.vlgmr.msra.gmra.mrb[32].mxu1 %v17733_v58  ;;  %17010 = vmatpush3.bf16.msra.mxu0 %v17745_v32  ;;  %v16490_v45 = vpop.f32.mrb[191].mxu0  ;;  %v10486_v58 = vshrl.u32 %v19946_v62, 16  ;;  %v17787_v62 = vld [vmem:[%s20938_s3 + $0x1f8] sm:$0xff]  }
 0x4be   : > { %16908 = vmatpush3.bf16.msra.mxu1 %v17734_v37  ;;  %16727 = vmatprep.mubr.msk.bf16.mxu1 %vm17899_vm0, %v17898_v1 }
 0x4bf   : > { %16909 = vmatprep.subr.bf16.mxu1 %v17898_v1  ;;  %17011 = vmatprep.subr.bf16.mxu0 %v17898_v1  ;;  %v7572_v50 = vpop.f32.mrb[184].mxu1 }
 0x4c0   : > { %16828 = vmatmul.mubr.bf16.gmra.mrb[40].mxu0 %v10469_v49  ;;  %v8198_v51 = vadd.f32 %v8087_v38, %v7572_v50  ;;  %v16389_v48 = vpop.f32.mrb[185].mxu1  ;;  %v17742_v38 = vld [vmem:[#allocation3 + $0x24] sm:$0xff]  }
 0x4c1   : > { %16831 = vmatprep.mubr.msk.bf16.mxu0 %vm17899_vm0, %v17898_v1  ;;  %17012 = vmatpush3.bf16.msra.mxu0 %v17752_v41  ;;  %v7575_v54 = vpop.f32.mrb[186].mxu1  ;;  %v17785_v41 = vld [vmem:[%s20938_s3 + $0x1b8] sm:$0xff]  }
 0x4c2   : > { %16910 = vmatpush3.bf16.msra.mxu1 %v17741_v42  ;;  %17013 = vmatprep.subr.bf16.mxu0 %v17898_v1  ;;  %8239 = vst [vmem:[#allocation2 + $0x100] sm:$0xff] %v8198_v51  ;;  %v8199_v59 = vadd.f32 %v8090_v43, %v7575_v54  ;;  %v16390_v55 = vpop.f32.mrb[187].mxu1  ;;  %v8095_v46 = vpop.f32.mrb[192].mxu0  ;;  %v10488_v43 = vor.u32 %v10486_v58, %v10484_v20  ;;  %v10498_v42 = vshll.u32 %v17746_v39, 16 }
 0x4c3   : > { %16911 = vmatprep.subr.bf16.mxu1 %v17898_v1  ;;  %v16493_v10 = vpop.f32.mrb[193].mxu0 }
 0x4c4   : > { %8240 = vst [vmem:[#allocation2 + $0x108] sm:$0xff] %v8199_v59  ;;  %v8098_v63 = vpop.f32.mrb[194].mxu0  ;;  %v10493_v45 = vsel %vm3743_vm4, %v10488_v43, %v10492_v23  ;;  %v10494_v59 = vshrl.u32 %v19971_v7, 16  ;;  %v10500_v55 = vrot.slane %v10498_v42, 1  ;;  %v8869_v7 = vld [vmem:[#allocation2] sm:$0xff] }
 0x4c5   : > { %16728 = vmatmul.mubr.bf16.gmra.mrb[36].mxu1 %v17736_v60  ;;  %17014 = vmatpush3.bf16.msra.mxu0 %v17759_v52  ;;  %v16494_v4 = vpop.f32.mrb[195].mxu0 }
 0x4c6   : > { %16731 = vmatprep.mubr.msk.bf16.mxu1 %vm17899_vm0, %v17898_v1  ;;  %16912 = vmatpush3.bf16.msra.mxu1 %v17748_v56  ;;  %v17744_v56 = vld [vmem:[#allocation3 + $0x2c] sm:$0xff]   ;;  %v10496_v61 = vor.u32 %v10494_v59, %v10492_v23 }
 0x4c7   : > { %16913 = vmatprep.subr.bf16.mxu1 %v17898_v1  ;;  %17015 = vmatprep.subr.bf16.mxu0 %v17898_v1  ;;  %v7580_v16 = vpop.f32.mrb[188].mxu1 }
 0x4c8   : > { %16832 = vmatmul.mubr.bf16.gmra.mrb[44].mxu0 %v10477_v3  ;;  %v8200_v8 = vadd.f32 %v8095_v46, %v7580_v16  ;;  %v16393_v9 = vpop.f32.mrb[189].mxu1  ;;  %v17749_v46 = vld [vmem:[#allocation3 + $0x44] sm:$0xff]   ;;  %v17747_v16 = vld [vmem:[#allocation3 + $0x34] sm:$0xff]  }
 0x4c9   : > { %16835 = vmatprep.mubr.msk.bf16.mxu0 %vm17899_vm0, %v17898_v1  ;;  %17016 = vmatpush3.bf16.msra.mxu0 %v17766_v53  ;;  %v7583_v13 = vpop.f32.mrb[190].mxu1  ;;  %v10506_v2 = vshll.u32 %v17749_v46, 16 }
 0x4ca   : > { %16914 = vmatpush3.bf16.msra.mxu1 %v17756_v6  ;;  %17017 = vmatprep.subr.bf16.mxu0 %v17898_v1  ;;  %8241 = vst [vmem:[#allocation2 + $0x110] sm:$0xff] %v8200_v8  ;;  %v8201_v5 = vadd.f32 %v8098_v63, %v7583_v13  ;;  %v16394_v14 = vpop.f32.mrb[191].mxu1  ;;  %v10501_v63 = vsel %vm3743_vm4, %v10496_v61, %v10500_v55  ;;  %v10502_v8 = vshrl.u32 %v17746_v39, 16  ;;  %v8871_v39 = vld [vmem:[#allocation2 + $0x10] sm:$0xff] }
 0x4cb   : > { %v8103_v15 = vpop.f32.mrb[196].mxu0  ;;  %16915 = vmatprep.subr.bf16.mxu1 %v17898_v1  ;;  %v10508_v9 = vrot.slane %v10506_v2, 1 }
 0x4cc   : > { %v16497_v21 = vpop.f32.mrb[197].mxu0  ;;  %8242 = vst [vmem:[#allocation2 + $0x118] sm:$0xff] %v8201_v5  ;;  %v10504_v5 = vor.u32 %v10502_v8, %v10500_v55 }
 0x4cd   : > { %16732 = vmatmul.mubr.bf16.gmra.mrb[40].mxu1 %v17739_v19  ;;  %v8106_v11 = vpop.f32.mrb[198].mxu0  ;;  %17018 = vmatpush3.bf16.msra.mxu0 %v17774_v12  ;;  %v17751_v12 = vld [vmem:[#allocation3 + $0x4c] sm:$0xff]  }
 0x4ce   : > { %v16498_v24 = vpop.f32.mrb[199].mxu0  ;;  %16735 = vmatprep.mubr.msk.bf16.mxu1 %vm17899_vm0, %v17898_v1  ;;  %16916 = vmatpush3.bf16.msra.mxu1 %v17763_v31  ;;  %v10514_v19 = vshll.u32 %v17751_v12, 16 }
 0x4cf   : > { %16917 = vmatprep.subr.bf16.mxu1 %v17898_v1  ;;  %17019 = vmatprep.subr.bf16.mxu0 %v17898_v1  ;;  %v8870_v24 = vld [vmem:[#allocation2 + $0x8] sm:$0xff] }
 0x4d0   : > { %v7588_v29 = vpop.f32.mrb[192].mxu1  ;;  %16836 = vmatmul.mubr.bf16.gmra.mrb[48].mxu0 %v10485_v26 }
 0x4d1   : > { %v8202_v28 = vadd.f32 %v8103_v15, %v7588_v29  ;;  %v16397_v30 = vpop.f32.mrb[193].mxu1  ;;  %16839 = vmatprep.mubr.msk.bf16.mxu0 %vm17899_vm0, %v17898_v1  ;;  %17020 = vmatpush3.bf16.msra.mxu0 %v17781_v22  ;;  %v10509_v15 = vsel %vm3743_vm4, %v10504_v5, %v10508_v9  ;;  %v17750_v29 = vld [vmem:[#allocation3 + $0x3c] sm:$0xff]  }
 0x4d2   : > { %v7591_v32 = vpop.f32.mrb[194].mxu1  ;;  %16918 = vmatpush3.bf16.msra.mxu1 %v17770_v18  ;;  %17021 = vmatprep.subr.bf16.mxu0 %v17898_v1  ;;  %v10516_v30 = vrot.slane %v10514_v19, 1  ;;  %v8875_v19 = vld [vmem:[#allocation2 + $0x30] sm:$0xff] }
 0x4d3   : > { %8243 = vst [vmem:[#allocation2 + $0x120] sm:$0xff] %v8202_v28  ;;  %v8203_v37 = vadd.f32 %v8106_v11, %v7591_v32  ;;  %v16398_v0 = vpop.f32.mrb[195].mxu1  ;;  %v8111_v34 = vpop.f32.mrb[200].mxu0  ;;  %16919 = vmatprep.subr.bf16.mxu1 %v17898_v1  ;;  %v10510_v28 = vshrl.u32 %v17749_v46, 16  ;;  %v17754_v32 = vld [vmem:[#allocation3 + $0x54] sm:$0xff]  }
 0x4d4   : > { %v16501_v40 = vpop.f32.mrb[201].mxu0  ;;  %v10522_v58 = vshll.u32 %v17754_v32, 16 }
 0x4d5   : > { %8244 = vst [vmem:[#allocation2 + $0x128] sm:$0xff] %v8203_v37  ;;  %16736 = vmatmul.mubr.bf16.gmra.mrb[44].mxu1 %v17742_v38  ;;  %v8114_v33 = vpop.f32.mrb[202].mxu0  ;;  %17022 = vmatpush3.bf16.msra.mxu0 %v17787_v62  ;;  %v10512_v0 = vor.u32 %v10510_v28, %v10508_v9 }
 0x4d6   : > { %v16502_v44 = vpop.f32.mrb[203].mxu0  ;;  %16739 = vmatprep.mubr.msk.bf16.mxu1 %vm17899_vm0, %v17898_v1  ;;  %16920 = vmatpush3.bf16.msra.mxu1 %v17777_v35 }
 0x4d7   : > { %16921 = vmatprep.subr.bf16.mxu1 %v17898_v1  ;;  %17207 = vmatprep.subr.bf16.mxu0 %v17898_v1  ;;  %v10517_v38 = vsel %vm3743_vm4, %v10512_v0, %v10516_v30  ;;  %v8872_v44 = vld [vmem:[#allocation2 + $0x18] sm:$0xff] }
 0x4d8   : > { %v7596_v49 = vpop.f32.mrb[196].mxu1  ;;  %16840 = vmatmul.mubr.bf16.gmra.mrb[52].mxu0 %v10493_v45 }
 0x4d9   : > { %v8204_v47 = vadd.f32 %v8111_v34, %v7596_v49  ;;  %v16401_v50 = vpop.f32.mrb[197].mxu1  ;;  %16843 = vmatprep.mubr.msk.bf16.mxu0 %vm17899_vm0, %v17898_v1  ;;  %v17753_v49 = vld [vmem:[#allocation3 + $0x44] sm:$0xff]  }
 0x4da   : > { %v7599_v51 = vpop.f32.mrb[198].mxu1  ;;  %16922 = vmatpush3.bf16.msra.mxu1 %v17785_v41  ;;  %v10524_v50 = vrot.slane %v10522_v58, 1  ;;  %v8877_v58 = vld [vmem:[#allocation2 + $0x40] sm:$0xff] }
 0x4db   : > { %8245 = vst [vmem:[#allocation2 + $0x130] sm:$0xff] %v8204_v47  ;;  %v8205_v48 = vadd.f32 %v8114_v33, %v7599_v51  ;;  %v16402_v52 = vpop.f32.mrb[199].mxu1  ;;  %v8119_v54 = vpop.f32.mrb[204].mxu0  ;;  %17107 = vmatprep.subr.bf16.mxu1 %v17898_v1  ;;  %v10518_v47 = vshrl.u32 %v17751_v12, 16  ;;  %v17757_v51 = vld [vmem:[#allocation3 + $0x5c] sm:$0xff]  }
 0x4dc   : > { %v16505_v60 = vpop.f32.mrb[205].mxu0  ;;  %v10530_v55 = vshll.u32 %v17757_v51, 16 }
 0x4dd   : > { %8246 = vst [vmem:[#allocation2 + $0x138] sm:$0xff] %v8205_v48  ;;  %16740 = vmatmul.mubr.bf16.gmra.mrb[48].mxu1 %v17744_v56  ;;  %v8122_v57 = vpop.f32.mrb[206].mxu0  ;;  %v8873_v60 = vld [vmem:[#allocation2 + $0x20] sm:$0xff] }
 0x4de   : > { %v16506_v10 = vpop.f32.mrb[207].mxu0  ;;  %16743 = vmatprep.mubr.msk.bf16.mxu1 %vm17899_vm0, %v17898_v1 }
 0x4df   : > { %v8874_v10 = vld [vmem:[#allocation2 + $0x28] sm:$0xff] }
 0x4e0   : > { %v7604_v53 = vpop.f32.mrb[200].mxu1  ;;  %16844 = vmatmul.mubr.bf16.gmra.mrb[56].mxu0 %v10501_v63 }
 0x4e1   : > { %7650 = vst [vmem:[#allocation2 + $0x140] sm:$0xf] %v7604_v53  ;;  %v16405_v4 = vpop.f32.mrb[201].mxu1  ;;  %16847 = vmatprep.mubr.msk.bf16.mxu0 %vm17899_vm0, %v17898_v1 }
 0x4e2   : > { %v7607_v6 = vpop.f32.mrb[202].mxu1  ;;  %v17755_v4 = vld [vmem:[#allocation3 + $0x4c] sm:$0xff]  }
 0x4e3   : > { %v16406_v3 = vpop.f32.mrb[203].mxu1  ;;  %v20014_v36 = vpop.f32.mrb[208].mxu0  ;;  %v10526_v6 = vshrl.u32 %v17754_v32, 16 }
 0x4e4   : > { %v16625_v13 = vpop.f32.mrb[209].mxu0  ;;  %v10532_v3 = vrot.slane %v10530_v55, 1 }
 0x4e5   : > { %16744 = vmatmul.mubr.bf16.gmra.mrb[52].mxu1 %v17747_v16  ;;  %v20016_v31 = vpop.f32.mrb[210].mxu0  ;;  %v17760_v16 = vld [vmem:[#allocation3 + $0x64] sm:$0xff]   ;;  %v10528_v12 = vor.u32 %v10526_v6, %v10524_v50 }
 0x4e6   : > { %v16626_v14 = vpop.f32.mrb[211].mxu0  ;;  %16747 = vmatprep.mubr.msk.bf16.mxu1 %vm17899_vm0, %v17898_v1  ;;  %v17764_v6 = vld [vmem:[#allocation3 + $0x64] sm:$0xff]  }
 0x4e7   : > { %v10533_v5 = vsel %vm3743_vm4, %v10528_v12, %v10532_v3  ;;  %v10538_v14 = vshll.u32 %v17760_v16, 16 }
 0x4e8   : > { %v8165_v17 = vld [vmem:[#allocation2 + $0x140] sm:$0xf]  ;;  %v8703_v20 = vpop.f32.mrb[204].mxu1  ;;  %16848 = vmatmul.mubr.bf16.gmra.mrb[60].mxu0 %v10509_v15 }
 0x4e9   : > { %v8206_v21 = vadd.f32 %v8165_v17, %v8119_v54  ;;  %v8910_v11 = vadd.f32 %v8869_v7, %v8703_v20  ;;  %v16525_v25 = vpop.f32.mrb[205].mxu1  ;;  %16851 = vmatprep.mubr.msk.bf16.mxu0 %vm17899_vm0, %v17898_v1  ;;  %v10520_v54 = vor.u32 %v10518_v47, %v10516_v30 }
 0x4ea   : > { %v8706_v22 = vpop.f32.mrb[206].mxu1 }
 0x4eb   : > { %8247 = vst [vmem:[#allocation2 + $0x140] sm:$0xf] %v8206_v21  ;;  %8951 = vst [vmem:[#allocation2] sm:$0xff] %v8910_v11  ;;  %v8911_v18 = vadd.f32 %v8870_v24, %v8706_v22  ;;  %v16526_v26 = vpop.f32.mrb[207].mxu1  ;;  %v20023_v27 = vpop.f32.mrb[212].mxu0  ;;  %v10525_v59 = vsel %vm3743_vm4, %v10520_v54, %v10524_v50  ;;  %v8876_v21 = vld [vmem:[#allocation2 + $0x38] sm:$0xff] }
 0x4ec   : > { %v16629_v35 = vpop.f32.mrb[213].mxu0  ;;  %v17758_v24 = vld [vmem:[#allocation3 + $0x54] sm:$0xff]   ;;  %v10540_v26 = vrot.slane %v10538_v14, 1 }
 0x4ed   : > { %8952 = vst [vmem:[#allocation2 + $0x8] sm:$0xff] %v8911_v18  ;;  %16748 = vmatmul.mubr.bf16.gmra.mrb[56].mxu1 %v17750_v29  ;;  %v20025_v37 = vpop.f32.mrb[214].mxu0  ;;  %v10534_v18 = vshrl.u32 %v17757_v51, 16  ;;  %v17762_v29 = vld [vmem:[#allocation3 + $0x6c] sm:$0xff]   ;;  %v17765_v50 = vld [vmem:[#allocation3 + $0x74] sm:$0xff]  }
 0x4ee   : > { %v16630_v34 = vpop.f32.mrb[215].mxu0  ;;  %16751 = vmatprep.mubr.msk.bf16.mxu1 %vm17899_vm0, %v17898_v1  ;;  %v10554_v55 = vshll.u32 %v17765_v50, 16 }
 0x4ef   : > { %v10536_v32 = vor.u32 %v10534_v18, %v10532_v3  ;;  %v10546_v34 = vshll.u32 %v17762_v29, 16  ;;  %v10550_v3 = vshrl.u32 %v17762_v29, 16  ;;  %v17767_v29 = vld [vmem:[#allocation3 + $0x6c] sm:$0xff]  }
 0x4f0   : > { %v8711_v23 = vpop.f32.mrb[208].mxu1  ;;  %16852 = vmatmul.mubr.bf16.gmra.mrb[64].mxu0 %v10517_v38 }
 0x4f1   : > { %v8912_v40 = vadd.f32 %v8871_v39, %v8711_v23  ;;  %v16529_v33 = vpop.f32.mrb[209].mxu1  ;;  %16855 = vmatprep.mubr.msk.bf16.mxu0 %vm17899_vm0, %v17898_v1  ;;  %v10541_v0 = vsel %vm3743_vm4, %v10536_v32, %v10540_v26  ;;  %v10548_v47 = vrot.slane %v10546_v34, 1 }
 0x4f2   : > { %v8714_v43 = vpop.f32.mrb[210].mxu1  ;;  %v8878_v33 = vld [vmem:[#allocation2 + $0x48] sm:$0xff] }
 0x4f3   : > { %8953 = vst [vmem:[#allocation2 + $0x10] sm:$0xff] %v8912_v40  ;;  %v8913_v41 = vadd.f32 %v8872_v44, %v8714_v43  ;;  %v16530_v45 = vpop.f32.mrb[211].mxu1  ;;  %v20032_v42 = vpop.f32.mrb[216].mxu0 }
 0x4f4   : > { %v16633_v48 = vpop.f32.mrb[217].mxu0  ;;  %v17761_v45 = vld [vmem:[#allocation3 + $0x5c] sm:$0xff]  }
 0x4f5   : > { %8954 = vst [vmem:[#allocation2 + $0x18] sm:$0xff] %v8913_v41  ;;  %16752 = vmatmul.mubr.bf16.gmra.mrb[60].mxu1 %v17753_v49  ;;  %v20034_v52 = vpop.f32.mrb[218].mxu0  ;;  %v10542_v49 = vshrl.u32 %v17760_v16, 16  ;;  %v10556_v16 = vrot.slane %v10554_v55, 1  ;;  %v17773_v55 = vld [vmem:[#allocation3 + $0x8c] sm:$0xff]  }
 0x4f6   : > { %v16634_v56 = vpop.f32.mrb[219].mxu0  ;;  %16755 = vmatprep.mubr.msk.bf16.mxu1 %vm17899_vm0, %v17898_v1 }
 0x4f7   : > { %v10544_v54 = vor.u32 %v10542_v49, %v10540_v26  ;;  %v8884_v49 = vld [vmem:[#allocation2 + $0x78] sm:$0xff] }
 0x4f8   : > { %v8719_v46 = vpop.f32.mrb[212].mxu1  ;;  %16856 = vmatmul.mubr.bf16.gmra.mrb[68].mxu0 %v10525_v59 }
 0x4f9   : > { %v8914_v57 = vadd.f32 %v8873_v60, %v8719_v46  ;;  %v16533_v61 = vpop.f32.mrb[213].mxu1  ;;  %16859 = vmatprep.mubr.msk.bf16.mxu0 %vm17899_vm0, %v17898_v1  ;;  %v10549_v59 = vsel %vm3743_vm4, %v10544_v54, %v10548_v47  ;;  %v8879_v60 = vld [vmem:[#allocation2 + $0x50] sm:$0xff]  ;;  %v17769_v54 = vld [vmem:[#allocation3 + $0x74] sm:$0xff]  }
 0x4fa   : > { %v8722_v62 = vpop.f32.mrb[214].mxu1 }
 0x4fb   : > { %8955 = vst [vmem:[#allocation2 + $0x20] sm:$0xff] %v8914_v57  ;;  %v8915_v63 = vadd.f32 %v8874_v10, %v8722_v62  ;;  %v16534_v2 = vpop.f32.mrb[215].mxu1  ;;  %v20041_v53 = vpop.f32.mrb[220].mxu0  ;;  %v8880_v10 = vld [vmem:[#allocation2 + $0x58] sm:$0xff] }
 0x4fc   : > { %v16637_v8 = vpop.f32.mrb[221].mxu0 }
 0x4fd   : > { %8956 = vst [vmem:[#allocation2 + $0x28] sm:$0xff] %v8915_v63  ;;  %16756 = vmatmul.mubr.bf16.gmra.mrb[64].mxu1 %v17755_v4  ;;  %v20043_v9 = vpop.f32.mrb[222].mxu0  ;;  %v17768_v8 = vld [vmem:[#allocation3 + $0x7c] sm:$0xff]  }
 0x4fe   : > { %v16638_v13 = vpop.f32.mrb[223].mxu0  ;;  %16759 = vmatprep.mubr.msk.bf16.mxu1 %vm17899_vm0, %v17898_v1 }
 0x500   : > { %v8727_v15 = vpop.f32.mrb[216].mxu1  ;;  %16860 = vmatmul.mubr.bf16.gmra.mrb[72].mxu0 %v10533_v5  ;;  %v10552_v5 = vor.u32 %v10550_v3, %v10548_v47 }
 0x501   : > { %v8916_v17 = vadd.f32 %v8875_v19, %v8727_v15  ;;  %v16537_v20 = vpop.f32.mrb[217].mxu1  ;;  %16863 = vmatprep.mubr.msk.bf16.mxu0 %vm17899_vm0, %v17898_v1  ;;  %v10562_v19 = vshll.u32 %v17768_v8, 16 }
 0x502   : > { %v8730_v7 = vpop.f32.mrb[218].mxu1  ;;  %v10557_v15 = vsel %vm3743_vm4, %v10552_v5, %v10556_v16  ;;  %v8881_v20 = vld [vmem:[#allocation2 + $0x60] sm:$0xff] }
 0x503   : > { %8957 = vst [vmem:[#allocation2 + $0x30] sm:$0xff] %v8916_v17  ;;  %v8917_v11 = vadd.f32 %v8876_v21, %v8730_v7  ;;  %v16538_v25 = vpop.f32.mrb[219].mxu1  ;;  %v20050_v22 = vpop.f32.mrb[224].mxu0  ;;  %v10564_v32 = vrot.slane %v10562_v19, 1 }
 0x504   : > { %v16641_v28 = vpop.f32.mrb[225].mxu0  ;;  %v8882_v25 = vld [vmem:[#allocation2 + $0x68] sm:$0xff] }
 0x505   : > { %8958 = vst [vmem:[#allocation2 + $0x38] sm:$0xff] %v8917_v11  ;;  %16760 = vmatmul.mubr.bf16.gmra.mrb[68].mxu1 %v17758_v24  ;;  %v20052_v30 = vpop.f32.mrb[226].mxu0  ;;  %v10558_v28 = vshrl.u32 %v17765_v50, 16 }
 0x506   : > { %v16642_v35 = vpop.f32.mrb[227].mxu0  ;;  %16763 = vmatprep.mubr.msk.bf16.mxu1 %vm17899_vm0, %v17898_v1 }
 0x507   : > { %v17771_v35 = vld [vmem:[#allocation3 + $0x84] sm:$0xff]  }
 0x508   : > { %v8735_v38 = vpop.f32.mrb[220].mxu1  ;;  %16864 = vmatmul.mubr.bf16.gmra.mrb[76].mxu0 %v10541_v0  ;;  %v10574_v19 = vshrl.u32 %v17771_v35, 16 }
 0x509   : > { %v8918_v23 = vadd.f32 %v8877_v58, %v8735_v38  ;;  %v16541_v39 = vpop.f32.mrb[221].mxu1  ;;  %16867 = vmatprep.mubr.msk.bf16.mxu0 %vm17899_vm0, %v17898_v1  ;;  %v10560_v38 = vor.u32 %v10558_v28, %v10556_v16  ;;  %v8887_v28 = vld [vmem:[#allocation2 + $0x90] sm:$0xff] }
 0x50a   : > { %v8738_v40 = vpop.f32.mrb[222].mxu1  ;;  %v10570_v39 = vshll.u32 %v17771_v35, 16 }
 0x50b   : > { %8959 = vst [vmem:[#allocation2 + $0x40] sm:$0xff] %v8918_v23  ;;  %v8919_v43 = vadd.f32 %v8878_v33, %v8738_v40  ;;  %v16542_v44 = vpop.f32.mrb[223].mxu1  ;;  %v20059_v41 = vpop.f32.mrb[228].mxu0  ;;  %v10565_v23 = vsel %vm3743_vm4, %v10560_v38, %v10564_v32  ;;  %v8883_v33 = vld [vmem:[#allocation2 + $0x70] sm:$0xff]  ;;  %v8888_v38 = vld [vmem:[#allocation2 + $0x98] sm:$0xff] }
 0x50c   : > { %v16645_v51 = vpop.f32.mrb[229].mxu0 }
 0x50d   : > { %8960 = vst [vmem:[#allocation2 + $0x48] sm:$0xff] %v8919_v43  ;;  %16764 = vmatmul.mubr.bf16.gmra.mrb[72].mxu1 %v17761_v45  ;;  %v20061_v48 = vpop.f32.mrb[230].mxu0 }
 0x50e   : > { %v16646_v56 = vpop.f32.mrb[231].mxu0  ;;  %16767 = vmatprep.mubr.msk.bf16.mxu1 %vm17899_vm0, %v17898_v1 }
 0x50f   : > { %v10566_v56 = vshrl.u32 %v17768_v8, 16  ;;  %v8886_v8 = vld [vmem:[#allocation2 + $0x88] sm:$0xff] }
 0x510   : > { %v8743_v46 = vpop.f32.mrb[224].mxu1  ;;  %16868 = vmatmul.mubr.bf16.gmra.mrb[80].mxu0 %v10549_v59  ;;  %v10572_v59 = vrot.slane %v10570_v39, 1 }
 0x511   : > { %v8920_v57 = vadd.f32 %v8879_v60, %v8743_v46  ;;  %v16545_v61 = vpop.f32.mrb[225].mxu1  ;;  %16871 = vmatprep.mubr.msk.bf16.mxu0 %vm17899_vm0, %v17898_v1 }
 0x512   : > { %v8746_v62 = vpop.f32.mrb[226].mxu1 }
 0x513   : > { %8961 = vst [vmem:[#allocation2 + $0x50] sm:$0xff] %v8920_v57  ;;  %v8921_v63 = vadd.f32 %v8880_v10, %v8746_v62  ;;  %v16546_v2 = vpop.f32.mrb[227].mxu1  ;;  %v20068_v4 = vpop.f32.mrb[232].mxu0  ;;  %v10568_v57 = vor.u32 %v10566_v56, %v10564_v32  ;;  %v10578_v10 = vshll.u32 %v17773_v55, 16 }
 0x514   : > { %v16649_v12 = vpop.f32.mrb[233].mxu0  ;;  %v8885_v2 = vld [vmem:[#allocation2 + $0x80] sm:$0xff] }
 0x515   : > { %8962 = vst [vmem:[#allocation2 + $0x58] sm:$0xff] %v8921_v63  ;;  %16768 = vmatmul.mubr.bf16.gmra.mrb[76].mxu1 %v17764_v6  ;;  %v20070_v13 = vpop.f32.mrb[234].mxu0  ;;  %v10573_v62 = vsel %vm3743_vm4, %v10568_v57, %v10572_v59 }
 0x516   : > { %v16650_v14 = vpop.f32.mrb[235].mxu0  ;;  %16771 = vmatprep.mubr.msk.bf16.mxu1 %vm17899_vm0, %v17898_v1 }
 0x518   : > { %v8751_v17 = vpop.f32.mrb[228].mxu1  ;;  %16872 = vmatmul.mubr.bf16.gmra.mrb[84].mxu0 %v10557_v15  ;;  %v17772_v15 = vld [vmem:[#allocation3 + $0x7c] sm:$0xff]  }
 0x519   : > { %v8922_v7 = vadd.f32 %v8881_v20, %v8751_v17  ;;  %v16549_v21 = vpop.f32.mrb[229].mxu1  ;;  %16875 = vmatprep.mubr.msk.bf16.mxu0 %vm17899_vm0, %v17898_v1  ;;  %v10580_v17 = vrot.slane %v10578_v10, 1  ;;  %v17776_v20 = vld [vmem:[#allocation3 + $0x94] sm:$0xff]  }
 0x51a   : > { %v8754_v11 = vpop.f32.mrb[230].mxu1 }
 0x51b   : > { %8963 = vst [vmem:[#allocation2 + $0x60] sm:$0xff] %v8922_v7  ;;  %v8923_v24 = vadd.f32 %v8882_v25, %v8754_v11  ;;  %v16550_v18 = vpop.f32.mrb[231].mxu1  ;;  %v20077_v26 = vpop.f32.mrb[236].mxu0  ;;  %v10576_v11 = vor.u32 %v10574_v19, %v10572_v59 }
 0x51c   : > { %v16653_v0 = vpop.f32.mrb[237].mxu0  ;;  %v10586_v18 = vshll.u32 %v17776_v20, 16 }
 0x51d   : > { %8964 = vst [vmem:[#allocation2 + $0x68] sm:$0xff] %v8923_v24  ;;  %16772 = vmatmul.mubr.bf16.gmra.mrb[80].mxu1 %v17767_v29  ;;  %v20079_v34 = vpop.f32.mrb[238].mxu0  ;;  %v10581_v24 = vsel %vm3743_vm4, %v10576_v11, %v10580_v17 }
 0x51e   : > { %v16654_v58 = vpop.f32.mrb[239].mxu0  ;;  %16775 = vmatprep.mubr.msk.bf16.mxu1 %vm17899_vm0, %v17898_v1 }
 0x520   : > { %v8759_v40 = vpop.f32.mrb[232].mxu1  ;;  %16876 = vmatmul.mubr.bf16.gmra.mrb[88].mxu0 %v10565_v23 }
 0x521   : > { %v8924_v43 = vadd.f32 %v8883_v33, %v8759_v40  ;;  %v16553_v44 = vpop.f32.mrb[233].mxu1  ;;  %16879 = vmatprep.mubr.msk.bf16.mxu0 %vm17899_vm0, %v17898_v1  ;;  %v17775_v40 = vld [vmem:[#allocation3 + $0x84] sm:$0xff]   ;;  %v10582_v33 = vshrl.u32 %v17773_v55, 16 }
 0x522   : > { %v8762_v45 = vpop.f32.mrb[234].mxu1  ;;  %v17779_v44 = vld [vmem:[#allocation3 + $0x9c] sm:$0xff]  }
 0x523   : > { %8965 = vst [vmem:[#allocation2 + $0x70] sm:$0xff] %v8924_v43  ;;  %v8925_v47 = vadd.f32 %v8884_v49, %v8762_v45  ;;  %v16554_v50 = vpop.f32.mrb[235].mxu1  ;;  %v20086_v51 = vpop.f32.mrb[240].mxu0  ;;  %v10588_v43 = vrot.slane %v10586_v18, 1  ;;  %v10594_v56 = vshll.u32 %v17779_v44, 16  ;;  %v10598_v18 = vshrl.u32 %v17779_v44, 16 }
 0x524   : > { %v16657_v46 = vpop.f32.mrb[241].mxu0 }
 0x525   : > { %8966 = vst [vmem:[#allocation2 + $0x78] sm:$0xff] %v8925_v47  ;;  %16776 = vmatmul.mubr.bf16.gmra.mrb[84].mxu1 %v17769_v54  ;;  %v20088_v60 = vpop.f32.mrb[242].mxu0  ;;  %v10584_v47 = vor.u32 %v10582_v33, %v10580_v17  ;;  %v8889_v46 = vld [vmem:[#allocation2 + $0xa0] sm:$0xff] }
 0x526   : > { %v16658_v61 = vpop.f32.mrb[243].mxu0  ;;  %16779 = vmatprep.mubr.msk.bf16.mxu1 %vm17899_vm0, %v17898_v1 }
 0x527   : > { %v10589_v54 = vsel %vm3743_vm4, %v10584_v47, %v10588_v43 }
 0x528   : > { %v8767_v63 = vpop.f32.mrb[236].mxu1  ;;  %16880 = vmatmul.mubr.bf16.gmra.mrb[92].mxu0 %v10573_v62  ;;  %v8890_v62 = vld [vmem:[#allocation2 + $0xa8] sm:$0xff] }
 0x529   : > { %v8926_v6 = vadd.f32 %v8885_v2, %v8767_v63  ;;  %v16557_v3 = vpop.f32.mrb[237].mxu1  ;;  %16883 = vmatprep.mubr.msk.bf16.mxu0 %vm17899_vm0, %v17898_v1 }
 0x52a   : > { %v8770_v16 = vpop.f32.mrb[238].mxu1  ;;  %v10590_v3 = vshrl.u32 %v17776_v20, 16 }
 0x52b   : > { %8967 = vst [vmem:[#allocation2 + $0x80] sm:$0xff] %v8926_v6  ;;  %v8927_v12 = vadd.f32 %v8886_v8, %v8770_v16  ;;  %v16558_v5 = vpop.f32.mrb[239].mxu1  ;;  %v20095_v14 = vpop.f32.mrb[244].mxu0  ;;  %v17778_v6 = vld [vmem:[#allocation3 + $0x8c] sm:$0xff]   ;;  %v10596_v16 = vrot.slane %v10594_v56, 1  ;;  %v17782_v8 = vld [vmem:[#allocation3 + $0xa4] sm:$0xff]  }
 0x52c   : > { %v16661_v7 = vpop.f32.mrb[245].mxu0 }
 0x52d   : > { %8968 = vst [vmem:[#allocation2 + $0x88] sm:$0xff] %v8927_v12  ;;  %16780 = vmatmul.mubr.bf16.gmra.mrb[88].mxu1 %v17772_v15  ;;  %v20097_v21 = vpop.f32.mrb[246].mxu0  ;;  %v10592_v15 = vor.u32 %v10590_v3, %v10588_v43  ;;  %v10602_v7 = vshll.u32 %v17782_v8, 16 }
 0x52e   : > { %v16662_v25 = vpop.f32.mrb[247].mxu0  ;;  %16783 = vmatprep.mubr.msk.bf16.mxu1 %vm17899_vm0, %v17898_v1 }
 0x52f   : > { %v10597_v17 = vsel %vm3743_vm4, %v10592_v15, %v10596_v16  ;;  %v8891_v25 = vld [vmem:[#allocation2 + $0xb0] sm:$0xff] }
 0x530   : > { %v8775_v29 = vpop.f32.mrb[240].mxu1  ;;  %16884 = vmatmul.mubr.bf16.gmra.mrb[96].mxu0 %v10581_v24 }
 0x531   : > { %v8928_v32 = vadd.f32 %v8887_v28, %v8775_v29  ;;  %v16561_v35 = vpop.f32.mrb[241].mxu1  ;;  %16887 = vmatprep.mubr.msk.bf16.mxu0 %vm17899_vm0, %v17898_v1  ;;  %v8892_v28 = vld [vmem:[#allocation2 + $0xb8] sm:$0xff] }
 0x532   : > { %v8778_v0 = vpop.f32.mrb[242].mxu1 }
 0x533   : > { %8969 = vst [vmem:[#allocation2 + $0x90] sm:$0xff] %v8928_v32  ;;  %v8929_v58 = vadd.f32 %v8888_v38, %v8778_v0  ;;  %v16562_v23 = vpop.f32.mrb[243].mxu1  ;;  %v20104_v39 = vpop.f32.mrb[248].mxu0  ;;  %v17780_v32 = vld [vmem:[#allocation3 + $0x94] sm:$0xff]  }
 0x534   : > { %v16665_v45 = vpop.f32.mrb[249].mxu0  ;;  %v10604_v23 = vrot.slane %v10602_v7, 1  ;;  %v8895_v7 = vld [vmem:[#allocation2 + $0xd0] sm:$0xff] }
 0x535   : > { %8970 = vst [vmem:[#allocation2 + $0x98] sm:$0xff] %v8929_v58  ;;  %16784 = vmatmul.mubr.bf16.gmra.mrb[92].mxu1 %v17775_v40  ;;  %v20106_v49 = vpop.f32.mrb[250].mxu0  ;;  %v10600_v58 = vor.u32 %v10598_v18, %v10596_v16  ;;  %v17784_v40 = vld [vmem:[#allocation3 + $0xac] ss:$0 sps:$4 sm:$0x77]  }
 0x536   : > { %v16666_v50 = vpop.f32.mrb[251].mxu0  ;;  %16787 = vmatprep.mubr.msk.bf16.mxu1 %vm17899_vm0, %v17898_v1  ;;  %v10610_v47 = vshll.u32 %v17784_v40, 16 }
 0x537   : > { %v10605_v44 = vsel %vm3743_vm4, %v10600_v58, %v10604_v23 }
 0x538   : > { %v8783_v59 = vpop.f32.mrb[244].mxu1  ;;  %16888 = vmatmul.mubr.bf16.gmra.mrb[100].mxu0 %v10589_v54  ;;  %v8893_v54 = vld [vmem:[#allocation2 + $0xc0] sm:$0xff] }
 0x539   : > { %v8930_v57 = vadd.f32 %v8889_v46, %v8783_v59  ;;  %v16565_v55 = vpop.f32.mrb[245].mxu1  ;;  %16891 = vmatprep.mubr.msk.bf16.mxu0 %vm17899_vm0, %v17898_v1 }
 0x53a   : > { %v8786_v61 = vpop.f32.mrb[246].mxu1 }
 0x53b   : > { %8971 = vst [vmem:[#allocation2 + $0xa0] sm:$0xff] %v8930_v57  ;;  %v8931_v10 = vadd.f32 %v8890_v62, %v8786_v61  ;;  %v16566_v63 = vpop.f32.mrb[247].mxu1  ;;  %v20113_v2 = vpop.f32.mrb[252].mxu0  ;;  %v8894_v57 = vld [vmem:[#allocation2 + $0xc8] sm:$0xff] }
 0x53c   : > { %v16669_v12 = vpop.f32.mrb[253].mxu0  ;;  %v10606_v63 = vshrl.u32 %v17782_v8, 16 }
 0x53d   : > { %8972 = vst [vmem:[#allocation2 + $0xa8] sm:$0xff] %v8931_v10  ;;  %16788 = vmatmul.mubr.bf16.gmra.mrb[96].mxu1 %v17778_v6  ;;  %v20115_v5 = vpop.f32.mrb[254].mxu0  ;;  %v17783_v10 = vld [vmem:[#allocation3 + $0x9c] sm:$0xff]   ;;  %v10612_v6 = vrot.slane %v10610_v47, 1 }
 0x53e   : > { %v16670_v19 = vpop.f32.mrb[255].mxu0  ;;  %16791 = vmatprep.mubr.msk.bf16.mxu1 %vm17899_vm0, %v17898_v1  ;;  %v10608_v12 = vor.u32 %v10606_v63, %v10604_v23  ;;  %v8897_v47 = vld [vmem:[#allocation2 + $0xe0] sm:$0xff]  ;;  %v17788_v63 = vld [vmem:[#allocation3 + $0xac] ss:$0 sps:$4 sm:$0x33]  }
 0x540   : > { %v8791_v11 = vpop.f32.mrb[248].mxu1  ;;  %16892 = vmatmul.mubr.bf16.gmra.mrb[104].mxu0 %v10597_v17  ;;  %v10613_v19 = vsel %vm3743_vm4, %v10608_v12, %v10612_v6 }
 0x541   : > { %v8932_v24 = vadd.f32 %v8891_v25, %v8791_v11  ;;  %v16569_v20 = vpop.f32.mrb[249].mxu1  ;;  %16895 = vmatprep.mubr.msk.bf16.mxu0 %vm17899_vm0, %v17898_v1 }
 0x542   : > { %v8794_v29 = vpop.f32.mrb[250].mxu1 }
 0x543   : > { %8973 = vst [vmem:[#allocation2 + $0xb0] sm:$0xff] %v8932_v24  ;;  %v8933_v35 = vadd.f32 %v8892_v28, %v8794_v29  ;;  %v16570_v0 = vpop.f32.mrb[251].mxu1  ;;  %v20122_v38 = vpop.f32.mrb[0].mxu0  ;;  %v8896_v24 = vld [vmem:[#allocation2 + $0xd8] sm:$0xff]  ;;  %v17786_v28 = vld [vmem:[#allocation3 + $0xa4] sm:$0xff]  }
 0x544   : > { %v16673_v33 = vpop.f32.mrb[1].mxu0 }
 0x545   : > { %8974 = vst [vmem:[#allocation2 + $0xb8] sm:$0xff] %v8933_v35  ;;  %16792 = vmatmul.mubr.bf16.gmra.mrb[100].mxu1 %v17780_v32  ;;  %v20124_v43 = vpop.f32.mrb[2].mxu0  ;;  %v10614_v32 = vshrl.u32 %v17784_v40, 16  ;;  %v17791_v33 = vld [vmem:[#allocation3 + $0x14] sm:$0xff]  }
 0x546   : > { %v16674_v45 = vpop.f32.mrb[3].mxu0  ;;  %16795 = vmatprep.mubr.msk.bf16.mxu1 %vm17899_vm0, %v17898_v1 }
 0x547   : > { %v10616_v58 = vor.u32 %v10614_v32, %v10612_v6  ;;  %v20146_v45 = vld [vmem:[#allocation3 + $0x1c] sm:$0xff]   ;;  %v20166_v32 = vld [vmem:[#allocation3 + $0x24] sm:$0xff]  }
 0x548   : > { %v8799_v50 = vpop.f32.mrb[252].mxu1  ;;  %16896 = vmatmul.mubr.bf16.gmra.mrb[108].mxu0 %v10605_v44  ;;  %v11891_v6 = vrot.slane %v20146_v45, 1 }
 0x549   : > { %v8934_v56 = vadd.f32 %v8893_v54, %v8799_v50  ;;  %v16573_v59 = vpop.f32.mrb[253].mxu1  ;;  %16899 = vmatprep.mubr.msk.bf16.mxu0 %vm17899_vm0, %v17898_v1  ;;  %v20148_v50 = vld [vmem:[#allocation3 + $0x1c] sm:$0xff]  }
 0x54a   : > { %v8802_v46 = vpop.f32.mrb[254].mxu1  ;;  %v11178_v12 = vshll.u32 %v20148_v50, 16 }
 0x54b   : > { %8975 = vst [vmem:[#allocation2 + $0xc0] sm:$0xff] %v8934_v56  ;;  %v8935_v55 = vadd.f32 %v8894_v57, %v8802_v46  ;;  %v16574_v61 = vpop.f32.mrb[255].mxu1  ;;  %v20131_v62 = vpop.f32.mrb[4].mxu0  ;;  %v17789_v56 = vld [vmem:[#allocation3 + $0x14] sm:$0xfe]   ;;  %v8898_v46 = vld [vmem:[#allocation2 + $0xe8] sm:$0xff] }
 0x54c   : > { %v16677_v3 = vpop.f32.mrb[5].mxu0  ;;  %v11173_v57 = vshll.u32 %v17791_v33, 16 }
 0x54d   : > { %8976 = vst [vmem:[#allocation2 + $0xc8] sm:$0xff] %v8935_v55  ;;  %16796 = vmatmul.mubr.bf16.gmra.mrb[104].mxu1 %v17783_v10  ;;  %v20133_v16 = vpop.f32.mrb[6].mxu0 }
 0x54e   : > { %v16678_v15 = vpop.f32.mrb[7].mxu0  ;;  %16799 = vmatprep.mubr.msk.bf16.mxu1 %vm17899_vm0, %v17898_v1 }
 0x550   : > { %v8807_v17 = vpop.f32.mrb[0].mxu1  ;;  %16900 = vmatmul.mubr.bf16.gmra.mrb[112].mxu0 %v10613_v19  ;;  %v11890_v19 = vrot.slane %v17789_v56, 1 }
 0x551   : > { %v8936_v11 = vadd.f32 %v8895_v7, %v8807_v17  ;;  %v16577_v25 = vpop.f32.mrb[1].mxu1  ;;  %16903 = vmatprep.mubr.msk.bf16.mxu0 %vm17899_vm0, %v17898_v1  ;;  %v17796_v17 = vld [vmem:[%s20939_s4] sm:$0xff]  }
 0x552   : > { %v8810_v8 = vpop.f32.mrb[2].mxu1  ;;  %v11892_v25 = vsel %vm5184_vm5, %v11890_v19, %v11891_v6 }
 0x553   : > { %8977 = vst [vmem:[#allocation2 + $0xd0] sm:$0xff] %v8936_v11  ;;  %v8937_v20 = vadd.f32 %v8896_v24, %v8810_v8  ;;  %v16578_v18 = vpop.f32.mrb[3].mxu1  ;;  %v20140_v29 = vpop.f32.mrb[8].mxu0  ;;  %v11175_v11 = vrot.slane %v11173_v57, 1  ;;  %v20164_v8 = vld [vmem:[#allocation3 + $0x24] sm:$0xff]  }
 0x554   : > { %v16681_v35 = vpop.f32.mrb[9].mxu0  ;;  %v11171_v18 = vshrl.u32 %v17791_v33, 16  ;;  %v17793_v33 = vld [vmem:[%s20938_s3 + $0x200] sm:$0xff]  }
 0x555   : > { %8978 = vst [vmem:[#allocation2 + $0xd8] sm:$0xff] %v8937_v20  ;;  %16800 = vmatmul.mubr.bf16.gmra.mrb[108].mxu1 %v17786_v28  ;;  %v20142_v0 = vpop.f32.mrb[10].mxu0  ;;  %v8899_v20 = vld [vmem:[#allocation2 + $0xf0] sm:$0xff]  ;;  %v11180_v28 = vrot.slane %v11178_v12, 1  ;;  %v17800_v12 = vld [vmem:[%s20938_s3 + $0x208] sm:$0xff]  }
 0x556   : > { %v16682_v23 = vpop.f32.mrb[11].mxu0  ;;  %16803 = vmatprep.mubr.msk.bf16.mxu1 %vm17899_vm0, %v17898_v1 }
 0x557   : > { %v17804_v23 = vld [vmem:[%s20939_s4 + $0x8] sm:$0xff]  }
 0x558   : > { %v8815_v44 = vpop.f32.mrb[4].mxu1  ;;  %16904 = vmatmul.mubr.bf16.gmra.mrb[116].mxu0 %v10616_v58 }
 0x559   : > { %v8938_v54 = vadd.f32 %v8897_v47, %v8815_v44  ;;  %v16581_v40 = vpop.f32.mrb[5].mxu1  ;;  %17023 = vmatprep.mubr.msk.bf16.mxu0 %vm17899_vm0, %v17898_v1  ;;  %v8900_v44 = vld [vmem:[#allocation2 + $0xf8] sm:$0xff]  ;;  %v11176_v47 = vor.u32 %v11175_v11, %v11171_v18  ;;  %v8901_v11 = vld [vmem:[#allocation2 + $0x100] sm:$0xff] }
 0x55a   : > { %v8818_v59 = vpop.f32.mrb[6].mxu1 }
 0x55b   : > { %8979 = vst [vmem:[#allocation2 + $0xe0] sm:$0xff] %v8938_v54  ;;  %v8939_v55 = vadd.f32 %v8898_v46, %v8818_v59  ;;  %v16582_v61 = vpop.f32.mrb[7].mxu1  ;;  %v20152_v10 = vpop.f32.mrb[12].mxu0  ;;  %v11893_v59 = vrot.slane %v20164_v8, 1  ;;  %v11181_v57 = vsel %vm3743_vm4, %v11176_v47, %v11180_v28 }
 0x55c   : > { %v16685_v3 = vpop.f32.mrb[13].mxu0 }
 0x55d   : > { %8980 = vst [vmem:[#allocation2 + $0xe8] sm:$0xff] %v8939_v55  ;;  %16804 = vmatmul.mubr.bf16.gmra.mrb[112].mxu1 %v17788_v63  ;;  %v20156_v15 = vpop.f32.mrb[14].mxu0  ;;  %v11186_v55 = vshll.u32 %v20166_v32, 16  ;;  %v17811_v63 = vld [vmem:[%s20939_s4 + $0x10] sm:$0xff]   ;;  %v11894_v19 = vsel %vm5184_vm5, %v11891_v6, %v11893_v59  ;;  %v17818_v6 = vld [vmem:[%s20939_s4 + $0x18] sm:$0xff]  }
 0x55e   : > { %v16686_v7 = vpop.f32.mrb[15].mxu0  ;;  %16923 = vmatprep.mubr.msk.bf16.mxu1 %vm17899_vm0, %v17898_v1 }
 0x55f   : > { %v11188_v8 = vrot.slane %v11186_v55, 1 }
 0x560   : > { %v8823_v24 = vpop.f32.mrb[8].mxu1  ;;  %17024 = vmatmul.mubr.bf16.vlgmr.msra.gmra.mrb[120].mxu0 %v11892_v25  ;;  %v11182_v25 = vshrl.u32 %v20148_v50, 16  ;;  %v17807_v50 = vld [vmem:[%s20938_s3 + $0x210] sm:$0xff]  }
 0x561   : > { %v8940_v35 = vadd.f32 %v8899_v20, %v8823_v24  ;;  %v16585_v58 = vpop.f32.mrb[9].mxu1  ;;  %17027 = vmatprep.mubr.msk.bf16.mxu0 %vm17899_vm0, %v17898_v1  ;;  %17208 = vmatpush3.bf16.msra.mxu0 %v17796_v17  ;;  %v20193_v17 = vld [vmem:[#allocation3 + $0x2c] sm:$0xff]  }
 0x562   : > { %v8826_v45 = vpop.f32.mrb[10].mxu1  ;;  %17209 = vmatprep.subr.bf16.mxu0 %v17898_v1  ;;  %v20198_v24 = vld [vmem:[#allocation3 + $0x2c] sm:$0xff]   ;;  %v8902_v58 = vld [vmem:[#allocation2 + $0x108] sm:$0xff] }
 0x563   : > { %8981 = vst [vmem:[#allocation2 + $0xf0] sm:$0xff] %v8940_v35  ;;  %v8941_v54 = vadd.f32 %v8900_v44, %v8826_v45  ;;  %v16586_v40 = vpop.f32.mrb[11].mxu1  ;;  %v20177_v56 = vpop.f32.mrb[16].mxu0 }
 0x564   : > { %v16689_v46 = vpop.f32.mrb[17].mxu0 }
 0x565   : > { %8982 = vst [vmem:[#allocation2 + $0xf8] sm:$0xff] %v8941_v54  ;;  %16924 = vmatmul.mubr.bf16.vlgmr.msra.gmra.mrb[116].mxu1 %v11181_v57  ;;  %v20182_v61 = vpop.f32.mrb[18].mxu0  ;;  %17210 = vmatpush3.bf16.msra.mxu0 %v17804_v23  ;;  %v11184_v23 = vor.u32 %v11182_v25, %v11180_v28  ;;  %v11194_v28 = vshll.u32 %v20198_v24, 16  ;;  %v17825_v57 = vld [vmem:[%s20939_s4 + $0x20] sm:$0xff]  }
 0x566   : > { %17108 = vmatpush3.bf16.msra.mxu1 %v17793_v33  ;;  %v16690_v3 = vpop.f32.mrb[19].mxu0  ;;  %16927 = vmatprep.mubr.msk.bf16.mxu1 %vm17899_vm0, %v17898_v1  ;;  %v11895_v33 = vrot.slane %v20193_v17, 1  ;;  %v8903_v17 = vld [vmem:[#allocation2 + $0x110] sm:$0xff]  ;;  %v20231_v25 = vld [vmem:[#allocation3 + $0x34] sm:$0xff]  }
 0x567   : > { %17109 = vmatprep.subr.bf16.mxu1 %v17898_v1  ;;  %17211 = vmatprep.subr.bf16.mxu0 %v17898_v1  ;;  %v11189_v40 = vsel %vm3743_vm4, %v11184_v23, %v11188_v8 }
 0x568   : > { %v8831_v7 = vpop.f32.mrb[12].mxu1  ;;  %17028 = vmatmul.mubr.bf16.gmra.mrb[124].mxu0 %v11894_v19  ;;  %v11896_v3 = vsel %vm5184_vm5, %v11893_v59, %v11895_v33  ;;  %v17833_v59 = vld [vmem:[%s20939_s4 + $0x28] sm:$0xff]  }
 0x569   : > { %v8942_v20 = vadd.f32 %v8901_v11, %v8831_v7  ;;  %v16589_v18 = vpop.f32.mrb[13].mxu1  ;;  %17031 = vmatprep.mubr.msk.bf16.mxu0 %vm17899_vm0, %v17898_v1  ;;  %17212 = vmatpush3.bf16.msra.mxu0 %v17811_v63  ;;  %v17815_v63 = vld [vmem:[%s20938_s3 + $0x218] sm:$0xff]   ;;  %v11190_v7 = vshrl.u32 %v20166_v32, 16  ;;  %v11196_v11 = vrot.slane %v11194_v28, 1  ;;  %v17822_v32 = vld [vmem:[%s20938_s3 + $0x220] sm:$0xff]  }
 0x56a   : > { %v8834_v35 = vpop.f32.mrb[14].mxu1  ;;  %17110 = vmatpush3.bf16.msra.mxu1 %v17800_v12  ;;  %17213 = vmatprep.subr.bf16.mxu0 %v17898_v1  ;;  %v20226_v12 = vld [vmem:[#allocation3 + $0x34] sm:$0xff]  }
 0x56b   : > { %8983 = vst [vmem:[#allocation2 + $0x100] sm:$0xff] %v8942_v20  ;;  %v8943_v45 = vadd.f32 %v8902_v58, %v8834_v35  ;;  %v16590_v44 = vpop.f32.mrb[15].mxu1  ;;  %v20209_v47 = vpop.f32.mrb[20].mxu0  ;;  %17111 = vmatprep.subr.bf16.mxu1 %v17898_v1  ;;  %v8904_v35 = vld [vmem:[#allocation2 + $0x118] sm:$0xff]  ;;  %v11192_v58 = vor.u32 %v11190_v7, %v11188_v8  ;;  %v11202_v8 = vshll.u32 %v20231_v25, 16  ;;  %v11198_v7 = vshrl.u32 %v20198_v24, 16 }
 0x56c   : > { %v16693_v54 = vpop.f32.mrb[21].mxu0  ;;  %v11897_v44 = vrot.slane %v20226_v12, 1  ;;  %v20259_v12 = vld [vmem:[#allocation3 + $0x3c] sm:$0xff]  }
 0x56d   : > { %8984 = vst [vmem:[#allocation2 + $0x108] sm:$0xff] %v8943_v45  ;;  %16928 = vmatmul.mubr.bf16.gmra.mrb[120].mxu1 %v11189_v40  ;;  %v20215_v46 = vpop.f32.mrb[22].mxu0  ;;  %17214 = vmatpush3.bf16.msra.mxu0 %v17818_v6  ;;  %v11197_v40 = vsel %vm3743_vm4, %v11192_v58, %v11196_v11  ;;  %v11200_v58 = vor.u32 %v11198_v7, %v11196_v11  ;;  %v11206_v7 = vshrl.u32 %v20231_v25, 16 }
 0x56e   : > { %v16694_v55 = vpop.f32.mrb[23].mxu0  ;;  %16931 = vmatprep.mubr.msk.bf16.mxu1 %vm17899_vm0, %v17898_v1  ;;  %17112 = vmatpush3.bf16.msra.mxu1 %v17807_v50 }
 0x56f   : > { %17113 = vmatprep.subr.bf16.mxu1 %v17898_v1  ;;  %17215 = vmatprep.subr.bf16.mxu0 %v17898_v1 }
 0x570   : > { %v8839_v19 = vpop.f32.mrb[16].mxu1  ;;  %17032 = vmatmul.mubr.bf16.gmra.mrb[128].mxu0 %v11896_v3  ;;  %v11898_v3 = vsel %vm5184_vm5, %v11895_v33, %v11897_v44 }
 0x571   : > { %v8944_v20 = vadd.f32 %v8903_v17, %v8839_v19  ;;  %v16593_v18 = vpop.f32.mrb[17].mxu1  ;;  %17035 = vmatprep.mubr.msk.bf16.mxu0 %vm17899_vm0, %v17898_v1  ;;  %17216 = vmatpush3.bf16.msra.mxu0 %v17825_v57  ;;  %v17840_v57 = vld [vmem:[%s20939_s4 + $0x30] sm:$0xff]   ;;  %v8905_v17 = vld [vmem:[#allocation2 + $0x120] sm:$0xff] }
 0x572   : > { %v8842_v6 = vpop.f32.mrb[18].mxu1  ;;  %17114 = vmatpush3.bf16.msra.mxu1 %v17815_v63  ;;  %17217 = vmatprep.subr.bf16.mxu0 %v17898_v1  ;;  %v17829_v63 = vld [vmem:[%s20938_s3 + $0x228] sm:$0xff]  }
 0x573   : > { %8985 = vst [vmem:[#allocation2 + $0x110] sm:$0xff] %v8944_v20  ;;  %v8945_v23 = vadd.f32 %v8904_v35, %v8842_v6  ;;  %v16594_v50 = vpop.f32.mrb[19].mxu1  ;;  %v20242_v45 = vpop.f32.mrb[24].mxu0  ;;  %17115 = vmatprep.subr.bf16.mxu1 %v17898_v1  ;;  %v11204_v20 = vrot.slane %v11202_v8, 1  ;;  %v20264_v18 = vld [vmem:[#allocation3 + $0x3c] sm:$0xff]  }
 0x574   : > { %v16697_v54 = vpop.f32.mrb[25].mxu0  ;;  %v8906_v35 = vld [vmem:[#allocation2 + $0x128] sm:$0xff]  ;;  %v11210_v11 = vshll.u32 %v20264_v18, 16 }
 0x575   : > { %8986 = vst [vmem:[#allocation2 + $0x118] sm:$0xff] %v8945_v23  ;;  %16932 = vmatmul.mubr.bf16.gmra.mrb[124].mxu1 %v11197_v40  ;;  %v20248_v28 = vpop.f32.mrb[26].mxu0  ;;  %17218 = vmatpush3.bf16.msra.mxu0 %v17833_v59  ;;  %v11899_v54 = vrot.slane %v20259_v12, 1  ;;  %v11205_v8 = vsel %vm3743_vm4, %v11200_v58, %v11204_v20  ;;  %v17805_v12 = vld [vmem:[#allocation3 + $0x44] sm:$0xff]  }
 0x576   : > { %v16698_v55 = vpop.f32.mrb[27].mxu0  ;;  %16935 = vmatprep.mubr.msk.bf16.mxu1 %vm17899_vm0, %v17898_v1  ;;  %17116 = vmatpush3.bf16.msra.mxu1 %v17822_v32  ;;  %v17836_v32 = vld [vmem:[%s20938_s3 + $0x230] sm:$0xff]  }
 0x577   : > { %17117 = vmatprep.subr.bf16.mxu1 %v17898_v1  ;;  %17219 = vmatprep.subr.bf16.mxu0 %v17898_v1 }
 0x578   : > { %v8847_v19 = vpop.f32.mrb[20].mxu1  ;;  %17036 = vmatmul.mubr.bf16.gmra.mrb[132].mxu0 %v11898_v3  ;;  %v11900_v3 = vsel %vm5184_vm5, %v11897_v44, %v11899_v54 }
 0x579   : > { %v8946_v59 = vadd.f32 %v8905_v17, %v8847_v19  ;;  %v16597_v6 = vpop.f32.mrb[21].mxu1  ;;  %17039 = vmatprep.mubr.msk.bf16.mxu0 %vm17899_vm0, %v17898_v1  ;;  %17220 = vmatpush3.bf16.msra.mxu0 %v17840_v57  ;;  %v8907_v17 = vld [vmem:[#allocation2 + $0x130] sm:$0xff] }
 0x57a   : > { %v8850_v33 = vpop.f32.mrb[22].mxu1  ;;  %17118 = vmatpush3.bf16.msra.mxu1 %v17829_v63  ;;  %17221 = vmatprep.subr.bf16.mxu0 %v17898_v1  ;;  %v17844_v63 = vld [vmem:[%s20938_s3 + $0x238] sm:$0xff]   ;;  %v20288_v6 = vld [vmem:[#allocation3 + $0x44] sm:$0xff]  }
 0x57b   : > { %8987 = vst [vmem:[#allocation2 + $0x120] sm:$0xff] %v8946_v59  ;;  %v8947_v24 = vadd.f32 %v8906_v35, %v8850_v33  ;;  %v16598_v23 = vpop.f32.mrb[23].mxu1  ;;  %v20272_v50 = vpop.f32.mrb[28].mxu0  ;;  %17119 = vmatprep.subr.bf16.mxu1 %v17898_v1  ;;  %v11212_v59 = vrot.slane %v11210_v11, 1  ;;  %v11218_v11 = vshll.u32 %v20288_v6, 16 }
 0x57c   : > { %v16701_v40 = vpop.f32.mrb[29].mxu0 }
 0x57d   : > { %8988 = vst [vmem:[#allocation2 + $0x128] sm:$0xff] %v8947_v24  ;;  %16936 = vmatmul.mubr.bf16.gmra.mrb[128].mxu1 %v11205_v8  ;;  %v20278_v57 = vpop.f32.mrb[30].mxu0  ;;  %v11208_v24 = vor.u32 %v11206_v7, %v11204_v20  ;;  %v11901_v8 = vrot.slane %v17805_v12, 1  ;;  %v8909_v7 = vld [vmem:[#allocation2 + $0x140] sm:$0xf] }
 0x57e   : > { %v16702_v55 = vpop.f32.mrb[31].mxu0  ;;  %16939 = vmatprep.mubr.msk.bf16.mxu1 %vm17899_vm0, %v17898_v1  ;;  %17120 = vmatpush3.bf16.msra.mxu1 %v17836_v32  ;;  %v8908_v32 = vld [vmem:[#allocation2 + $0x138] sm:$0xff] }
 0x57f   : > { %17121 = vmatprep.subr.bf16.mxu1 %v17898_v1  ;;  %v11213_v25 = vsel %vm3743_vm4, %v11208_v24, %v11212_v59 }
 0x580   : > { %v8855_v19 = vpop.f32.mrb[24].mxu1  ;;  %17040 = vmatmul.mubr.bf16.gmra.mrb[136].mxu0 %v11900_v3 }
 0x581   : > { %v8948_v33 = vadd.f32 %v8907_v17, %v8855_v19  ;;  %v16601_v35 = vpop.f32.mrb[25].mxu1  ;;  %17043 = vmatprep.mubr.msk.bf16.mxu0 %vm17899_vm0, %v17898_v1  ;;  %v17846_v19 = vld [vmem:[%s20939_s4 + $0x38] sm:$0xff]  }
 0x582   : > { %v8858_v58 = vpop.f32.mrb[26].mxu1  ;;  %17122 = vmatpush3.bf16.msra.mxu1 %v17844_v63  ;;  %v11902_v63 = vsel %vm5184_vm5, %v11899_v54, %v11901_v8  ;;  %v17808_v17 = vld [vmem:[#allocation3 + $0x4c] sm:$0xff]   ;;  %17222 = vmatpush3.bf16.msra.mxu0 %v17846_v19  ;;  %v11220_v35 = vrot.slane %v11218_v11, 1 }
 0x583   : > { %8989 = vst [vmem:[#allocation2 + $0x130] sm:$0xff] %v8948_v33  ;;  %v8949_v44 = vadd.f32 %v8908_v32, %v8858_v58  ;;  %v16602_v23 = vpop.f32.mrb[27].mxu1  ;;  %v20292_v40 = vpop.f32.mrb[32].mxu0  ;;  %v11214_v33 = vshrl.u32 %v20264_v18, 16  ;;  %v17809_v58 = vld [vmem:[#allocation3 + $0x4c] sm:$0xff]   ;;  %v11903_v54 = vrot.slane %v17808_v17, 1 }
 0x584   : > { %v16705_v55 = vpop.f32.mrb[33].mxu0  ;;  %v11222_v17 = vshrl.u32 %v20288_v6, 16 }
 0x585   : > { %8990 = vst [vmem:[#allocation2 + $0x138] sm:$0xff] %v8949_v44  ;;  %16940 = vmatmul.mubr.bf16.gmra.mrb[132].mxu1 %v11213_v25  ;;  %v9610_v3 = vpop.f32.mrb[34].mxu0  ;;  %v11216_v23 = vor.u32 %v11214_v33, %v11212_v59  ;;  %v17810_v33 = vld [vmem:[#allocation3 + $0x54] sm:$0xff]  }
 0x586   : > { %v16706_v20 = vpop.f32.mrb[35].mxu0  ;;  %16943 = vmatprep.mubr.msk.bf16.mxu1 %vm17899_vm0, %v17898_v1 }
 0x587   : > { %v11221_v19 = vsel %vm3743_vm4, %v11216_v23, %v11220_v35  ;;  %v9613_v20 = vld [vmem:[#allocation2] sm:$0xff] }
 0x588   : > { %v8863_v12 = vpop.f32.mrb[28].mxu1  ;;  %17044 = vmatmul.mubr.bf16.gmra.mrb[140].mxu0 %v11902_v63  ;;  %v11226_v63 = vshll.u32 %v17809_v58, 16  ;;  %v9654_v59 = vadd.f32 %v9613_v20, %v20014_v36 }
 0x589   : > { %v8950_v32 = vadd.f32 %v8909_v7, %v8863_v12  ;;  %v16605_v24 = vpop.f32.mrb[29].mxu1  ;;  %17047 = vmatprep.mubr.msk.bf16.mxu0 %vm17899_vm0, %v17898_v1  ;;  %v9614_v12 = vld [vmem:[#allocation2 + $0x8] sm:$0xff]  ;;  %v11904_v7 = vsel %vm5184_vm5, %v11901_v8, %v11903_v54 }
 0x58a   : > { %v8866_v44 = vpop.f32.mrb[30].mxu1  ;;  %v11228_v24 = vrot.slane %v11226_v63, 1  ;;  %v9615_v63 = vld [vmem:[#allocation2 + $0x10] sm:$0xff] }
 0x58b   : > { %8991 = vst [vmem:[#allocation2 + $0x140] sm:$0xf] %v8950_v32  ;;  %v16606_v55 = vpop.f32.mrb[31].mxu1  ;;  %v20305_v25 = vpop.f32.mrb[36].mxu0  ;;  %v20315_v44 = vld [vmem:[#allocation3 + $0x54] sm:$0xff]  }
 0x58c   : > { %v16825_v3 = vpop.f32.mrb[37].mxu0 }
 0x58d   : > { %16944 = vmatmul.mubr.bf16.gmra.mrb[136].mxu1 %v11221_v19  ;;  %v20308_v18 = vpop.f32.mrb[38].mxu0  ;;  %v9655_v3 = vadd.f32 %v9614_v12, %v20016_v31 }
 0x58e   : > { %20943 = vst [vmem:[#allocation4_spill] sm:$0xff] %v20308_v18  ;;  %v16826_v11 = vpop.f32.mrb[39].mxu0  ;;  %16947 = vmatprep.mubr.msk.bf16.mxu1 %vm17899_vm0, %v17898_v1 }
 0x58f   : > { %v11224_v11 = vor.u32 %v11222_v17, %v11220_v35  ;;  %v9656_v35 = vadd.f32 %v9615_v63, %v20023_v27 }
 0x590   : > { %v10000_v32 = vpop.f32.mrb[32].mxu1  ;;  %17048 = vmatmul.mubr.bf16.gmra.mrb[144].mxu0 %v11904_v7  ;;  %v11905_v7 = vrot.slane %v17810_v33, 1  ;;  %v17813_v33 = vld [vmem:[#allocation3 + $0x5c] sm:$0xff]  }
 0x591   : > { %v10207_v23 = vadd.f32 %v10000_v32, %v9654_v59  ;;  %v16725_v55 = vpop.f32.mrb[33].mxu1  ;;  %17051 = vmatprep.mubr.msk.bf16.mxu0 %vm17899_vm0, %v17898_v1  ;;  %v11229_v6 = vsel %vm3743_vm4, %v11224_v11, %v11228_v24  ;;  %v11234_v59 = vshll.u32 %v20315_v44, 16  ;;  %v9616_v32 = vld [vmem:[#allocation2 + $0x18] sm:$0xff] }
 0x592   : > { %v10003_v19 = vpop.f32.mrb[34].mxu1  ;;  %v11906_v17 = vsel %vm5184_vm5, %v11903_v54, %v11905_v7 }
 0x593   : > { %10248 = vst [vmem:[#allocation2] sm:$0xff] %v10207_v23  ;;  %v10208_v36 = vadd.f32 %v10003_v19, %v9655_v3  ;;  %v16726_v8 = vpop.f32.mrb[35].mxu1  ;;  %v20320_v20 = vpop.f32.mrb[40].mxu0  ;;  %v11230_v23 = vshrl.u32 %v17809_v58, 16  ;;  %v11236_v55 = vrot.slane %v11234_v59, 1  ;;  %v20330_v3 = vld [vmem:[#allocation3 + $0x5c] sm:$0xff]  }
 0x594   : > { %v16829_v18 = vpop.f32.mrb[41].mxu0  ;;  %v9617_v59 = vld [vmem:[#allocation2 + $0x20] sm:$0xff] }
 0x595   : > { %10249 = vst [vmem:[#allocation2 + $0x8] sm:$0xff] %v10208_v36  ;;  %16948 = vmatmul.mubr.bf16.gmra.mrb[140].mxu1 %v11229_v6  ;;  %v20324_v31 = vpop.f32.mrb[42].mxu0  ;;  %v9657_v36 = vadd.f32 %v9616_v32, %v20025_v37  ;;  %v11232_v6 = vor.u32 %v11230_v23, %v11228_v24  ;;  %v9658_v24 = vadd.f32 %v9617_v59, %v20032_v42 }
 0x596   : > { %v16830_v12 = vpop.f32.mrb[43].mxu0  ;;  %16951 = vmatprep.mubr.msk.bf16.mxu1 %vm17899_vm0, %v17898_v1 }
 0x597   : > { %v11907_v12 = vrot.slane %v17813_v33, 1  ;;  %v11237_v58 = vsel %vm3743_vm4, %v11232_v6, %v11236_v55  ;;  %v17816_v33 = vld [vmem:[#allocation3 + $0x64] sm:$0xff]  }
 0x598   : > { %v10008_v18 = vpop.f32.mrb[36].mxu1  ;;  %17052 = vmatmul.mubr.bf16.gmra.mrb[148].mxu0 %v11906_v17 }
 0x599   : > { %v10209_v19 = vadd.f32 %v10008_v18, %v9656_v35  ;;  %v16729_v11 = vpop.f32.mrb[37].mxu1  ;;  %17055 = vmatprep.mubr.msk.bf16.mxu0 %vm17899_vm0, %v17898_v1  ;;  %v11242_v35 = vshll.u32 %v20330_v3, 16  ;;  %v9618_v18 = vld [vmem:[#allocation2 + $0x28] sm:$0xff]  ;;  %v11908_v23 = vsel %vm5184_vm5, %v11905_v7, %v11907_v12 }
 0x59a   : > { %v10011_v8 = vpop.f32.mrb[38].mxu1  ;;  %v11238_v11 = vshrl.u32 %v20315_v44, 16 }
 0x59b   : > { %10250 = vst [vmem:[#allocation2 + $0x10] sm:$0xff] %v10209_v19  ;;  %v10210_v27 = vadd.f32 %v10011_v8, %v9657_v36  ;;  %v16730_v63 = vpop.f32.mrb[39].mxu1  ;;  %v20335_v54 = vpop.f32.mrb[44].mxu0  ;;  %v11244_v36 = vrot.slane %v11242_v35, 1  ;;  %v20346_v8 = vld [vmem:[#allocation3 + $0x64] sm:$0xff]  }
 0x59c   : > { %v16833_v17 = vpop.f32.mrb[45].mxu0  ;;  %v9659_v63 = vadd.f32 %v9618_v18, %v20034_v52  ;;  %v9619_v35 = vld [vmem:[#allocation2 + $0x30] sm:$0xff] }
 0x59d   : > { %10251 = vst [vmem:[#allocation2 + $0x18] sm:$0xff] %v10210_v27  ;;  %16952 = vmatmul.mubr.bf16.gmra.mrb[144].mxu1 %v11237_v58  ;;  %v20339_v37 = vpop.f32.mrb[46].mxu0  ;;  %v11240_v58 = vor.u32 %v11238_v11, %v11236_v55  ;;  %v9660_v55 = vadd.f32 %v9619_v35, %v20041_v53 }
 0x59e   : > { %v16834_v32 = vpop.f32.mrb[47].mxu0  ;;  %16955 = vmatprep.mubr.msk.bf16.mxu1 %vm17899_vm0, %v17898_v1 }
 0x59f   : > { %v11909_v32 = vrot.slane %v17816_v33, 1  ;;  %v11245_v44 = vsel %vm3743_vm4, %v11240_v58, %v11244_v36  ;;  %v17819_v33 = vld [vmem:[#allocation3 + $0x6c] sm:$0xff]  }
 0x5a0   : > { %v10016_v19 = vpop.f32.mrb[40].mxu1  ;;  %17056 = vmatmul.mubr.bf16.gmra.mrb[152].mxu0 %v11908_v23 }
 0x5a1   : > { %v10211_v6 = vadd.f32 %v10016_v19, %v9658_v24  ;;  %v16733_v27 = vpop.f32.mrb[41].mxu1  ;;  %17059 = vmatprep.mubr.msk.bf16.mxu0 %vm17899_vm0, %v17898_v1  ;;  %v11250_v24 = vshll.u32 %v20346_v8, 16  ;;  %v9620_v19 = vld [vmem:[#allocation2 + $0x38] sm:$0xff]  ;;  %v11910_v11 = vsel %vm5184_vm5, %v11907_v12, %v11909_v32 }
 0x5a2   : > { %v10019_v17 = vpop.f32.mrb[42].mxu1  ;;  %v11246_v27 = vshrl.u32 %v20330_v3, 16 }
 0x5a3   : > { %10252 = vst [vmem:[#allocation2 + $0x20] sm:$0xff] %v10211_v6  ;;  %v10212_v42 = vadd.f32 %v10019_v17, %v9659_v63  ;;  %v16734_v7 = vpop.f32.mrb[43].mxu1  ;;  %v20351_v59 = vpop.f32.mrb[48].mxu0  ;;  %v11252_v63 = vrot.slane %v11250_v24, 1  ;;  %v20362_v17 = vld [vmem:[#allocation3 + $0x6c] sm:$0xff]   ;;  %v9621_v24 = vld [vmem:[#allocation2 + $0x40] sm:$0xff] }
 0x5a4   : > { %v16837_v23 = vpop.f32.mrb[49].mxu0  ;;  %v9661_v7 = vadd.f32 %v9620_v19, %v20043_v9 }
 0x5a5   : > { %10253 = vst [vmem:[#allocation2 + $0x28] sm:$0xff] %v10212_v42  ;;  %16956 = vmatmul.mubr.bf16.gmra.mrb[148].mxu1 %v11245_v44  ;;  %v20355_v52 = vpop.f32.mrb[50].mxu0  ;;  %v11248_v44 = vor.u32 %v11246_v27, %v11244_v36  ;;  %v9653_v36 = vld [vmem:[#allocation2 + $0x140] sm:$0xf]  ;;  %v9662_v27 = vadd.f32 %v9621_v24, %v20050_v22 }
 0x5a6   : > { %v16838_v18 = vpop.f32.mrb[51].mxu0  ;;  %16959 = vmatprep.mubr.msk.bf16.mxu1 %vm17899_vm0, %v17898_v1 }
 0x5a7   : > { %v11911_v18 = vrot.slane %v17819_v33, 1  ;;  %v11253_v3 = vsel %vm3743_vm4, %v11248_v44, %v11252_v63 }
 0x5a8   : > { %v10024_v6 = vpop.f32.mrb[44].mxu1  ;;  %17060 = vmatmul.mubr.bf16.gmra.mrb[156].mxu0 %v11910_v11 }
 0x5a9   : > { %v10213_v58 = vadd.f32 %v10024_v6, %v9660_v55  ;;  %v16737_v42 = vpop.f32.mrb[45].mxu1  ;;  %17063 = vmatprep.mubr.msk.bf16.mxu0 %vm17899_vm0, %v17898_v1  ;;  %v11258_v55 = vshll.u32 %v20362_v17, 16  ;;  %v9622_v6 = vld [vmem:[#allocation2 + $0x48] sm:$0xff]  ;;  %v11912_v33 = vsel %vm5184_vm5, %v11909_v32, %v11911_v18 }
 0x5aa   : > { %v10027_v23 = vpop.f32.mrb[46].mxu1  ;;  %v9694_v42 = vadd.f32 %v9653_v36, %v20292_v40 }
 0x5ab   : > { %10254 = vst [vmem:[#allocation2 + $0x30] sm:$0xff] %v10213_v58  ;;  %v10214_v53 = vadd.f32 %v10027_v23, %v9661_v7  ;;  %v16738_v12 = vpop.f32.mrb[47].mxu1  ;;  %v20367_v35 = vpop.f32.mrb[52].mxu0  ;;  %v17821_v58 = vld [vmem:[#allocation3 + $0x74] sm:$0xff]   ;;  %v11254_v23 = vshrl.u32 %v20346_v8, 16  ;;  %v11260_v44 = vrot.slane %v11258_v55, 1 }
 0x5ac   : > { %v16841_v11 = vpop.f32.mrb[53].mxu0  ;;  %9735 = vst [vmem:[#allocation2 + $0x140] sm:$0xf] %v9694_v42  ;;  %v11913_v36 = vrot.slane %v17821_v58, 1  ;;  %v9624_v42 = vld [vmem:[#allocation2 + $0x58] sm:$0xff]  ;;  %v17824_v58 = vld [vmem:[#allocation3 + $0x7c] sm:$0xff]  }
 0x5ad   : > { %10255 = vst [vmem:[#allocation2 + $0x38] sm:$0xff] %v10214_v53  ;;  %16960 = vmatmul.mubr.bf16.gmra.mrb[152].mxu1 %v11253_v3  ;;  %v20371_v9 = vpop.f32.mrb[54].mxu0  ;;  %v20379_v53 = vld [vmem:[#allocation3 + $0x74] sm:$0xff]   ;;  %v9663_v3 = vadd.f32 %v9622_v6, %v20052_v30  ;;  %v11256_v32 = vor.u32 %v11254_v23, %v11252_v63 }
 0x5ae   : > { %v16842_v19 = vpop.f32.mrb[55].mxu0  ;;  %16963 = vmatprep.mubr.msk.bf16.mxu1 %vm17899_vm0, %v17898_v1 }
 0x5af   : > { %v11261_v55 = vsel %vm3743_vm4, %v11256_v32, %v11260_v44 }
 0x5b0   : > { %v10032_v7 = vpop.f32.mrb[48].mxu1  ;;  %17064 = vmatmul.mubr.bf16.gmra.mrb[160].mxu0 %v11912_v33  ;;  %v9623_v33 = vld [vmem:[#allocation2 + $0x50] sm:$0xff] }
 0x5b1   : > { %v10215_v12 = vadd.f32 %v10032_v7, %v9662_v27  ;;  %v16741_v11 = vpop.f32.mrb[49].mxu1  ;;  %17067 = vmatprep.mubr.msk.bf16.mxu0 %vm17899_vm0, %v17898_v1  ;;  %v11266_v27 = vshll.u32 %v20379_v53, 16  ;;  %v9664_v63 = vadd.f32 %v9623_v33, %v20059_v41  ;;  %v11914_v7 = vsel %vm5184_vm5, %v11911_v18, %v11913_v36 }
 0x5b2   : > { %v10035_v22 = vpop.f32.mrb[50].mxu1  ;;  %v11915_v33 = vrot.slane %v17824_v58, 1  ;;  %v17827_v58 = vld [vmem:[#allocation3 + $0x84] sm:$0xff]  }
 0x5b3   : > { %10256 = vst [vmem:[#allocation2 + $0x40] sm:$0xff] %v10215_v12  ;;  %v10216_v24 = vadd.f32 %v10035_v22, %v9663_v3  ;;  %v16742_v40 = vpop.f32.mrb[51].mxu1  ;;  %v20384_v19 = vpop.f32.mrb[56].mxu0  ;;  %v11262_v12 = vshrl.u32 %v20362_v17, 16  ;;  %v11268_v11 = vrot.slane %v11266_v27, 1  ;;  %v20395_v3 = vld [vmem:[#allocation3 + $0x7c] sm:$0xff]  }
 0x5b4   : > { %v16845_v8 = vpop.f32.mrb[57].mxu0  ;;  %v9625_v27 = vld [vmem:[#allocation2 + $0x60] sm:$0xff] }
 0x5b5   : > { %10257 = vst [vmem:[#allocation2 + $0x48] sm:$0xff] %v10216_v24  ;;  %16964 = vmatmul.mubr.bf16.gmra.mrb[156].mxu1 %v11261_v55  ;;  %v20388_v30 = vpop.f32.mrb[58].mxu0  ;;  %v9665_v24 = vadd.f32 %v9624_v42, %v20061_v48  ;;  %v11264_v8 = vor.u32 %v11262_v12, %v11260_v44  ;;  %v9666_v44 = vadd.f32 %v9625_v27, %v20068_v4  ;;  %v11917_v27 = vrot.slane %v17827_v58, 1  ;;  %v17830_v58 = vld [vmem:[#allocation3 + $0x8c] sm:$0xff]  }
 0x5b6   : > { %v16846_v6 = vpop.f32.mrb[59].mxu0  ;;  %16967 = vmatprep.mubr.msk.bf16.mxu1 %vm17899_vm0, %v17898_v1 }
 0x5b7   : > { %v11269_v17 = vsel %vm3743_vm4, %v11264_v8, %v11268_v11 }
 0x5b8   : > { %v10040_v23 = vpop.f32.mrb[52].mxu1  ;;  %17068 = vmatmul.mubr.bf16.gmra.mrb[164].mxu0 %v11914_v7  ;;  %v9626_v7 = vld [vmem:[#allocation2 + $0x68] sm:$0xff] }
 0x5b9   : > { %v10217_v22 = vadd.f32 %v10040_v23, %v9664_v63  ;;  %v16745_v32 = vpop.f32.mrb[53].mxu1  ;;  %17071 = vmatprep.mubr.msk.bf16.mxu0 %vm17899_vm0, %v17898_v1  ;;  %v11274_v63 = vshll.u32 %v20395_v3, 16  ;;  %v11916_v23 = vsel %vm5184_vm5, %v11913_v36, %v11915_v33 }
 0x5ba   : > { %v10043_v40 = vpop.f32.mrb[54].mxu1 }
 0x5bb   : > { %10258 = vst [vmem:[#allocation2 + $0x50] sm:$0xff] %v10217_v22  ;;  %v10218_v41 = vadd.f32 %v10043_v40, %v9665_v24  ;;  %v16746_v18 = vpop.f32.mrb[55].mxu1  ;;  %v20400_v55 = vpop.f32.mrb[60].mxu0  ;;  %v11270_v22 = vshrl.u32 %v20379_v53, 16  ;;  %v11276_v32 = vrot.slane %v11274_v63, 1  ;;  %v20411_v24 = vld [vmem:[#allocation3 + $0x84] sm:$0xff]  }
 0x5bc   : > { %v16849_v6 = vpop.f32.mrb[61].mxu0  ;;  %v9627_v63 = vld [vmem:[#allocation2 + $0x70] sm:$0xff] }
 0x5bd   : > { %10259 = vst [vmem:[#allocation2 + $0x58] sm:$0xff] %v10218_v41  ;;  %16968 = vmatmul.mubr.bf16.gmra.mrb[160].mxu1 %v11269_v17  ;;  %v20404_v48 = vpop.f32.mrb[62].mxu0  ;;  %v9667_v41 = vadd.f32 %v9626_v7, %v20070_v13  ;;  %v11272_v6 = vor.u32 %v11270_v22, %v11268_v11  ;;  %v9668_v11 = vadd.f32 %v9627_v63, %v20077_v26  ;;  %v11919_v63 = vrot.slane %v17830_v58, 1  ;;  %v17832_v58 = vld [vmem:[#allocation3 + $0x94] sm:$0xff]  }
 0x5be   : > { %v16850_v42 = vpop.f32.mrb[63].mxu0  ;;  %16971 = vmatprep.mubr.msk.bf16.mxu1 %vm17899_vm0, %v17898_v1 }
 0x5bf   : > { %v11277_v53 = vsel %vm3743_vm4, %v11272_v6, %v11276_v32 }
 0x5c0   : > { %v10048_v12 = vpop.f32.mrb[56].mxu1  ;;  %17072 = vmatmul.mubr.bf16.gmra.mrb[168].mxu0 %v11916_v23  ;;  %v9628_v23 = vld [vmem:[#allocation2 + $0x78] sm:$0xff] }
 0x5c1   : > { %v10219_v40 = vadd.f32 %v10048_v12, %v9666_v44  ;;  %v16749_v8 = vpop.f32.mrb[57].mxu1  ;;  %17075 = vmatprep.mubr.msk.bf16.mxu0 %vm17899_vm0, %v17898_v1  ;;  %v11282_v44 = vshll.u32 %v20411_v24, 16  ;;  %v11918_v12 = vsel %vm5184_vm5, %v11915_v33, %v11917_v27 }
 0x5c2   : > { %v10051_v18 = vpop.f32.mrb[58].mxu1 }
 0x5c3   : > { %10260 = vst [vmem:[#allocation2 + $0x60] sm:$0xff] %v10219_v40  ;;  %v10220_v4 = vadd.f32 %v10051_v18, %v9667_v41  ;;  %v16750_v36 = vpop.f32.mrb[59].mxu1  ;;  %v20416_v17 = vpop.f32.mrb[64].mxu0  ;;  %v11278_v40 = vshrl.u32 %v20395_v3, 16  ;;  %v11284_v8 = vrot.slane %v11282_v44, 1  ;;  %v20427_v41 = vld [vmem:[#allocation3 + $0x8c] sm:$0xff]  }
 0x5c4   : > { %v16853_v42 = vpop.f32.mrb[65].mxu0  ;;  %v9629_v44 = vld [vmem:[#allocation2 + $0x80] sm:$0xff] }
 0x5c5   : > { %10261 = vst [vmem:[#allocation2 + $0x68] sm:$0xff] %v10220_v4  ;;  %16972 = vmatmul.mubr.bf16.gmra.mrb[164].mxu1 %v11277_v53  ;;  %v20420_v13 = vpop.f32.mrb[66].mxu0  ;;  %v9669_v4 = vadd.f32 %v9628_v23, %v20079_v34  ;;  %v11280_v42 = vor.u32 %v11278_v40, %v11276_v32  ;;  %v9670_v32 = vadd.f32 %v9629_v44, %v20086_v51  ;;  %v11921_v44 = vrot.slane %v17832_v58, 1  ;;  %v17835_v58 = vld [vmem:[#allocation3 + $0x9c] sm:$0xff]  }
 0x5c6   : > { %v16854_v7 = vpop.f32.mrb[67].mxu0  ;;  %16975 = vmatprep.mubr.msk.bf16.mxu1 %vm17899_vm0, %v17898_v1 }
 0x5c7   : > { %v11285_v3 = vsel %vm3743_vm4, %v11280_v42, %v11284_v8 }
 0x5c8   : > { %v10056_v22 = vpop.f32.mrb[60].mxu1  ;;  %17076 = vmatmul.mubr.bf16.gmra.mrb[172].mxu0 %v11918_v12  ;;  %v9630_v12 = vld [vmem:[#allocation2 + $0x88] sm:$0xff] }
 0x5c9   : > { %v10221_v18 = vadd.f32 %v10056_v22, %v9668_v11  ;;  %v16753_v6 = vpop.f32.mrb[61].mxu1  ;;  %17079 = vmatprep.mubr.msk.bf16.mxu0 %vm17899_vm0, %v17898_v1  ;;  %v11290_v11 = vshll.u32 %v20427_v41, 16  ;;  %v11920_v22 = vsel %vm5184_vm5, %v11917_v27, %v11919_v63 }
 0x5ca   : > { %v10059_v36 = vpop.f32.mrb[62].mxu1 }
 0x5cb   : > { %10262 = vst [vmem:[#allocation2 + $0x70] sm:$0xff] %v10221_v18  ;;  %v10222_v26 = vadd.f32 %v10059_v36, %v9669_v4  ;;  %v16754_v33 = vpop.f32.mrb[63].mxu1  ;;  %v20432_v53 = vpop.f32.mrb[68].mxu0  ;;  %v11286_v18 = vshrl.u32 %v20411_v24, 16  ;;  %v11292_v6 = vrot.slane %v11290_v11, 1  ;;  %v20443_v4 = vld [vmem:[#allocation3 + $0x94] sm:$0xff]  }
 0x5cc   : > { %v16857_v7 = vpop.f32.mrb[69].mxu0  ;;  %v9631_v11 = vld [vmem:[#allocation2 + $0x90] sm:$0xff] }
 0x5cd   : > { %10263 = vst [vmem:[#allocation2 + $0x78] sm:$0xff] %v10222_v26  ;;  %16976 = vmatmul.mubr.bf16.gmra.mrb[168].mxu1 %v11285_v3  ;;  %v20436_v34 = vpop.f32.mrb[70].mxu0  ;;  %v9671_v26 = vadd.f32 %v9630_v12, %v20088_v60  ;;  %v11288_v7 = vor.u32 %v11286_v18, %v11284_v8  ;;  %v9672_v8 = vadd.f32 %v9631_v11, %v20095_v14  ;;  %v11923_v11 = vrot.slane %v17835_v58, 1 }
 0x5ce   : > { %v16858_v23 = vpop.f32.mrb[71].mxu0  ;;  %16979 = vmatprep.mubr.msk.bf16.mxu1 %vm17899_vm0, %v17898_v1 }
 0x5cf   : > { %v11293_v24 = vsel %vm3743_vm4, %v11288_v7, %v11292_v6 }
 0x5d0   : > { %v10064_v40 = vpop.f32.mrb[64].mxu1  ;;  %17080 = vmatmul.mubr.bf16.gmra.mrb[176].mxu0 %v11920_v22  ;;  %v9632_v22 = vld [vmem:[#allocation2 + $0x98] sm:$0xff] }
 0x5d1   : > { %v10223_v36 = vadd.f32 %v10064_v40, %v9670_v32  ;;  %v16757_v42 = vpop.f32.mrb[65].mxu1  ;;  %17083 = vmatprep.mubr.msk.bf16.mxu0 %vm17899_vm0, %v17898_v1  ;;  %v11298_v32 = vshll.u32 %v20443_v4, 16  ;;  %v11922_v40 = vsel %vm5184_vm5, %v11919_v63, %v11921_v44 }
 0x5d2   : > { %v10067_v33 = vpop.f32.mrb[66].mxu1 }
 0x5d3   : > { %10264 = vst [vmem:[#allocation2 + $0x80] sm:$0xff] %v10223_v36  ;;  %v10224_v51 = vadd.f32 %v10067_v33, %v9671_v26  ;;  %v16758_v27 = vpop.f32.mrb[67].mxu1  ;;  %v20448_v3 = vpop.f32.mrb[72].mxu0  ;;  %v11294_v36 = vshrl.u32 %v20427_v41, 16  ;;  %v11300_v42 = vrot.slane %v11298_v32, 1  ;;  %v17837_v26 = vld [vmem:[#allocation3 + $0x9c] sm:$0xff]  }
 0x5d4   : > { %v16861_v23 = vpop.f32.mrb[73].mxu0  ;;  %v9633_v32 = vld [vmem:[#allocation2 + $0xa0] sm:$0xff] }
 0x5d5   : > { %10265 = vst [vmem:[#allocation2 + $0x88] sm:$0xff] %v10224_v51  ;;  %16980 = vmatmul.mubr.bf16.gmra.mrb[172].mxu1 %v11293_v24  ;;  %v20452_v60 = vpop.f32.mrb[74].mxu0  ;;  %v9673_v51 = vadd.f32 %v9632_v22, %v20097_v21  ;;  %v11296_v23 = vor.u32 %v11294_v36, %v11292_v6  ;;  %v9634_v22 = vld [vmem:[#allocation2 + $0xa8] sm:$0xff]  ;;  %v9674_v6 = vadd.f32 %v9633_v32, %v20104_v39 }
 0x5d6   : > { %v16862_v12 = vpop.f32.mrb[75].mxu0  ;;  %16983 = vmatprep.mubr.msk.bf16.mxu1 %vm17899_vm0, %v17898_v1  ;;  %v17838_v36 = vld [vmem:[#allocation3 + $0xa4] sm:$0xff]  }
 0x5d7   : > { %v11301_v41 = vsel %vm3743_vm4, %v11296_v23, %v11300_v42  ;;  %v11925_v32 = vrot.slane %v17838_v36, 1 }
 0x5d8   : > { %v10072_v18 = vpop.f32.mrb[68].mxu1  ;;  %17084 = vmatmul.mubr.bf16.gmra.mrb[180].mxu0 %v11922_v40  ;;  %v11306_v40 = vshll.u32 %v17837_v26, 16 }
 0x5d9   : > { %v10225_v33 = vadd.f32 %v10072_v18, %v9672_v8  ;;  %v16761_v7 = vpop.f32.mrb[69].mxu1  ;;  %17087 = vmatprep.mubr.msk.bf16.mxu0 %vm17899_vm0, %v17898_v1  ;;  %v11924_v18 = vsel %vm5184_vm5, %v11921_v44, %v11923_v11  ;;  %v11926_v36 = vsel %vm5184_vm5, %v11923_v11, %v11925_v32 }
 0x5da   : > { %v10075_v27 = vpop.f32.mrb[70].mxu1  ;;  %v11308_v7 = vrot.slane %v11306_v40, 1  ;;  %v9635_v40 = vld [vmem:[#allocation2 + $0xb0] sm:$0xff] }
 0x5db   : > { %10266 = vst [vmem:[#allocation2 + $0x90] sm:$0xff] %v10225_v33  ;;  %v10226_v14 = vadd.f32 %v10075_v27, %v9673_v51  ;;  %v16762_v24 = vpop.f32.mrb[71].mxu1  ;;  %v20462_v63 = vpop.f32.mrb[76].mxu0  ;;  %v11302_v33 = vshrl.u32 %v20443_v4, 16  ;;  %v20472_v51 = vld [vmem:[#allocation3 + $0xa4] sm:$0xff]  }
 0x5dc   : > { %v16865_v12 = vpop.f32.mrb[77].mxu0 }
 0x5dd   : > { %10267 = vst [vmem:[#allocation2 + $0x98] sm:$0xff] %v10226_v14  ;;  %16984 = vmatmul.mubr.bf16.gmra.mrb[176].mxu1 %v11301_v41  ;;  %v20465_v8 = vpop.f32.mrb[78].mxu0  ;;  %v9675_v14 = vadd.f32 %v9634_v22, %v20106_v49  ;;  %v11304_v12 = vor.u32 %v11302_v33, %v11300_v42  ;;  %v11310_v42 = vshrl.u32 %v17837_v26, 16  ;;  %v17841_v33 = vld [vmem:[#allocation3 + $0xac] sm:$0xff]  }
 0x5de   : > { %v16866_v21 = vpop.f32.mrb[79].mxu0  ;;  %16987 = vmatprep.mubr.msk.bf16.mxu1 %vm17899_vm0, %v17898_v1  ;;  %v11927_v11 = vrot.slane %v17841_v33, 1 }
 0x5df   : > { %v11309_v4 = vsel %vm3743_vm4, %v11304_v12, %v11308_v7 }
 0x5e0   : > { %v10080_v58 = vpop.f32.mrb[72].mxu1  ;;  %17088 = vmatmul.mubr.bf16.gmra.mrb[184].mxu0 %v11924_v18  ;;  %v9636_v18 = vld [vmem:[#allocation2 + $0xb8] sm:$0xff] }
 0x5e1   : > { %v10227_v27 = vadd.f32 %v10080_v58, %v9674_v6  ;;  %v16765_v23 = vpop.f32.mrb[73].mxu1  ;;  %17091 = vmatprep.mubr.msk.bf16.mxu0 %vm17899_vm0, %v17898_v1  ;;  %v11314_v6 = vshll.u32 %v20472_v51, 16  ;;  %v9676_v58 = vadd.f32 %v9635_v40, %v20113_v2 }
 0x5e2   : > { %v10083_v24 = vpop.f32.mrb[74].mxu1  ;;  %v11312_v23 = vor.u32 %v11310_v42, %v11308_v7  ;;  %v9637_v7 = vld [vmem:[#allocation2 + $0xc0] sm:$0xff] }
 0x5e3   : > { %10268 = vst [vmem:[#allocation2 + $0xa0] sm:$0xff] %v10227_v27  ;;  %v10228_v39 = vadd.f32 %v10083_v24, %v9675_v14  ;;  %v16766_v44 = vpop.f32.mrb[75].mxu1  ;;  %v20477_v41 = vpop.f32.mrb[80].mxu0  ;;  %v11316_v14 = vrot.slane %v11314_v6, 1  ;;  %v17842_v24 = vld [vmem:[#allocation3 + $0xac] sm:$0xff]  }
 0x5e4   : > { %v16869_v21 = vpop.f32.mrb[81].mxu0  ;;  %v9677_v44 = vadd.f32 %v9636_v18, %v20115_v5  ;;  %v11322_v6 = vshll.u32 %v17842_v24, 16  ;;  %v9638_v18 = vld [vmem:[#allocation2 + $0xc8] sm:$0xff] }
 0x5e5   : > { %10269 = vst [vmem:[#allocation2 + $0xa8] sm:$0xff] %v10228_v39  ;;  %16988 = vmatmul.mubr.bf16.gmra.mrb[180].mxu1 %v11309_v4  ;;  %v20481_v49 = vpop.f32.mrb[82].mxu0 }
 0x5e6   : > { %v16870_v22 = vpop.f32.mrb[83].mxu0  ;;  %16991 = vmatprep.mubr.msk.bf16.mxu1 %vm17899_vm0, %v17898_v1 }
 0x5e7   : > { %v11317_v22 = vsel %vm3743_vm4, %v11312_v23, %v11316_v14  ;;  %v11318_v23 = vshrl.u32 %v20472_v51, 16 }
 0x5e8   : > { %v10088_v27 = vpop.f32.mrb[76].mxu1  ;;  %17092 = vmatmul.mubr.bf16.gmra.mrb[188].mxu0 %v11926_v36  ;;  %v11928_v36 = vsel %vm5184_vm5, %v11925_v32, %v11927_v11 }
 0x5e9   : > { %v10229_v12 = vadd.f32 %v10088_v27, %v9676_v58  ;;  %v16769_v39 = vpop.f32.mrb[77].mxu1  ;;  %17095 = vmatprep.mubr.msk.bf16.mxu0 %vm17899_vm0, %v17898_v1  ;;  %v9678_v58 = vadd.f32 %v9637_v7, %v20122_v38  ;;  %v17843_v27 = vld [vmem:[#allocation3 + $0xb4] ss:$0 sps:$4 sm:$0x77]  }
 0x5ea   : > { %v10091_v21 = vpop.f32.mrb[78].mxu1  ;;  %v17845_v39 = vld [vmem:[#allocation3 + $0xb4] ss:$0 sps:$4 sm:$0x77]   ;;  %v11929_v7 = vrot.slane %v17843_v27, 1 }
 0x5eb   : > { %10270 = vst [vmem:[#allocation2 + $0xb0] sm:$0xff] %v10229_v12  ;;  %v10230_v26 = vadd.f32 %v10091_v21, %v9677_v44  ;;  %v16770_v4 = vpop.f32.mrb[79].mxu1  ;;  %v20490_v2 = vpop.f32.mrb[84].mxu0  ;;  %v11324_v12 = vrot.slane %v11322_v6, 1  ;;  %v9639_v6 = vld [vmem:[#allocation2 + $0xd0] sm:$0xff] }
 0x5ec   : > { %v16873_v40 = vpop.f32.mrb[85].mxu0 }
 0x5ed   : > { %10271 = vst [vmem:[#allocation2 + $0xb8] sm:$0xff] %v10230_v26  ;;  %16992 = vmatmul.mubr.bf16.gmra.mrb[184].mxu1 %v11317_v22  ;;  %v20493_v42 = vpop.f32.mrb[86].mxu0  ;;  %v9679_v26 = vadd.f32 %v9638_v18, %v20124_v43  ;;  %v11320_v40 = vor.u32 %v11318_v23, %v11316_v14  ;;  %v9640_v18 = vld [vmem:[#allocation2 + $0xd8] sm:$0xff]  ;;  %v11326_v14 = vshrl.u32 %v17842_v24, 16  ;;  %v11930_v23 = vsel %vm5184_vm5, %v11927_v11, %v11929_v7 }
 0x5ee   : > { %v16874_v5 = vpop.f32.mrb[87].mxu0  ;;  %16995 = vmatprep.mubr.msk.bf16.mxu1 %vm17899_vm0, %v17898_v1 }
 0x5ef   : > { %v11325_v51 = vsel %vm3743_vm4, %v11320_v40, %v11324_v12  ;;  %v9681_v40 = vadd.f32 %v9640_v18, %v20133_v16  ;;  %v17847_v18 = vld [vmem:[#allocation3 + $0x14] sm:$0xfe]  }
 0x5f0   : > { %v10096_v33 = vpop.f32.mrb[80].mxu1  ;;  %17096 = vmatmul.mubr.bf16.gmra.mrb[192].mxu0 %v11928_v36  ;;  %v11330_v36 = vshll.u32 %v17845_v39, 16 }
 0x5f1   : > { %v10231_v44 = vadd.f32 %v10096_v33, %v9678_v58  ;;  %v16773_v21 = vpop.f32.mrb[81].mxu1  ;;  %17099 = vmatprep.mubr.msk.bf16.mxu0 %vm17899_vm0, %v17898_v1  ;;  %v9680_v33 = vadd.f32 %v9639_v6, %v20131_v62  ;;  %v17848_v6 = vld [vmem:[#allocation3 + $0x1c] sm:$0xff]  }
 0x5f2   : > { %v10099_v4 = vpop.f32.mrb[82].mxu1  ;;  %v11332_v21 = vrot.slane %v11330_v36, 1 }
 0x5f3   : > { %10272 = vst [vmem:[#allocation2 + $0xc0] sm:$0xff] %v10231_v44  ;;  %v10232_v38 = vadd.f32 %v10099_v4, %v9679_v26  ;;  %v16774_v22 = vpop.f32.mrb[83].mxu1  ;;  %v20503_v32 = vpop.f32.mrb[88].mxu0  ;;  %v11328_v44 = vor.u32 %v11326_v14, %v11324_v12  ;;  %v11334_v12 = vshrl.u32 %v17845_v39, 16 }
 0x5f4   : > { %v16877_v5 = vpop.f32.mrb[89].mxu0 }
 0x5f5   : > { %10273 = vst [vmem:[#allocation2 + $0xc8] sm:$0xff] %v10232_v38  ;;  %16996 = vmatmul.mubr.bf16.gmra.mrb[188].mxu1 %v11325_v51  ;;  %v20506_v58 = vpop.f32.mrb[90].mxu0  ;;  %v11333_v11 = vsel %vm3743_vm4, %v11328_v44, %v11332_v21  ;;  %v9641_v51 = vld [vmem:[#allocation2 + $0xe0] sm:$0xff]  ;;  %v11336_v44 = vor.u32 %v11334_v12, %v11332_v21  ;;  %v17850_v12 = vld [vmem:[%s17974_s12 + $0xc] sm:$0xff]  }
 0x5f6   : > { %v16878_v43 = vpop.f32.mrb[91].mxu0  ;;  %16999 = vmatprep.mubr.msk.bf16.mxu1 %vm17899_vm0, %v17898_v1  ;;  %v9682_v14 = vadd.f32 %v9641_v51, %v20140_v29 }
 0x5f7   : > { %v9642_v43 = vld [vmem:[#allocation2 + $0xe8] sm:$0xff] }
 0x5f8   : > { %v10104_v27 = vpop.f32.mrb[84].mxu1  ;;  %17100 = vmatmul.mubr.bf16.gmra.mrb[196].mxu0 %v11930_v23  ;;  %v12493_v23 = vshrl.u32 %v17848_v6, 16  ;;  %v9683_v39 = vadd.f32 %v9642_v43, %v20142_v0  ;;  %v9644_v43 = vld [vmem:[#allocation2 + $0xf8] sm:$0xff] }
 0x5f9   : > { %v10233_v26 = vadd.f32 %v10104_v27, %v9680_v33  ;;  %v16777_v4 = vpop.f32.mrb[85].mxu1  ;;  %17103 = vmatprep.mubr.msk.bf16.mxu0 %vm17899_vm0, %v17898_v1  ;;  %v12496_v27 = vshll.u32 %v17848_v6, 16  ;;  %v17849_v6 = vld [vmem:[#allocation3 + $0x24] sm:$0xff]  }
 0x5fa   : > { %v10107_v38 = vpop.f32.mrb[86].mxu1  ;;  %v12495_v51 = vrot.slane %v12493_v23, 1  ;;  %v12505_v23 = vshll.u32 %v17849_v6, 16 }
 0x5fb   : > { %10274 = vst [vmem:[#allocation2 + $0xd0] sm:$0xff] %v10233_v26  ;;  %v10234_v22 = vadd.f32 %v10107_v38, %v9681_v40  ;;  %v16778_v5 = vpop.f32.mrb[87].mxu1  ;;  %v20515_v24 = vpop.f32.mrb[92].mxu0  ;;  %v12485_v38 = vshrl.u32 %v17847_v18, 16  ;;  %v12498_v21 = vrot.slane %v12496_v27, 2 }
 0x5fc   : > { %v16881_v62 = vpop.f32.mrb[93].mxu0 }
 0x5fd   : > { %10275 = vst [vmem:[#allocation2 + $0xd8] sm:$0xff] %v10234_v22  ;;  %17000 = vmatmul.mubr.bf16.gmra.mrb[192].mxu1 %v11333_v11  ;;  %v20518_v36 = vpop.f32.mrb[94].mxu0  ;;  %v12488_v22 = vshll.u32 %v17847_v18, 16  ;;  %v9643_v11 = vld [vmem:[#allocation2 + $0xf0] sm:$0xff]  ;;  %v12487_v18 = vrot.slane %v12485_v38, 1 }
 0x5fe   : > { %v16882_v16 = vpop.f32.mrb[95].mxu0  ;;  %17003 = vmatprep.mubr.msk.bf16.mxu1 %vm17899_vm0, %v17898_v1 }
 0x600   : > { %v10112_v33 = vpop.f32.mrb[88].mxu1  ;;  %17104 = vmatmul.mubr.bf16.gmra.mrb[200].mxu0 %v11929_v7 }
 0x601   : > { %v10235_v26 = vadd.f32 %v10112_v33, %v9682_v14  ;;  %v16781_v4 = vpop.f32.mrb[89].mxu1  ;;  %17223 = vmatprep.mubr.msk.bf16.mxu0 %vm17899_vm0, %v17898_v1  ;;  %v12490_v14 = vrot.slane %v12488_v22, 2  ;;  %v9684_v33 = vadd.f32 %v9643_v11, %v20152_v10 }
 0x602   : > { %v10115_v40 = vpop.f32.mrb[90].mxu1  ;;  %v12499_v4 = vor.u32 %v12498_v21, %v12495_v51  ;;  %v9645_v51 = vld [vmem:[#allocation2 + $0x100] sm:$0xff] }
 0x603   : > { %10276 = vst [vmem:[#allocation2 + $0xe0] sm:$0xff] %v10235_v26  ;;  %v10236_v5 = vadd.f32 %v10115_v40, %v9683_v39  ;;  %v16782_v62 = vpop.f32.mrb[91].mxu1  ;;  %v20526_v29 = vpop.f32.mrb[96].mxu0  ;;  %v12502_v39 = vshrl.u32 %v17849_v6, 16  ;;  %v12507_v6 = vrot.slane %v12505_v23, 2 }
 0x604   : > { %v16885_v7 = vpop.f32.mrb[97].mxu0  ;;  %v12491_v62 = vor.u32 %v12490_v14, %v12487_v18  ;;  %v9686_v18 = vadd.f32 %v9645_v51, %v20177_v56 }
 0x605   : > { %10277 = vst [vmem:[#allocation2 + $0xe8] sm:$0xff] %v10236_v5  ;;  %17004 = vmatmul.mubr.bf16.gmra.mrb[196].mxu1 %v11336_v44  ;;  %v20529_v0 = vpop.f32.mrb[98].mxu0  ;;  %v9685_v44 = vadd.f32 %v9644_v43, %v20156_v15  ;;  %v12504_v21 = vrot.slane %v12502_v39, 1 }
 0x606   : > { %v16886_v16 = vpop.f32.mrb[99].mxu0  ;;  %17123 = vmatprep.mubr.msk.bf16.mxu1 %vm17899_vm0, %v17898_v1  ;;  %v12500_v11 = vsel %vm5779_vm6, %v12491_v62, %v12499_v4 }
 0x607   : > { %v17852_v16 = vld [vmem:[%s17974_s12 + $0x14] sm:$0xff]  }
 0x608   : > { %v10120_v26 = vpop.f32.mrb[92].mxu1  ;;  %17224 = vmatmul.mubr.bf16.vlgmr.msra.gmra.mrb[204].mxu0 %v17850_v12  ;;  %v17851_v12 = vld [vmem:[#allocation3 + $0x2c] sm:$0xff]  }
 0x609   : > { %v10237_v27 = vadd.f32 %v10120_v26, %v9684_v33  ;;  %v16785_v40 = vpop.f32.mrb[93].mxu1  ;;  %17227 = vmatprep.mubr.msk.bf16.mxu0 %vm17899_vm0, %v17898_v1  ;;  %v9646_v33 = vld [vmem:[#allocation2 + $0x108] sm:$0xff]  ;;  %v12508_v26 = vor.u32 %v12507_v6, %v12504_v21  ;;  %v17853_v6 = vld [vmem:[#allocation3 + $0x34] sm:$0xff]  }
 0x60a   : > { %v10123_v5 = vpop.f32.mrb[94].mxu1  ;;  %v12514_v40 = vshll.u32 %v17851_v12, 16 }
 0x60b   : > { %10278 = vst [vmem:[#allocation2 + $0xf0] sm:$0xff] %v10237_v27  ;;  %v10238_v38 = vadd.f32 %v10123_v5, %v9685_v44  ;;  %v16786_v22 = vpop.f32.mrb[95].mxu1  ;;  %v20537_v7 = vpop.f32.mrb[100].mxu0  ;;  %v12511_v27 = vshrl.u32 %v17851_v12, 16  ;;  %v9687_v44 = vadd.f32 %v9646_v33, %v20182_v61  ;;  %v17854_v12 = vld [vmem:[%s17974_s12 + $0x1c] sm:$0xff]  }
 0x60c   : > { %v16889_v10 = vpop.f32.mrb[101].mxu0  ;;  %v12516_v21 = vrot.slane %v12514_v40, 2 }
 0x60d   : > { %10279 = vst [vmem:[#allocation2 + $0xf8] sm:$0xff] %v10238_v38  ;;  %17124 = vmatmul.mubr.bf16.vlgmr.msra.gmra.mrb[200].mxu1 %v12500_v11  ;;  %v20541_v15 = vpop.f32.mrb[102].mxu0  ;;  %v12509_v10 = vsel %vm5779_vm6, %v12499_v4, %v12508_v26  ;;  %v9647_v11 = vld [vmem:[#allocation2 + $0x110] sm:$0xff]  ;;  %v12513_v51 = vrot.slane %v12511_v27, 1  ;;  %v12523_v4 = vshll.u32 %v17853_v6, 16 }
 0x60e   : > { %v16890_v43 = vpop.f32.mrb[103].mxu0  ;;  %17127 = vmatprep.mubr.msk.bf16.mxu1 %vm17899_vm0, %v17898_v1  ;;  %v9688_v33 = vadd.f32 %v9647_v11, %v20209_v47 }
 0x60f   : > { %v9648_v43 = vld [vmem:[#allocation2 + $0x118] sm:$0xff] }
 0x610   : > { %v10128_v14 = vpop.f32.mrb[96].mxu1  ;;  %17228 = vmatmul.mubr.bf16.gmra.mrb[208].mxu0 %v17852_v16 }
 0x611   : > { %v10239_v39 = vadd.f32 %v10128_v14, %v9686_v18  ;;  %v16789_v23 = vpop.f32.mrb[97].mxu1  ;;  %17231 = vmatprep.mubr.msk.bf16.mxu0 %vm17899_vm0, %v17898_v1  ;;  %v12517_v14 = vor.u32 %v12516_v21, %v12513_v51  ;;  %v12525_v51 = vrot.slane %v12523_v4, 2  ;;  %v17855_v21 = vld [vmem:[#allocation3 + $0x3c] sm:$0xff]  }
 0x612   : > { %v10131_v5 = vpop.f32.mrb[98].mxu1  ;;  %v9689_v23 = vadd.f32 %v9648_v43, %v20215_v46 }
 0x613   : > { %10280 = vst [vmem:[#allocation2 + $0x100] sm:$0xff] %v10239_v39  ;;  %v10240_v62 = vadd.f32 %v10131_v5, %v9687_v44  ;;  %v16790_v38 = vpop.f32.mrb[99].mxu1  ;;  %v20549_v22 = vpop.f32.mrb[104].mxu0  ;;  %v12520_v39 = vshrl.u32 %v17853_v6, 16  ;;  %v17856_v6 = vld [vmem:[%s17974_s12 + $0x24] sm:$0xff]  }
 0x614   : > { %v16893_v56 = vpop.f32.mrb[105].mxu0 }
 0x615   : > { %10281 = vst [vmem:[#allocation2 + $0x108] sm:$0xff] %v10240_v62  ;;  %17128 = vmatmul.mubr.bf16.gmra.mrb[204].mxu1 %v12509_v10  ;;  %v20553_v61 = vpop.f32.mrb[106].mxu0  ;;  %v12518_v56 = vsel %vm5779_vm6, %v12508_v26, %v12517_v14  ;;  %v9649_v10 = vld [vmem:[#allocation2 + $0x120] sm:$0xff]  ;;  %v12522_v11 = vrot.slane %v12520_v39, 1  ;;  %v12532_v26 = vshll.u32 %v17855_v21, 16 }
 0x616   : > { %v16894_v16 = vpop.f32.mrb[107].mxu0  ;;  %17131 = vmatprep.mubr.msk.bf16.mxu1 %vm17899_vm0, %v17898_v1  ;;  %v9690_v43 = vadd.f32 %v9649_v10, %v20242_v45 }
 0x617   : > { %v9650_v16 = vld [vmem:[#allocation2 + $0x128] sm:$0xff] }
 0x618   : > { %v10136_v18 = vpop.f32.mrb[100].mxu1  ;;  %17232 = vmatmul.mubr.bf16.gmra.mrb[212].mxu0 %v17854_v12 }
 0x619   : > { %v10241_v27 = vadd.f32 %v10136_v18, %v9688_v33  ;;  %v16793_v40 = vpop.f32.mrb[101].mxu1  ;;  %17235 = vmatprep.mubr.msk.bf16.mxu0 %vm17899_vm0, %v17898_v1  ;;  %v12526_v18 = vor.u32 %v12525_v51, %v12522_v11  ;;  %v12534_v11 = vrot.slane %v12532_v26, 2  ;;  %v17857_v51 = vld [vmem:[#allocation3 + $0x44] sm:$0xff]  }
 0x61a   : > { %v10139_v44 = vpop.f32.mrb[102].mxu1  ;;  %v9691_v40 = vadd.f32 %v9650_v16, %v20248_v28 }
 0x61b   : > { %10282 = vst [vmem:[#allocation2 + $0x110] sm:$0xff] %v10241_v27  ;;  %v10242_v5 = vadd.f32 %v10139_v44, %v9689_v23  ;;  %v16794_v62 = vpop.f32.mrb[103].mxu1  ;;  %v20561_v38 = vpop.f32.mrb[108].mxu0  ;;  %v12529_v27 = vshrl.u32 %v17855_v21, 16  ;;  %v17858_v21 = vld [vmem:[%s17974_s12 + $0x2c] sm:$0xff]  }
 0x61c   : > { %v16897_v47 = vpop.f32.mrb[109].mxu0 }
 0x61d   : > { %10283 = vst [vmem:[#allocation2 + $0x118] sm:$0xff] %v10242_v5  ;;  %17132 = vmatmul.mubr.bf16.gmra.mrb[208].mxu1 %v12518_v56  ;;  %v20565_v46 = vpop.f32.mrb[110].mxu0  ;;  %v12527_v47 = vsel %vm5779_vm6, %v12517_v14, %v12526_v18  ;;  %v9651_v56 = vld [vmem:[#allocation2 + $0x130] sm:$0xff]  ;;  %v12531_v10 = vrot.slane %v12529_v27, 1  ;;  %v12541_v14 = vshll.u32 %v17857_v51, 16 }
 0x61e   : > { %v16898_v12 = vpop.f32.mrb[111].mxu0  ;;  %17135 = vmatprep.mubr.msk.bf16.mxu1 %vm17899_vm0, %v17898_v1  ;;  %v9692_v16 = vadd.f32 %v9651_v56, %v20272_v50 }
 0x61f   : > { %v9652_v12 = vld [vmem:[#allocation2 + $0x138] sm:$0xff]  ;;  %v12543_v56 = vrot.slane %v12541_v14, 2 }
 0x620   : > { %v10144_v33 = vpop.f32.mrb[104].mxu1  ;;  %17236 = vmatmul.mubr.bf16.gmra.mrb[216].mxu0 %v17856_v6 }
 0x621   : > { %v10243_v39 = vadd.f32 %v10144_v33, %v9690_v43  ;;  %v16797_v4 = vpop.f32.mrb[105].mxu1  ;;  %17239 = vmatprep.mubr.msk.bf16.mxu0 %vm17899_vm0, %v17898_v1  ;;  %v12535_v33 = vor.u32 %v12534_v11, %v12531_v10  ;;  %v17859_v10 = vld [vmem:[#allocation3 + $0x4c] sm:$0xff]  }
 0x622   : > { %v10147_v23 = vpop.f32.mrb[106].mxu1  ;;  %v9693_v4 = vadd.f32 %v9652_v12, %v20278_v57  ;;  %v17860_v11 = vld [vmem:[%s17974_s12 + $0x34] sm:$0xff]  }
 0x623   : > { %10284 = vst [vmem:[#allocation2 + $0x120] sm:$0xff] %v10243_v39  ;;  %v10244_v44 = vadd.f32 %v10147_v23, %v9691_v40  ;;  %v16798_v5 = vpop.f32.mrb[107].mxu1  ;;  %v20573_v62 = vpop.f32.mrb[112].mxu0  ;;  %v12538_v39 = vshrl.u32 %v17857_v51, 16  ;;  %v12536_v50 = vsel %vm5779_vm6, %v12526_v18, %v12535_v33 }
 0x624   : > { %v16901_v45 = vpop.f32.mrb[113].mxu0 }
 0x625   : > { %10285 = vst [vmem:[#allocation2 + $0x128] sm:$0xff] %v10244_v44  ;;  %17136 = vmatmul.mubr.bf16.gmra.mrb[212].mxu1 %v12527_v47  ;;  %v20577_v28 = vpop.f32.mrb[114].mxu0  ;;  %v12540_v47 = vrot.slane %v12538_v39, 1 }
 0x626   : > { %v16902_v6 = vpop.f32.mrb[115].mxu0  ;;  %17139 = vmatprep.mubr.msk.bf16.mxu1 %vm17899_vm0, %v17898_v1 }
 0x627   : > { %v10206_v6 = vld [vmem:[#allocation2 + $0x140] sm:$0xf]  ;;  %v12544_v12 = vor.u32 %v12543_v56, %v12540_v47 }
 0x628   : > { %v10152_v43 = vpop.f32.mrb[108].mxu1  ;;  %17240 = vmatmul.mubr.bf16.gmra.mrb[220].mxu0 %v17858_v21  ;;  %v17862_v47 = vld [vmem:[%s17974_s12 + $0x3c] sm:$0xff]  }
 0x629   : > { %v10245_v27 = vadd.f32 %v10152_v43, %v9692_v16  ;;  %v16801_v26 = vpop.f32.mrb[109].mxu1  ;;  %17243 = vmatprep.mubr.msk.bf16.mxu0 %vm17899_vm0, %v17898_v1  ;;  %v12547_v16 = vshrl.u32 %v17859_v10, 16  ;;  %v12550_v43 = vshll.u32 %v17859_v10, 16 }
 0x62a   : > { %v10155_v40 = vpop.f32.mrb[110].mxu1 }
 0x62b   : > { %10286 = vst [vmem:[#allocation2 + $0x130] sm:$0xff] %v10245_v27  ;;  %v10246_v23 = vadd.f32 %v10155_v40, %v9693_v4  ;;  %v16802_v44 = vpop.f32.mrb[111].mxu1  ;;  %v10880_v5 = vpop.f32.mrb[116].mxu0  ;;  %v12545_v40 = vsel %vm5779_vm6, %v12535_v33, %v12544_v12 }
 0x62c   : > { %v16905_v45 = vpop.f32.mrb[117].mxu0  ;;  %v12549_v44 = vrot.slane %v12547_v16, 1 }
 0x62d   : > { %10287 = vst [vmem:[#allocation2 + $0x138] sm:$0xff] %v10246_v23  ;;  %17140 = vmatmul.mubr.bf16.gmra.mrb[216].mxu1 %v12536_v50  ;;  %v10883_v51 = vpop.f32.mrb[118].mxu0  ;;  %v10886_v23 = vld [vmem:[#allocation2] sm:$0xff]  ;;  %v12552_v45 = vrot.slane %v12550_v43, 2 }
 0x62e   : > { %v16906_v21 = vpop.f32.mrb[119].mxu0  ;;  %17143 = vmatprep.mubr.msk.bf16.mxu1 %vm17899_vm0, %v17898_v1  ;;  %v17861_v50 = vld [vmem:[#allocation3 + $0x54] sm:$0xff]   ;;  %v10927_v51 = vadd.f32 %v10886_v23, %v20305_v25  ;;  %v20944_v43 = vld [vmem:[#allocation4_spill] sm:$0xff] }
 0x630   : > { %v10160_v57 = vpop.f32.mrb[112].mxu1  ;;  %17244 = vmatmul.mubr.bf16.gmra.mrb[224].mxu0 %v17860_v11  ;;  %v10887_v11 = vld [vmem:[#allocation2 + $0x8] sm:$0xff] }
 0x631   : > { %v10247_v27 = vadd.f32 %v10206_v6, %v10160_v57  ;;  %v16805_v18 = vpop.f32.mrb[113].mxu1  ;;  %17247 = vmatprep.mubr.msk.bf16.mxu0 %vm17899_vm0, %v17898_v1  ;;  %v12553_v57 = vor.u32 %v12552_v45, %v12549_v44  ;;  %v12556_v6 = vshrl.u32 %v17861_v50, 16  ;;  %v10888_v45 = vld [vmem:[#allocation2 + $0x10] sm:$0xff] }
 0x632   : > { %v10163_v39 = vpop.f32.mrb[114].mxu1  ;;  %v10928_v18 = vadd.f32 %v10887_v11, %v20944_v43 }
 0x633   : > { %10288 = vst [vmem:[#allocation2 + $0x140] sm:$0xf] %v10247_v27  ;;  %v16806_v14 = vpop.f32.mrb[115].mxu1  ;;  %v20591_v26 = vpop.f32.mrb[120].mxu0  ;;  %v12559_v27 = vshll.u32 %v17861_v50, 16  ;;  %v12554_v44 = vsel %vm5779_vm6, %v12544_v12, %v12553_v57  ;;  %v12558_v50 = vrot.slane %v12556_v6, 1 }
 0x634   : > { %v17025_v4 = vpop.f32.mrb[121].mxu0 }
 0x635   : > { %17144 = vmatmul.mubr.bf16.gmra.mrb[220].mxu1 %v12545_v40  ;;  %v20595_v56 = vpop.f32.mrb[122].mxu0 }
 0x636   : > { %v17026_v10 = vpop.f32.mrb[123].mxu0  ;;  %17147 = vmatprep.mubr.msk.bf16.mxu1 %vm17899_vm0, %v17898_v1 }
 0x638   : > { %v11440_v21 = vpop.f32.mrb[116].mxu1  ;;  %17248 = vmatmul.mubr.bf16.gmra.mrb[228].mxu0 %v17862_v47  ;;  %v12561_v47 = vrot.slane %v12559_v27, 2 }
 0x639   : > { %v11647_v33 = vadd.f32 %v11440_v21, %v10927_v51  ;;  %v16925_v16 = vpop.f32.mrb[117].mxu1  ;;  %17251 = vmatprep.mubr.msk.bf16.mxu0 %vm17899_vm0, %v17898_v1  ;;  %v17863_v51 = vld [vmem:[#allocation3 + $0x5c] sm:$0xff]  }
 0x63a   : > { %v10926_v39 = vld [vmem:[#allocation2 + $0x140] sm:$0xf]  ;;  %v11443_v14 = vpop.f32.mrb[118].mxu1  ;;  %v17864_v21 = vld [vmem:[%s17974_s12 + $0x44] sm:$0xff]   ;;  %v12565_v12 = vshrl.u32 %v17863_v51, 16 }
 0x63b   : > { %v10967_v4 = vadd.f32 %v10926_v39, %v10880_v5  ;;  %11688 = vst [vmem:[#allocation2] sm:$0xff] %v11647_v33  ;;  %v11648_v40 = vadd.f32 %v11443_v14, %v10928_v18  ;;  %v16926_v10 = vpop.f32.mrb[119].mxu1  ;;  %v20603_v25 = vpop.f32.mrb[124].mxu0  ;;  %v10889_v5 = vld [vmem:[#allocation2 + $0x18] sm:$0xff]  ;;  %v10929_v33 = vadd.f32 %v10888_v45, %v20320_v20  ;;  %v12562_v18 = vor.u32 %v12561_v47, %v12558_v50  ;;  %v10890_v45 = vld [vmem:[#allocation2 + $0x20] sm:$0xff] }
 0x63c   : > { %v17029_v23 = vpop.f32.mrb[125].mxu0  ;;  %v12568_v39 = vshll.u32 %v17863_v51, 16  ;;  %v10930_v14 = vadd.f32 %v10889_v5, %v20324_v31  ;;  %v12567_v50 = vrot.slane %v12565_v12, 1  ;;  %v17865_v51 = vld [vmem:[#allocation3 + $0x64] sm:$0xff]  }
 0x63d   : > { %11008 = vst [vmem:[#allocation2 + $0x140] sm:$0xf] %v10967_v4  ;;  %11689 = vst [vmem:[#allocation2 + $0x8] sm:$0xff] %v11648_v40  ;;  %17148 = vmatmul.mubr.bf16.gmra.mrb[224].mxu1 %v12554_v44  ;;  %v20607_v11 = vpop.f32.mrb[126].mxu0  ;;  %v12563_v44 = vsel %vm5779_vm6, %v12553_v57, %v12562_v18  ;;  %v10891_v5 = vld [vmem:[#allocation2 + $0x28] sm:$0xff]  ;;  %v12577_v57 = vshll.u32 %v17865_v51, 16 }
 0x63e   : > { %v17030_v16 = vpop.f32.mrb[127].mxu0  ;;  %17151 = vmatprep.mubr.msk.bf16.mxu1 %vm17899_vm0, %v17898_v1  ;;  %v12570_v47 = vrot.slane %v12568_v39, 2 }
 0x640   : > { %v11448_v43 = vpop.f32.mrb[120].mxu1  ;;  %17252 = vmatmul.mubr.bf16.gmra.mrb[232].mxu0 %v17864_v21  ;;  %v17866_v21 = vld [vmem:[%s17974_s12 + $0x4c] sm:$0xff]  }
 0x641   : > { %v11649_v6 = vadd.f32 %v11448_v43, %v10929_v33  ;;  %v16929_v27 = vpop.f32.mrb[121].mxu1  ;;  %17255 = vmatprep.mubr.msk.bf16.mxu0 %vm17899_vm0, %v17898_v1  ;;  %v10931_v33 = vadd.f32 %v10890_v45, %v20335_v54  ;;  %v10892_v45 = vld [vmem:[#allocation2 + $0x30] sm:$0xff] }
 0x642   : > { %v11451_v4 = vpop.f32.mrb[122].mxu1  ;;  %v12574_v27 = vshrl.u32 %v17865_v51, 16  ;;  %v17867_v51 = vld [vmem:[#allocation3 + $0x6c] sm:$0xff]  }
 0x643   : > { %11690 = vst [vmem:[#allocation2 + $0x10] sm:$0xff] %v11649_v6  ;;  %v11650_v40 = vadd.f32 %v11451_v4, %v10930_v14  ;;  %v16930_v10 = vpop.f32.mrb[123].mxu1  ;;  %v20615_v23 = vpop.f32.mrb[128].mxu0  ;;  %v12571_v6 = vor.u32 %v12570_v47, %v12567_v50  ;;  %v10932_v14 = vadd.f32 %v10891_v5, %v20339_v37  ;;  %v12579_v47 = vrot.slane %v12577_v57, 2  ;;  %v10893_v5 = vld [vmem:[#allocation2 + $0x38] sm:$0xff] }
 0x644   : > { %v17033_v20 = vpop.f32.mrb[129].mxu0  ;;  %v12576_v50 = vrot.slane %v12574_v27, 1 }
 0x645   : > { %11691 = vst [vmem:[#allocation2 + $0x18] sm:$0xff] %v11650_v40  ;;  %17152 = vmatmul.mubr.bf16.gmra.mrb[228].mxu1 %v12563_v44  ;;  %v20619_v31 = vpop.f32.mrb[130].mxu0  ;;  %v12572_v44 = vsel %vm5779_vm6, %v12562_v18, %v12571_v6  ;;  %v12586_v18 = vshll.u32 %v17867_v51, 16 }
 0x646   : > { %v17034_v16 = vpop.f32.mrb[131].mxu0  ;;  %17155 = vmatprep.mubr.msk.bf16.mxu1 %vm17899_vm0, %v17898_v1 }
 0x648   : > { %v11456_v43 = vpop.f32.mrb[124].mxu1  ;;  %17256 = vmatmul.mubr.bf16.gmra.mrb[236].mxu0 %v17866_v21  ;;  %v17868_v21 = vld [vmem:[%s17974_s12 + $0x54] sm:$0xff]  }
 0x649   : > { %v11651_v12 = vadd.f32 %v11456_v43, %v10931_v33  ;;  %v16933_v39 = vpop.f32.mrb[125].mxu1  ;;  %17259 = vmatprep.mubr.msk.bf16.mxu0 %vm17899_vm0, %v17898_v1  ;;  %v10933_v33 = vadd.f32 %v10892_v45, %v20351_v59  ;;  %v10894_v45 = vld [vmem:[#allocation2 + $0x40] sm:$0xff] }
 0x64a   : > { %v11459_v4 = vpop.f32.mrb[126].mxu1  ;;  %v12583_v39 = vshrl.u32 %v17867_v51, 16  ;;  %v17869_v51 = vld [vmem:[#allocation3 + $0x74] sm:$0xff]  }
 0x64b   : > { %11692 = vst [vmem:[#allocation2 + $0x20] sm:$0xff] %v11651_v12  ;;  %v11652_v40 = vadd.f32 %v11459_v4, %v10932_v14  ;;  %v16934_v10 = vpop.f32.mrb[127].mxu1  ;;  %v20627_v20 = vpop.f32.mrb[132].mxu0  ;;  %v12580_v12 = vor.u32 %v12579_v47, %v12576_v50  ;;  %v10934_v14 = vadd.f32 %v10893_v5, %v20355_v52  ;;  %v12588_v47 = vrot.slane %v12586_v18, 2  ;;  %v10895_v5 = vld [vmem:[#allocation2 + $0x48] sm:$0xff] }
 0x64c   : > { %v17037_v54 = vpop.f32.mrb[133].mxu0  ;;  %v12585_v50 = vrot.slane %v12583_v39, 1 }
 0x64d   : > { %11693 = vst [vmem:[#allocation2 + $0x28] sm:$0xff] %v11652_v40  ;;  %17156 = vmatmul.mubr.bf16.gmra.mrb[232].mxu1 %v12572_v44  ;;  %v20631_v37 = vpop.f32.mrb[134].mxu0  ;;  %v12581_v44 = vsel %vm5779_vm6, %v12571_v6, %v12580_v12  ;;  %v12595_v6 = vshll.u32 %v17869_v51, 16 }
 0x64e   : > { %v17038_v16 = vpop.f32.mrb[135].mxu0  ;;  %17159 = vmatprep.mubr.msk.bf16.mxu1 %vm17899_vm0, %v17898_v1 }
 0x650   : > { %v11464_v43 = vpop.f32.mrb[128].mxu1  ;;  %17260 = vmatmul.mubr.bf16.gmra.mrb[240].mxu0 %v17868_v21  ;;  %v17870_v21 = vld [vmem:[%s17974_s12 + $0x5c] sm:$0xff]  }
 0x651   : > { %v11653_v27 = vadd.f32 %v11464_v43, %v10933_v33  ;;  %v16937_v57 = vpop.f32.mrb[129].mxu1  ;;  %17263 = vmatprep.mubr.msk.bf16.mxu0 %vm17899_vm0, %v17898_v1  ;;  %v10935_v33 = vadd.f32 %v10894_v45, %v20367_v35  ;;  %v10896_v45 = vld [vmem:[#allocation2 + $0x50] sm:$0xff] }
 0x652   : > { %v11467_v4 = vpop.f32.mrb[130].mxu1  ;;  %v12592_v57 = vshrl.u32 %v17869_v51, 16  ;;  %v17871_v51 = vld [vmem:[#allocation3 + $0x7c] sm:$0xff]  }
 0x653   : > { %11694 = vst [vmem:[#allocation2 + $0x30] sm:$0xff] %v11653_v27  ;;  %v11654_v40 = vadd.f32 %v11467_v4, %v10934_v14  ;;  %v16938_v10 = vpop.f32.mrb[131].mxu1  ;;  %v20639_v54 = vpop.f32.mrb[136].mxu0  ;;  %v12589_v27 = vor.u32 %v12588_v47, %v12585_v50  ;;  %v10936_v14 = vadd.f32 %v10895_v5, %v20371_v9  ;;  %v12597_v47 = vrot.slane %v12595_v6, 2  ;;  %v10897_v5 = vld [vmem:[#allocation2 + $0x58] sm:$0xff] }
 0x654   : > { %v17041_v59 = vpop.f32.mrb[137].mxu0  ;;  %v12594_v50 = vrot.slane %v12592_v57, 1 }
 0x655   : > { %11695 = vst [vmem:[#allocation2 + $0x38] sm:$0xff] %v11654_v40  ;;  %17160 = vmatmul.mubr.bf16.gmra.mrb[236].mxu1 %v12581_v44  ;;  %v20643_v52 = vpop.f32.mrb[138].mxu0  ;;  %v12590_v44 = vsel %vm5779_vm6, %v12580_v12, %v12589_v27  ;;  %v12604_v12 = vshll.u32 %v17871_v51, 16 }
 0x656   : > { %v17042_v16 = vpop.f32.mrb[139].mxu0  ;;  %17163 = vmatprep.mubr.msk.bf16.mxu1 %vm17899_vm0, %v17898_v1 }
 0x658   : > { %v11472_v43 = vpop.f32.mrb[132].mxu1  ;;  %17264 = vmatmul.mubr.bf16.gmra.mrb[244].mxu0 %v17870_v21  ;;  %v17872_v21 = vld [vmem:[%s17974_s12 + $0x64] sm:$0xff]  }
 0x659   : > { %v11655_v39 = vadd.f32 %v11472_v43, %v10935_v33  ;;  %v16941_v18 = vpop.f32.mrb[133].mxu1  ;;  %17267 = vmatprep.mubr.msk.bf16.mxu0 %vm17899_vm0, %v17898_v1  ;;  %v10937_v33 = vadd.f32 %v10896_v45, %v20384_v19  ;;  %v10898_v45 = vld [vmem:[#allocation2 + $0x60] sm:$0xff] }
 0x65a   : > { %v11475_v4 = vpop.f32.mrb[134].mxu1  ;;  %v12601_v18 = vshrl.u32 %v17871_v51, 16  ;;  %v17873_v51 = vld [vmem:[#allocation3 + $0x84] sm:$0xff]  }
 0x65b   : > { %11696 = vst [vmem:[#allocation2 + $0x40] sm:$0xff] %v11655_v39  ;;  %v11656_v40 = vadd.f32 %v11475_v4, %v10936_v14  ;;  %v16942_v10 = vpop.f32.mrb[135].mxu1  ;;  %v20651_v59 = vpop.f32.mrb[140].mxu0  ;;  %v12598_v39 = vor.u32 %v12597_v47, %v12594_v50  ;;  %v10938_v14 = vadd.f32 %v10897_v5, %v20388_v30  ;;  %v12606_v47 = vrot.slane %v12604_v12, 2  ;;  %v10899_v5 = vld [vmem:[#allocation2 + $0x68] sm:$0xff] }
 0x65c   : > { %v17045_v35 = vpop.f32.mrb[141].mxu0  ;;  %v12603_v50 = vrot.slane %v12601_v18, 1 }
 0x65d   : > { %11697 = vst [vmem:[#allocation2 + $0x48] sm:$0xff] %v11656_v40  ;;  %17164 = vmatmul.mubr.bf16.gmra.mrb[240].mxu1 %v12590_v44  ;;  %v20655_v9 = vpop.f32.mrb[142].mxu0  ;;  %v12599_v44 = vsel %vm5779_vm6, %v12589_v27, %v12598_v39  ;;  %v12613_v27 = vshll.u32 %v17873_v51, 16 }
 0x65e   : > { %v17046_v16 = vpop.f32.mrb[143].mxu0  ;;  %17167 = vmatprep.mubr.msk.bf16.mxu1 %vm17899_vm0, %v17898_v1 }
 0x660   : > { %v11480_v43 = vpop.f32.mrb[136].mxu1  ;;  %17268 = vmatmul.mubr.bf16.gmra.mrb[248].mxu0 %v17872_v21  ;;  %v17874_v21 = vld [vmem:[%s17974_s12 + $0x6c] sm:$0xff]  }
 0x661   : > { %v11657_v57 = vadd.f32 %v11480_v43, %v10937_v33  ;;  %v16945_v6 = vpop.f32.mrb[137].mxu1  ;;  %17271 = vmatprep.mubr.msk.bf16.mxu0 %vm17899_vm0, %v17898_v1  ;;  %v10939_v33 = vadd.f32 %v10898_v45, %v20400_v55  ;;  %v10900_v45 = vld [vmem:[#allocation2 + $0x70] sm:$0xff] }
 0x662   : > { %v11483_v4 = vpop.f32.mrb[138].mxu1  ;;  %v12610_v6 = vshrl.u32 %v17873_v51, 16  ;;  %v17875_v51 = vld [vmem:[#allocation3 + $0x8c] sm:$0xff]  }
 0x663   : > { %11698 = vst [vmem:[#allocation2 + $0x50] sm:$0xff] %v11657_v57  ;;  %v11658_v40 = vadd.f32 %v11483_v4, %v10938_v14  ;;  %v16946_v10 = vpop.f32.mrb[139].mxu1  ;;  %v20663_v35 = vpop.f32.mrb[144].mxu0  ;;  %v12607_v57 = vor.u32 %v12606_v47, %v12603_v50  ;;  %v10940_v14 = vadd.f32 %v10899_v5, %v20404_v48  ;;  %v12615_v47 = vrot.slane %v12613_v27, 2  ;;  %v10901_v5 = vld [vmem:[#allocation2 + $0x78] sm:$0xff] }
 0x664   : > { %v17049_v19 = vpop.f32.mrb[145].mxu0  ;;  %v12612_v50 = vrot.slane %v12610_v6, 1 }
 0x665   : > { %11699 = vst [vmem:[#allocation2 + $0x58] sm:$0xff] %v11658_v40  ;;  %17168 = vmatmul.mubr.bf16.gmra.mrb[244].mxu1 %v12599_v44  ;;  %v20667_v30 = vpop.f32.mrb[146].mxu0  ;;  %v12608_v44 = vsel %vm5779_vm6, %v12598_v39, %v12607_v57  ;;  %v12622_v39 = vshll.u32 %v17875_v51, 16 }
 0x666   : > { %v17050_v16 = vpop.f32.mrb[147].mxu0  ;;  %17171 = vmatprep.mubr.msk.bf16.mxu1 %vm17899_vm0, %v17898_v1 }
 0x668   : > { %v11488_v43 = vpop.f32.mrb[140].mxu1  ;;  %17272 = vmatmul.mubr.bf16.gmra.mrb[252].mxu0 %v17874_v21  ;;  %v17876_v21 = vld [vmem:[%s17974_s12 + $0x74] sm:$0xff]  }
 0x669   : > { %v11659_v18 = vadd.f32 %v11488_v43, %v10939_v33  ;;  %v16949_v12 = vpop.f32.mrb[141].mxu1  ;;  %17275 = vmatprep.mubr.msk.bf16.mxu0 %vm17899_vm0, %v17898_v1  ;;  %v10941_v33 = vadd.f32 %v10900_v45, %v20416_v17  ;;  %v10902_v45 = vld [vmem:[#allocation2 + $0x80] sm:$0xff] }
 0x66a   : > { %v11491_v4 = vpop.f32.mrb[142].mxu1  ;;  %v12619_v12 = vshrl.u32 %v17875_v51, 16  ;;  %v17877_v51 = vld [vmem:[#allocation3 + $0x94] sm:$0xff]  }
 0x66b   : > { %11700 = vst [vmem:[#allocation2 + $0x60] sm:$0xff] %v11659_v18  ;;  %v11660_v40 = vadd.f32 %v11491_v4, %v10940_v14  ;;  %v16950_v10 = vpop.f32.mrb[143].mxu1  ;;  %v20675_v19 = vpop.f32.mrb[148].mxu0  ;;  %v12616_v18 = vor.u32 %v12615_v47, %v12612_v50  ;;  %v10942_v14 = vadd.f32 %v10901_v5, %v20420_v13  ;;  %v12624_v47 = vrot.slane %v12622_v39, 2  ;;  %v10903_v5 = vld [vmem:[#allocation2 + $0x88] sm:$0xff] }
 0x66c   : > { %v17053_v55 = vpop.f32.mrb[149].mxu0  ;;  %v12621_v50 = vrot.slane %v12619_v12, 1 }
 0x66d   : > { %11701 = vst [vmem:[#allocation2 + $0x68] sm:$0xff] %v11660_v40  ;;  %17172 = vmatmul.mubr.bf16.gmra.mrb[248].mxu1 %v12608_v44  ;;  %v20679_v48 = vpop.f32.mrb[150].mxu0  ;;  %v12617_v44 = vsel %vm5779_vm6, %v12607_v57, %v12616_v18  ;;  %v12631_v57 = vshll.u32 %v17877_v51, 16 }
 0x66e   : > { %v17054_v16 = vpop.f32.mrb[151].mxu0  ;;  %17175 = vmatprep.mubr.msk.bf16.mxu1 %vm17899_vm0, %v17898_v1 }
 0x670   : > { %v11496_v43 = vpop.f32.mrb[144].mxu1  ;;  %17276 = vmatmul.mubr.bf16.gmra.mrb[0].mxu0 %v17876_v21  ;;  %v17878_v21 = vld [vmem:[%s17974_s12 + $0x7c] sm:$0xff]  }
 0x671   : > { %v11661_v6 = vadd.f32 %v11496_v43, %v10941_v33  ;;  %v16953_v27 = vpop.f32.mrb[145].mxu1  ;;  %17279 = vmatprep.mubr.msk.bf16.mxu0 %vm17899_vm0, %v17898_v1  ;;  %v10943_v33 = vadd.f32 %v10902_v45, %v20432_v53  ;;  %v10904_v45 = vld [vmem:[#allocation2 + $0x90] sm:$0xff] }
 0x672   : > { %v11499_v4 = vpop.f32.mrb[146].mxu1  ;;  %v12628_v27 = vshrl.u32 %v17877_v51, 16  ;;  %v17879_v51 = vld [vmem:[#allocation3 + $0x9c] sm:$0xff]  }
 0x673   : > { %11702 = vst [vmem:[#allocation2 + $0x70] sm:$0xff] %v11661_v6  ;;  %v11662_v40 = vadd.f32 %v11499_v4, %v10942_v14  ;;  %v16954_v10 = vpop.f32.mrb[147].mxu1  ;;  %v20687_v55 = vpop.f32.mrb[152].mxu0  ;;  %v12625_v6 = vor.u32 %v12624_v47, %v12621_v50  ;;  %v10944_v14 = vadd.f32 %v10903_v5, %v20436_v34  ;;  %v12633_v47 = vrot.slane %v12631_v57, 2  ;;  %v10905_v5 = vld [vmem:[#allocation2 + $0x98] sm:$0xff] }
 0x674   : > { %v17057_v17 = vpop.f32.mrb[153].mxu0  ;;  %v12630_v50 = vrot.slane %v12628_v27, 1 }
 0x675   : > { %11703 = vst [vmem:[#allocation2 + $0x78] sm:$0xff] %v11662_v40  ;;  %17176 = vmatmul.mubr.bf16.gmra.mrb[252].mxu1 %v12617_v44  ;;  %v20691_v13 = vpop.f32.mrb[154].mxu0  ;;  %v12626_v44 = vsel %vm5779_vm6, %v12616_v18, %v12625_v6  ;;  %v12640_v18 = vshll.u32 %v17879_v51, 16 }
 0x676   : > { %v17058_v16 = vpop.f32.mrb[155].mxu0  ;;  %17179 = vmatprep.mubr.msk.bf16.mxu1 %vm17899_vm0, %v17898_v1 }
 0x678   : > { %v11504_v43 = vpop.f32.mrb[148].mxu1  ;;  %17280 = vmatmul.mubr.bf16.gmra.mrb[4].mxu0 %v17878_v21  ;;  %v17880_v21 = vld [vmem:[%s17974_s12 + $0x84] sm:$0xff]  }
 0x679   : > { %v11663_v12 = vadd.f32 %v11504_v43, %v10943_v33  ;;  %v16957_v39 = vpop.f32.mrb[149].mxu1  ;;  %17283 = vmatprep.mubr.msk.bf16.mxu0 %vm17899_vm0, %v17898_v1  ;;  %v10945_v33 = vadd.f32 %v10904_v45, %v20448_v3  ;;  %v10906_v45 = vld [vmem:[#allocation2 + $0xa0] sm:$0xff] }
 0x67a   : > { %v11507_v4 = vpop.f32.mrb[150].mxu1  ;;  %v12637_v39 = vshrl.u32 %v17879_v51, 16  ;;  %v17881_v51 = vld [vmem:[#allocation3 + $0xa4] sm:$0xff]  }
 0x67b   : > { %11704 = vst [vmem:[#allocation2 + $0x80] sm:$0xff] %v11663_v12  ;;  %v11664_v40 = vadd.f32 %v11507_v4, %v10944_v14  ;;  %v16958_v10 = vpop.f32.mrb[151].mxu1  ;;  %v20699_v17 = vpop.f32.mrb[156].mxu0  ;;  %v12634_v12 = vor.u32 %v12633_v47, %v12630_v50  ;;  %v10946_v14 = vadd.f32 %v10905_v5, %v20452_v60  ;;  %v12642_v47 = vrot.slane %v12640_v18, 2  ;;  %v10907_v5 = vld [vmem:[#allocation2 + $0xa8] sm:$0xff] }
 0x67c   : > { %v17061_v53 = vpop.f32.mrb[157].mxu0  ;;  %v12639_v50 = vrot.slane %v12637_v39, 1 }
 0x67d   : > { %11705 = vst [vmem:[#allocation2 + $0x88] sm:$0xff] %v11664_v40  ;;  %17180 = vmatmul.mubr.bf16.gmra.mrb[0].mxu1 %v12626_v44  ;;  %v20703_v34 = vpop.f32.mrb[158].mxu0  ;;  %v12635_v44 = vsel %vm5779_vm6, %v12625_v6, %v12634_v12  ;;  %v12649_v6 = vshll.u32 %v17881_v51, 16 }
 0x67e   : > { %v17062_v16 = vpop.f32.mrb[159].mxu0  ;;  %17183 = vmatprep.mubr.msk.bf16.mxu1 %vm17899_vm0, %v17898_v1 }
 0x680   : > { %v11512_v43 = vpop.f32.mrb[152].mxu1  ;;  %17284 = vmatmul.mubr.bf16.gmra.mrb[8].mxu0 %v17880_v21  ;;  %v17882_v21 = vld [vmem:[%s17974_s12 + $0x8c] sm:$0xff]  }
 0x681   : > { %v11665_v27 = vadd.f32 %v11512_v43, %v10945_v33  ;;  %v16961_v57 = vpop.f32.mrb[153].mxu1  ;;  %17287 = vmatprep.mubr.msk.bf16.mxu0 %vm17899_vm0, %v17898_v1  ;;  %v10947_v33 = vadd.f32 %v10906_v45, %v20462_v63  ;;  %v17883_v63 = vld [vmem:[#allocation3 + $0xac] sm:$0xff]  }
 0x682   : > { %v11515_v4 = vpop.f32.mrb[154].mxu1  ;;  %v12646_v57 = vshrl.u32 %v17881_v51, 16  ;;  %v12651_v51 = vrot.slane %v12649_v6, 2 }
 0x683   : > { %11706 = vst [vmem:[#allocation2 + $0x90] sm:$0xff] %v11665_v27  ;;  %v11666_v40 = vadd.f32 %v11515_v4, %v10946_v14  ;;  %v16962_v10 = vpop.f32.mrb[155].mxu1  ;;  %v20711_v53 = vpop.f32.mrb[160].mxu0  ;;  %v12643_v27 = vor.u32 %v12642_v47, %v12639_v50  ;;  %v10948_v14 = vadd.f32 %v10907_v5, %v20465_v8  ;;  %v10908_v50 = vld [vmem:[#allocation2 + $0xb0] sm:$0xff]  ;;  %v10909_v5 = vld [vmem:[#allocation2 + $0xb8] sm:$0xff] }
 0x684   : > { %v17065_v3 = vpop.f32.mrb[161].mxu0  ;;  %v12648_v47 = vrot.slane %v12646_v57, 1  ;;  %v10950_v6 = vadd.f32 %v10909_v5, %v20481_v49  ;;  %v10911_v5 = vld [vmem:[#allocation2 + $0xc8] sm:$0xff] }
 0x685   : > { %11707 = vst [vmem:[#allocation2 + $0x98] sm:$0xff] %v11666_v40  ;;  %17184 = vmatmul.mubr.bf16.gmra.mrb[4].mxu1 %v12635_v44  ;;  %v20715_v60 = vpop.f32.mrb[162].mxu0  ;;  %v12644_v45 = vsel %vm5779_vm6, %v12634_v12, %v12643_v27 }
 0x686   : > { %v17066_v16 = vpop.f32.mrb[163].mxu0  ;;  %17187 = vmatprep.mubr.msk.bf16.mxu1 %vm17899_vm0, %v17898_v1 }
 0x688   : > { %v11520_v43 = vpop.f32.mrb[156].mxu1  ;;  %17288 = vmatmul.mubr.bf16.gmra.mrb[12].mxu0 %v17882_v21  ;;  %v17884_v21 = vld [vmem:[%s17974_s12 + $0x94] sm:$0xff]  }
 0x689   : > { %v11667_v39 = vadd.f32 %v11520_v43, %v10947_v33  ;;  %v16965_v18 = vpop.f32.mrb[157].mxu1  ;;  %17291 = vmatprep.mubr.msk.bf16.mxu0 %vm17899_vm0, %v17898_v1  ;;  %v10949_v33 = vadd.f32 %v10908_v50, %v20477_v41  ;;  %v12655_v43 = vshrl.u32 %v17883_v63, 16 }
 0x68a   : > { %v11523_v4 = vpop.f32.mrb[158].mxu1  ;;  %v12652_v18 = vor.u32 %v12651_v51, %v12648_v47  ;;  %v17885_v51 = vld [vmem:[#allocation3 + $0xb4] ss:$0 sps:$4 sm:$0xff]  }
 0x68b   : > { %11708 = vst [vmem:[#allocation2 + $0xa0] sm:$0xff] %v11667_v39  ;;  %v11668_v40 = vadd.f32 %v11523_v4, %v10948_v14  ;;  %v16966_v10 = vpop.f32.mrb[159].mxu1  ;;  %v20723_v3 = vpop.f32.mrb[164].mxu0  ;;  %v12658_v14 = vshll.u32 %v17883_v63, 16  ;;  %v12657_v41 = vrot.slane %v12655_v43, 1  ;;  %v10910_v63 = vld [vmem:[#allocation2 + $0xc0] sm:$0xff] }
 0x68c   : > { %v17069_v44 = vpop.f32.mrb[165].mxu0  ;;  %v12653_v50 = vsel %vm5779_vm6, %v12643_v27, %v12652_v18 }
 0x68d   : > { %11709 = vst [vmem:[#allocation2 + $0xa8] sm:$0xff] %v11668_v40  ;;  %17188 = vmatmul.mubr.bf16.gmra.mrb[8].mxu1 %v12644_v45  ;;  %v20727_v8 = vpop.f32.mrb[166].mxu0  ;;  %v12660_v47 = vrot.slane %v12658_v14, 2 }
 0x68e   : > { %v17070_v16 = vpop.f32.mrb[167].mxu0  ;;  %17191 = vmatprep.mubr.msk.bf16.mxu1 %vm17899_vm0, %v17898_v1 }
 0x68f   : > { %v12661_v43 = vor.u32 %v12660_v47, %v12657_v41 }
 0x690   : > { %v11528_v39 = vpop.f32.mrb[160].mxu1  ;;  %17292 = vmatmul.mubr.bf16.gmra.mrb[16].mxu0 %v17884_v21  ;;  %v17886_v21 = vld [vmem:[%s17974_s12 + $0x9c] sm:$0xff]  }
 0x691   : > { %v11669_v12 = vadd.f32 %v11528_v39, %v10949_v33  ;;  %v16969_v57 = vpop.f32.mrb[161].mxu1  ;;  %17295 = vmatprep.mubr.msk.bf16.mxu0 %vm17899_vm0, %v17898_v1  ;;  %v10951_v33 = vadd.f32 %v10910_v63, %v20490_v2  ;;  %v12662_v41 = vsel %vm5779_vm6, %v12652_v18, %v12661_v43 }
 0x692   : > { %v11531_v4 = vpop.f32.mrb[162].mxu1  ;;  %v12667_v57 = vshll.u32 %v17885_v51, 16 }
 0x693   : > { %11710 = vst [vmem:[#allocation2 + $0xb0] sm:$0xff] %v11669_v12  ;;  %v11670_v40 = vadd.f32 %v11531_v4, %v10950_v6  ;;  %v16970_v10 = vpop.f32.mrb[163].mxu1  ;;  %v20735_v44 = vpop.f32.mrb[168].mxu0  ;;  %v12664_v12 = vshrl.u32 %v17885_v51, 16  ;;  %v10952_v6 = vadd.f32 %v10911_v5, %v20493_v42  ;;  %v17887_v51 = vld [vmem:[%s17974_s12 + $0xa4] sm:$0xff]  }
 0x694   : > { %v17073_v45 = vpop.f32.mrb[169].mxu0  ;;  %v12669_v47 = vrot.slane %v12667_v57, 2 }
 0x695   : > { %11711 = vst [vmem:[#allocation2 + $0xb8] sm:$0xff] %v11670_v40  ;;  %17192 = vmatmul.mubr.bf16.gmra.mrb[12].mxu1 %v12653_v50  ;;  %v20739_v49 = vpop.f32.mrb[170].mxu0  ;;  %v10912_v50 = vld [vmem:[#allocation2 + $0xd0] sm:$0xff]  ;;  %v12666_v63 = vrot.slane %v12664_v12, 1 }
 0x696   : > { %v17074_v16 = vpop.f32.mrb[171].mxu0  ;;  %17195 = vmatprep.mubr.msk.bf16.mxu1 %vm17899_vm0, %v17898_v1  ;;  %v10953_v5 = vadd.f32 %v10912_v50, %v20503_v32 }
 0x697   : > { %v10913_v16 = vld [vmem:[#allocation2 + $0xd8] sm:$0xff] }
 0x698   : > { %v11536_v39 = vpop.f32.mrb[164].mxu1  ;;  %17296 = vmatmul.mubr.bf16.gmra.mrb[20].mxu0 %v17886_v21  ;;  %v10954_v12 = vadd.f32 %v10913_v16, %v20506_v58  ;;  %v10915_v58 = vld [vmem:[#allocation2 + $0xe8] sm:$0xff] }
 0x699   : > { %v11671_v27 = vadd.f32 %v11536_v39, %v10951_v33  ;;  %v16973_v14 = vpop.f32.mrb[165].mxu1  ;;  %17299 = vmatprep.mubr.msk.bf16.mxu0 %vm17899_vm0, %v17898_v1  ;;  %v12670_v39 = vor.u32 %v12669_v47, %v12666_v63  ;;  %v10956_v16 = vadd.f32 %v10915_v58, %v20518_v36 }
 0x69a   : > { %v11539_v4 = vpop.f32.mrb[166].mxu1 }
 0x69b   : > { %11712 = vst [vmem:[#allocation2 + $0xc0] sm:$0xff] %v11671_v27  ;;  %v11672_v40 = vadd.f32 %v11539_v4, %v10952_v6  ;;  %v16974_v10 = vpop.f32.mrb[167].mxu1  ;;  %v20747_v45 = vpop.f32.mrb[172].mxu0  ;;  %v12671_v32 = vsel %vm5779_vm6, %v12661_v43, %v12670_v39 }
 0x69c   : > { %v17077_v2 = vpop.f32.mrb[173].mxu0  ;;  %v10914_v10 = vld [vmem:[#allocation2 + $0xe0] sm:$0xff] }
 0x69d   : > { %11713 = vst [vmem:[#allocation2 + $0xc8] sm:$0xff] %v11672_v40  ;;  %17196 = vmatmul.mubr.bf16.gmra.mrb[16].mxu1 %v12662_v41  ;;  %v20751_v21 = vpop.f32.mrb[174].mxu0  ;;  %v17888_v2 = vld [vmem:[%s17974_s12 + $0xac] ss:$0 sps:$4 sm:$0x33]   ;;  %v10955_v63 = vadd.f32 %v10914_v10, %v20515_v24  ;;  %v10917_v24 = vld [vmem:[#allocation2 + $0xf8] sm:$0xff] }
 0x69e   : > { %v17078_v42 = vpop.f32.mrb[175].mxu0  ;;  %17199 = vmatprep.mubr.msk.bf16.mxu1 %vm17899_vm0, %v17898_v1  ;;  %v10958_v36 = vadd.f32 %v10917_v24, %v20529_v0  ;;  %s17324_s12 = smul.u32 328, %s20946_s25 }
 0x6a0   : > { %v11544_v33 = vpop.f32.mrb[168].mxu1  ;;  %17300 = vmatmul.mubr.bf16.gmra.mrb[24].mxu0 %v17887_v51  ;;  %s20811_s20 = scalar_lea.vmem %s20942_s7, %s17324_s12 }
 0x6a1   : > { %v11673_v18 = vadd.f32 %v11544_v33, %v10953_v5  ;;  %v16977_v27 = vpop.f32.mrb[169].mxu1  ;;  %17303 = vmatprep.mubr.msk.bf16.mxu0 %vm17899_vm0, %v17898_v1 }
 0x6a2   : > { %v11547_v57 = vpop.f32.mrb[170].mxu1 }
 0x6a3   : > { %11714 = vst [vmem:[#allocation2 + $0xd0] sm:$0xff] %v11673_v18  ;;  %v11674_v14 = vadd.f32 %v11547_v57, %v10954_v12  ;;  %v16978_v6 = vpop.f32.mrb[171].mxu1  ;;  %v20759_v4 = vpop.f32.mrb[176].mxu0  ;;  %v10916_v12 = vld [vmem:[#allocation2 + $0xf0] sm:$0xff] }
 0x6a4   : > { %v17081_v40 = vpop.f32.mrb[177].mxu0 }
 0x6a5   : > { %11715 = vst [vmem:[#allocation2 + $0xd8] sm:$0xff] %v11674_v14  ;;  %17200 = vmatmul.mubr.bf16.gmra.mrb[20].mxu1 %v12671_v32  ;;  %v20763_v41 = vpop.f32.mrb[178].mxu0  ;;  %v10957_v14 = vadd.f32 %v10916_v12, %v20526_v29 }
 0x6a6   : > { %v17082_v50 = vpop.f32.mrb[179].mxu0  ;;  %17203 = vmatprep.mubr.msk.bf16.mxu1 %vm17899_vm0, %v17898_v1 }
 0x6a8   : > { %v11552_v47 = vpop.f32.mrb[172].mxu1  ;;  %17304 = vmatmul.mubr.bf16.gmra.mrb[28].mxu0 %v17888_v2 }
 0x6a9   : > { %v11675_v51 = vadd.f32 %v11552_v47, %v10955_v63  ;;  %v16981_v42 = vpop.f32.mrb[173].mxu1  ;;  %v10918_v47 = vld [vmem:[#allocation2 + $0x100] sm:$0xff] }
 0x6aa   : > { %v11555_v43 = vpop.f32.mrb[174].mxu1  ;;  %v10919_v42 = vld [vmem:[#allocation2 + $0x108] sm:$0xff]  ;;  %v10959_v29 = vadd.f32 %v10918_v47, %v20537_v7 }
 0x6ab   : > { %11716 = vst [vmem:[#allocation2 + $0xe0] sm:$0xff] %v11675_v51  ;;  %v11676_v5 = vadd.f32 %v11555_v43, %v10956_v16  ;;  %v16982_v33 = vpop.f32.mrb[175].mxu1  ;;  %v20769_v18 = vpop.f32.mrb[180].mxu0  ;;  %v10960_v0 = vadd.f32 %v10919_v42, %v20541_v15 }
 0x6ac   : > { %v17085_v27 = vpop.f32.mrb[181].mxu0 }
 0x6ad   : > { %11717 = vst [vmem:[#allocation2 + $0xe8] sm:$0xff] %v11676_v5  ;;  %17204 = vmatmul.mubr.bf16.gmra.mrb[24].mxu1 %v12670_v39  ;;  %v20771_v57 = vpop.f32.mrb[182].mxu0 }
 0x6ae   : > { %v17086_v1 = vpop.f32.mrb[183].mxu0 }
 0x6b0   : > { %v11560_v6 = vpop.f32.mrb[176].mxu1 }
 0x6b1   : > { %v11677_v40 = vadd.f32 %v11560_v6, %v10957_v14  ;;  %v16985_v32 = vpop.f32.mrb[177].mxu1  ;;  %v10920_v14 = vld [vmem:[#allocation2 + $0x110] sm:$0xff] }
 0x6b2   : > { %v11563_v10 = vpop.f32.mrb[178].mxu1  ;;  %v10921_v32 = vld [vmem:[#allocation2 + $0x118] sm:$0xff]  ;;  %v10961_v7 = vadd.f32 %v10920_v14, %v20549_v22 }
 0x6b3   : > { %11718 = vst [vmem:[#allocation2 + $0xf0] sm:$0xff] %v11677_v40  ;;  %v11678_v2 = vadd.f32 %v11563_v10, %v10958_v36  ;;  %v16986_v50 = vpop.f32.mrb[179].mxu1  ;;  %v20775_v58 = vpop.f32.mrb[184].mxu0  ;;  %v10962_v15 = vadd.f32 %v10921_v32, %v20553_v61 }
 0x6b4   : > { %v17089_v63 = vpop.f32.mrb[185].mxu0 }
 0x6b5   : > { %11719 = vst [vmem:[#allocation2 + $0xf8] sm:$0xff] %v11678_v2  ;;  %v20777_v39 = vpop.f32.mrb[186].mxu0 }
 0x6b6   : > { %v17090_v51 = vpop.f32.mrb[187].mxu0 }
 0x6b8   : > { %v11568_v16 = vpop.f32.mrb[180].mxu1 }
 0x6b9   : > { %v11679_v43 = vadd.f32 %v11568_v16, %v10959_v29  ;;  %v16989_v5 = vpop.f32.mrb[181].mxu1  ;;  %v10922_v29 = vld [vmem:[#allocation2 + $0x120] sm:$0xff] }
 0x6ba   : > { %v11571_v33 = vpop.f32.mrb[182].mxu1  ;;  %v10923_v5 = vld [vmem:[#allocation2 + $0x128] sm:$0xff]  ;;  %v10963_v22 = vadd.f32 %v10922_v29, %v20561_v38 }
 0x6bb   : > { %11720 = vst [vmem:[#allocation2 + $0x100] sm:$0xff] %v11679_v43  ;;  %v11680_v27 = vadd.f32 %v11571_v33, %v10960_v0  ;;  %v16990_v12 = vpop.f32.mrb[183].mxu1  ;;  %v20781_v1 = vpop.f32.mrb[188].mxu0  ;;  %v10964_v61 = vadd.f32 %v10923_v5, %v20565_v46 }
 0x6bc   : > { %v17093_v24 = vpop.f32.mrb[189].mxu0 }
 0x6bd   : > { %11721 = vst [vmem:[#allocation2 + $0x108] sm:$0xff] %v11680_v27  ;;  %v20783_v6 = vpop.f32.mrb[190].mxu0 }
 0x6be   : > { %v17094_v40 = vpop.f32.mrb[191].mxu0 }
 0x6c0   : > { %v11576_v36 = vpop.f32.mrb[184].mxu1 }
 0x6c1   : > { %v11681_v10 = vadd.f32 %v11576_v36, %v10961_v7  ;;  %v16993_v2 = vpop.f32.mrb[185].mxu1  ;;  %v10924_v7 = vld [vmem:[#allocation2 + $0x130] sm:$0xff] }
 0x6c2   : > { %v11579_v50 = vpop.f32.mrb[186].mxu1  ;;  %v10925_v2 = vld [vmem:[#allocation2 + $0x138] sm:$0xff]  ;;  %v10965_v38 = vadd.f32 %v10924_v7, %v20573_v62 }
 0x6c3   : > { %11722 = vst [vmem:[#allocation2 + $0x110] sm:$0xff] %v11681_v10  ;;  %v11682_v63 = vadd.f32 %v11579_v50, %v10962_v15  ;;  %v16994_v47 = vpop.f32.mrb[187].mxu1  ;;  %v20787_v51 = vpop.f32.mrb[192].mxu0  ;;  %v10966_v46 = vadd.f32 %v10925_v2, %v20577_v28 }
 0x6c4   : > { %v17097_v42 = vpop.f32.mrb[193].mxu0 }
 0x6c5   : > { %11723 = vst [vmem:[#allocation2 + $0x118] sm:$0xff] %v11682_v63  ;;  %v20789_v16 = vpop.f32.mrb[194].mxu0 }
 0x6c6   : > { %v17098_v43 = vpop.f32.mrb[195].mxu0 }
 0x6c8   : > { %v11584_v0 = vpop.f32.mrb[188].mxu1 }
 0x6c9   : > { %v11683_v33 = vadd.f32 %v11584_v0, %v10963_v22  ;;  %v16997_v27 = vpop.f32.mrb[189].mxu1 }
 0x6ca   : > { %v11587_v12 = vpop.f32.mrb[190].mxu1  ;;  %v11646_v27 = vld [vmem:[#allocation2 + $0x140] sm:$0xf] }
 0x6cb   : > { %11724 = vst [vmem:[#allocation2 + $0x120] sm:$0xff] %v11683_v33  ;;  %v11684_v24 = vadd.f32 %v11587_v12, %v10964_v61  ;;  %v16998_v14 = vpop.f32.mrb[191].mxu1  ;;  %v20793_v40 = vpop.f32.mrb[196].mxu0 }
 0x6cc   : > { %v17101_v32 = vpop.f32.mrb[197].mxu0 }
 0x6cd   : > { %11725 = vst [vmem:[#allocation2 + $0x128] sm:$0xff] %v11684_v24  ;;  %v20795_v36 = vpop.f32.mrb[198].mxu0  ;;  %v12200_v32 = vld [vmem:[#allocation2] sm:$0xff] }
 0x6ce   : > { %v17102_v10 = vpop.f32.mrb[199].mxu0 }
 0x6cf   : > { %v12201_v10 = vld [vmem:[#allocation2 + $0x8] sm:$0xff] }
 0x6d0   : > { %v11592_v15 = vpop.f32.mrb[192].mxu1 }
 0x6d1   : > { %v11685_v50 = vadd.f32 %v11592_v15, %v10965_v38  ;;  %v17001_v63 = vpop.f32.mrb[193].mxu1  ;;  %v12241_v38 = vadd.f32 %v12200_v32, %v20591_v26 }
 0x6d2   : > { %v11595_v47 = vpop.f32.mrb[194].mxu1 }
 0x6d3   : > { %11726 = vst [vmem:[#allocation2 + $0x130] sm:$0xff] %v11685_v50  ;;  %v11686_v42 = vadd.f32 %v11595_v47, %v10966_v46  ;;  %v17002_v29 = vpop.f32.mrb[195].mxu1  ;;  %v12194_v43 = vpop.f32.mrb[200].mxu0  ;;  %v12242_v46 = vadd.f32 %v12201_v10, %v20595_v56 }
 0x6d4   : > { %v17105_v5 = vpop.f32.mrb[201].mxu0  ;;  %v20805_v29 = vld [vmem:[%s20940_s5] ss:$0 sm:$0xff] }
 0x6d5   : > { %11727 = vst [vmem:[#allocation2 + $0x138] sm:$0xff] %v11686_v42  ;;  %v12197_v22 = vpop.f32.mrb[202].mxu0 }
 0x6d6   : > { %v17106_v0 = vpop.f32.mrb[203].mxu0 }
 0x6d8   : > { %v11600_v33 = vpop.f32.mrb[196].mxu1 }
 0x6d9   : > { %v11687_v61 = vadd.f32 %v11646_v27, %v11600_v33  ;;  %v17005_v12 = vpop.f32.mrb[197].mxu1 }
 0x6da   : > { %v11603_v24 = vpop.f32.mrb[198].mxu1 }
 0x6db   : > { %11728 = vst [vmem:[#allocation2 + $0x140] sm:$0xf] %v11687_v61  ;;  %v17006_v62 = vpop.f32.mrb[199].mxu1  ;;  %v13368_v14 = vpop.f32.mrb[204].mxu0  ;;  %v12202_v61 = vld [vmem:[#allocation2 + $0x10] sm:$0xff] }
 0x6dc   : > { %v17225_v28 = vpop.f32.mrb[205].mxu0 }
 0x6dd   : > { %v13371_v7 = vpop.f32.mrb[206].mxu0 }
 0x6de   : > { %v17226_v2 = vpop.f32.mrb[207].mxu0 }
 0x6e0   : > { %v12775_v15 = vpop.f32.mrb[200].mxu1 }
 0x6e1   : > { %v12982_v50 = vadd.f32 %v12775_v15, %v12241_v38  ;;  %v17125_v63 = vpop.f32.mrb[201].mxu1 }
 0x6e2   : > { %v12240_v47 = vld [vmem:[#allocation2 + $0x140] sm:$0xf]  ;;  %v12778_v42 = vpop.f32.mrb[202].mxu1 }
 0x6e3   : > { %v12281_v5 = vadd.f32 %v12240_v47, %v12194_v43  ;;  %v12983_v22 = vadd.f32 %v12778_v42, %v12242_v46  ;;  %v17126_v0 = vpop.f32.mrb[203].mxu1  ;;  %v13534_v33 = vadd.f32 %v13368_v14, %v12982_v50  ;;  %v13376_v27 = vpop.f32.mrb[208].mxu0  ;;  %v12203_v43 = vld [vmem:[#allocation2 + $0x18] sm:$0xff]  ;;  %v12243_v14 = vadd.f32 %v12202_v61, %v20603_v25  ;;  %v12205_v61 = vld [vmem:[#allocation2 + $0x28] sm:$0xff] }
 0x6e4   : > { %v17229_v26 = vpop.f32.mrb[209].mxu0  ;;  %v12244_v38 = vadd.f32 %v12203_v43, %v20607_v11 }
 0x6e5   : > { %12322 = vst [vmem:[#allocation2 + $0x140] sm:$0xf] %v12281_v5  ;;  %13575 = vst [vmem:[#allocation2] sm:$0xff] %v13534_v33  ;;  %v13664_v12 = vadd.f32 %v20805_v29, %v13534_v33  ;;  %v13535_v56 = vadd.f32 %v13371_v7, %v12983_v22  ;;  %v13379_v24 = vpop.f32.mrb[210].mxu0  ;;  %v12204_v5 = vld [vmem:[#allocation2 + $0x20] sm:$0xff] }
 0x6e6   : > { %v17230_v62 = vpop.f32.mrb[211].mxu0  ;;  %v12245_v11 = vadd.f32 %v12204_v5, %v20615_v23 }
 0x6e7   : > { %v13705_v32 = vmax.f32 %v13664_v12, 0.0  ;;  %13576 = vst [vmem:[#allocation2 + $0x8] sm:$0xff] %v13535_v56  ;;  %v13665_v28 = vadd.f32 %v20805_v29, %v13535_v56 }
 0x6e8   : > { %v12783_v10 = vpop.f32.mrb[204].mxu1 }
 0x6e9   : > { %v12984_v2 = vadd.f32 %v12783_v10, %v12243_v14  ;;  %13746 = vst [vmem:[%s20811_s20] sm:$0xff] %v13705_v32  ;;  %v17129_v7 = vpop.f32.mrb[205].mxu1  ;;  %v13706_v15 = vmax.f32 %v13665_v28, 0.0  ;;  %v12246_v14 = vadd.f32 %v12205_v61, %v20619_v31 }
 0x6ea   : > { %v12786_v50 = vpop.f32.mrb[206].mxu1 }
 0x6eb   : > { %v12985_v63 = vadd.f32 %v12786_v50, %v12244_v38  ;;  %13747 = vst [vmem:[%s20811_s20 + $0x8] sm:$0xff] %v13706_v15  ;;  %v17130_v46 = vpop.f32.mrb[207].mxu1  ;;  %v13536_v47 = vadd.f32 %v13376_v27, %v12984_v2  ;;  %v13384_v42 = vpop.f32.mrb[212].mxu0  ;;  %v12206_v38 = vld [vmem:[#allocation2 + $0x30] sm:$0xff] }
 0x6ec   : > { %v17233_v25 = vpop.f32.mrb[213].mxu0  ;;  %v12207_v46 = vld [vmem:[#allocation2 + $0x38] sm:$0xff]  ;;  %v12247_v31 = vadd.f32 %v12206_v38, %v20627_v20 }
 0x6ed   : > { %13577 = vst [vmem:[#allocation2 + $0x10] sm:$0xff] %v13536_v47  ;;  %v13666_v22 = vadd.f32 %v20805_v29, %v13536_v47  ;;  %v13537_v0 = vadd.f32 %v13379_v24, %v12985_v63  ;;  %v13387_v33 = vpop.f32.mrb[214].mxu0  ;;  %v12248_v61 = vadd.f32 %v12207_v46, %v20631_v37 }
 0x6ee   : > { %v17234_v26 = vpop.f32.mrb[215].mxu0 }
 0x6ef   : > { %v13707_v12 = vmax.f32 %v13666_v22, 0.0  ;;  %13578 = vst [vmem:[#allocation2 + $0x18] sm:$0xff] %v13537_v0  ;;  %v13667_v56 = vadd.f32 %v20805_v29, %v13537_v0 }
 0x6f0   : > { %v12791_v43 = vpop.f32.mrb[208].mxu1 }
 0x6f1   : > { %v12986_v27 = vadd.f32 %v12791_v43, %v12245_v11  ;;  %13748 = vst [vmem:[%s20811_s20 + $0x10] sm:$0xff] %v13707_v12  ;;  %v17133_v62 = vpop.f32.mrb[209].mxu1  ;;  %v13708_v32 = vmax.f32 %v13667_v56, 0.0 }
 0x6f2   : > { %v12794_v28 = vpop.f32.mrb[210].mxu1 }
 0x6f3   : > { %v12987_v10 = vadd.f32 %v12794_v28, %v12246_v14  ;;  %13749 = vst [vmem:[%s20811_s20 + $0x18] sm:$0xff] %v13708_v32  ;;  %v17134_v24 = vpop.f32.mrb[211].mxu1  ;;  %v13538_v2 = vadd.f32 %v13384_v42, %v12986_v27  ;;  %v13392_v7 = vpop.f32.mrb[216].mxu0  ;;  %v12208_v27 = vld [vmem:[#allocation2 + $0x40] sm:$0xff]  ;;  %v12209_v28 = vld [vmem:[#allocation2 + $0x48] sm:$0xff] }
 0x6f4   : > { %v17237_v23 = vpop.f32.mrb[217].mxu0  ;;  %v12249_v37 = vadd.f32 %v12208_v27, %v20639_v54 }
 0x6f5   : > { %13579 = vst [vmem:[#allocation2 + $0x20] sm:$0xff] %v13538_v2  ;;  %v13668_v15 = vadd.f32 %v20805_v29, %v13538_v2  ;;  %v13539_v50 = vadd.f32 %v13387_v33, %v12987_v10  ;;  %v13395_v63 = vpop.f32.mrb[218].mxu0 }
 0x6f6   : > { %v17238_v47 = vpop.f32.mrb[219].mxu0 }
 0x6f7   : > { %v13709_v5 = vmax.f32 %v13668_v15, 0.0  ;;  %13580 = vst [vmem:[#allocation2 + $0x28] sm:$0xff] %v13539_v50  ;;  %v13669_v25 = vadd.f32 %v20805_v29, %v13539_v50  ;;  %v12250_v15 = vadd.f32 %v12209_v28, %v20643_v52 }
 0x6f8   : > { %v12799_v22 = vpop.f32.mrb[212].mxu1 }
 0x6f9   : > { %v12988_v42 = vadd.f32 %v12799_v22, %v12247_v31  ;;  %13750 = vst [vmem:[%s20811_s20 + $0x20] sm:$0xff] %v13709_v5  ;;  %v17137_v0 = vpop.f32.mrb[213].mxu1  ;;  %v13710_v26 = vmax.f32 %v13669_v25, 0.0  ;;  %v12210_v25 = vld [vmem:[#allocation2 + $0x50] sm:$0xff] }
 0x6fa   : > { %v12802_v11 = vpop.f32.mrb[214].mxu1  ;;  %v12251_v52 = vadd.f32 %v12210_v25, %v20651_v59 }
 0x6fb   : > { %v12989_v12 = vadd.f32 %v12802_v11, %v12248_v61  ;;  %13751 = vst [vmem:[%s20811_s20 + $0x28] sm:$0xff] %v13710_v26  ;;  %v17138_v33 = vpop.f32.mrb[215].mxu1  ;;  %v13540_v56 = vadd.f32 %v13392_v7, %v12988_v42  ;;  %v13400_v43 = vpop.f32.mrb[220].mxu0  ;;  %v12211_v61 = vld [vmem:[#allocation2 + $0x58] sm:$0xff] }
 0x6fc   : > { %v17241_v20 = vpop.f32.mrb[221].mxu0  ;;  %v12252_v27 = vadd.f32 %v12211_v61, %v20655_v9  ;;  %v12214_v61 = vld [vmem:[#allocation2 + $0x70] sm:$0xff] }
 0x6fd   : > { %13581 = vst [vmem:[#allocation2 + $0x30] sm:$0xff] %v13540_v56  ;;  %v13670_v62 = vadd.f32 %v20805_v29, %v13540_v56  ;;  %v13541_v14 = vadd.f32 %v13395_v63, %v12989_v12  ;;  %v13403_v32 = vpop.f32.mrb[222].mxu0 }
 0x6fe   : > { %v17242_v10 = vpop.f32.mrb[223].mxu0 }
 0x6ff   : > { %v13711_v24 = vmax.f32 %v13670_v62, 0.0  ;;  %13582 = vst [vmem:[#allocation2 + $0x38] sm:$0xff] %v13541_v14  ;;  %v13671_v2 = vadd.f32 %v20805_v29, %v13541_v14 }
 0x700   : > { %v12807_v38 = vpop.f32.mrb[216].mxu1 }
 0x701   : > { %v12990_v7 = vadd.f32 %v12807_v38, %v12249_v37  ;;  %13752 = vst [vmem:[%s20811_s20 + $0x30] sm:$0xff] %v13711_v24  ;;  %v17141_v23 = vpop.f32.mrb[217].mxu1  ;;  %v13712_v50 = vmax.f32 %v13671_v2, 0.0  ;;  %v12212_v37 = vld [vmem:[#allocation2 + $0x60] sm:$0xff] }
 0x702   : > { %v12810_v46 = vpop.f32.mrb[218].mxu1  ;;  %v12253_v9 = vadd.f32 %v12212_v37, %v20663_v35 }
 0x703   : > { %v12991_v47 = vadd.f32 %v12810_v46, %v12250_v15  ;;  %13753 = vst [vmem:[%s20811_s20 + $0x38] sm:$0xff] %v13712_v50  ;;  %v17142_v63 = vpop.f32.mrb[219].mxu1  ;;  %v13542_v31 = vadd.f32 %v13400_v43, %v12990_v7  ;;  %v13408_v5 = vpop.f32.mrb[224].mxu0  ;;  %v12213_v7 = vld [vmem:[#allocation2 + $0x68] sm:$0xff] }
 0x704   : > { %v17245_v54 = vpop.f32.mrb[225].mxu0 }
 0x705   : > { %13583 = vst [vmem:[#allocation2 + $0x40] sm:$0xff] %v13542_v31  ;;  %v13672_v22 = vadd.f32 %v20805_v29, %v13542_v31  ;;  %v13543_v42 = vadd.f32 %v13403_v32, %v12991_v47  ;;  %v13411_v0 = vpop.f32.mrb[226].mxu0  ;;  %v12254_v31 = vadd.f32 %v12213_v7, %v20667_v30  ;;  %v12255_v30 = vadd.f32 %v12214_v61, %v20675_v19 }
 0x706   : > { %v17246_v26 = vpop.f32.mrb[227].mxu0 }
 0x707   : > { %v13713_v11 = vmax.f32 %v13672_v22, 0.0  ;;  %13584 = vst [vmem:[#allocation2 + $0x48] sm:$0xff] %v13543_v42  ;;  %v13673_v12 = vadd.f32 %v20805_v29, %v13543_v42 }
 0x708   : > { %v12815_v33 = vpop.f32.mrb[220].mxu1 }
 0x709   : > { %v12992_v56 = vadd.f32 %v12815_v33, %v12251_v52  ;;  %13754 = vst [vmem:[%s20811_s20 + $0x40] sm:$0xff] %v13713_v11  ;;  %v17145_v43 = vpop.f32.mrb[221].mxu1  ;;  %v13714_v20 = vmax.f32 %v13673_v12, 0.0  ;;  %v12215_v12 = vld [vmem:[#allocation2 + $0x78] sm:$0xff] }
 0x70a   : > { %v12818_v62 = vpop.f32.mrb[222].mxu1 }
 0x70b   : > { %v12993_v14 = vadd.f32 %v12818_v62, %v12252_v27  ;;  %13755 = vst [vmem:[%s20811_s20 + $0x48] sm:$0xff] %v13714_v20  ;;  %v17146_v32 = vpop.f32.mrb[223].mxu1  ;;  %v13544_v28 = vadd.f32 %v13408_v5, %v12992_v56  ;;  %v13416_v10 = vpop.f32.mrb[228].mxu0 }
 0x70c   : > { %v17249_v59 = vpop.f32.mrb[229].mxu0 }
 0x70d   : > { %13585 = vst [vmem:[#allocation2 + $0x50] sm:$0xff] %v13544_v28  ;;  %v13674_v24 = vadd.f32 %v20805_v29, %v13544_v28  ;;  %v13545_v2 = vadd.f32 %v13411_v0, %v12993_v14  ;;  %v13419_v38 = vpop.f32.mrb[230].mxu0  ;;  %v12256_v14 = vadd.f32 %v12215_v12, %v20679_v48  ;;  %v12219_v12 = vld [vmem:[#allocation2 + $0x98] sm:$0xff] }
 0x70e   : > { %v17250_v23 = vpop.f32.mrb[231].mxu0 }
 0x70f   : > { %v13715_v15 = vmax.f32 %v13674_v24, 0.0  ;;  %13586 = vst [vmem:[#allocation2 + $0x58] sm:$0xff] %v13545_v2  ;;  %v13675_v50 = vadd.f32 %v20805_v29, %v13545_v2  ;;  %v12216_v2 = vld [vmem:[#allocation2 + $0x80] sm:$0xff] }
 0x710   : > { %v12823_v46 = vpop.f32.mrb[224].mxu1  ;;  %v12257_v48 = vadd.f32 %v12216_v2, %v20687_v55 }
 0x711   : > { %v12994_v47 = vadd.f32 %v12823_v46, %v12253_v9  ;;  %13756 = vst [vmem:[%s20811_s20 + $0x50] sm:$0xff] %v13715_v15  ;;  %v17149_v63 = vpop.f32.mrb[225].mxu1  ;;  %v13716_v5 = vmax.f32 %v13675_v50, 0.0  ;;  %v12217_v9 = vld [vmem:[#allocation2 + $0x88] sm:$0xff] }
 0x712   : > { %v12826_v25 = vpop.f32.mrb[226].mxu1 }
 0x713   : > { %v12995_v54 = vadd.f32 %v12826_v25, %v12254_v31  ;;  %13757 = vst [vmem:[%s20811_s20 + $0x58] sm:$0xff] %v13716_v5  ;;  %v17150_v22 = vpop.f32.mrb[227].mxu1  ;;  %v13546_v42 = vadd.f32 %v13416_v10, %v12994_v47  ;;  %v13424_v0 = vpop.f32.mrb[232].mxu0  ;;  %v12258_v5 = vadd.f32 %v12217_v9, %v20691_v13 }
 0x714   : > { %v17253_v35 = vpop.f32.mrb[233].mxu0 }
 0x715   : > { %13587 = vst [vmem:[#allocation2 + $0x60] sm:$0xff] %v13546_v42  ;;  %v13676_v26 = vadd.f32 %v20805_v29, %v13546_v42  ;;  %v13547_v52 = vadd.f32 %v13419_v38, %v12995_v54  ;;  %v13427_v11 = vpop.f32.mrb[234].mxu0  ;;  %v12218_v35 = vld [vmem:[#allocation2 + $0x90] sm:$0xff] }
 0x716   : > { %v17254_v33 = vpop.f32.mrb[235].mxu0  ;;  %v12259_v13 = vadd.f32 %v12218_v35, %v20699_v17 }
 0x717   : > { %v13717_v56 = vmax.f32 %v13676_v26, 0.0  ;;  %13588 = vst [vmem:[#allocation2 + $0x68] sm:$0xff] %v13547_v52  ;;  %v13677_v43 = vadd.f32 %v20805_v29, %v13547_v52 }
 0x718   : > { %v12831_v27 = vpop.f32.mrb[228].mxu1 }
 0x719   : > { %v12996_v20 = vadd.f32 %v12831_v27, %v12255_v30  ;;  %13758 = vst [vmem:[%s20811_s20 + $0x60] sm:$0xff] %v13717_v56  ;;  %v17153_v62 = vpop.f32.mrb[229].mxu1  ;;  %v13718_v32 = vmax.f32 %v13677_v43, 0.0 }
 0x71a   : > { %v12834_v28 = vpop.f32.mrb[230].mxu1  ;;  %v12260_v62 = vadd.f32 %v12219_v12, %v20703_v34 }
 0x71b   : > { %v12997_v10 = vadd.f32 %v12834_v28, %v12256_v14  ;;  %13759 = vst [vmem:[%s20811_s20 + $0x68] sm:$0xff] %v13718_v32  ;;  %v17154_v37 = vpop.f32.mrb[231].mxu1  ;;  %v13548_v59 = vadd.f32 %v13424_v0, %v12996_v20  ;;  %v13432_v24 = vpop.f32.mrb[236].mxu0 }
 0x71c   : > { %v17257_v19 = vpop.f32.mrb[237].mxu0 }
 0x71d   : > { %13589 = vst [vmem:[#allocation2 + $0x70] sm:$0xff] %v13548_v59  ;;  %v13678_v38 = vadd.f32 %v20805_v29, %v13548_v59  ;;  %v13549_v7 = vadd.f32 %v13427_v11, %v12997_v10  ;;  %v13435_v23 = vpop.f32.mrb[238].mxu0 }
 0x71e   : > { %v17258_v15 = vpop.f32.mrb[239].mxu0 }
 0x71f   : > { %v13719_v50 = vmax.f32 %v13678_v38, 0.0  ;;  %13590 = vst [vmem:[#allocation2 + $0x78] sm:$0xff] %v13549_v7  ;;  %v13679_v46 = vadd.f32 %v20805_v29, %v13549_v7  ;;  %v12221_v7 = vld [vmem:[#allocation2 + $0xa8] sm:$0xff] }
 0x720   : > { %v12839_v47 = vpop.f32.mrb[232].mxu1 }
 0x721   : > { %v12998_v63 = vadd.f32 %v12839_v47, %v12257_v48  ;;  %13760 = vst [vmem:[%s20811_s20 + $0x70] sm:$0xff] %v13719_v50  ;;  %v17157_v31 = vpop.f32.mrb[233].mxu1  ;;  %v13720_v25 = vmax.f32 %v13679_v46, 0.0  ;;  %v12262_v47 = vadd.f32 %v12221_v7, %v20715_v60 }
 0x722   : > { %v12842_v54 = vpop.f32.mrb[234].mxu1 }
 0x723   : > { %v12999_v22 = vadd.f32 %v12842_v54, %v12258_v5  ;;  %13761 = vst [vmem:[%s20811_s20 + $0x78] sm:$0xff] %v13720_v25  ;;  %v17158_v42 = vpop.f32.mrb[235].mxu1  ;;  %v13550_v0 = vadd.f32 %v13432_v24, %v12998_v63  ;;  %v13440_v61 = vpop.f32.mrb[240].mxu0  ;;  %v12220_v24 = vld [vmem:[#allocation2 + $0xa0] sm:$0xff] }
 0x724   : > { %v17261_v55 = vpop.f32.mrb[241].mxu0  ;;  %v12261_v34 = vadd.f32 %v12220_v24, %v20711_v53  ;;  %v12222_v42 = vld [vmem:[#allocation2 + $0xb0] sm:$0xff] }
 0x725   : > { %13591 = vst [vmem:[#allocation2 + $0x80] sm:$0xff] %v13550_v0  ;;  %v13680_v26 = vadd.f32 %v20805_v29, %v13550_v0  ;;  %v13551_v52 = vadd.f32 %v13435_v23, %v12999_v22  ;;  %v13443_v11 = vpop.f32.mrb[242].mxu0  ;;  %v12223_v55 = vld [vmem:[#allocation2 + $0xb8] sm:$0xff]  ;;  %v12263_v60 = vadd.f32 %v12222_v42, %v20723_v3 }
 0x726   : > { %v17262_v33 = vpop.f32.mrb[243].mxu0 }
 0x727   : > { %v13721_v30 = vmax.f32 %v13680_v26, 0.0  ;;  %13592 = vst [vmem:[#allocation2 + $0x88] sm:$0xff] %v13551_v52  ;;  %v13681_v56 = vadd.f32 %v20805_v29, %v13551_v52 }
 0x728   : > { %v12847_v43 = vpop.f32.mrb[236].mxu1 }
 0x729   : > { %v13000_v27 = vadd.f32 %v12847_v43, %v12259_v13  ;;  %13762 = vst [vmem:[%s20811_s20 + $0x80] sm:$0xff] %v13721_v30  ;;  %v17161_v20 = vpop.f32.mrb[237].mxu1  ;;  %v13722_v14 = vmax.f32 %v13681_v56, 0.0  ;;  %v12264_v30 = vadd.f32 %v12223_v55, %v20727_v8 }
 0x72a   : > { %v12850_v32 = vpop.f32.mrb[238].mxu1 }
 0x72b   : > { %v13001_v28 = vadd.f32 %v12850_v32, %v12260_v62  ;;  %13763 = vst [vmem:[%s20811_s20 + $0x88] sm:$0xff] %v13722_v14  ;;  %v17162_v10 = vpop.f32.mrb[239].mxu1  ;;  %v13552_v37 = vadd.f32 %v13440_v61, %v13000_v27  ;;  %v13448_v59 = vpop.f32.mrb[244].mxu0  ;;  %v12224_v32 = vld [vmem:[#allocation2 + $0xc0] sm:$0xff] }
 0x72c   : > { %v17265_v17 = vpop.f32.mrb[245].mxu0  ;;  %v12265_v8 = vadd.f32 %v12224_v32, %v20735_v44 }
 0x72d   : > { %13593 = vst [vmem:[#allocation2 + $0x90] sm:$0xff] %v13552_v37  ;;  %v13682_v2 = vadd.f32 %v20805_v29, %v13552_v37  ;;  %v13553_v19 = vadd.f32 %v13443_v11, %v13001_v28  ;;  %v13451_v38 = vpop.f32.mrb[246].mxu0 }
 0x72e   : > { %v17266_v23 = vpop.f32.mrb[247].mxu0 }
 0x72f   : > { %v13723_v9 = vmax.f32 %v13682_v2, 0.0  ;;  %13594 = vst [vmem:[#allocation2 + $0x98] sm:$0xff] %v13553_v19  ;;  %v13683_v15 = vadd.f32 %v20805_v29, %v13553_v19 }
 0x730   : > { %v12855_v48 = vpop.f32.mrb[240].mxu1 }
 0x731   : > { %v13002_v50 = vadd.f32 %v12855_v48, %v12261_v34  ;;  %13764 = vst [vmem:[%s20811_s20 + $0x90] sm:$0xff] %v13723_v9  ;;  %v17165_v46 = vpop.f32.mrb[241].mxu1  ;;  %v13724_v63 = vmax.f32 %v13683_v15, 0.0 }
 0x732   : > { %v12858_v31 = vpop.f32.mrb[242].mxu1 }
 0x733   : > { %v13003_v5 = vadd.f32 %v12858_v31, %v12262_v47  ;;  %13765 = vst [vmem:[%s20811_s20 + $0x98] sm:$0xff] %v13724_v63  ;;  %v17166_v25 = vpop.f32.mrb[243].mxu1  ;;  %v13554_v54 = vadd.f32 %v13448_v59, %v13002_v50  ;;  %v13456_v22 = vpop.f32.mrb[248].mxu0  ;;  %v12225_v59 = vld [vmem:[#allocation2 + $0xc8] sm:$0xff]  ;;  %v12226_v47 = vld [vmem:[#allocation2 + $0xd0] sm:$0xff] }
 0x734   : > { %v17269_v53 = vpop.f32.mrb[249].mxu0  ;;  %v12266_v23 = vadd.f32 %v12225_v59, %v20739_v49  ;;  %v12227_v25 = vld [vmem:[#allocation2 + $0xd8] sm:$0xff]  ;;  %v12267_v49 = vadd.f32 %v12226_v47, %v20747_v45 }
 0x735   : > { %13595 = vst [vmem:[#allocation2 + $0xa0] sm:$0xff] %v13554_v54  ;;  %v13684_v0 = vadd.f32 %v20805_v29, %v13554_v54  ;;  %v13555_v61 = vadd.f32 %v13451_v38, %v13003_v5  ;;  %v13459_v35 = vpop.f32.mrb[250].mxu0 }
 0x736   : > { %v17270_v26 = vpop.f32.mrb[251].mxu0 }
 0x737   : > { %v13725_v52 = vmax.f32 %v13684_v0, 0.0  ;;  %13596 = vst [vmem:[#allocation2 + $0xa8] sm:$0xff] %v13555_v61  ;;  %v13685_v11 = vadd.f32 %v20805_v29, %v13555_v61 }
 0x738   : > { %v12863_v12 = vpop.f32.mrb[244].mxu1 }
 0x739   : > { %v13004_v33 = vadd.f32 %v12863_v12, %v12263_v60  ;;  %13766 = vst [vmem:[%s20811_s20 + $0xa0] sm:$0xff] %v13725_v52  ;;  %v17169_v13 = vpop.f32.mrb[245].mxu1  ;;  %v13726_v56 = vmax.f32 %v13685_v11, 0.0 }
 0x73a   : > { %v12866_v43 = vpop.f32.mrb[246].mxu1 }
 0x73b   : > { %v13005_v27 = vadd.f32 %v12866_v43, %v12264_v30  ;;  %13767 = vst [vmem:[%s20811_s20 + $0xa8] sm:$0xff] %v13726_v56  ;;  %v17170_v20 = vpop.f32.mrb[247].mxu1  ;;  %v13556_v62 = vadd.f32 %v13456_v22, %v13004_v33  ;;  %v13464_v14 = vpop.f32.mrb[252].mxu0  ;;  %v12228_v33 = vld [vmem:[#allocation2 + $0xe0] sm:$0xff]  ;;  %v12229_v43 = vld [vmem:[#allocation2 + $0xe8] sm:$0xff] }
 0x73c   : > { %v17273_v3 = vpop.f32.mrb[253].mxu0 }
 0x73d   : > { %13597 = vst [vmem:[#allocation2 + $0xb0] sm:$0xff] %v13556_v62  ;;  %v13686_v28 = vadd.f32 %v20805_v29, %v13556_v62  ;;  %v13557_v10 = vadd.f32 %v13459_v35, %v13005_v27  ;;  %v13467_v37 = vpop.f32.mrb[254].mxu0  ;;  %v12268_v35 = vadd.f32 %v12227_v25, %v20751_v21  ;;  %v12269_v21 = vadd.f32 %v12228_v33, %v20759_v4 }
 0x73e   : > { %v17274_v24 = vpop.f32.mrb[255].mxu0 }
 0x73f   : > { %v13727_v17 = vmax.f32 %v13686_v28, 0.0  ;;  %13598 = vst [vmem:[#allocation2 + $0xb8] sm:$0xff] %v13557_v10  ;;  %v13687_v2 = vadd.f32 %v20805_v29, %v13557_v10  ;;  %v12270_v28 = vadd.f32 %v12229_v43, %v20763_v41  ;;  %v12234_v43 = vld [vmem:[#allocation2 + $0x110] sm:$0xff] }
 0x740   : > { %v12871_v19 = vpop.f32.mrb[248].mxu1 }
 0x741   : > { %v13006_v38 = vadd.f32 %v12871_v19, %v12265_v8  ;;  %13768 = vst [vmem:[%s20811_s20 + $0xb0] sm:$0xff] %v13727_v17  ;;  %v17173_v7 = vpop.f32.mrb[249].mxu1  ;;  %v13728_v34 = vmax.f32 %v13687_v2, 0.0  ;;  %v12230_v2 = vld [vmem:[#allocation2 + $0xf0] sm:$0xff] }
 0x742   : > { %v12874_v9 = vpop.f32.mrb[250].mxu1  ;;  %v12271_v41 = vadd.f32 %v12230_v2, %v20769_v18 }
 0x743   : > { %v13007_v15 = vadd.f32 %v12874_v9, %v12266_v23  ;;  %13769 = vst [vmem:[%s20811_s20 + $0xb8] sm:$0xff] %v13728_v34  ;;  %v17174_v48 = vpop.f32.mrb[251].mxu1  ;;  %v13558_v50 = vadd.f32 %v13464_v14, %v13006_v38  ;;  %v13472_v46 = vpop.f32.mrb[0].mxu0  ;;  %v12231_v23 = vld [vmem:[#allocation2 + $0xf8] sm:$0xff] }
 0x744   : > { %v17277_v44 = vpop.f32.mrb[1].mxu0  ;;  %v12272_v47 = vadd.f32 %v12231_v23, %v20771_v57 }
 0x745   : > { %13599 = vst [vmem:[#allocation2 + $0xc0] sm:$0xff] %v13558_v50  ;;  %v13688_v63 = vadd.f32 %v20805_v29, %v13558_v50  ;;  %v13559_v31 = vadd.f32 %v13467_v37, %v13007_v15  ;;  %v13475_v5 = vpop.f32.mrb[2].mxu0 }
 0x746   : > { %v17278_v54 = vpop.f32.mrb[3].mxu0 }
 0x747   : > { %v13729_v22 = vmax.f32 %v13688_v63, 0.0  ;;  %13600 = vst [vmem:[#allocation2 + $0xc8] sm:$0xff] %v13559_v31  ;;  %v13689_v42 = vadd.f32 %v20805_v29, %v13559_v31 }
 0x748   : > { %v12879_v53 = vpop.f32.mrb[252].mxu1 }
 0x749   : > { %v13008_v0 = vadd.f32 %v12879_v53, %v12267_v49  ;;  %13770 = vst [vmem:[%s20811_s20 + $0xc0] sm:$0xff] %v13729_v22  ;;  %v17177_v61 = vpop.f32.mrb[253].mxu1  ;;  %v13730_v55 = vmax.f32 %v13689_v42, 0.0  ;;  %v12232_v49 = vld [vmem:[#allocation2 + $0x100] sm:$0xff] }
 0x74a   : > { %v12882_v26 = vpop.f32.mrb[254].mxu1  ;;  %v12273_v57 = vadd.f32 %v12232_v49, %v20775_v58 }
 0x74b   : > { %v13009_v60 = vadd.f32 %v12882_v26, %v12268_v35  ;;  %13771 = vst [vmem:[%s20811_s20 + $0xc8] sm:$0xff] %v13730_v55  ;;  %v17178_v52 = vpop.f32.mrb[255].mxu1  ;;  %v13560_v11 = vadd.f32 %v13472_v46, %v13008_v0  ;;  %v13480_v12 = vpop.f32.mrb[4].mxu0  ;;  %v12233_v0 = vld [vmem:[#allocation2 + $0x108] sm:$0xff] }
 0x74c   : > { %v17281_v45 = vpop.f32.mrb[5].mxu0 }
 0x74d   : > { %13601 = vst [vmem:[#allocation2 + $0xd0] sm:$0xff] %v13560_v11  ;;  %v13690_v13 = vadd.f32 %v20805_v29, %v13560_v11  ;;  %v13561_v30 = vadd.f32 %v13475_v5, %v13009_v60  ;;  %v13483_v56 = vpop.f32.mrb[6].mxu0  ;;  %v12274_v11 = vadd.f32 %v12233_v0, %v20777_v39  ;;  %v12275_v39 = vadd.f32 %v12234_v43, %v20781_v1  ;;  %v12239_v0 = vld [vmem:[#allocation2 + $0x138] sm:$0xff] }
 0x74e   : > { %v17282_v27 = vpop.f32.mrb[7].mxu0 }
 0x74f   : > { %v13731_v20 = vmax.f32 %v13690_v13, 0.0  ;;  %13602 = vst [vmem:[#allocation2 + $0xd8] sm:$0xff] %v13561_v30  ;;  %v13691_v62 = vadd.f32 %v20805_v29, %v13561_v30 }
 0x750   : > { %v12887_v14 = vpop.f32.mrb[0].mxu1 }
 0x751   : > { %v13010_v32 = vadd.f32 %v12887_v14, %v12269_v21  ;;  %13772 = vst [vmem:[%s20811_s20 + $0xd0] sm:$0xff] %v13731_v20  ;;  %v17181_v3 = vpop.f32.mrb[1].mxu1  ;;  %v13732_v10 = vmax.f32 %v13691_v62, 0.0  ;;  %v12235_v62 = vld [vmem:[#allocation2 + $0x118] sm:$0xff] }
 0x752   : > { %v12890_v37 = vpop.f32.mrb[2].mxu1 }
 0x753   : > { %v13011_v59 = vadd.f32 %v12890_v37, %v12270_v28  ;;  %13773 = vst [vmem:[%s20811_s20 + $0xd8] sm:$0xff] %v13732_v10  ;;  %v17182_v24 = vpop.f32.mrb[3].mxu1  ;;  %v13562_v8 = vadd.f32 %v13480_v12, %v13010_v32  ;;  %v13488_v17 = vpop.f32.mrb[8].mxu0 }
 0x754   : > { %v17285_v4 = vpop.f32.mrb[9].mxu0 }
 0x755   : > { %13603 = vst [vmem:[#allocation2 + $0xe0] sm:$0xff] %v13562_v8  ;;  %v13692_v19 = vadd.f32 %v20805_v29, %v13562_v8  ;;  %v13563_v38 = vadd.f32 %v13483_v56, %v13011_v59  ;;  %v13491_v7 = vpop.f32.mrb[10].mxu0  ;;  %v12276_v59 = vadd.f32 %v12235_v62, %v20783_v6  ;;  %v12981_v62 = vld [vmem:[#allocation2 + $0x140] sm:$0xf] }
 0x756   : > { %v17286_v34 = vpop.f32.mrb[11].mxu0 }
 0x757   : > { %v13733_v9 = vmax.f32 %v13692_v19, 0.0  ;;  %13604 = vst [vmem:[#allocation2 + $0xe8] sm:$0xff] %v13563_v38  ;;  %v13693_v15 = vadd.f32 %v20805_v29, %v13563_v38  ;;  %v12236_v38 = vld [vmem:[#allocation2 + $0x120] sm:$0xff] }
 0x758   : > { %v12895_v48 = vpop.f32.mrb[4].mxu1  ;;  %v12277_v6 = vadd.f32 %v12236_v38, %v20787_v51 }
 0x759   : > { %v13012_v50 = vadd.f32 %v12895_v48, %v12271_v41  ;;  %13774 = vst [vmem:[%s20811_s20 + $0xe0] sm:$0xff] %v13733_v9  ;;  %v17185_v46 = vpop.f32.mrb[5].mxu1  ;;  %v13734_v44 = vmax.f32 %v13693_v15, 0.0  ;;  %v12237_v41 = vld [vmem:[#allocation2 + $0x128] sm:$0xff] }
 0x75a   : > { %v12898_v63 = vpop.f32.mrb[6].mxu1 }
 0x75b   : > { %v13013_v31 = vadd.f32 %v12898_v63, %v12272_v47  ;;  %13775 = vst [vmem:[%s20811_s20 + $0xe8] sm:$0xff] %v13734_v44  ;;  %v17186_v5 = vpop.f32.mrb[7].mxu1  ;;  %v13564_v25 = vadd.f32 %v13488_v17, %v13012_v50  ;;  %v13496_v54 = vpop.f32.mrb[12].mxu0  ;;  %v12278_v44 = vadd.f32 %v12237_v41, %v20789_v16 }
 0x75c   : > { %v17289_v18 = vpop.f32.mrb[13].mxu0 }
 0x75d   : > { %13605 = vst [vmem:[#allocation2 + $0xf0] sm:$0xff] %v13564_v25  ;;  %v13694_v22 = vadd.f32 %v20805_v29, %v13564_v25  ;;  %v13565_v42 = vadd.f32 %v13491_v7, %v13013_v31  ;;  %v13499_v53 = vpop.f32.mrb[14].mxu0  ;;  %v12238_v18 = vld [vmem:[#allocation2 + $0x130] sm:$0xff] }
 0x75e   : > { %v17290_v61 = vpop.f32.mrb[15].mxu0  ;;  %v12279_v16 = vadd.f32 %v12238_v18, %v20793_v40 }
 0x75f   : > { %v13735_v35 = vmax.f32 %v13694_v22, 0.0  ;;  %13606 = vst [vmem:[#allocation2 + $0xf8] sm:$0xff] %v13565_v42  ;;  %v13695_v55 = vadd.f32 %v20805_v29, %v13565_v42 }
 0x760   : > { %v12903_v26 = vpop.f32.mrb[8].mxu1 }
 0x761   : > { %v13014_v60 = vadd.f32 %v12903_v26, %v12273_v57  ;;  %13776 = vst [vmem:[%s20811_s20 + $0xf0] sm:$0xff] %v13735_v35  ;;  %v17189_v52 = vpop.f32.mrb[9].mxu1  ;;  %v13736_v12 = vmax.f32 %v13695_v55, 0.0 }
 0x762   : > { %v12906_v33 = vpop.f32.mrb[10].mxu1  ;;  %v12280_v52 = vadd.f32 %v12239_v0, %v20795_v36 }
 0x763   : > { %v13015_v45 = vadd.f32 %v12906_v33, %v12274_v11  ;;  %13777 = vst [vmem:[%s20811_s20 + $0xf8] sm:$0xff] %v13736_v12  ;;  %v17190_v13 = vpop.f32.mrb[11].mxu1  ;;  %v13566_v30 = vadd.f32 %v13496_v54, %v13014_v60  ;;  %v13504_v56 = vpop.f32.mrb[16].mxu0 }
 0x764   : > { %v17293_v58 = vpop.f32.mrb[17].mxu0 }
 0x765   : > { %13607 = vst [vmem:[#allocation2 + $0x100] sm:$0xff] %v13566_v30  ;;  %v13696_v27 = vadd.f32 %v20805_v29, %v13566_v30  ;;  %v13567_v21 = vadd.f32 %v13499_v53, %v13015_v45  ;;  %v13507_v20 = vpop.f32.mrb[18].mxu0 }
 0x766   : > { %v17294_v14 = vpop.f32.mrb[19].mxu0 }
 0x767   : > { %v13737_v32 = vmax.f32 %v13696_v27, 0.0  ;;  %13608 = vst [vmem:[#allocation2 + $0x108] sm:$0xff] %v13567_v21  ;;  %v13697_v3 = vadd.f32 %v20805_v29, %v13567_v21 }
 0x768   : > { %v12911_v28 = vpop.f32.mrb[12].mxu1 }
 0x769   : > { %v13016_v10 = vadd.f32 %v12911_v28, %v12275_v39  ;;  %13778 = vst [vmem:[%s20811_s20 + $0x100] sm:$0xff] %v13737_v32  ;;  %v17193_v37 = vpop.f32.mrb[13].mxu1  ;;  %v13738_v24 = vmax.f32 %v13697_v3, 0.0 }
 0x76a   : > { %v12914_v8 = vpop.f32.mrb[14].mxu1 }
 0x76b   : > { %v13017_v17 = vadd.f32 %v12914_v8, %v12276_v59  ;;  %13779 = vst [vmem:[%s20811_s20 + $0x108] sm:$0xff] %v13738_v24  ;;  %v17194_v2 = vpop.f32.mrb[15].mxu1  ;;  %v13568_v4 = vadd.f32 %v13504_v56, %v13016_v10  ;;  %v13512_v19 = vpop.f32.mrb[20].mxu0 }
 0x76c   : > { %v17297_v1 = vpop.f32.mrb[21].mxu0 }
 0x76d   : > { %13609 = vst [vmem:[#allocation2 + $0x110] sm:$0xff] %v13568_v4  ;;  %v13698_v7 = vadd.f32 %v20805_v29, %v13568_v4  ;;  %v13569_v23 = vadd.f32 %v13507_v20, %v13017_v17  ;;  %v13515_v34 = vpop.f32.mrb[22].mxu0 }
 0x76e   : > { %v17298_v9 = vpop.f32.mrb[23].mxu0 }
 0x76f   : > { %v13739_v15 = vmax.f32 %v13698_v7, 0.0  ;;  %13610 = vst [vmem:[#allocation2 + $0x118] sm:$0xff] %v13569_v23  ;;  %v13699_v48 = vadd.f32 %v20805_v29, %v13569_v23 }
 0x770   : > { %v12919_v50 = vpop.f32.mrb[16].mxu1 }
 0x771   : > { %v13018_v46 = vadd.f32 %v12919_v50, %v12277_v6  ;;  %13780 = vst [vmem:[%s20811_s20 + $0x110] sm:$0xff] %v13739_v15  ;;  %v17197_v47 = vpop.f32.mrb[17].mxu1  ;;  %v13740_v63 = vmax.f32 %v13699_v48, 0.0 }
 0x772   : > { %v12922_v31 = vpop.f32.mrb[18].mxu1 }
 0x773   : > { %v13019_v5 = vadd.f32 %v12922_v31, %v12278_v44  ;;  %13781 = vst [vmem:[%s20811_s20 + $0x118] sm:$0xff] %v13740_v63  ;;  %v17198_v25 = vpop.f32.mrb[19].mxu1  ;;  %v13570_v54 = vadd.f32 %v13512_v19, %v13018_v46  ;;  %v13520_v49 = vpop.f32.mrb[24].mxu0 }
 0x774   : > { %v17301_v51 = vpop.f32.mrb[25].mxu0 }
 0x775   : > { %13611 = vst [vmem:[#allocation2 + $0x120] sm:$0xff] %v13570_v54  ;;  %v13700_v22 = vadd.f32 %v20805_v29, %v13570_v54  ;;  %v13571_v42 = vadd.f32 %v13515_v34, %v13019_v5  ;;  %v13523_v53 = vpop.f32.mrb[26].mxu0 }
 0x776   : > { %v17302_v61 = vpop.f32.mrb[27].mxu0 }
 0x777   : > { %v13741_v57 = vmax.f32 %v13700_v22, 0.0  ;;  %13612 = vst [vmem:[#allocation2 + $0x128] sm:$0xff] %v13571_v42  ;;  %v13701_v35 = vadd.f32 %v20805_v29, %v13571_v42 }
 0x778   : > { %v12927_v55 = vpop.f32.mrb[20].mxu1 }
 0x779   : > { %v13020_v26 = vadd.f32 %v12927_v55, %v12279_v16  ;;  %13782 = vst [vmem:[%s20811_s20 + $0x120] sm:$0xff] %v13741_v57  ;;  %v17201_v60 = vpop.f32.mrb[21].mxu1  ;;  %v13742_v11 = vmax.f32 %v13701_v35, 0.0 }
 0x77a   : > { %v12930_v12 = vpop.f32.mrb[22].mxu1 }
 0x77b   : > { %v13021_v33 = vadd.f32 %v12930_v12, %v12280_v52  ;;  %13783 = vst [vmem:[%s20811_s20 + $0x128] sm:$0xff] %v13742_v11  ;;  %v17202_v45 = vpop.f32.mrb[23].mxu1  ;;  %v13572_v13 = vadd.f32 %v13520_v49, %v13020_v26  ;;  %v13528_v30 = vpop.f32.mrb[28].mxu0 }
 0x77c   : > { %v17305_v56 = vpop.f32.mrb[29].mxu0 }
 0x77d   : > { %13613 = vst [vmem:[#allocation2 + $0x130] sm:$0xff] %v13572_v13  ;;  %v13702_v40 = vadd.f32 %v20805_v29, %v13572_v13  ;;  %v13573_v43 = vadd.f32 %v13523_v53, %v13021_v33  ;;  %v13531_v58 = vpop.f32.mrb[30].mxu0 }
 0x77e   : > { %v17306_v27 = vpop.f32.mrb[31].mxu0 }
 0x77f   : > { %v13743_v21 = vmax.f32 %v13702_v40, 0.0  ;;  %13614 = vst [vmem:[#allocation2 + $0x138] sm:$0xff] %v13573_v43  ;;  %v13703_v36 = vadd.f32 %v20805_v29, %v13573_v43 }
 0x780   : > { %v12935_v20 = vpop.f32.mrb[24].mxu1 }
 0x781   : > { %v13022_v14 = vadd.f32 %v12981_v62, %v12935_v20  ;;  %13784 = vst [vmem:[%s20811_s20 + $0x130] sm:$0xff] %v13743_v21  ;;  %v17205_v39 = vpop.f32.mrb[25].mxu1  ;;  %v13744_v32 = vmax.f32 %v13703_v36, 0.0 }
 0x782   : > { %v12938_v3 = vpop.f32.mrb[26].mxu1 }
 0x783   : > { %13063 = vst [vmem:[#allocation2 + $0x140] sm:$0xf] %v13022_v14  ;;  %13785 = vst [vmem:[%s20811_s20 + $0x138] sm:$0xff] %v13744_v32  ;;  %v17206_v28 = vpop.f32.mrb[27].mxu1 }
 0x78a   : > { %v13104_v10 = vld [vmem:[#allocation2 + $0x140] sm:$0xf] }
 0x78b   : > { %v13574_v37 = vadd.f32 %v13528_v30, %v13104_v10 }
 0x78d   : > { %13615 = vst [vmem:[#allocation2 + $0x140] sm:$0xf] %v13574_v37 }
 0x794   : > { %v13656_v59 = vld [vmem:[#allocation2 + $0x140] sm:$0xf] }
 0x795   : > { %v13704_v24 = vadd.f32 %v20805_v29, %v13656_v59 }
 0x797   : > { %v13745_v8 = vmax.f32 %v13704_v24, 0.0 }
 0x799   : > { %13786 = vst [vmem:[%s20811_s20 + $0x140] sm:$0xf] %v13745_v8 }
 0x79a PF: > { %s17_s24 = sadd.s32 1, %s17896_s24  }
 0x79b   : > { %p14_p4 = scmp.ge.s32.totalorder %s17_s24, 4  }
 0x79d   :  { %16 = sbr.rel (!%p14_p4) target bundleno = 1 (0x1), region = 94 }

</bundles_post_ra>
